<compile_context>
chip_gen: v7x
topology: tpu7x:2x2x1
jax: 0.10.0
libtpu: 0.0.40
codegen_flags: <defaults>
</compile_context>

<pallas_src>
import functools

import jax
import jax.numpy as jnp
from jax.experimental import pallas as pl
from jax.experimental.pallas import tpu as pltpu

EPS = 1e-5


def _round_up(x, m):
    return (x + m - 1) // m * m


# ----------------------------------------------------------------------------
# Pallas kernel: one (batch, H-tile) step of the RepLKBlock forward.
# ----------------------------------------------------------------------------
def replk_block_kernel(x_cur_ref, x_nxt_ref, s1_ref, sh1_ref, w1_ref, b1_ref,
                       lk_ref, blk_ref, w2_ref, b2_ref, o_ref, hpad_ref,
                       *, H, W, Cin, Cdw, K, TH, PL, Wp):
    P = K // 2
    t = pl.program_id(1)

    # ---- zero only the W-halo columns of the h scratch (interior is fully
    #      rewritten below; done every step so it is megacore-safe) ----------
    if PL > 0:
        hpad_ref[:, 0:PL, :] = jnp.zeros((TH + 2 * P, PL, Cdw), jnp.float32)
    if Wp > PL + W:
        hpad_ref[:, PL + W:Wp, :] = jnp.zeros((TH + 2 * P, Wp - PL - W, Cdw),
                                              jnp.float32)

    # ---- prelkb_bn + pw1 (1x1 conv + BN folded) + ReLU, bf16 MXU matmul ----
    def pw1_rows(x_rows, n_rows, slab_row0, xpad_row0):
        h = x_rows * s1_ref[...] + sh1_ref[...]                      # BN (f32)
        h = jnp.dot(h.reshape(n_rows * W, Cin).astype(jnp.bfloat16),
                    w1_ref[...],                                     # bf16
                    preferred_element_type=jnp.float32) + b1_ref[...]
        h = jnp.maximum(h, 0.0).reshape(n_rows, W, Cdw)
        # Rows outside the image must be zero (the dw-conv "same" padding).
        gp = xpad_row0 + jax.lax.broadcasted_iota(jnp.int32, (n_rows, 1, 1), 0)
        h = jnp.where((gp >= P) & (gp < H + P), h, 0.0)
        hpad_ref[slab_row0:slab_row0 + n_rows, PL:PL + W, :] = h

    pw1_rows(x_cur_ref[0], TH, 0, t * TH)                 # slab rows [0, TH)
    if P > 0:                                             # halo rows from next block
        pw1_rows(x_nxt_ref[0, 0:2 * P, :, :], 2 * P, TH, (t + 1) * TH)

    # ---- depthwise KxK conv (large + small merged): aligned row-slab loads,
    #      dx shifts via pltpu.roll (XLU), f32 accumulation -------------------
    acc = jnp.zeros((TH, W, Cdw), jnp.float32)
    for dy in range(K):
        slab = hpad_ref[dy:dy + TH, :, :]                 # (TH, Wp, Cdw), aligned
        for dx in range(K):
            d = PL - P + dx                               # column offset of this tap
            shift = (-d) % Wp
            tap = pltpu.roll(slab, shift, axis=1) if shift else slab
            wrow = lk_ref[dy * K + dx:dy * K + dx + 1, :]  # (1, Cdw)
            acc = acc + tap[:, 0:W, :] * wrow
    acc = jnp.maximum(acc + blk_ref[...], 0.0)            # merged bias + lk_nonlinear

    # ---- pw2 (1x1 conv + BN folded), bf16 MXU matmul ------------------------
    out = jnp.dot(acc.reshape(TH * W, Cdw).astype(jnp.bfloat16),
                  w2_ref[...],                            # bf16
                  preferred_element_type=jnp.float32) + b2_ref[...]
    out = out.reshape(TH, W, Cin)

    # ---- residual add (drop_path == Identity); x re-read from VMEM ---------
    o_ref[0, 0:TH - P, :, :] = out[0:TH - P] + x_cur_ref[0, P:TH, :, :]
    if P > 0:
        o_ref[0, TH - P:TH, :, :] = out[TH - P:TH] + x_nxt_ref[0, 0:P, :, :]


# ----------------------------------------------------------------------------
# Tile-height selection: largest divisor of H that covers the 2P-row halo from
# one neighbouring block, fits the VMEM budget (sized for v7x's 64 MiB), and
# when possible leaves >= 2 H-tiles so the H axis adds megacore parallelism.
# ----------------------------------------------------------------------------
def _pick_tile_h(H, W, Cin, Cdw, K, vmem_budget_bytes):
    P = K // 2
    PL = _round_up(P, 8)
    Wp = _round_up(PL + W + P, 8)
    divisors = [th for th in range(max(2 * P, 1), H + 1) if H % th == 0]
    if not divisors:
        return H

    def working_set(th):
        io = 6 * th * W * Cin * 4                    # 2 in-specs + out, double-buffered
        scratch = (th + 2 * P) * Wp * Cdw * 4        # padded h scratch (f32)
        live = 4 * th * W * Cdw * 4                  # acc / rolled tap / pw1 values
        return io + scratch + live

    fitting = [th for th in divisors if working_set(th) <= vmem_budget_bytes]
    pool = fitting if fitting else divisors[:1]
    multi_tile = [th for th in pool if H // th >= 2]
    return max(multi_tile) if multi_tile else max(pool)


# ----------------------------------------------------------------------------
# Wrapper: parameter folding + pallas_call
# ----------------------------------------------------------------------------
def replk_block(x_nchw, p, K, S, *, tile_h=None,
                vmem_budget_bytes=48 * 1024 * 1024):
    N, Cin, H, W = x_nchw.shape
    Cdw = p["w1"].shape[1]
    P = K // 2
    PL = _round_up(P, 8)                      # sublane-aligned left halo in scratch
    Wp = _round_up(PL + W + P, 8)             # padded scratch width (multiple of 8)

    if tile_h is None:
        tile_h = _pick_tile_h(H, W, Cin, Cdw, K, vmem_budget_bytes)
    TH = tile_h
    assert H % TH == 0 and TH >= 2 * P, (
        "H-tile must divide H and cover the dw-conv halo from one neighbour block")
    nT = H // TH

    x_nhwc = jnp.transpose(x_nchw, (0, 2, 3, 1)).astype(jnp.float32)
    # Zero-pad H so tile t can read equal-size blocks t and t+1 (halo rows).
    x_pad = jnp.pad(x_nhwc,
                    ((0, 0), (P, (nT + 1) * TH - H - P), (0, 0), (0, 0)))

    # Merge large + small depthwise kernels (exact: stride 1, same padding).
    padw = (K - S) // 2
    lk_merged = p["lk_eff"] + jnp.pad(p["sk_eff"],
                                      ((padw, padw), (padw, padw), (0, 0)))
    b_merged = p["blk"] + p["bsk"]

    kernel = functools.partial(replk_block_kernel, H=H, W=W, Cin=Cin, Cdw=Cdw,
                               K=K, TH=TH, PL=PL, Wp=Wp)

    # Explicit VMEM limit, computed from actual buffer sizes (with headroom).
    f32b, bf16b = 4, 2
    vmem_bytes = (
        2 * (2 * TH * W * Cin * f32b)            # x curr + next blocks, double-buffered
        + 2 * TH * W * Cin * f32b                # output block, double-buffered
        + (TH + 2 * P) * Wp * Cdw * f32b         # padded h scratch
        + 4 * TH * W * Cdw * f32b                # acc / rolled taps / pw1 intermediates
        + 2 * Cin * Cdw * bf16b                  # pw1 / pw2 weights (bf16)
        + (K * K + 2) * Cdw * f32b + 3 * Cin * f32b
    )
    vmem_limit = int(min(max(3 * vmem_bytes, 32 << 20), 64 << 20))

    out_nhwc = pl.pallas_call(
        kernel,
        out_shape=jax.ShapeDtypeStruct((N, H, W, Cin), jnp.float32),
        grid_spec=pltpu.PrefetchScalarGridSpec(
            num_scalar_prefetch=0,
            grid=(N, nT),
            in_specs=[
                pl.BlockSpec((1, TH, W, Cin), lambda b, t: (b, t, 0, 0)),      # x rows (current tile)
                pl.BlockSpec((1, TH, W, Cin), lambda b, t: (b, t + 1, 0, 0)),  # x rows (halo / next)
                pl.BlockSpec((1, Cin), lambda b, t: (0, 0)),                   # prelkb_bn scale
                pl.BlockSpec((1, Cin), lambda b, t: (0, 0)),                   # prelkb_bn shift
                pl.BlockSpec((Cin, Cdw), lambda b, t: (0, 0)),                 # pw1 weight (bf16)
                pl.BlockSpec((1, Cdw), lambda b, t: (0, 0)),                   # pw1 bias
                pl.BlockSpec((K * K, Cdw), lambda b, t: (0, 0)),               # merged dw kernel
                pl.BlockSpec((1, Cdw), lambda b, t: (0, 0)),                   # merged dw bias
                pl.BlockSpec((Cdw, Cin), lambda b, t: (0, 0)),                 # pw2 weight (bf16)
                pl.BlockSpec((1, Cin), lambda b, t: (0, 0)),                   # pw2 bias
            ],
            out_specs=pl.BlockSpec((1, TH, W, Cin), lambda b, t: (b, t, 0, 0)),
            scratch_shapes=[pltpu.VMEM((TH + 2 * P, Wp, Cdw), jnp.float32)],
        ),
        compiler_params=pltpu.CompilerParams(
            dimension_semantics=("parallel", "parallel"),
            vmem_limit_bytes=vmem_limit,
        ),
    )(
        x_pad, x_pad,
        p["scale1"].reshape(1, Cin), p["shift1"].reshape(1, Cin),
        p["w1"].astype(jnp.bfloat16), p["b1"].reshape(1, Cdw),
        lk_merged.reshape(K * K, Cdw), b_merged.reshape(1, Cdw),
        p["w2"].astype(jnp.bfloat16), p["b2"].reshape(1, Cin),
    )
    return jnp.transpose(out_nhwc, (0, 3, 1, 2))


# ----------------------------------------------------------------------------
# Deterministic synthetic parameters (BN folded into preceding convs)
# ----------------------------------------------------------------------------
def init_params(key, Cin, Cdw, K, S):
    ks = iter(jax.random.split(key, 32))

    def nrm(shape, scale=1.0):
        return scale * jax.random.normal(next(ks), shape, jnp.float32)

    def bn_params(C):
        gamma = 1.0 + 0.1 * nrm((C,))
        beta = 0.1 * nrm((C,))
        mean = 0.1 * nrm((C,))
        var = jnp.abs(nrm((C,))) + 0.5
        return gamma, beta, mean, var

    def fold(w_out_last, bnp):
        gamma, beta, mean, var = bnp
        scale = gamma / jnp.sqrt(var + EPS)
        return w_out_last * scale, beta - mean * scale

    # prelkb_bn
    g, b, m, v = bn_params(Cin)
    scale1 = g / jnp.sqrt(v + EPS)
    shift1 = b - m * scale1
    # pw1: Conv2d(Cin, Cdw, 1) weight stored as (Cin, Cdw)
    w1, b1 = fold(nrm((Cin, Cdw), 0.3), bn_params(Cdw))
    # large depthwise: (Cdw,1,K,K) stored as (K,K,Cdw)
    lk_eff, blk = fold(nrm((K, K, Cdw), 0.1), bn_params(Cdw))
    # small depthwise: (Cdw,1,S,S) stored as (S,S,Cdw)
    sk_eff, bsk = fold(nrm((S, S, Cdw), 0.3), bn_params(Cdw))
    # pw2: Conv2d(Cdw, Cin, 1) stored as (Cdw, Cin)
    w2, b2 = fold(nrm((Cdw, Cin), 0.3), bn_params(Cin))

    return dict(scale1=scale1, shift1=shift1, w1=w1, b1=b1,
                lk_eff=lk_eff, blk=blk, sk_eff=sk_eff, bsk=bsk,
                w2=w2, b2=b2)


# ----------------------------------------------------------------------------
# Pure-JAX reference (unmerged large + small branches, f32), NHWC
# ----------------------------------------------------------------------------
def ref_forward(x_nhwc, p, K, S):
    Cdw = p["w1"].shape[1]

    def dwconv(inp, w_kkc, pad):
        return jax.lax.conv_general_dilated(
            inp, w_kkc[:, :, None, :], window_strides=(1, 1),
            padding=[(pad, pad), (pad, pad)],
            dimension_numbers=("NHWC", "HWIO", "NHWC"),
            feature_group_count=Cdw)

    h = x_nhwc * p["scale1"] + p["shift1"]
    h = jax.nn.relu(jnp.einsum("nhwc,cd->nhwd", h, p["w1"]) + p["b1"])
    out = (dwconv(h, p["lk_eff"], K // 2) + p["blk"]
           + dwconv(h, p["sk_eff"], S // 2) + p["bsk"])
    out = jax.nn.relu(out)
    out = jnp.einsum("nhwc,cd->nhwd", out, p["w2"]) + p["b2"]
    return x_nhwc + out


if __name__ == "__main__":
    N, Cin, Cdw, H, W = 2, 8, 8, 16, 16
    K, S = 7, 3  # block_lk_size=7, small_kernel=3

    key = jax.random.PRNGKey(0)
    k_param, k_x = jax.random.split(key)
    params = init_params(k_param, Cin, Cdw, K, S)
    x_nchw = jax.random.normal(k_x, (N, Cin, H, W), jnp.float32)

    out_nchw = jax.block_until_ready(replk_block(x_nchw, params, K, S))

    # verify against pure-JAX f32 reference
    ref = ref_forward(jnp.transpose(x_nchw, (0, 2, 3, 1)), params, K, S)
    ref_nchw = jnp.transpose(ref, (0, 3, 1, 2))
    err = float(jnp.max(jnp.abs(out_nchw - ref_nchw)))
    # tolerance re-baselined for bf16 MXU matmul operands (f32 accumulation)
    assert err < 1e-1, f"mismatch vs reference: max abs err {err}"

    print("KERNEL_OK")
</pallas_src>

<mosaic_0001>
module attributes {stable_mosaic.version = 11 : i64} {
  func.func @replk_block_kernel(%arg0: i32, %arg1: i32, %arg2: memref<1x8x16x8xf32, #tpu.memory_space<vmem>>, %arg3: memref<1x8x16x8xf32, #tpu.memory_space<vmem>>, %arg4: memref<1x8xf32, #tpu.memory_space<vmem>>, %arg5: memref<1x8xf32, #tpu.memory_space<vmem>>, %arg6: memref<8x8xbf16, #tpu.memory_space<vmem>>, %arg7: memref<1x8xf32, #tpu.memory_space<vmem>>, %arg8: memref<49x8xf32, #tpu.memory_space<vmem>>, %arg9: memref<1x8xf32, #tpu.memory_space<vmem>>, %arg10: memref<8x8xbf16, #tpu.memory_space<vmem>>, %arg11: memref<1x8xf32, #tpu.memory_space<vmem>>, %arg12: memref<1x8x16x8xf32, #tpu.memory_space<vmem>>, %arg13: memref<14x32x8xf32, #tpu.memory_space<vmem>>) attributes {dimension_semantics = [#tpu.dimension_semantics<parallel>, #tpu.dimension_semantics<parallel>], iteration_bounds = array<i64: 2, 2>, scalar_prefetch = 0 : i64, scratch_operands = 1 : i64, tpu.core_type = #tpu.core_type<tc>, window_params = [{transform_indices = @transform_0, window_bounds = array<i64: 1, 8, 16, 8>}, {transform_indices = @transform_1, window_bounds = array<i64: 1, 8, 16, 8>}, {pipeline_mode = #tpu.pipeline_mode<synchronous>, transform_indices = @transform_2, window_bounds = array<i64: 1, 8>}, {pipeline_mode = #tpu.pipeline_mode<synchronous>, transform_indices = @transform_3, window_bounds = array<i64: 1, 8>}, {pipeline_mode = #tpu.pipeline_mode<synchronous>, transform_indices = @transform_4, window_bounds = array<i64: 8, 8>}, {pipeline_mode = #tpu.pipeline_mode<synchronous>, transform_indices = @transform_5, window_bounds = array<i64: 1, 8>}, {pipeline_mode = #tpu.pipeline_mode<synchronous>, transform_indices = @transform_6, window_bounds = array<i64: 49, 8>}, {pipeline_mode = #tpu.pipeline_mode<synchronous>, transform_indices = @transform_7, window_bounds = array<i64: 1, 8>}, {pipeline_mode = #tpu.pipeline_mode<synchronous>, transform_indices = @transform_8, window_bounds = array<i64: 8, 8>}, {pipeline_mode = #tpu.pipeline_mode<synchronous>, transform_indices = @transform_9, window_bounds = array<i64: 1, 8>}, {transform_indices = @transform_10, window_bounds = array<i64: 1, 8, 16, 8>}]} {
    %cst = arith.constant 0.000000e+00 : f32
    %0 = vector.broadcast %cst : f32 to vector<14x8x8xf32>
    %c0 = arith.constant 0 : index
    %c0_0 = arith.constant 0 : index
    %c0_1 = arith.constant 0 : index
    %1 = vector.load %arg13[%c0, %c0_0, %c0_1] : memref<14x32x8xf32, #tpu.memory_space<vmem>>, vector<14x8x8xf32>
    tpu.vector_store %arg13[%c0, %c0_0, %c0_1], %0 {strides = array<i32>} : memref<14x32x8xf32, #tpu.memory_space<vmem>>, vector<14x8x8xf32>,
    %cst_2 = arith.constant 0.000000e+00 : f32
    %2 = vector.broadcast %cst_2 : f32 to vector<14x8x8xf32>
    %c0_3 = arith.constant 0 : index
    %c24 = arith.constant 24 : index
    %c0_4 = arith.constant 0 : index
    %3 = vector.load %arg13[%c0_3, %c24, %c0_4] : memref<14x32x8xf32, #tpu.memory_space<vmem>>, vector<14x8x8xf32>
    tpu.vector_store %arg13[%c0_3, %c24, %c0_4], %2 {strides = array<i32>} : memref<14x32x8xf32, #tpu.memory_space<vmem>>, vector<14x8x8xf32>,
    %c0_5 = arith.constant 0 : index
    %c0_6 = arith.constant 0 : index
    %c0_7 = arith.constant 0 : index
    %c0_8 = arith.constant 0 : index
    %4 = vector.load %arg2[%c0_5, %c0_6, %c0_7, %c0_8] : memref<1x8x16x8xf32, #tpu.memory_space<vmem>>, vector<1x8x16x8xf32>
    %5 = vector.shape_cast %4 : vector<1x8x16x8xf32> to vector<8x16x8xf32>
    %c8_i32 = arith.constant 8 : i32
    %6 = arith.muli %arg1, %c8_i32 : i32
    %c0_9 = arith.constant 0 : index
    %c0_10 = arith.constant 0 : index
    %7 = vector.load %arg4[%c0_9, %c0_10] : memref<1x8xf32, #tpu.memory_space<vmem>>, vector<1x8xf32>
    %8 = vector.shape_cast %7 : vector<1x8xf32> to vector<1x1x8xf32>
    %9 = vector.broadcast %8 : vector<1x1x8xf32> to vector<8x16x8xf32>
    %10 = arith.mulf %5, %9 : vector<8x16x8xf32>
    %c0_11 = arith.constant 0 : index
    %c0_12 = arith.constant 0 : index
    %11 = vector.load %arg5[%c0_11, %c0_12] : memref<1x8xf32, #tpu.memory_space<vmem>>, vector<1x8xf32>
    %12 = vector.shape_cast %11 : vector<1x8xf32> to vector<1x1x8xf32>
    %13 = vector.broadcast %12 : vector<1x1x8xf32> to vector<8x16x8xf32>
    %14 = arith.addf %10, %13 : vector<8x16x8xf32>
    %15 = vector.shape_cast %14 : vector<8x16x8xf32> to vector<128x8xf32>
    %16 = arith.truncf %15 : vector<128x8xf32> to vector<128x8xbf16>
    %c0_13 = arith.constant 0 : index
    %c0_14 = arith.constant 0 : index
    %17 = vector.load %arg6[%c0_13, %c0_14] : memref<8x8xbf16, #tpu.memory_space<vmem>>, vector<8x8xbf16>
    %cst_15 = arith.constant dense<0.000000e+00> : vector<128x8xf32>
    %18 = tpu.matmul %16, %17, %cst_15 {dimension_numbers = #tpu.dot_dimension_numbers<[1], [0], [0], [1], [0, 0, 1, 1], [], []>} : vector<128x8xbf16>, vector<8x8xbf16>, vector<128x8xf32> -> vector<128x8xf32>
    %c0_16 = arith.constant 0 : index
    %c0_17 = arith.constant 0 : index
    %19 = vector.load %arg7[%c0_16, %c0_17] : memref<1x8xf32, #tpu.memory_space<vmem>>, vector<1x8xf32>
    %20 = vector.broadcast %19 : vector<1x8xf32> to vector<128x8xf32>
    %21 = arith.addf %18, %20 : vector<128x8xf32>
    %cst_18 = arith.constant 0.000000e+00 : f32
    %22 = vector.broadcast %cst_18 : f32 to vector<128x8xf32>
    %23 = arith.maximumf %21, %22 : vector<128x8xf32>
    %24 = vector.shape_cast %23 : vector<128x8xf32> to vector<8x16x8xf32>
    %25 = tpu.iota {dimensions = array<i32: 0>} : vector<8x1x1xi32>
    %26 = vector.broadcast %6 : i32 to vector<8x1x1xi32>
    %27 = arith.addi %26, %25 : vector<8x1x1xi32>
    %c3_i32 = arith.constant 3 : i32
    %28 = vector.broadcast %c3_i32 : i32 to vector<8x1x1xi32>
    %29 = arith.cmpi sge, %27, %28 : vector<8x1x1xi32>
    %c19_i32 = arith.constant 19 : i32
    %30 = vector.broadcast %c19_i32 : i32 to vector<8x1x1xi32>
    %31 = arith.cmpi slt, %27, %30 : vector<8x1x1xi32>
    %32 = arith.andi %29, %31 : vector<8x1x1xi1>
    %cst_19 = arith.constant 0.000000e+00 : f32
    %33 = vector.shape_cast %32 : vector<8x1x1xi1> to vector<8x1x1xi1>
    %34 = vector.broadcast %33 : vector<8x1x1xi1> to vector<8x16x8xi1>
    %35 = vector.broadcast %cst_19 : f32 to vector<8x16x8xf32>
    %36 = arith.select %34, %24, %35 : vector<8x16x8xi1>, vector<8x16x8xf32>
    %c0_20 = arith.constant 0 : index
    %c8 = arith.constant 8 : index
    %c0_21 = arith.constant 0 : index
    %37 = vector.load %arg13[%c0_20, %c8, %c0_21] : memref<14x32x8xf32, #tpu.memory_space<vmem>>, vector<8x16x8xf32>
    tpu.vector_store %arg13[%c0_20, %c8, %c0_21], %36 {strides = array<i32>} : memref<14x32x8xf32, #tpu.memory_space<vmem>>, vector<8x16x8xf32>,
    %c0_22 = arith.constant 0 : index
    %c0_23 = arith.constant 0 : index
    %c0_24 = arith.constant 0 : index
    %c0_25 = arith.constant 0 : index
    %38 = vector.load %arg3[%c0_22, %c0_23, %c0_24, %c0_25] : memref<1x8x16x8xf32, #tpu.memory_space<vmem>>, vector<1x6x16x8xf32>
    %39 = vector.shape_cast %38 : vector<1x6x16x8xf32> to vector<6x16x8xf32>
    %c1_i32 = arith.constant 1 : i32
    %40 = arith.addi %arg1, %c1_i32 : i32
    %c8_i32_26 = arith.constant 8 : i32
    %41 = arith.muli %40, %c8_i32_26 : i32
    %c0_27 = arith.constant 0 : index
    %c0_28 = arith.constant 0 : index
    %42 = vector.load %arg4[%c0_27, %c0_28] : memref<1x8xf32, #tpu.memory_space<vmem>>, vector<1x8xf32>
    %43 = vector.shape_cast %42 : vector<1x8xf32> to vector<1x1x8xf32>
    %44 = vector.broadcast %43 : vector<1x1x8xf32> to vector<6x16x8xf32>
    %45 = arith.mulf %39, %44 : vector<6x16x8xf32>
    %c0_29 = arith.constant 0 : index
    %c0_30 = arith.constant 0 : index
    %46 = vector.load %arg5[%c0_29, %c0_30] : memref<1x8xf32, #tpu.memory_space<vmem>>, vector<1x8xf32>
    %47 = vector.shape_cast %46 : vector<1x8xf32> to vector<1x1x8xf32>
    %48 = vector.broadcast %47 : vector<1x1x8xf32> to vector<6x16x8xf32>
    %49 = arith.addf %45, %48 : vector<6x16x8xf32>
    %50 = vector.shape_cast %49 : vector<6x16x8xf32> to vector<96x8xf32>
    %51 = arith.truncf %50 : vector<96x8xf32> to vector<96x8xbf16>
    %c0_31 = arith.constant 0 : index
    %c0_32 = arith.constant 0 : index
    %52 = vector.load %arg6[%c0_31, %c0_32] : memref<8x8xbf16, #tpu.memory_space<vmem>>, vector<8x8xbf16>
    %cst_33 = arith.constant dense<0.000000e+00> : vector<96x8xf32>
    %53 = tpu.matmul %51, %52, %cst_33 {dimension_numbers = #tpu.dot_dimension_numbers<[1], [0], [0], [1], [0, 0, 1, 1], [], []>} : vector<96x8xbf16>, vector<8x8xbf16>, vector<96x8xf32> -> vector<96x8xf32>
    %c0_34 = arith.constant 0 : index
    %c0_35 = arith.constant 0 : index
    %54 = vector.load %arg7[%c0_34, %c0_35] : memref<1x8xf32, #tpu.memory_space<vmem>>, vector<1x8xf32>
    %55 = vector.broadcast %54 : vector<1x8xf32> to vector<96x8xf32>
    %56 = arith.addf %53, %55 : vector<96x8xf32>
    %cst_36 = arith.constant 0.000000e+00 : f32
    %57 = vector.broadcast %cst_36 : f32 to vector<96x8xf32>
    %58 = arith.maximumf %56, %57 : vector<96x8xf32>
    %59 = vector.shape_cast %58 : vector<96x8xf32> to vector<6x16x8xf32>
    %60 = tpu.iota {dimensions = array<i32: 0>} : vector<6x1x1xi32>
    %61 = vector.broadcast %41 : i32 to vector<6x1x1xi32>
    %62 = arith.addi %61, %60 : vector<6x1x1xi32>
    %c3_i32_37 = arith.constant 3 : i32
    %63 = vector.broadcast %c3_i32_37 : i32 to vector<6x1x1xi32>
    %64 = arith.cmpi sge, %62, %63 : vector<6x1x1xi32>
    %c19_i32_38 = arith.constant 19 : i32
    %65 = vector.broadcast %c19_i32_38 : i32 to vector<6x1x1xi32>
    %66 = arith.cmpi slt, %62, %65 : vector<6x1x1xi32>
    %67 = arith.andi %64, %66 : vector<6x1x1xi1>
    %cst_39 = arith.constant 0.000000e+00 : f32
    %68 = vector.shape_cast %67 : vector<6x1x1xi1> to vector<6x1x1xi1>
    %69 = vector.broadcast %68 : vector<6x1x1xi1> to vector<6x16x8xi1>
    %70 = vector.broadcast %cst_39 : f32 to vector<6x16x8xf32>
    %71 = arith.select %69, %59, %70 : vector<6x16x8xi1>, vector<6x16x8xf32>
    %c8_40 = arith.constant 8 : index
    %c8_41 = arith.constant 8 : index
    %c0_42 = arith.constant 0 : index
    %72 = vector.load %arg13[%c8_40, %c8_41, %c0_42] : memref<14x32x8xf32, #tpu.memory_space<vmem>>, vector<6x16x8xf32>
    tpu.vector_store %arg13[%c8_40, %c8_41, %c0_42], %71 {strides = array<i32>} : memref<14x32x8xf32, #tpu.memory_space<vmem>>, vector<6x16x8xf32>,
    %cst_43 = arith.constant 0.000000e+00 : f32
    %73 = vector.broadcast %cst_43 : f32 to vector<8x16x8xf32>
    %c0_44 = arith.constant 0 : index
    %c0_45 = arith.constant 0 : index
    %c0_46 = arith.constant 0 : index
    %74 = vector.load %arg13[%c0_44, %c0_45, %c0_46] : memref<14x32x8xf32, #tpu.memory_space<vmem>>, vector<8x32x8xf32>
    %c27_i32 = arith.constant 27 : i32
    %75 = tpu.dynamic_rotate %74 by %c27_i32 dim 1 : vector<8x32x8xf32>, i32 -> vector<8x32x8xf32>
    %c0_47 = arith.constant 0 : index
    %c0_48 = arith.constant 0 : index
    %76 = vector.load %arg8[%c0_47, %c0_48] : memref<49x8xf32, #tpu.memory_space<vmem>>, vector<1x8xf32>
    %77 = vector.extract_strided_slice %75 {offsets = [0, 0, 0], sizes = [8, 16, 8], strides = [1, 1, 1]} : vector<8x32x8xf32> to vector<8x16x8xf32>
    %78 = vector.shape_cast %76 : vector<1x8xf32> to vector<1x1x8xf32>
    %79 = vector.broadcast %78 : vector<1x1x8xf32> to vector<8x16x8xf32>
    %80 = arith.mulf %77, %79 : vector<8x16x8xf32>
    %81 = arith.addf %73, %80 : vector<8x16x8xf32>
    %c26_i32 = arith.constant 26 : i32
    %82 = tpu.dynamic_rotate %74 by %c26_i32 dim 1 : vector<8x32x8xf32>, i32 -> vector<8x32x8xf32>
    %c1 = arith.constant 1 : index
    %c0_49 = arith.constant 0 : index
    %83 = vector.load %arg8[%c1, %c0_49] : memref<49x8xf32, #tpu.memory_space<vmem>>, vector<1x8xf32>
    %84 = vector.extract_strided_slice %82 {offsets = [0, 0, 0], sizes = [8, 16, 8], strides = [1, 1, 1]} : vector<8x32x8xf32> to vector<8x16x8xf32>
    %85 = vector.shape_cast %83 : vector<1x8xf32> to vector<1x1x8xf32>
    %86 = vector.broadcast %85 : vector<1x1x8xf32> to vector<8x16x8xf32>
    %87 = arith.mulf %84, %86 : vector<8x16x8xf32>
    %88 = arith.addf %81, %87 : vector<8x16x8xf32>
    %c25_i32 = arith.constant 25 : i32
    %89 = tpu.dynamic_rotate %74 by %c25_i32 dim 1 : vector<8x32x8xf32>, i32 -> vector<8x32x8xf32>
    %c2 = arith.constant 2 : index
    %c0_50 = arith.constant 0 : index
    %90 = vector.load %arg8[%c2, %c0_50] : memref<49x8xf32, #tpu.memory_space<vmem>>, vector<1x8xf32>
    %91 = vector.extract_strided_slice %89 {offsets = [0, 0, 0], sizes = [8, 16, 8], strides = [1, 1, 1]} : vector<8x32x8xf32> to vector<8x16x8xf32>
    %92 = vector.shape_cast %90 : vector<1x8xf32> to vector<1x1x8xf32>
    %93 = vector.broadcast %92 : vector<1x1x8xf32> to vector<8x16x8xf32>
    %94 = arith.mulf %91, %93 : vector<8x16x8xf32>
    %95 = arith.addf %88, %94 : vector<8x16x8xf32>
    %c24_i32 = arith.constant 24 : i32
    %96 = tpu.dynamic_rotate %74 by %c24_i32 dim 1 : vector<8x32x8xf32>, i32 -> vector<8x32x8xf32>
    %c3 = arith.constant 3 : index
    %c0_51 = arith.constant 0 : index
    %97 = vector.load %arg8[%c3, %c0_51] : memref<49x8xf32, #tpu.memory_space<vmem>>, vector<1x8xf32>
    %98 = vector.extract_strided_slice %96 {offsets = [0, 0, 0], sizes = [8, 16, 8], strides = [1, 1, 1]} : vector<8x32x8xf32> to vector<8x16x8xf32>
    %99 = vector.shape_cast %97 : vector<1x8xf32> to vector<1x1x8xf32>
    %100 = vector.broadcast %99 : vector<1x1x8xf32> to vector<8x16x8xf32>
    %101 = arith.mulf %98, %100 : vector<8x16x8xf32>
    %102 = arith.addf %95, %101 : vector<8x16x8xf32>
    %c23_i32 = arith.constant 23 : i32
    %103 = tpu.dynamic_rotate %74 by %c23_i32 dim 1 : vector<8x32x8xf32>, i32 -> vector<8x32x8xf32>
    %c4 = arith.constant 4 : index
    %c0_52 = arith.constant 0 : index
    %104 = vector.load %arg8[%c4, %c0_52] : memref<49x8xf32, #tpu.memory_space<vmem>>, vector<1x8xf32>
    %105 = vector.extract_strided_slice %103 {offsets = [0, 0, 0], sizes = [8, 16, 8], strides = [1, 1, 1]} : vector<8x32x8xf32> to vector<8x16x8xf32>
    %106 = vector.shape_cast %104 : vector<1x8xf32> to vector<1x1x8xf32>
    %107 = vector.broadcast %106 : vector<1x1x8xf32> to vector<8x16x8xf32>
    %108 = arith.mulf %105, %107 : vector<8x16x8xf32>
    %109 = arith.addf %102, %108 : vector<8x16x8xf32>
    %c22_i32 = arith.constant 22 : i32
    %110 = tpu.dynamic_rotate %74 by %c22_i32 dim 1 : vector<8x32x8xf32>, i32 -> vector<8x32x8xf32>
    %c5 = arith.constant 5 : index
    %c0_53 = arith.constant 0 : index
    %111 = vector.load %arg8[%c5, %c0_53] : memref<49x8xf32, #tpu.memory_space<vmem>>, vector<1x8xf32>
    %112 = vector.extract_strided_slice %110 {offsets = [0, 0, 0], sizes = [8, 16, 8], strides = [1, 1, 1]} : vector<8x32x8xf32> to vector<8x16x8xf32>
    %113 = vector.shape_cast %111 : vector<1x8xf32> to vector<1x1x8xf32>
    %114 = vector.broadcast %113 : vector<1x1x8xf32> to vector<8x16x8xf32>
    %115 = arith.mulf %112, %114 : vector<8x16x8xf32>
    %116 = arith.addf %109, %115 : vector<8x16x8xf32>
    %c21_i32 = arith.constant 21 : i32
    %117 = tpu.dynamic_rotate %74 by %c21_i32 dim 1 : vector<8x32x8xf32>, i32 -> vector<8x32x8xf32>
    %c6 = arith.constant 6 : index
    %c0_54 = arith.constant 0 : index
    %118 = vector.load %arg8[%c6, %c0_54] : memref<49x8xf32, #tpu.memory_space<vmem>>, vector<1x8xf32>
    %119 = vector.extract_strided_slice %117 {offsets = [0, 0, 0], sizes = [8, 16, 8], strides = [1, 1, 1]} : vector<8x32x8xf32> to vector<8x16x8xf32>
    %120 = vector.shape_cast %118 : vector<1x8xf32> to vector<1x1x8xf32>
    %121 = vector.broadcast %120 : vector<1x1x8xf32> to vector<8x16x8xf32>
    %122 = arith.mulf %119, %121 : vector<8x16x8xf32>
    %123 = arith.addf %116, %122 : vector<8x16x8xf32>
    %c1_55 = arith.constant 1 : index
    %c0_56 = arith.constant 0 : index
    %c0_57 = arith.constant 0 : index
    %124 = vector.load %arg13[%c1_55, %c0_56, %c0_57] : memref<14x32x8xf32, #tpu.memory_space<vmem>>, vector<8x32x8xf32>
    %c27_i32_58 = arith.constant 27 : i32
    %125 = tpu.dynamic_rotate %124 by %c27_i32_58 dim 1 : vector<8x32x8xf32>, i32 -> vector<8x32x8xf32>
    %c7 = arith.constant 7 : index
    %c0_59 = arith.constant 0 : index
    %126 = vector.load %arg8[%c7, %c0_59] : memref<49x8xf32, #tpu.memory_space<vmem>>, vector<1x8xf32>
    %127 = vector.extract_strided_slice %125 {offsets = [0, 0, 0], sizes = [8, 16, 8], strides = [1, 1, 1]} : vector<8x32x8xf32> to vector<8x16x8xf32>
    %128 = vector.shape_cast %126 : vector<1x8xf32> to vector<1x1x8xf32>
    %129 = vector.broadcast %128 : vector<1x1x8xf32> to vector<8x16x8xf32>
    %130 = arith.mulf %127, %129 : vector<8x16x8xf32>
    %131 = arith.addf %123, %130 : vector<8x16x8xf32>
    %c26_i32_60 = arith.constant 26 : i32
    %132 = tpu.dynamic_rotate %124 by %c26_i32_60 dim 1 : vector<8x32x8xf32>, i32 -> vector<8x32x8xf32>
    %c8_61 = arith.constant 8 : index
    %c0_62 = arith.constant 0 : index
    %133 = vector.load %arg8[%c8_61, %c0_62] : memref<49x8xf32, #tpu.memory_space<vmem>>, vector<1x8xf32>
    %134 = vector.extract_strided_slice %132 {offsets = [0, 0, 0], sizes = [8, 16, 8], strides = [1, 1, 1]} : vector<8x32x8xf32> to vector<8x16x8xf32>
    %135 = vector.shape_cast %133 : vector<1x8xf32> to vector<1x1x8xf32>
    %136 = vector.broadcast %135 : vector<1x1x8xf32> to vector<8x16x8xf32>
    %137 = arith.mulf %134, %136 : vector<8x16x8xf32>
    %138 = arith.addf %131, %137 : vector<8x16x8xf32>
    %c25_i32_63 = arith.constant 25 : i32
    %139 = tpu.dynamic_rotate %124 by %c25_i32_63 dim 1 : vector<8x32x8xf32>, i32 -> vector<8x32x8xf32>
    %c9 = arith.constant 9 : index
    %c0_64 = arith.constant 0 : index
    %140 = vector.load %arg8[%c9, %c0_64] : memref<49x8xf32, #tpu.memory_space<vmem>>, vector<1x8xf32>
    %141 = vector.extract_strided_slice %139 {offsets = [0, 0, 0], sizes = [8, 16, 8], strides = [1, 1, 1]} : vector<8x32x8xf32> to vector<8x16x8xf32>
    %142 = vector.shape_cast %140 : vector<1x8xf32> to vector<1x1x8xf32>
    %143 = vector.broadcast %142 : vector<1x1x8xf32> to vector<8x16x8xf32>
    %144 = arith.mulf %141, %143 : vector<8x16x8xf32>
    %145 = arith.addf %138, %144 : vector<8x16x8xf32>
    %c24_i32_65 = arith.constant 24 : i32
    %146 = tpu.dynamic_rotate %124 by %c24_i32_65 dim 1 : vector<8x32x8xf32>, i32 -> vector<8x32x8xf32>
    %c10 = arith.constant 10 : index
    %c0_66 = arith.constant 0 : index
    %147 = vector.load %arg8[%c10, %c0_66] : memref<49x8xf32, #tpu.memory_space<vmem>>, vector<1x8xf32>
    %148 = vector.extract_strided_slice %146 {offsets = [0, 0, 0], sizes = [8, 16, 8], strides = [1, 1, 1]} : vector<8x32x8xf32> to vector<8x16x8xf32>
    %149 = vector.shape_cast %147 : vector<1x8xf32> to vector<1x1x8xf32>
    %150 = vector.broadcast %149 : vector<1x1x8xf32> to vector<8x16x8xf32>
    %151 = arith.mulf %148, %150 : vector<8x16x8xf32>
    %152 = arith.addf %145, %151 : vector<8x16x8xf32>
    %c23_i32_67 = arith.constant 23 : i32
    %153 = tpu.dynamic_rotate %124 by %c23_i32_67 dim 1 : vector<8x32x8xf32>, i32 -> vector<8x32x8xf32>
    %c11 = arith.constant 11 : index
    %c0_68 = arith.constant 0 : index
    %154 = vector.load %arg8[%c11, %c0_68] : memref<49x8xf32, #tpu.memory_space<vmem>>, vector<1x8xf32>
    %155 = vector.extract_strided_slice %153 {offsets = [0, 0, 0], sizes = [8, 16, 8], strides = [1, 1, 1]} : vector<8x32x8xf32> to vector<8x16x8xf32>
    %156 = vector.shape_cast %154 : vector<1x8xf32> to vector<1x1x8xf32>
    %157 = vector.broadcast %156 : vector<1x1x8xf32> to vector<8x16x8xf32>
    %158 = arith.mulf %155, %157 : vector<8x16x8xf32>
    %159 = arith.addf %152, %158 : vector<8x16x8xf32>
    %c22_i32_69 = arith.constant 22 : i32
    %160 = tpu.dynamic_rotate %124 by %c22_i32_69 dim 1 : vector<8x32x8xf32>, i32 -> vector<8x32x8xf32>
    %c12 = arith.constant 12 : index
    %c0_70 = arith.constant 0 : index
    %161 = vector.load %arg8[%c12, %c0_70] : memref<49x8xf32, #tpu.memory_space<vmem>>, vector<1x8xf32>
    %162 = vector.extract_strided_slice %160 {offsets = [0, 0, 0], sizes = [8, 16, 8], strides = [1, 1, 1]} : vector<8x32x8xf32> to vector<8x16x8xf32>
    %163 = vector.shape_cast %161 : vector<1x8xf32> to vector<1x1x8xf32>
    %164 = vector.broadcast %163 : vector<1x1x8xf32> to vector<8x16x8xf32>
    %165 = arith.mulf %162, %164 : vector<8x16x8xf32>
    %166 = arith.addf %159, %165 : vector<8x16x8xf32>
    %c21_i32_71 = arith.constant 21 : i32
    %167 = tpu.dynamic_rotate %124 by %c21_i32_71 dim 1 : vector<8x32x8xf32>, i32 -> vector<8x32x8xf32>
    %c13 = arith.constant 13 : index
    %c0_72 = arith.constant 0 : index
    %168 = vector.load %arg8[%c13, %c0_72] : memref<49x8xf32, #tpu.memory_space<vmem>>, vector<1x8xf32>
    %169 = vector.extract_strided_slice %167 {offsets = [0, 0, 0], sizes = [8, 16, 8], strides = [1, 1, 1]} : vector<8x32x8xf32> to vector<8x16x8xf32>
    %170 = vector.shape_cast %168 : vector<1x8xf32> to vector<1x1x8xf32>
    %171 = vector.broadcast %170 : vector<1x1x8xf32> to vector<8x16x8xf32>
    %172 = arith.mulf %169, %171 : vector<8x16x8xf32>
    %173 = arith.addf %166, %172 : vector<8x16x8xf32>
    %c2_73 = arith.constant 2 : index
    %c0_74 = arith.constant 0 : index
    %c0_75 = arith.constant 0 : index
    %174 = vector.load %arg13[%c2_73, %c0_74, %c0_75] : memref<14x32x8xf32, #tpu.memory_space<vmem>>, vector<8x32x8xf32>
    %c27_i32_76 = arith.constant 27 : i32
    %175 = tpu.dynamic_rotate %174 by %c27_i32_76 dim 1 : vector<8x32x8xf32>, i32 -> vector<8x32x8xf32>
    %c14 = arith.constant 14 : index
    %c0_77 = arith.constant 0 : index
    %176 = vector.load %arg8[%c14, %c0_77] : memref<49x8xf32, #tpu.memory_space<vmem>>, vector<1x8xf32>
    %177 = vector.extract_strided_slice %175 {offsets = [0, 0, 0], sizes = [8, 16, 8], strides = [1, 1, 1]} : vector<8x32x8xf32> to vector<8x16x8xf32>
    %178 = vector.shape_cast %176 : vector<1x8xf32> to vector<1x1x8xf32>
    %179 = vector.broadcast %178 : vector<1x1x8xf32> to vector<8x16x8xf32>
    %180 = arith.mulf %177, %179 : vector<8x16x8xf32>
    %181 = arith.addf %173, %180 : vector<8x16x8xf32>
    %c26_i32_78 = arith.constant 26 : i32
    %182 = tpu.dynamic_rotate %174 by %c26_i32_78 dim 1 : vector<8x32x8xf32>, i32 -> vector<8x32x8xf32>
    %c15 = arith.constant 15 : index
    %c0_79 = arith.constant 0 : index
    %183 = vector.load %arg8[%c15, %c0_79] : memref<49x8xf32, #tpu.memory_space<vmem>>, vector<1x8xf32>
    %184 = vector.extract_strided_slice %182 {offsets = [0, 0, 0], sizes = [8, 16, 8], strides = [1, 1, 1]} : vector<8x32x8xf32> to vector<8x16x8xf32>
    %185 = vector.shape_cast %183 : vector<1x8xf32> to vector<1x1x8xf32>
    %186 = vector.broadcast %185 : vector<1x1x8xf32> to vector<8x16x8xf32>
    %187 = arith.mulf %184, %186 : vector<8x16x8xf32>
    %188 = arith.addf %181, %187 : vector<8x16x8xf32>
    %c25_i32_80 = arith.constant 25 : i32
    %189 = tpu.dynamic_rotate %174 by %c25_i32_80 dim 1 : vector<8x32x8xf32>, i32 -> vector<8x32x8xf32>
    %c16 = arith.constant 16 : index
    %c0_81 = arith.constant 0 : index
    %190 = vector.load %arg8[%c16, %c0_81] : memref<49x8xf32, #tpu.memory_space<vmem>>, vector<1x8xf32>
    %191 = vector.extract_strided_slice %189 {offsets = [0, 0, 0], sizes = [8, 16, 8], strides = [1, 1, 1]} : vector<8x32x8xf32> to vector<8x16x8xf32>
    %192 = vector.shape_cast %190 : vector<1x8xf32> to vector<1x1x8xf32>
    %193 = vector.broadcast %192 : vector<1x1x8xf32> to vector<8x16x8xf32>
    %194 = arith.mulf %191, %193 : vector<8x16x8xf32>
    %195 = arith.addf %188, %194 : vector<8x16x8xf32>
    %c24_i32_82 = arith.constant 24 : i32
    %196 = tpu.dynamic_rotate %174 by %c24_i32_82 dim 1 : vector<8x32x8xf32>, i32 -> vector<8x32x8xf32>
    %c17 = arith.constant 17 : index
    %c0_83 = arith.constant 0 : index
    %197 = vector.load %arg8[%c17, %c0_83] : memref<49x8xf32, #tpu.memory_space<vmem>>, vector<1x8xf32>
    %198 = vector.extract_strided_slice %196 {offsets = [0, 0, 0], sizes = [8, 16, 8], strides = [1, 1, 1]} : vector<8x32x8xf32> to vector<8x16x8xf32>
    %199 = vector.shape_cast %197 : vector<1x8xf32> to vector<1x1x8xf32>
    %200 = vector.broadcast %199 : vector<1x1x8xf32> to vector<8x16x8xf32>
    %201 = arith.mulf %198, %200 : vector<8x16x8xf32>
    %202 = arith.addf %195, %201 : vector<8x16x8xf32>
    %c23_i32_84 = arith.constant 23 : i32
    %203 = tpu.dynamic_rotate %174 by %c23_i32_84 dim 1 : vector<8x32x8xf32>, i32 -> vector<8x32x8xf32>
    %c18 = arith.constant 18 : index
    %c0_85 = arith.constant 0 : index
    %204 = vector.load %arg8[%c18, %c0_85] : memref<49x8xf32, #tpu.memory_space<vmem>>, vector<1x8xf32>
    %205 = vector.extract_strided_slice %203 {offsets = [0, 0, 0], sizes = [8, 16, 8], strides = [1, 1, 1]} : vector<8x32x8xf32> to vector<8x16x8xf32>
    %206 = vector.shape_cast %204 : vector<1x8xf32> to vector<1x1x8xf32>
    %207 = vector.broadcast %206 : vector<1x1x8xf32> to vector<8x16x8xf32>
    %208 = arith.mulf %205, %207 : vector<8x16x8xf32>
    %209 = arith.addf %202, %208 : vector<8x16x8xf32>
    %c22_i32_86 = arith.constant 22 : i32
    %210 = tpu.dynamic_rotate %174 by %c22_i32_86 dim 1 : vector<8x32x8xf32>, i32 -> vector<8x32x8xf32>
    %c19 = arith.constant 19 : index
    %c0_87 = arith.constant 0 : index
    %211 = vector.load %arg8[%c19, %c0_87] : memref<49x8xf32, #tpu.memory_space<vmem>>, vector<1x8xf32>
    %212 = vector.extract_strided_slice %210 {offsets = [0, 0, 0], sizes = [8, 16, 8], strides = [1, 1, 1]} : vector<8x32x8xf32> to vector<8x16x8xf32>
    %213 = vector.shape_cast %211 : vector<1x8xf32> to vector<1x1x8xf32>
    %214 = vector.broadcast %213 : vector<1x1x8xf32> to vector<8x16x8xf32>
    %215 = arith.mulf %212, %214 : vector<8x16x8xf32>
    %216 = arith.addf %209, %215 : vector<8x16x8xf32>
    %c21_i32_88 = arith.constant 21 : i32
    %217 = tpu.dynamic_rotate %174 by %c21_i32_88 dim 1 : vector<8x32x8xf32>, i32 -> vector<8x32x8xf32>
    %c20 = arith.constant 20 : index
    %c0_89 = arith.constant 0 : index
    %218 = vector.load %arg8[%c20, %c0_89] : memref<49x8xf32, #tpu.memory_space<vmem>>, vector<1x8xf32>
    %219 = vector.extract_strided_slice %217 {offsets = [0, 0, 0], sizes = [8, 16, 8], strides = [1, 1, 1]} : vector<8x32x8xf32> to vector<8x16x8xf32>
    %220 = vector.shape_cast %218 : vector<1x8xf32> to vector<1x1x8xf32>
    %221 = vector.broadcast %220 : vector<1x1x8xf32> to vector<8x16x8xf32>
    %222 = arith.mulf %219, %221 : vector<8x16x8xf32>
    %223 = arith.addf %216, %222 : vector<8x16x8xf32>
    %c3_90 = arith.constant 3 : index
    %c0_91 = arith.constant 0 : index
    %c0_92 = arith.constant 0 : index
    %224 = vector.load %arg13[%c3_90, %c0_91, %c0_92] : memref<14x32x8xf32, #tpu.memory_space<vmem>>, vector<8x32x8xf32>
    %c27_i32_93 = arith.constant 27 : i32
    %225 = tpu.dynamic_rotate %224 by %c27_i32_93 dim 1 : vector<8x32x8xf32>, i32 -> vector<8x32x8xf32>
    %c21 = arith.constant 21 : index
    %c0_94 = arith.constant 0 : index
    %226 = vector.load %arg8[%c21, %c0_94] : memref<49x8xf32, #tpu.memory_space<vmem>>, vector<1x8xf32>
    %227 = vector.extract_strided_slice %225 {offsets = [0, 0, 0], sizes = [8, 16, 8], strides = [1, 1, 1]} : vector<8x32x8xf32> to vector<8x16x8xf32>
    %228 = vector.shape_cast %226 : vector<1x8xf32> to vector<1x1x8xf32>
    %229 = vector.broadcast %228 : vector<1x1x8xf32> to vector<8x16x8xf32>
    %230 = arith.mulf %227, %229 : vector<8x16x8xf32>
    %231 = arith.addf %223, %230 : vector<8x16x8xf32>
    %c26_i32_95 = arith.constant 26 : i32
    %232 = tpu.dynamic_rotate %224 by %c26_i32_95 dim 1 : vector<8x32x8xf32>, i32 -> vector<8x32x8xf32>
    %c22 = arith.constant 22 : index
    %c0_96 = arith.constant 0 : index
    %233 = vector.load %arg8[%c22, %c0_96] : memref<49x8xf32, #tpu.memory_space<vmem>>, vector<1x8xf32>
    %234 = vector.extract_strided_slice %232 {offsets = [0, 0, 0], sizes = [8, 16, 8], strides = [1, 1, 1]} : vector<8x32x8xf32> to vector<8x16x8xf32>
    %235 = vector.shape_cast %233 : vector<1x8xf32> to vector<1x1x8xf32>
    %236 = vector.broadcast %235 : vector<1x1x8xf32> to vector<8x16x8xf32>
    %237 = arith.mulf %234, %236 : vector<8x16x8xf32>
    %238 = arith.addf %231, %237 : vector<8x16x8xf32>
    %c25_i32_97 = arith.constant 25 : i32
    %239 = tpu.dynamic_rotate %224 by %c25_i32_97 dim 1 : vector<8x32x8xf32>, i32 -> vector<8x32x8xf32>
    %c23 = arith.constant 23 : index
    %c0_98 = arith.constant 0 : index
    %240 = vector.load %arg8[%c23, %c0_98] : memref<49x8xf32, #tpu.memory_space<vmem>>, vector<1x8xf32>
    %241 = vector.extract_strided_slice %239 {offsets = [0, 0, 0], sizes = [8, 16, 8], strides = [1, 1, 1]} : vector<8x32x8xf32> to vector<8x16x8xf32>
    %242 = vector.shape_cast %240 : vector<1x8xf32> to vector<1x1x8xf32>
    %243 = vector.broadcast %242 : vector<1x1x8xf32> to vector<8x16x8xf32>
    %244 = arith.mulf %241, %243 : vector<8x16x8xf32>
    %245 = arith.addf %238, %244 : vector<8x16x8xf32>
    %c24_i32_99 = arith.constant 24 : i32
    %246 = tpu.dynamic_rotate %224 by %c24_i32_99 dim 1 : vector<8x32x8xf32>, i32 -> vector<8x32x8xf32>
    %c24_100 = arith.constant 24 : index
    %c0_101 = arith.constant 0 : index
    %247 = vector.load %arg8[%c24_100, %c0_101] : memref<49x8xf32, #tpu.memory_space<vmem>>, vector<1x8xf32>
    %248 = vector.extract_strided_slice %246 {offsets = [0, 0, 0], sizes = [8, 16, 8], strides = [1, 1, 1]} : vector<8x32x8xf32> to vector<8x16x8xf32>
    %249 = vector.shape_cast %247 : vector<1x8xf32> to vector<1x1x8xf32>
    %250 = vector.broadcast %249 : vector<1x1x8xf32> to vector<8x16x8xf32>
    %251 = arith.mulf %248, %250 : vector<8x16x8xf32>
    %252 = arith.addf %245, %251 : vector<8x16x8xf32>
    %c23_i32_102 = arith.constant 23 : i32
    %253 = tpu.dynamic_rotate %224 by %c23_i32_102 dim 1 : vector<8x32x8xf32>, i32 -> vector<8x32x8xf32>
    %c25 = arith.constant 25 : index
    %c0_103 = arith.constant 0 : index
    %254 = vector.load %arg8[%c25, %c0_103] : memref<49x8xf32, #tpu.memory_space<vmem>>, vector<1x8xf32>
    %255 = vector.extract_strided_slice %253 {offsets = [0, 0, 0], sizes = [8, 16, 8], strides = [1, 1, 1]} : vector<8x32x8xf32> to vector<8x16x8xf32>
    %256 = vector.shape_cast %254 : vector<1x8xf32> to vector<1x1x8xf32>
    %257 = vector.broadcast %256 : vector<1x1x8xf32> to vector<8x16x8xf32>
    %258 = arith.mulf %255, %257 : vector<8x16x8xf32>
    %259 = arith.addf %252, %258 : vector<8x16x8xf32>
    %c22_i32_104 = arith.constant 22 : i32
    %260 = tpu.dynamic_rotate %224 by %c22_i32_104 dim 1 : vector<8x32x8xf32>, i32 -> vector<8x32x8xf32>
    %c26 = arith.constant 26 : index
    %c0_105 = arith.constant 0 : index
    %261 = vector.load %arg8[%c26, %c0_105] : memref<49x8xf32, #tpu.memory_space<vmem>>, vector<1x8xf32>
    %262 = vector.extract_strided_slice %260 {offsets = [0, 0, 0], sizes = [8, 16, 8], strides = [1, 1, 1]} : vector<8x32x8xf32> to vector<8x16x8xf32>
    %263 = vector.shape_cast %261 : vector<1x8xf32> to vector<1x1x8xf32>
    %264 = vector.broadcast %263 : vector<1x1x8xf32> to vector<8x16x8xf32>
    %265 = arith.mulf %262, %264 : vector<8x16x8xf32>
    %266 = arith.addf %259, %265 : vector<8x16x8xf32>
    %c21_i32_106 = arith.constant 21 : i32
    %267 = tpu.dynamic_rotate %224 by %c21_i32_106 dim 1 : vector<8x32x8xf32>, i32 -> vector<8x32x8xf32>
    %c27 = arith.constant 27 : index
    %c0_107 = arith.constant 0 : index
    %268 = vector.load %arg8[%c27, %c0_107] : memref<49x8xf32, #tpu.memory_space<vmem>>, vector<1x8xf32>
    %269 = vector.extract_strided_slice %267 {offsets = [0, 0, 0], sizes = [8, 16, 8], strides = [1, 1, 1]} : vector<8x32x8xf32> to vector<8x16x8xf32>
    %270 = vector.shape_cast %268 : vector<1x8xf32> to vector<1x1x8xf32>
    %271 = vector.broadcast %270 : vector<1x1x8xf32> to vector<8x16x8xf32>
    %272 = arith.mulf %269, %271 : vector<8x16x8xf32>
    %273 = arith.addf %266, %272 : vector<8x16x8xf32>
    %c4_108 = arith.constant 4 : index
    %c0_109 = arith.constant 0 : index
    %c0_110 = arith.constant 0 : index
    %274 = vector.load %arg13[%c4_108, %c0_109, %c0_110] : memref<14x32x8xf32, #tpu.memory_space<vmem>>, vector<8x32x8xf32>
    %c27_i32_111 = arith.constant 27 : i32
    %275 = tpu.dynamic_rotate %274 by %c27_i32_111 dim 1 : vector<8x32x8xf32>, i32 -> vector<8x32x8xf32>
    %c28 = arith.constant 28 : index
    %c0_112 = arith.constant 0 : index
    %276 = vector.load %arg8[%c28, %c0_112] : memref<49x8xf32, #tpu.memory_space<vmem>>, vector<1x8xf32>
    %277 = vector.extract_strided_slice %275 {offsets = [0, 0, 0], sizes = [8, 16, 8], strides = [1, 1, 1]} : vector<8x32x8xf32> to vector<8x16x8xf32>
    %278 = vector.shape_cast %276 : vector<1x8xf32> to vector<1x1x8xf32>
    %279 = vector.broadcast %278 : vector<1x1x8xf32> to vector<8x16x8xf32>
    %280 = arith.mulf %277, %279 : vector<8x16x8xf32>
    %281 = arith.addf %273, %280 : vector<8x16x8xf32>
    %c26_i32_113 = arith.constant 26 : i32
    %282 = tpu.dynamic_rotate %274 by %c26_i32_113 dim 1 : vector<8x32x8xf32>, i32 -> vector<8x32x8xf32>
    %c29 = arith.constant 29 : index
    %c0_114 = arith.constant 0 : index
    %283 = vector.load %arg8[%c29, %c0_114] : memref<49x8xf32, #tpu.memory_space<vmem>>, vector<1x8xf32>
    %284 = vector.extract_strided_slice %282 {offsets = [0, 0, 0], sizes = [8, 16, 8], strides = [1, 1, 1]} : vector<8x32x8xf32> to vector<8x16x8xf32>
    %285 = vector.shape_cast %283 : vector<1x8xf32> to vector<1x1x8xf32>
    %286 = vector.broadcast %285 : vector<1x1x8xf32> to vector<8x16x8xf32>
    %287 = arith.mulf %284, %286 : vector<8x16x8xf32>
    %288 = arith.addf %281, %287 : vector<8x16x8xf32>
    %c25_i32_115 = arith.constant 25 : i32
    %289 = tpu.dynamic_rotate %274 by %c25_i32_115 dim 1 : vector<8x32x8xf32>, i32 -> vector<8x32x8xf32>
    %c30 = arith.constant 30 : index
    %c0_116 = arith.constant 0 : index
    %290 = vector.load %arg8[%c30, %c0_116] : memref<49x8xf32, #tpu.memory_space<vmem>>, vector<1x8xf32>
    %291 = vector.extract_strided_slice %289 {offsets = [0, 0, 0], sizes = [8, 16, 8], strides = [1, 1, 1]} : vector<8x32x8xf32> to vector<8x16x8xf32>
    %292 = vector.shape_cast %290 : vector<1x8xf32> to vector<1x1x8xf32>
    %293 = vector.broadcast %292 : vector<1x1x8xf32> to vector<8x16x8xf32>
    %294 = arith.mulf %291, %293 : vector<8x16x8xf32>
    %295 = arith.addf %288, %294 : vector<8x16x8xf32>
    %c24_i32_117 = arith.constant 24 : i32
    %296 = tpu.dynamic_rotate %274 by %c24_i32_117 dim 1 : vector<8x32x8xf32>, i32 -> vector<8x32x8xf32>
    %c31 = arith.constant 31 : index
    %c0_118 = arith.constant 0 : index
    %297 = vector.load %arg8[%c31, %c0_118] : memref<49x8xf32, #tpu.memory_space<vmem>>, vector<1x8xf32>
    %298 = vector.extract_strided_slice %296 {offsets = [0, 0, 0], sizes = [8, 16, 8], strides = [1, 1, 1]} : vector<8x32x8xf32> to vector<8x16x8xf32>
    %299 = vector.shape_cast %297 : vector<1x8xf32> to vector<1x1x8xf32>
    %300 = vector.broadcast %299 : vector<1x1x8xf32> to vector<8x16x8xf32>
    %301 = arith.mulf %298, %300 : vector<8x16x8xf32>
    %302 = arith.addf %295, %301 : vector<8x16x8xf32>
    %c23_i32_119 = arith.constant 23 : i32
    %303 = tpu.dynamic_rotate %274 by %c23_i32_119 dim 1 : vector<8x32x8xf32>, i32 -> vector<8x32x8xf32>
    %c32 = arith.constant 32 : index
    %c0_120 = arith.constant 0 : index
    %304 = vector.load %arg8[%c32, %c0_120] : memref<49x8xf32, #tpu.memory_space<vmem>>, vector<1x8xf32>
    %305 = vector.extract_strided_slice %303 {offsets = [0, 0, 0], sizes = [8, 16, 8], strides = [1, 1, 1]} : vector<8x32x8xf32> to vector<8x16x8xf32>
    %306 = vector.shape_cast %304 : vector<1x8xf32> to vector<1x1x8xf32>
    %307 = vector.broadcast %306 : vector<1x1x8xf32> to vector<8x16x8xf32>
    %308 = arith.mulf %305, %307 : vector<8x16x8xf32>
    %309 = arith.addf %302, %308 : vector<8x16x8xf32>
    %c22_i32_121 = arith.constant 22 : i32
    %310 = tpu.dynamic_rotate %274 by %c22_i32_121 dim 1 : vector<8x32x8xf32>, i32 -> vector<8x32x8xf32>
    %c33 = arith.constant 33 : index
    %c0_122 = arith.constant 0 : index
    %311 = vector.load %arg8[%c33, %c0_122] : memref<49x8xf32, #tpu.memory_space<vmem>>, vector<1x8xf32>
    %312 = vector.extract_strided_slice %310 {offsets = [0, 0, 0], sizes = [8, 16, 8], strides = [1, 1, 1]} : vector<8x32x8xf32> to vector<8x16x8xf32>
    %313 = vector.shape_cast %311 : vector<1x8xf32> to vector<1x1x8xf32>
    %314 = vector.broadcast %313 : vector<1x1x8xf32> to vector<8x16x8xf32>
    %315 = arith.mulf %312, %314 : vector<8x16x8xf32>
    %316 = arith.addf %309, %315 : vector<8x16x8xf32>
    %c21_i32_123 = arith.constant 21 : i32
    %317 = tpu.dynamic_rotate %274 by %c21_i32_123 dim 1 : vector<8x32x8xf32>, i32 -> vector<8x32x8xf32>
    %c34 = arith.constant 34 : index
    %c0_124 = arith.constant 0 : index
    %318 = vector.load %arg8[%c34, %c0_124] : memref<49x8xf32, #tpu.memory_space<vmem>>, vector<1x8xf32>
    %319 = vector.extract_strided_slice %317 {offsets = [0, 0, 0], sizes = [8, 16, 8], strides = [1, 1, 1]} : vector<8x32x8xf32> to vector<8x16x8xf32>
    %320 = vector.shape_cast %318 : vector<1x8xf32> to vector<1x1x8xf32>
    %321 = vector.broadcast %320 : vector<1x1x8xf32> to vector<8x16x8xf32>
    %322 = arith.mulf %319, %321 : vector<8x16x8xf32>
    %323 = arith.addf %316, %322 : vector<8x16x8xf32>
    %c5_125 = arith.constant 5 : index
    %c0_126 = arith.constant 0 : index
    %c0_127 = arith.constant 0 : index
    %324 = vector.load %arg13[%c5_125, %c0_126, %c0_127] : memref<14x32x8xf32, #tpu.memory_space<vmem>>, vector<8x32x8xf32>
    %c27_i32_128 = arith.constant 27 : i32
    %325 = tpu.dynamic_rotate %324 by %c27_i32_128 dim 1 : vector<8x32x8xf32>, i32 -> vector<8x32x8xf32>
    %c35 = arith.constant 35 : index
    %c0_129 = arith.constant 0 : index
    %326 = vector.load %arg8[%c35, %c0_129] : memref<49x8xf32, #tpu.memory_space<vmem>>, vector<1x8xf32>
    %327 = vector.extract_strided_slice %325 {offsets = [0, 0, 0], sizes = [8, 16, 8], strides = [1, 1, 1]} : vector<8x32x8xf32> to vector<8x16x8xf32>
    %328 = vector.shape_cast %326 : vector<1x8xf32> to vector<1x1x8xf32>
    %329 = vector.broadcast %328 : vector<1x1x8xf32> to vector<8x16x8xf32>
    %330 = arith.mulf %327, %329 : vector<8x16x8xf32>
    %331 = arith.addf %323, %330 : vector<8x16x8xf32>
    %c26_i32_130 = arith.constant 26 : i32
    %332 = tpu.dynamic_rotate %324 by %c26_i32_130 dim 1 : vector<8x32x8xf32>, i32 -> vector<8x32x8xf32>
    %c36 = arith.constant 36 : index
    %c0_131 = arith.constant 0 : index
    %333 = vector.load %arg8[%c36, %c0_131] : memref<49x8xf32, #tpu.memory_space<vmem>>, vector<1x8xf32>
    %334 = vector.extract_strided_slice %332 {offsets = [0, 0, 0], sizes = [8, 16, 8], strides = [1, 1, 1]} : vector<8x32x8xf32> to vector<8x16x8xf32>
    %335 = vector.shape_cast %333 : vector<1x8xf32> to vector<1x1x8xf32>
    %336 = vector.broadcast %335 : vector<1x1x8xf32> to vector<8x16x8xf32>
    %337 = arith.mulf %334, %336 : vector<8x16x8xf32>
    %338 = arith.addf %331, %337 : vector<8x16x8xf32>
    %c25_i32_132 = arith.constant 25 : i32
    %339 = tpu.dynamic_rotate %324 by %c25_i32_132 dim 1 : vector<8x32x8xf32>, i32 -> vector<8x32x8xf32>
    %c37 = arith.constant 37 : index
    %c0_133 = arith.constant 0 : index
    %340 = vector.load %arg8[%c37, %c0_133] : memref<49x8xf32, #tpu.memory_space<vmem>>, vector<1x8xf32>
    %341 = vector.extract_strided_slice %339 {offsets = [0, 0, 0], sizes = [8, 16, 8], strides = [1, 1, 1]} : vector<8x32x8xf32> to vector<8x16x8xf32>
    %342 = vector.shape_cast %340 : vector<1x8xf32> to vector<1x1x8xf32>
    %343 = vector.broadcast %342 : vector<1x1x8xf32> to vector<8x16x8xf32>
    %344 = arith.mulf %341, %343 : vector<8x16x8xf32>
    %345 = arith.addf %338, %344 : vector<8x16x8xf32>
    %c24_i32_134 = arith.constant 24 : i32
    %346 = tpu.dynamic_rotate %324 by %c24_i32_134 dim 1 : vector<8x32x8xf32>, i32 -> vector<8x32x8xf32>
    %c38 = arith.constant 38 : index
    %c0_135 = arith.constant 0 : index
    %347 = vector.load %arg8[%c38, %c0_135] : memref<49x8xf32, #tpu.memory_space<vmem>>, vector<1x8xf32>
    %348 = vector.extract_strided_slice %346 {offsets = [0, 0, 0], sizes = [8, 16, 8], strides = [1, 1, 1]} : vector<8x32x8xf32> to vector<8x16x8xf32>
    %349 = vector.shape_cast %347 : vector<1x8xf32> to vector<1x1x8xf32>
    %350 = vector.broadcast %349 : vector<1x1x8xf32> to vector<8x16x8xf32>
    %351 = arith.mulf %348, %350 : vector<8x16x8xf32>
    %352 = arith.addf %345, %351 : vector<8x16x8xf32>
    %c23_i32_136 = arith.constant 23 : i32
    %353 = tpu.dynamic_rotate %324 by %c23_i32_136 dim 1 : vector<8x32x8xf32>, i32 -> vector<8x32x8xf32>
    %c39 = arith.constant 39 : index
    %c0_137 = arith.constant 0 : index
    %354 = vector.load %arg8[%c39, %c0_137] : memref<49x8xf32, #tpu.memory_space<vmem>>, vector<1x8xf32>
    %355 = vector.extract_strided_slice %353 {offsets = [0, 0, 0], sizes = [8, 16, 8], strides = [1, 1, 1]} : vector<8x32x8xf32> to vector<8x16x8xf32>
    %356 = vector.shape_cast %354 : vector<1x8xf32> to vector<1x1x8xf32>
    %357 = vector.broadcast %356 : vector<1x1x8xf32> to vector<8x16x8xf32>
    %358 = arith.mulf %355, %357 : vector<8x16x8xf32>
    %359 = arith.addf %352, %358 : vector<8x16x8xf32>
    %c22_i32_138 = arith.constant 22 : i32
    %360 = tpu.dynamic_rotate %324 by %c22_i32_138 dim 1 : vector<8x32x8xf32>, i32 -> vector<8x32x8xf32>
    %c40 = arith.constant 40 : index
    %c0_139 = arith.constant 0 : index
    %361 = vector.load %arg8[%c40, %c0_139] : memref<49x8xf32, #tpu.memory_space<vmem>>, vector<1x8xf32>
    %362 = vector.extract_strided_slice %360 {offsets = [0, 0, 0], sizes = [8, 16, 8], strides = [1, 1, 1]} : vector<8x32x8xf32> to vector<8x16x8xf32>
    %363 = vector.shape_cast %361 : vector<1x8xf32> to vector<1x1x8xf32>
    %364 = vector.broadcast %363 : vector<1x1x8xf32> to vector<8x16x8xf32>
    %365 = arith.mulf %362, %364 : vector<8x16x8xf32>
    %366 = arith.addf %359, %365 : vector<8x16x8xf32>
    %c21_i32_140 = arith.constant 21 : i32
    %367 = tpu.dynamic_rotate %324 by %c21_i32_140 dim 1 : vector<8x32x8xf32>, i32 -> vector<8x32x8xf32>
    %c41 = arith.constant 41 : index
    %c0_141 = arith.constant 0 : index
    %368 = vector.load %arg8[%c41, %c0_141] : memref<49x8xf32, #tpu.memory_space<vmem>>, vector<1x8xf32>
    %369 = vector.extract_strided_slice %367 {offsets = [0, 0, 0], sizes = [8, 16, 8], strides = [1, 1, 1]} : vector<8x32x8xf32> to vector<8x16x8xf32>
    %370 = vector.shape_cast %368 : vector<1x8xf32> to vector<1x1x8xf32>
    %371 = vector.broadcast %370 : vector<1x1x8xf32> to vector<8x16x8xf32>
    %372 = arith.mulf %369, %371 : vector<8x16x8xf32>
    %373 = arith.addf %366, %372 : vector<8x16x8xf32>
    %c6_142 = arith.constant 6 : index
    %c0_143 = arith.constant 0 : index
    %c0_144 = arith.constant 0 : index
    %374 = vector.load %arg13[%c6_142, %c0_143, %c0_144] : memref<14x32x8xf32, #tpu.memory_space<vmem>>, vector<8x32x8xf32>
    %c27_i32_145 = arith.constant 27 : i32
    %375 = tpu.dynamic_rotate %374 by %c27_i32_145 dim 1 : vector<8x32x8xf32>, i32 -> vector<8x32x8xf32>
    %c42 = arith.constant 42 : index
    %c0_146 = arith.constant 0 : index
    %376 = vector.load %arg8[%c42, %c0_146] : memref<49x8xf32, #tpu.memory_space<vmem>>, vector<1x8xf32>
    %377 = vector.extract_strided_slice %375 {offsets = [0, 0, 0], sizes = [8, 16, 8], strides = [1, 1, 1]} : vector<8x32x8xf32> to vector<8x16x8xf32>
    %378 = vector.shape_cast %376 : vector<1x8xf32> to vector<1x1x8xf32>
    %379 = vector.broadcast %378 : vector<1x1x8xf32> to vector<8x16x8xf32>
    %380 = arith.mulf %377, %379 : vector<8x16x8xf32>
    %381 = arith.addf %373, %380 : vector<8x16x8xf32>
    %c26_i32_147 = arith.constant 26 : i32
    %382 = tpu.dynamic_rotate %374 by %c26_i32_147 dim 1 : vector<8x32x8xf32>, i32 -> vector<8x32x8xf32>
    %c43 = arith.constant 43 : index
    %c0_148 = arith.constant 0 : index
    %383 = vector.load %arg8[%c43, %c0_148] : memref<49x8xf32, #tpu.memory_space<vmem>>, vector<1x8xf32>
    %384 = vector.extract_strided_slice %382 {offsets = [0, 0, 0], sizes = [8, 16, 8], strides = [1, 1, 1]} : vector<8x32x8xf32> to vector<8x16x8xf32>
    %385 = vector.shape_cast %383 : vector<1x8xf32> to vector<1x1x8xf32>
    %386 = vector.broadcast %385 : vector<1x1x8xf32> to vector<8x16x8xf32>
    %387 = arith.mulf %384, %386 : vector<8x16x8xf32>
    %388 = arith.addf %381, %387 : vector<8x16x8xf32>
    %c25_i32_149 = arith.constant 25 : i32
    %389 = tpu.dynamic_rotate %374 by %c25_i32_149 dim 1 : vector<8x32x8xf32>, i32 -> vector<8x32x8xf32>
    %c44 = arith.constant 44 : index
    %c0_150 = arith.constant 0 : index
    %390 = vector.load %arg8[%c44, %c0_150] : memref<49x8xf32, #tpu.memory_space<vmem>>, vector<1x8xf32>
    %391 = vector.extract_strided_slice %389 {offsets = [0, 0, 0], sizes = [8, 16, 8], strides = [1, 1, 1]} : vector<8x32x8xf32> to vector<8x16x8xf32>
    %392 = vector.shape_cast %390 : vector<1x8xf32> to vector<1x1x8xf32>
    %393 = vector.broadcast %392 : vector<1x1x8xf32> to vector<8x16x8xf32>
    %394 = arith.mulf %391, %393 : vector<8x16x8xf32>
    %395 = arith.addf %388, %394 : vector<8x16x8xf32>
    %c24_i32_151 = arith.constant 24 : i32
    %396 = tpu.dynamic_rotate %374 by %c24_i32_151 dim 1 : vector<8x32x8xf32>, i32 -> vector<8x32x8xf32>
    %c45 = arith.constant 45 : index
    %c0_152 = arith.constant 0 : index
    %397 = vector.load %arg8[%c45, %c0_152] : memref<49x8xf32, #tpu.memory_space<vmem>>, vector<1x8xf32>
    %398 = vector.extract_strided_slice %396 {offsets = [0, 0, 0], sizes = [8, 16, 8], strides = [1, 1, 1]} : vector<8x32x8xf32> to vector<8x16x8xf32>
    %399 = vector.shape_cast %397 : vector<1x8xf32> to vector<1x1x8xf32>
    %400 = vector.broadcast %399 : vector<1x1x8xf32> to vector<8x16x8xf32>
    %401 = arith.mulf %398, %400 : vector<8x16x8xf32>
    %402 = arith.addf %395, %401 : vector<8x16x8xf32>
    %c23_i32_153 = arith.constant 23 : i32
    %403 = tpu.dynamic_rotate %374 by %c23_i32_153 dim 1 : vector<8x32x8xf32>, i32 -> vector<8x32x8xf32>
    %c46 = arith.constant 46 : index
    %c0_154 = arith.constant 0 : index
    %404 = vector.load %arg8[%c46, %c0_154] : memref<49x8xf32, #tpu.memory_space<vmem>>, vector<1x8xf32>
    %405 = vector.extract_strided_slice %403 {offsets = [0, 0, 0], sizes = [8, 16, 8], strides = [1, 1, 1]} : vector<8x32x8xf32> to vector<8x16x8xf32>
    %406 = vector.shape_cast %404 : vector<1x8xf32> to vector<1x1x8xf32>
    %407 = vector.broadcast %406 : vector<1x1x8xf32> to vector<8x16x8xf32>
    %408 = arith.mulf %405, %407 : vector<8x16x8xf32>
    %409 = arith.addf %402, %408 : vector<8x16x8xf32>
    %c22_i32_155 = arith.constant 22 : i32
    %410 = tpu.dynamic_rotate %374 by %c22_i32_155 dim 1 : vector<8x32x8xf32>, i32 -> vector<8x32x8xf32>
    %c47 = arith.constant 47 : index
    %c0_156 = arith.constant 0 : index
    %411 = vector.load %arg8[%c47, %c0_156] : memref<49x8xf32, #tpu.memory_space<vmem>>, vector<1x8xf32>
    %412 = vector.extract_strided_slice %410 {offsets = [0, 0, 0], sizes = [8, 16, 8], strides = [1, 1, 1]} : vector<8x32x8xf32> to vector<8x16x8xf32>
    %413 = vector.shape_cast %411 : vector<1x8xf32> to vector<1x1x8xf32>
    %414 = vector.broadcast %413 : vector<1x1x8xf32> to vector<8x16x8xf32>
    %415 = arith.mulf %412, %414 : vector<8x16x8xf32>
    %416 = arith.addf %409, %415 : vector<8x16x8xf32>
    %c21_i32_157 = arith.constant 21 : i32
    %417 = tpu.dynamic_rotate %374 by %c21_i32_157 dim 1 : vector<8x32x8xf32>, i32 -> vector<8x32x8xf32>
    %c48 = arith.constant 48 : index
    %c0_158 = arith.constant 0 : index
    %418 = vector.load %arg8[%c48, %c0_158] : memref<49x8xf32, #tpu.memory_space<vmem>>, vector<1x8xf32>
    %419 = vector.extract_strided_slice %417 {offsets = [0, 0, 0], sizes = [8, 16, 8], strides = [1, 1, 1]} : vector<8x32x8xf32> to vector<8x16x8xf32>
    %420 = vector.shape_cast %418 : vector<1x8xf32> to vector<1x1x8xf32>
    %421 = vector.broadcast %420 : vector<1x1x8xf32> to vector<8x16x8xf32>
    %422 = arith.mulf %419, %421 : vector<8x16x8xf32>
    %423 = arith.addf %416, %422 : vector<8x16x8xf32>
    %c0_159 = arith.constant 0 : index
    %c0_160 = arith.constant 0 : index
    %424 = vector.load %arg9[%c0_159, %c0_160] : memref<1x8xf32, #tpu.memory_space<vmem>>, vector<1x8xf32>
    %425 = vector.shape_cast %424 : vector<1x8xf32> to vector<1x1x8xf32>
    %426 = vector.broadcast %425 : vector<1x1x8xf32> to vector<8x16x8xf32>
    %427 = arith.addf %423, %426 : vector<8x16x8xf32>
    %cst_161 = arith.constant 0.000000e+00 : f32
    %428 = vector.broadcast %cst_161 : f32 to vector<8x16x8xf32>
    %429 = arith.maximumf %427, %428 : vector<8x16x8xf32>
    %430 = vector.shape_cast %429 : vector<8x16x8xf32> to vector<128x8xf32>
    %431 = arith.truncf %430 : vector<128x8xf32> to vector<128x8xbf16>
    %c0_162 = arith.constant 0 : index
    %c0_163 = arith.constant 0 : index
    %432 = vector.load %arg10[%c0_162, %c0_163] : memref<8x8xbf16, #tpu.memory_space<vmem>>, vector<8x8xbf16>
    %cst_164 = arith.constant dense<0.000000e+00> : vector<128x8xf32>
    %433 = tpu.matmul %431, %432, %cst_164 {dimension_numbers = #tpu.dot_dimension_numbers<[1], [0], [0], [1], [0, 0, 1, 1], [], []>} : vector<128x8xbf16>, vector<8x8xbf16>, vector<128x8xf32> -> vector<128x8xf32>
    %c0_165 = arith.constant 0 : index
    %c0_166 = arith.constant 0 : index
    %434 = vector.load %arg11[%c0_165, %c0_166] : memref<1x8xf32, #tpu.memory_space<vmem>>, vector<1x8xf32>
    %435 = vector.broadcast %434 : vector<1x8xf32> to vector<128x8xf32>
    %436 = arith.addf %433, %435 : vector<128x8xf32>
    %437 = vector.shape_cast %436 : vector<128x8xf32> to vector<8x16x8xf32>
    %438 = vector.extract_strided_slice %437 {offsets = [0, 0, 0], sizes = [5, 16, 8], strides = [1, 1, 1]} : vector<8x16x8xf32> to vector<5x16x8xf32>
    %c0_167 = arith.constant 0 : index
    %c3_168 = arith.constant 3 : index
    %c0_169 = arith.constant 0 : index
    %c0_170 = arith.constant 0 : index
    %439 = vector.load %arg2[%c0_167, %c3_168, %c0_169, %c0_170] : memref<1x8x16x8xf32, #tpu.memory_space<vmem>>, vector<1x5x16x8xf32>
    %440 = vector.shape_cast %439 : vector<1x5x16x8xf32> to vector<5x16x8xf32>
    %441 = arith.addf %438, %440 : vector<5x16x8xf32>
    %c0_171 = arith.constant 0 : index
    %c0_172 = arith.constant 0 : index
    %c0_173 = arith.constant 0 : index
    %c0_174 = arith.constant 0 : index
    %442 = vector.load %arg12[%c0_171, %c0_172, %c0_173, %c0_174] : memref<1x8x16x8xf32, #tpu.memory_space<vmem>>, vector<1x5x16x8xf32>
    %443 = vector.shape_cast %442 : vector<1x5x16x8xf32> to vector<5x16x8xf32>
    %444 = vector.shape_cast %441 : vector<5x16x8xf32> to vector<1x5x16x8xf32>
    tpu.vector_store %arg12[%c0_171, %c0_172, %c0_173, %c0_174], %444 {strides = array<i32>} : memref<1x8x16x8xf32, #tpu.memory_space<vmem>>, vector<1x5x16x8xf32>,
    %445 = vector.extract_strided_slice %437 {offsets = [5, 0, 0], sizes = [3, 16, 8], strides = [1, 1, 1]} : vector<8x16x8xf32> to vector<3x16x8xf32>
    %c0_175 = arith.constant 0 : index
    %c0_176 = arith.constant 0 : index
    %c0_177 = arith.constant 0 : index
    %c0_178 = arith.constant 0 : index
    %446 = vector.load %arg3[%c0_175, %c0_176, %c0_177, %c0_178] : memref<1x8x16x8xf32, #tpu.memory_space<vmem>>, vector<1x3x16x8xf32>
    %447 = vector.shape_cast %446 : vector<1x3x16x8xf32> to vector<3x16x8xf32>
    %448 = arith.addf %445, %447 : vector<3x16x8xf32>
    %c0_179 = arith.constant 0 : index
    %c5_180 = arith.constant 5 : index
    %c0_181 = arith.constant 0 : index
    %c0_182 = arith.constant 0 : index
    %449 = vector.load %arg12[%c0_179, %c5_180, %c0_181, %c0_182] : memref<1x8x16x8xf32, #tpu.memory_space<vmem>>, vector<1x3x16x8xf32>
    %450 = vector.shape_cast %449 : vector<1x3x16x8xf32> to vector<3x16x8xf32>
    %451 = vector.shape_cast %448 : vector<3x16x8xf32> to vector<1x3x16x8xf32>
    tpu.vector_store %arg12[%c0_179, %c5_180, %c0_181, %c0_182], %451 {strides = array<i32>} : memref<1x8x16x8xf32, #tpu.memory_space<vmem>>, vector<1x3x16x8xf32>,
    return
  }
  func.func @transform_0(%arg0: i32, %arg1: i32) -> (i32, i32, i32, i32) {
    %c0_i32 = arith.constant 0 : i32
    %c0_i32_0 = arith.constant 0 : i32
    %c0_i32_1 = arith.constant 0 : i32
    return %arg0, %arg1, %c0_i32, %c0_i32_0 : i32, i32, i32, i32
  }
  func.func @transform_1(%arg0: i32, %arg1: i32) -> (i32, i32, i32, i32) {
    %c1_i32 = arith.constant 1 : i32
    %0 = arith.addi %arg1, %c1_i32 : i32
    %c0_i32 = arith.constant 0 : i32
    %c0_i32_0 = arith.constant 0 : i32
    %c0_i32_1 = arith.constant 0 : i32
    return %arg0, %0, %c0_i32, %c0_i32_0 : i32, i32, i32, i32
  }
  func.func @transform_2(%arg0: i32, %arg1: i32) -> (i32, i32) {
    %c0_i32 = arith.constant 0 : i32
    %c0_i32_0 = arith.constant 0 : i32
    %c0_i32_1 = arith.constant 0 : i32
    return %c0_i32, %c0_i32_0 : i32, i32
  }
  func.func @transform_3(%arg0: i32, %arg1: i32) -> (i32, i32) {
    %c0_i32 = arith.constant 0 : i32
    %c0_i32_0 = arith.constant 0 : i32
    %c0_i32_1 = arith.constant 0 : i32
    return %c0_i32, %c0_i32_0 : i32, i32
  }
  func.func @transform_4(%arg0: i32, %arg1: i32) -> (i32, i32) {
    %c0_i32 = arith.constant 0 : i32
    %c0_i32_0 = arith.constant 0 : i32
    %c0_i32_1 = arith.constant 0 : i32
    return %c0_i32, %c0_i32_0 : i32, i32
  }
  func.func @transform_5(%arg0: i32, %arg1: i32) -> (i32, i32) {
    %c0_i32 = arith.constant 0 : i32
    %c0_i32_0 = arith.constant 0 : i32
    %c0_i32_1 = arith.constant 0 : i32
    return %c0_i32, %c0_i32_0 : i32, i32
  }
  func.func @transform_6(%arg0: i32, %arg1: i32) -> (i32, i32) {
    %c0_i32 = arith.constant 0 : i32
    %c0_i32_0 = arith.constant 0 : i32
    %c0_i32_1 = arith.constant 0 : i32
    return %c0_i32, %c0_i32_0 : i32, i32
  }
  func.func @transform_7(%arg0: i32, %arg1: i32) -> (i32, i32) {
    %c0_i32 = arith.constant 0 : i32
    %c0_i32_0 = arith.constant 0 : i32
    %c0_i32_1 = arith.constant 0 : i32
    return %c0_i32, %c0_i32_0 : i32, i32
  }
  func.func @transform_8(%arg0: i32, %arg1: i32) -> (i32, i32) {
    %c0_i32 = arith.constant 0 : i32
    %c0_i32_0 = arith.constant 0 : i32
    %c0_i32_1 = arith.constant 0 : i32
    return %c0_i32, %c0_i32_0 : i32, i32
  }
  func.func @transform_9(%arg0: i32, %arg1: i32) -> (i32, i32) {
    %c0_i32 = arith.constant 0 : i32
    %c0_i32_0 = arith.constant 0 : i32
    %c0_i32_1 = arith.constant 0 : i32
    return %c0_i32, %c0_i32_0 : i32, i32
  }
  func.func @transform_10(%arg0: i32, %arg1: i32) -> (i32, i32, i32, i32) {
    %c0_i32 = arith.constant 0 : i32
    %c0_i32_0 = arith.constant 0 : i32
    %c0_i32_1 = arith.constant 0 : i32
    return %arg0, %arg1, %c0_i32, %c0_i32_0 : i32, i32, i32, i32
  }
}

</mosaic_0001>

<bundles_post_ra>
// kernel: tpu_custom_call.1
= control target key start
LH: loop header
LB: loop body
LE: loop exit
PB: predicated region body
PF: predicated region fallthrough
CT: control target
= control target key end

     0   :  { %s5527_s13 = smov 0   ;;  %s5529_s14 = smov 0   ;;  %s10747_s0 = inlined_call_operand.vmem [shape: f32[2,24,16,8], index: 0, kind: input, shape index: {}]   ;;  %s10748_s1 = inlined_call_operand.vmem [shape: f32[2,24,16,8], index: 1, kind: input, shape index: {}]   ;;  %s10749_s2 = inlined_call_operand.vmem [shape: f32[1,8], index: 2, kind: input, shape index: {}]   ;;  %s10750_s3 = inlined_call_operand.vmem [shape: f32[1,8], index: 3, kind: input, shape index: {}]   ;;  %s10751_s4 = inlined_call_operand.vmem [shape: bf16[8,8], index: 4, kind: input, shape index: {}]   ;;  %s10752_s5 = inlined_call_operand.vmem [shape: f32[1,8], index: 5, kind: input, shape index: {}]   ;;  %s10753_s6 = inlined_call_operand.vmem [shape: f32[49,8], index: 6, kind: input, shape index: {}]   ;;  %s10754_s7 = inlined_call_operand.vmem [shape: f32[1,8], index: 7, kind: input, shape index: {}]   ;;  %s10755_s8 = inlined_call_operand.vmem [shape: bf16[8,8], index: 8, kind: input, shape index: {}]   ;;  %s10756_s9 = inlined_call_operand.vmem [shape: f32[1,8], index: 9, kind: input, shape index: {}]   ;;  %s10757_s10 = inlined_call_operand.vmem [shape: f32[2,16,16,8], index: 10, kind: output, shape index: {}]  }
   0x1   :  { %s5531_s15 = smov 0   ;;  %s5533_s16 = smov 0  }
   0x2   :  { %s5535_s17 = smov 0  }
   0x3 LB: > { %s29_s18 = sadd.s32 1, %s5461_s15  ;;  %s32_s19 = sadd.s32 1, %s5465_s16  ;;  %s5469_s17 = sphi %s5535_s17, %s20_s17   ;;  %s5465_s16 = sphi %s5533_s16, %s11739_s16   ;;  %s5461_s15 = sphi %s5531_s15, %s11738_s15   ;;  %s5457_s14 = sphi %s5529_s14, %s11737_s14   ;;  %s5453_s13 = sphi %s5527_s13, %s11736_s13  }
   0x4   : > { %p30_p0 = scmp.ge.s32.totalorder %s29_s18, 2  ;;  %p5105_p1 = scmp.ge.s32.totalorder %s5469_s17, 1 }
   0x5   : > { %p356_p2 = scmp.lt.s32.totalorder %s5469_s17, 5 }
   0x6   : > { %s11741_s18 = smov (%p30_p0, %s29_s18), 0  ;;  %s11743_s19 = smov (!%p30_p0, %s32_s19), %s5465_s16 }
   0x7   : > { %p357_p3 = pnand %p5105_p1, %p356_p2  ;;  %p34_p4 = scmp.ge.s32.totalorder %s11743_s19, 2 }
   0x9   : > { %s11745_s19 = smov (%p34_p4, %s11743_s19), 0  ;;  %360 = sbr.rel (%p357_p3) target bundleno = 1147 (0x47b), region = 60 }
  0x10   : > { %v551_v0 = vld [vmem:[%s10751_s4] sm:$0xf]  ;;  %vm583_vm0 = vcmask 1043456   ;;  %s5560_s22 = sshll.u32 %s5453_s13, 3  ;;  %p416_p5 = scmp.lt.s32.totalorder %s5457_s14, 1  ;;  %vm451_vm1 = vcmask 64512  }
  0x11   : > { %5296 = vmatprep.subr.msk.bf16.mxu0 %vm583_vm0, %v551_v0  ;;  %v585_v1 = vsel %vm583_vm0, %v551_v0, 0  ;;  %p418_p6 = scmp.lt.s32.totalorder %s5560_s22, 23  ;;  %v838_v2 = vld [vmem:[%s10751_s4] sm:$0xf]  ;;  %v5471_v4 = vmov 0.0   ;;  %s5608_s27 = sadd.s32 8, %s5560_s22 }
  0x12   : > { %5245 = vmatpush3.bf16.msra.mxu0 %v585_v1  ;;  %s11747_s14 = smov (!%p416_p5, %s5457_s14), 1  ;;  %v5575_v3 = vsel %vm583_vm0, %v838_v2, 0  ;;  %5298 = vmatprep.subr.msk.bf16.mxu1 %vm583_vm0, %v838_v2  ;;  %453 = vst.msk [vmem:[#allocation2 + $0x20] sm:$0xff] %vm451_vm1, %v5471_v4  ;;  %452 = vst.msk [vmem:[#allocation2] sm:$0xff] %vm451_vm1, %v5471_v4  ;;  %p430_p7 = scmp.lt.s32.totalorder %s5608_s27, 23 }
  0x13   : > { %s5571_s25 = scalar_select %p418_p6, %s5560_s22, 23  ;;  %5297 = vmatprep.subr.msk.bf16.mxu0 %vm583_vm0, %v838_v2  ;;  %454 = vst.msk [vmem:[#allocation2 + $0x40] sm:$0xff] %vm451_vm1, %v5471_v4  ;;  %455 = vst.msk [vmem:[#allocation2 + $0x60] sm:$0xff] %vm451_vm1, %v5471_v4  ;;  %5295 = vmatpush3.bf16.msra.mxu1 %v5575_v3  ;;  %v5618_v5 = vld [vmem:[%s10749_s2] ss:$0 sm:$0xff] }
  0x14   : > { %456 = vst.msk [vmem:[#allocation2 + $0x80] sm:$0xff] %vm451_vm1, %v5471_v4  ;;  %457 = vst.msk [vmem:[#allocation2 + $0xa0] sm:$0xff] %vm451_vm1, %v5471_v4  ;;  %s5300_s26 = smul.u32 48, %s11747_s14  ;;  %v5628_v6 = vld [vmem:[%s10750_s3] ss:$0 sm:$0xff]  ;;  %p442_p8 = scmp.lt.s32.totalorder %s5560_s22, 15 }
  0x15   : > { %458 = vst.msk [vmem:[#allocation2 + $0xc0] sm:$0xff] %vm451_vm1, %v5471_v4  ;;  %459 = vst.msk [vmem:[#allocation2 + $0xe0] sm:$0xff] %vm451_vm1, %v5471_v4  ;;  %s5107_s28 = sshll.u32 %s5571_s25, 1 }
  0x16   : > { %460 = vst.msk [vmem:[#allocation2 + $0x100] sm:$0xff] %vm451_vm1, %v5471_v4  ;;  %461 = vst.msk [vmem:[#allocation2 + $0x120] sm:$0xff] %vm451_vm1, %v5471_v4  ;;  %s422_s29 = sadd.s32 %s5300_s26, %s5107_s28 }
  0x17   : > { %462 = vst.msk [vmem:[#allocation2 + $0x140] sm:$0xff] %vm451_vm1, %v5471_v4  ;;  %463 = vst.msk [vmem:[#allocation2 + $0x160] sm:$0xff] %vm451_vm1, %v5471_v4  ;;  %s5108_s30 = sshll.u32 %s422_s29, 3 }
  0x18   : > { %464 = vst.msk [vmem:[#allocation2 + $0x180] sm:$0xff] %vm451_vm1, %v5471_v4  ;;  %465 = vst.msk [vmem:[#allocation2 + $0x1a0] sm:$0xff] %vm451_vm1, %v5471_v4  ;;  %s5623_s21 = scalar_lea.vmem %s10747_s0, %s5108_s30 }
  0x19   : > { %466 = vst.msk [vmem:[#allocation2 + $0x18] sm:$0xff] %vm451_vm1, %v5471_v4  ;;  %467 = vst.msk [vmem:[#allocation2 + $0x38] sm:$0xff] %vm451_vm1, %v5471_v4  ;;  %v480_v7 = vld [vmem:[%s5623_s21] sm:$0xff]  ;;  %v481_v8 = vld [vmem:[%s5623_s21 + $0x8] sm:$0xff]  ;;  %s431_s25 = scalar_select %p430_p7, %s5608_s27, 23 }
  0x1a   : > { %468 = vst.msk [vmem:[#allocation2 + $0x58] sm:$0xff] %vm451_vm1, %v5471_v4  ;;  %469 = vst.msk [vmem:[#allocation2 + $0x78] sm:$0xff] %vm451_vm1, %v5471_v4  ;;  %v482_v9 = vld [vmem:[%s5623_s21 + $0x10] sm:$0xff]  ;;  %v504_v10 = vmul.f32 %v5618_v5, %v480_v7  ;;  %v505_v11 = vmul.f32 %v5618_v5, %v481_v8  ;;  %v483_v12 = vld [vmem:[%s5623_s21 + $0x18] sm:$0xff] }
  0x1b   : > { %470 = vst.msk [vmem:[#allocation2 + $0x98] sm:$0xff] %vm451_vm1, %v5471_v4  ;;  %471 = vst.msk [vmem:[#allocation2 + $0xb8] sm:$0xff] %vm451_vm1, %v5471_v4  ;;  %v506_v13 = vmul.f32 %v5618_v5, %v482_v9  ;;  %v484_v14 = vld [vmem:[%s5623_s21 + $0x20] sm:$0xff]  ;;  %v485_v15 = vld [vmem:[%s5623_s21 + $0x28] sm:$0xff]  ;;  %v507_v16 = vmul.f32 %v5618_v5, %v483_v12  ;;  %s5110_s28 = sshll.u32 %s431_s25, 1 }
  0x1c   : > { %472 = vst.msk [vmem:[#allocation2 + $0xd8] sm:$0xff] %vm451_vm1, %v5471_v4  ;;  %473 = vst.msk [vmem:[#allocation2 + $0xf8] sm:$0xff] %vm451_vm1, %v5471_v4  ;;  %v508_v17 = vmul.f32 %v5618_v5, %v484_v14  ;;  %v509_v18 = vmul.f32 %v5618_v5, %v485_v15  ;;  %v486_v19 = vld [vmem:[%s5623_s21 + $0x30] sm:$0xff]  ;;  %v487_v20 = vld [vmem:[%s5623_s21 + $0x38] sm:$0xff]  ;;  %v527_v22 = vadd.f32 %v5628_v6, %v504_v10  ;;  %s434_s29 = sadd.s32 %s5300_s26, %s5110_s28 }
  0x1d   : > { %474 = vst.msk [vmem:[#allocation2 + $0x118] sm:$0xff] %vm451_vm1, %v5471_v4  ;;  %475 = vst.msk [vmem:[#allocation2 + $0x138] sm:$0xff] %vm451_vm1, %v5471_v4  ;;  %v488_v21 = vld [vmem:[%s5623_s21 + $0x40] sm:$0xff]  ;;  %v528_v23 = vadd.f32 %v5628_v6, %v505_v11  ;;  %v529_v24 = vadd.f32 %v5628_v6, %v506_v13  ;;  %v510_v25 = vmul.f32 %v5618_v5, %v486_v19  ;;  %v489_v26 = vld [vmem:[%s5623_s21 + $0x48] sm:$0xff]  ;;  %s5111_s30 = sshll.u32 %s434_s29, 3  ;;  %s5114_s29 = sshll.u32 %s11747_s14, 5 }
  0x1e   : > { %476 = vst.msk [vmem:[#allocation2 + $0x158] sm:$0xff] %vm451_vm1, %v5471_v4  ;;  %477 = vst.msk [vmem:[#allocation2 + $0x178] sm:$0xff] %vm451_vm1, %v5471_v4  ;;  %v530_v27 = vadd.f32 %v5628_v6, %v507_v16  ;;  %v531_v28 = vadd.f32 %v5628_v6, %v508_v17  ;;  %v532_v29 = vadd.f32 %v5628_v6, %v509_v18  ;;  %v490_v40 = vld [vmem:[%s5623_s21 + $0x50] sm:$0xff]  ;;  %v491_v41 = vld [vmem:[%s5623_s21 + $0x58] sm:$0xff]  ;;  %s5674_s12 = scalar_lea.vmem %s10748_s1, %s5111_s30 }
  0x1f   : > { %478 = vst.msk [vmem:[#allocation2 + $0x198] sm:$0xff] %vm451_vm1, %v5471_v4  ;;  %479 = vst.msk [vmem:[#allocation2 + $0x1b8] sm:$0xff] %vm451_vm1, %v5471_v4  ;;  %v511_v30 = vmul.f32 %v5618_v5, %v487_v20  ;;  %v543_v31 = vpack.c.bf16 %v528_v23, %v527_v22  ;;  %v512_v32 = vmul.f32 %v5618_v5, %v488_v21  ;;  %v492_v42 = vld [vmem:[%s5623_s21 + $0x60] sm:$0xff]  ;;  %v493_v43 = vld [vmem:[%s5623_s21 + $0x68] sm:$0xff] }
  0x20   : > { %v513_v33 = vmul.f32 %v5618_v5, %v489_v26  ;;  %v544_v34 = vpack.c.bf16 %v530_v27, %v529_v24  ;;  %v545_v35 = vpack.c.bf16 %v532_v29, %v531_v28  ;;  %v533_v36 = vadd.f32 %v5628_v6, %v510_v25  ;;  %v788_v47 = vld [vmem:[%s5674_s12 + $0x40] sm:$0xff]  ;;  %v789_v51 = vld [vmem:[%s5674_s12 + $0x48] sm:$0xff]  ;;  %v790_v52 = vld [vmem:[%s5674_s12 + $0x50] sm:$0xff] }
  0x21   : > { %5246 = vmatprep.mubr.msk.bf16.mxu0 %vm451_vm1, %v543_v31  ;;  %v534_v37 = vadd.f32 %v5628_v6, %v511_v30  ;;  %v535_v38 = vadd.f32 %v5628_v6, %v512_v32  ;;  %v514_v45 = vmul.f32 %v5618_v5, %v490_v40  ;;  %v515_v46 = vmul.f32 %v5618_v5, %v491_v41  ;;  %v791_v53 = vld [vmem:[%s5674_s12 + $0x58] sm:$0xff]  ;;  %v494_v61 = vld [vmem:[%s5623_s21 + $0x70] sm:$0xff]  ;;  %v780_v1 = vld [vmem:[%s5674_s12] sm:$0xff] }
  0x22   : > { %5247 = vmatmul.mubr.msk.bf16.vlgmr.msra.gmra.mrb[0].mxu0 %vm451_vm1, %v544_v34  ;;  %v536_v39 = vadd.f32 %v5628_v6, %v513_v33  ;;  %v516_v49 = vmul.f32 %v5618_v5, %v492_v42  ;;  %v517_v50 = vmul.f32 %v5618_v5, %v493_v43  ;;  %v809_v54 = vmul.f32 %v5618_v5, %v788_v47  ;;  %v495_v62 = vld [vmem:[%s5623_s21 + $0x78] sm:$0xff]  ;;  %v781_v2 = vld [vmem:[%s5674_s12 + $0x8] sm:$0xff]  ;;  %v782_v20 = vld [vmem:[%s5674_s12 + $0x10] sm:$0xff] }
  0x23   : > { %5263 = vmatpush3.bf16.msra.mxu0 %v5575_v3  ;;  %5250 = vmatprep.mubr.msk.bf16.mxu0 %vm451_vm1, %v545_v35  ;;  %v546_v44 = vpack.c.bf16 %v534_v37, %v533_v36  ;;  %v537_v55 = vadd.f32 %v5628_v6, %v514_v45  ;;  %v538_v56 = vadd.f32 %v5628_v6, %v515_v46  ;;  %v783_v21 = vld [vmem:[%s5674_s12 + $0x18] sm:$0xff]  ;;  %v784_v22 = vld [vmem:[%s5674_s12 + $0x20] sm:$0xff]  ;;  %v785_v23 = vld [vmem:[%s5674_s12 + $0x28] sm:$0xff]  ;;  %v5738_v43 = vstv %s5560_s22  ;;  %s11749_s22 = smov (!%p442_p8, %s5560_s22), 15 }
  0x24   : > { %v547_v48 = vpack.c.bf16 %v536_v39, %v535_v38  ;;  %v810_v57 = vmul.f32 %v5618_v5, %v789_v51  ;;  %v811_v58 = vmul.f32 %v5618_v5, %v790_v52  ;;  %v539_v59 = vadd.f32 %v5628_v6, %v516_v49  ;;  %v786_v34 = vld [vmem:[%s5674_s12 + $0x30] sm:$0xff]  ;;  %v787_v35 = vld [vmem:[%s5674_s12 + $0x38] sm:$0xff]  ;;  %10963 = vst [vmem:[#allocation3_spill] sm:$0xff] %v5738_v43  ;;  %v5741_v45 = vld [vmem:[#allocation2 + $0x20] sm:$0xff]  ;;  %s5113_s28 = sshll.u32 %s11749_s22, 1 }
  0x25   : > { %v540_v60 = vadd.f32 %v5628_v6, %v517_v50  ;;  %v828_v63 = vadd.f32 %v5628_v6, %v809_v54  ;;  %v812_v0 = vmul.f32 %v5618_v5, %v791_v53  ;;  %v548_v8 = vpack.c.bf16 %v538_v56, %v537_v55  ;;  %v5748_v47 = vld [vmem:[%s10752_s5] ss:$0 sm:$0xff]  ;;  %v5763_v55 = vld [vmem:[#allocation2 + $0x18] sm:$0xff]  ;;  %s446_s14 = sadd.s32 %s5114_s29, %s5113_s28 }
  0x26   : > { %v829_v3 = vadd.f32 %v5628_v6, %v810_v57  ;;  %v830_v4 = vadd.f32 %v5628_v6, %v811_v58  ;;  %v518_v9 = vmul.f32 %v5618_v5, %v494_v61  ;;  %v519_v10 = vmul.f32 %v5618_v5, %v495_v62  ;;  %s5115_s26 = sshll.u32 %s446_s14, 3 }
  0x27   : > { %v831_v7 = vadd.f32 %v5628_v6, %v812_v0  ;;  %v549_v12 = vpack.c.bf16 %v540_v60, %v539_v59  ;;  %v801_v13 = vmul.f32 %v5618_v5, %v780_v1  ;;  %v802_v14 = vmul.f32 %v5618_v5, %v781_v2  ;;  %v5779_v2 = vld [vmem:[#allocation2 + $0x60] sm:$0xff]  ;;  %s10666_s20 = scalar_lea.vmem %s10757_s10, %s5115_s26 }
  0x28   : > { %v836_v11 = vpack.c.bf16 %v829_v3, %v828_v63  ;;  %v541_v16 = vadd.f32 %v5628_v6, %v518_v9  ;;  %v542_v17 = vadd.f32 %v5628_v6, %v519_v10  ;;  %v803_v25 = vmul.f32 %v5618_v5, %v782_v20 }
  0x29   : > { %v837_v15 = vpack.c.bf16 %v831_v7, %v830_v4  ;;  %v820_v18 = vadd.f32 %v5628_v6, %v801_v13  ;;  %v821_v19 = vadd.f32 %v5628_v6, %v802_v14  ;;  %v804_v26 = vmul.f32 %v5618_v5, %v783_v21  ;;  %v5795_v14 = vld [vmem:[#allocation2 + $0x40] sm:$0xff] }
  0x2a   : > { %5251 = vmatmul.mubr.msk.bf16.gmra.mrb[4].mxu0 %vm451_vm1, %v546_v44  ;;  %5272 = vmatprep.mubr.msk.bf16.mxu1 %vm451_vm1, %v836_v11  ;;  %v550_v24 = vpack.c.bf16 %v542_v17, %v541_v16  ;;  %v805_v28 = vmul.f32 %v5618_v5, %v784_v22  ;;  %v806_v29 = vmul.f32 %v5618_v5, %v785_v23  ;;  %v701_v44 = vadd.s32 1, %v5738_v43  ;;  %v5914_v4 = vld [vmem:[%s10753_s6 + $0x7] ss:$0 sm:$0xff] }
  0x2b   : > { %5254 = vmatprep.mubr.msk.bf16.mxu0 %vm451_vm1, %v547_v48  ;;  %5273 = vmatmul.mubr.msk.bf16.vlgmr.msra.gmra.mrb[0].mxu1 %vm451_vm1, %v837_v15  ;;  %v832_v27 = vpack.c.bf16 %v821_v19, %v820_v18  ;;  %v822_v30 = vadd.f32 %v5628_v6, %v803_v25  ;;  %v823_v31 = vadd.f32 %v5628_v6, %v804_v26  ;;  %v1077_v46 = vlaneseq  ;;  %v5806_v19 = vld [vmem:[#allocation2 + $0x78] sm:$0xff] }
  0x2c   : > { %v824_v32 = vadd.f32 %v5628_v6, %v805_v28  ;;  %v825_v33 = vadd.f32 %v5628_v6, %v806_v29  ;;  %v807_v37 = vmul.f32 %v5618_v5, %v786_v34  ;;  %v808_v38 = vmul.f32 %v5618_v5, %v787_v35  ;;  %v5743_v5 = vld [vmem:[#allocation2] sm:$0xff]  ;;  %10969 = vst [vmem:[#allocation5_spill] sm:$0xff] %v5795_v14 }
  0x2d   : > { %v833_v36 = vpack.c.bf16 %v823_v31, %v822_v30  ;;  %vm709_vm2 = vcmp.ge.s32.totalorder %v701_v44, 3  ;;  %v5753_v48 = vadd.s32 3, %v5738_v43  ;;  %vm717_vm3 = vcmp.lt.s32.totalorder %v701_v44, 19  ;;  %10970 = vst [vmem:[#allocation6_spill] sm:$0xff] %v5806_v19  ;;  %v5821_v29 = vld [vmem:[#allocation2 + $0xa0] sm:$0xff]  ;;  %10978 = vst [vmem:[#allocation12_spill] sm:$0xff] %v5914_v4 }
  0x2e   : > { %v834_v39 = vpack.c.bf16 %v825_v33, %v824_v32  ;;  %v826_v40 = vadd.f32 %v5628_v6, %v807_v37  ;;  %v827_v41 = vadd.f32 %v5628_v6, %v808_v38  ;;  %v5750_v6 = vld [vmem:[#allocation2 + $0x38] sm:$0xff]  ;;  %v1054_v49 = vrot.slane %v5741_v45, 5  ;;  %vm5771_vm6 = vmand %vm709_vm2, %vm717_vm3  ;;  %10972 = vst [vmem:[#allocation8_spill] sm:$0xff] %v5821_v29 }
  0x2f   : > { %vm708_vm4 = vcmp.ge.s32.totalorder %v5738_v43, 3  ;;  %vm716_vm5 = vcmp.lt.s32.totalorder %v5738_v43, 19  ;;  %v5758_v51 = vshrl.u32 %v1077_v46, 7  ;;  %v1134_v52 = vrot.slane %v5741_v45, 6 }
  0x30   : > { %v835_v42 = vpack.c.bf16 %v827_v41, %v826_v40  ;;  %v1212_v53 = vrot.slane %v5741_v45, 7  ;;  %v1053_v54 = vrot.slane %v5743_v5, 5  ;;  %v1133_v58 = vrot.slane %v5743_v5, 6  ;;  %vm5785_vm8 = vmand %vm708_vm4, %vm716_vm5  ;;  %v5834_v40 = vld [vmem:[#allocation2 + $0x80] sm:$0xff]  ;;  %v5836_v41 = vld [vmem:[#allocation2 + $0xb8] sm:$0xff] }
  0x31   : > { %10964 = vst [vmem:[#allocation4_spill] sm:$0xff] %v5758_v51  ;;  %v1211_v59 = vrot.slane %v5743_v5, 7  ;;  %v1343_v60 = vrot.slane %v5750_v6, 1  ;;  %v1421_v0 = vrot.slane %v5750_v6, 2  ;;  %vm711_vm7 = vcmp.ge.s32.totalorder %v5753_v48, 3  ;;  %10973 = vst [vmem:[#allocation9_spill] sm:$0xff] %v5834_v40 }
  0x32   : > { %5255 = vmatmul.mubr.msk.bf16.gmra.mrb[8].mxu0 %vm451_vm1, %v548_v8  ;;  %vm719_vm9 = vcmp.lt.s32.totalorder %v5753_v48, 19  ;;  %vm1079_vm10 = vcmp.lt.s32.totalorder %v5758_v51, 3  ;;  %vm1157_vm11 = vcmp.lt.s32.totalorder %v5758_v51, 2  ;;  %vm1235_vm12 = vcmp.lt.s32.totalorder %v5758_v51, 1  ;;  %10974 = vst [vmem:[#allocation10_spill] sm:$0xff] %v5836_v41 }
  0x33   : > { %5258 = vmatprep.mubr.msk.bf16.mxu0 %vm451_vm1, %v549_v12  ;;  %v5804_v18 = vadd.s32 2, %v5738_v43  ;;  %vm5842_vm13 = vmand %vm711_vm7, %vm719_vm9  ;;  %v5859_v48 = vld [vmem:[%s10753_s6 + $0x3] ss:$0 sm:$0xff]  ;;  %vm1350_vm14 = vcmp.lt.s32.totalorder %v5758_v51, 7  ;;  %vm1428_vm15 = vcmp.lt.s32.totalorder %v5758_v51, 6  ;;  %vm1506_vm2 = vcmp.lt.s32.totalorder %v5758_v51, 5 }
  0x34   : > { %v5944_v45 = vld [vmem:[%s10753_s6 + $0x9] ss:$0 sm:$0xff] }
  0x35   : > { %vm710_vm3 = vcmp.ge.s32.totalorder %v5804_v18, 3  ;;  %vm718_vm4 = vcmp.lt.s32.totalorder %v5804_v18, 19  ;;  %v6241_v18 = vld [vmem:[%s10753_s6 + $0x17] ss:$0 sm:$0xff] }
  0x36   : > { %vm6221_vm9 = vmand %vm710_vm3, %vm718_vm4  ;;  %11012 = vst [vmem:[#allocation30_spill] sm:$0xff] %v6241_v18 }
  0x3a   : > { %5259 = vmatmul.mubr.msk.bf16.gmra.mrb[12].mxu0 %vm451_vm1, %v550_v24  ;;  %v5813_v24 = vld [vmem:[#allocation2 + $0x58] sm:$0xff] }
  0x3b   : > { %5264 = vmatprep.mubr.msk.bf16.mxu0 %vm451_vm1, %v832_v27  ;;  %10971 = vst [vmem:[#allocation7_spill] sm:$0xff] %v5813_v24 }
  0x42   : > { %5265 = vmatmul.mubr.msk.bf16.vlgmr.msra.gmra.mrb[16].mxu0 %vm451_vm1, %v833_v36 }
  0x43   : > { %5268 = vmatprep.mubr.msk.bf16.mxu0 %vm451_vm1, %v834_v39  ;;  %v5933_v39 = vld [vmem:[%s10753_s6 + $0x8] ss:$0 sm:$0xff] }
  0x44   : > { %10979 = vst [vmem:[#allocation13_spill] sm:$0xff] %v5933_v39 }
  0x4a   : > { %5269 = vmatmul.mubr.msk.bf16.gmra.mrb[20].mxu0 %vm451_vm1, %v835_v42 }
  0xf5   : > { %v5248_v50 = vpop.f32.mrb[0].mxu0 }
  0xf6   : > { %v630_v56 = vadd.f32 %v5248_v50, %v5748_v47  ;;  %v621_v57 = vpop.f32.mrb[1].mxu0  ;;  %v5850_v50 = vadd.s32 5, %v5738_v43 }
  0xf7   : > { %v622_v62 = vadd.f32 %v5748_v47, %v621_v57  ;;  %v5249_v63 = vpop.f32.mrb[2].mxu0  ;;  %v5854_v57 = vadd.s32 4, %v5738_v43 }
  0xf8   : > { %v686_v3 = vmax.f32 %v630_v56, 0.0  ;;  %v633_v7 = vadd.f32 %v5249_v63, %v5748_v47  ;;  %v624_v8 = vpop.f32.mrb[3].mxu0  ;;  %vm713_vm5 = vcmp.ge.s32.totalorder %v5850_v50, 3 }
  0xf9   : > { %v684_v10 = vmax.f32 %v622_v62, 0.0  ;;  %v625_v11 = vadd.f32 %v5748_v47, %v624_v8  ;;  %v5874_v8 = vld [vmem:[%s10753_s6 + $0x1] ss:$0 sm:$0xff]  ;;  %vm712_vm7 = vcmp.ge.s32.totalorder %v5854_v57, 3 }
  0xfa   : > { %v750_v15 = vsel %vm5771_vm6, %v686_v3, 0.0  ;;  %v687_v16 = vmax.f32 %v633_v7, 0.0  ;;  %v5869_v7 = vld [vmem:[%s10753_s6] ss:$0 sm:$0xff] }
  0xfb   : > { %766 = vst.msk [vmem:[#allocation2 + $0x28] sm:$0xff] %vm451_vm1, %v750_v15  ;;  %v748_v20 = vsel %vm5785_vm8, %v684_v10, 0.0  ;;  %v685_v21 = vmax.f32 %v625_v11, 0.0  ;;  %v5879_v10 = vld [vmem:[%s10753_s6 + $0xa] ss:$0 sm:$0xff] }
  0xfc   : > { %764 = vst.msk [vmem:[#allocation2 + $0x8] sm:$0xff] %vm451_vm1, %v748_v20  ;;  %v751_v25 = vsel %vm5771_vm6, %v687_v16, 0.0  ;;  %10977 = vst [vmem:[#allocation11_spill] sm:$0xff] %v5879_v10  ;;  %v5898_v20 = vld [vmem:[%s10753_s6 + $0x2] ss:$0 sm:$0xff]  ;;  %vm721_vm6 = vcmp.lt.s32.totalorder %v5850_v50, 19 }
  0xfd   : > { %767 = vst.msk [vmem:[#allocation2 + $0x30] sm:$0xff] %vm451_vm1, %v751_v25  ;;  %v749_v30 = vsel %vm5785_vm8, %v685_v21, 0.0  ;;  %v5252_v31 = vpop.f32.mrb[4].mxu0  ;;  %vm720_vm8 = vcmp.lt.s32.totalorder %v5854_v57, 19  ;;  %vm6286_vm3 = vmand %vm713_vm5, %vm721_vm6 }
  0xfe   : > { %765 = vst.msk [vmem:[#allocation2 + $0x10] sm:$0xff] %vm451_vm1, %v749_v30  ;;  %v646_v35 = vadd.f32 %v5252_v31, %v5748_v47  ;;  %v637_v36 = vpop.f32.mrb[5].mxu0 }
  0xff   : > { %v5847_v44 = vadd.f32 %v5748_v47, %v637_v36  ;;  %v5253_v46 = vpop.f32.mrb[6].mxu0 }
 0x100   : > { %v690_v61 = vmax.f32 %v646_v35, 0.0  ;;  %v5862_v62 = vadd.f32 %v5253_v46, %v5748_v47  ;;  %v640_v63 = vpop.f32.mrb[7].mxu0 }
 0x102   : > { %v5885_v21 = vld [vmem:[#allocation2 + $0x28] sm:$0xff]  ;;  %v754_v25 = vsel %vm5842_vm13, %v690_v61, 0.0  ;;  %v5905_v61 = vadd.f32 %v5748_v47, %v640_v63 }
 0x103   : > { %v1062_v36 = vrot.slane %v5885_v21, 5  ;;  %v1142_v46 = vrot.slane %v5885_v21, 6  ;;  %v1220_v15 = vrot.slane %v5885_v21, 7  ;;  %v5900_v16 = vld [vmem:[#allocation2 + $0x8] sm:$0xff]  ;;  %770 = vst.msk [vmem:[#allocation2 + $0x68] sm:$0xff] %vm451_vm1, %v754_v25  ;;  %v1296_v35 = vmul.f32 %v5859_v48, %v5885_v21 }
 0x104   : > { %v1327_v31 = vrot.slane %v5885_v21, 1  ;;  %v1405_v11 = vrot.slane %v5885_v21, 2  ;;  %v10758_v38 = vrot.slane %v5900_v16, 5  ;;  %v10759_v26 = vrot.slane %v5900_v16, 6  ;;  %v1027_v3 = vld [vmem:[#allocation2 + $0x30] sm:$0xff] }
 0x105   : > { %v1089_v63 = vsel %vm1079_vm10, %v1054_v49, %v1062_v36  ;;  %v1167_v25 = vsel %vm1157_vm11, %v1134_v52, %v1142_v46  ;;  %v1245_v56 = vsel %vm1235_vm12, %v1212_v53, %v1220_v15  ;;  %v5936_v37 = vpop.f32.mrb[8].mxu0  ;;  %v5948_v53 = vmul.f32 %v5879_v10, %v5885_v21 }
 0x106   : > { %v1103_v49 = vmul.f32 %v5869_v7, %v1089_v63  ;;  %v1181_v34 = vmul.f32 %v5874_v8, %v1167_v25  ;;  %v5950_v33 = vpop.f32.mrb[9].mxu0  ;;  %v1259_v32 = vmul.f32 %v5898_v20, %v1245_v56  ;;  %v5954_v28 = vmul.f32 %v5914_v4, %v1089_v63 }
 0x107   : > { %v1088_v27 = vsel %vm1079_vm10, %v1053_v54, %v10758_v38  ;;  %v5963_v30 = vpop.f32.mrb[10].mxu0  ;;  %v5966_v22 = vmul.f32 %v5933_v39, %v1167_v25  ;;  %v10760_v63 = vrot.slane %v5900_v16, 7  ;;  %v5974_v12 = vmul.f32 %v5944_v45, %v1245_v56 }
 0x108   : > { %v1197_v23 = vadd.f32 %v1181_v34, %v1103_v49  ;;  %v1101_v17 = vmul.f32 %v5869_v7, %v1088_v27  ;;  %v5971_v13 = vpop.f32.mrb[11].mxu0  ;;  %v1166_v54 = vsel %vm1157_vm11, %v1133_v58, %v10759_v26  ;;  %v1294_v34 = vmul.f32 %v5859_v48, %v5900_v16  ;;  %v6005_v58 = vld [vmem:[%s10753_s6 + $0x4] ss:$0 sm:$0xff] }
 0x109   : > { %v1179_v49 = vmul.f32 %v5874_v8, %v1166_v54  ;;  %v1244_v56 = vsel %vm1235_vm12, %v1211_v59, %v10760_v63  ;;  %v1070_v9 = vrot.slane %v1027_v3, 5  ;;  %v1150_v26 = vrot.slane %v1027_v3, 6  ;;  %10980 = vst [vmem:[#allocation14_spill] sm:$0xff] %v6005_v58 }
 0x10a   : > { %v1275_v25 = vadd.f32 %v1259_v32, %v1197_v23  ;;  %v1228_v52 = vrot.slane %v1027_v3, 7  ;;  %v1257_v27 = vmul.f32 %v5898_v20, %v1244_v56  ;;  %v1335_v32 = vrot.slane %v1027_v3, 1 }
 0x10b   : > { %v1195_v1 = vadd.f32 %v1179_v49, %v1101_v17  ;;  %v1081_v23 = vsel %vm1079_vm10, %v1062_v36, %v1070_v9  ;;  %v1159_v5 = vsel %vm1157_vm11, %v1142_v46, %v1150_v26  ;;  %v1413_v17 = vrot.slane %v1027_v3, 2  ;;  %v6015_v26 = vld [vmem:[%s10753_s6 + $0x5] ss:$0 sm:$0xff] }
 0x10c   : > { %v1104_v54 = vmul.f32 %v5869_v7, %v1081_v23  ;;  %v1237_v59 = vsel %vm1235_vm12, %v1220_v15, %v1228_v52  ;;  %v1312_v49 = vadd.f32 %v1296_v35, %v1275_v25  ;;  %v1182_v38 = vmul.f32 %v5874_v8, %v1159_v5  ;;  %10981 = vst [vmem:[#allocation15_spill] sm:$0xff] %v6015_v26 }
 0x10d   : > { %v1273_v56 = vadd.f32 %v1257_v27, %v1195_v1  ;;  %v1352_v9 = vsel %vm1350_vm14, %v1335_v32, %v1343_v60  ;;  %v1297_v15 = vmul.f32 %v5859_v48, %v1027_v3  ;;  %v1360_v36 = vsel %vm1350_vm14, %v1327_v31, %v1335_v32  ;;  %v6071_v40 = vpop.f32.mrb[12].mxu0 }
 0x10e   : > { %v1430_v1 = vsel %vm1428_vm15, %v1413_v17, %v1421_v0  ;;  %v1438_v35 = vsel %vm1428_vm15, %v1405_v11, %v1413_v17  ;;  %v1198_v46 = vadd.f32 %v1182_v38, %v1104_v54  ;;  %v1260_v60 = vmul.f32 %v5898_v20, %v1237_v59  ;;  %v6034_v0 = vld [vmem:[%s10753_s6 + $0xb] ss:$0 sm:$0xff]  ;;  %v6039_v38 = vld [vmem:[%s10753_s6 + $0x6] ss:$0 sm:$0xff]  ;;  %v6050_v17 = vld [vmem:[%s10753_s6 + $0xc] ss:$0 sm:$0xff] }
 0x10f   : > { %v1374_v52 = vmul.f32 %v6005_v58, %v1360_v36  ;;  %v1375_v27 = vmul.f32 %v6005_v58, %v1352_v9  ;;  %v1310_v25 = vadd.f32 %v1294_v34, %v1273_v56  ;;  %v1452_v63 = vmul.f32 %v6015_v26, %v1438_v35  ;;  %10982 = vst [vmem:[#allocation16_spill] sm:$0xff] %v6034_v0 }
 0x110   : > { %v1453_v31 = vmul.f32 %v6015_v26, %v1430_v1  ;;  %v1491_v32 = vrot.slane %v1027_v3, 3  ;;  %v1276_v41 = vadd.f32 %v1260_v60, %v1198_v46  ;;  %10983 = vst [vmem:[#allocation17_spill] sm:$0xff] %v6039_v38  ;;  %v6042_v54 = vmul.f32 %v5914_v4, %v1081_v23 }
 0x111   : > { %v1390_v11 = vadd.f32 %v1374_v52, %v1312_v49  ;;  %v6045_v34 = vmul.f32 %v5933_v39, %v1159_v5  ;;  %v10984_v56 = vrot.slane %v5750_v6, 3  ;;  %v10985_v46 = vrot.slane %v5885_v21, 3  ;;  %v6069_v52 = vld [vmem:[%s10753_s6 + $0xd] ss:$0 sm:$0xff]  ;;  %v1023_v6 = vld [vmem:[#allocation2 + $0x10] sm:$0xff] }
 0x112   : > { %v6061_v23 = vmul.f32 %v5944_v45, %v1237_v59  ;;  %v6064_v5 = vmul.f32 %v5879_v10, %v1027_v3  ;;  %10986 = vst [vmem:[#allocation18_spill] sm:$0xff] %v6069_v52  ;;  %v6074_v21 = vmul.f32 %v6034_v0, %v1360_v36  ;;  %v6085_v24 = vmul.f32 %v6050_v17, %v1430_v1 }
 0x113   : > { %v1508_v49 = vsel %vm1506_vm2, %v1491_v32, %v10984_v56  ;;  %v1516_v60 = vsel %vm1506_vm2, %v10985_v46, %v1491_v32  ;;  %v1313_v56 = vadd.f32 %v1297_v15, %v1276_v41  ;;  %v1468_v29 = vadd.f32 %v1452_v63, %v1390_v11 }
 0x114   : > { %v6077_v32 = vmul.f32 %v6034_v0, %v1352_v9  ;;  %v1530_v59 = vmul.f32 %v6039_v38, %v1516_v60  ;;  %v1531_v3 = vmul.f32 %v6039_v38, %v1508_v49  ;;  %v6082_v46 = vmul.f32 %v6050_v17, %v1438_v35  ;;  %10988 = vst [vmem:[#allocation20_spill] sm:$0xff] %v6085_v24 }
 0x115   : > { %v1391_v19 = vadd.f32 %v1375_v27, %v1313_v56  ;;  %v6088_v41 = vmul.f32 %v6069_v52, %v1516_v60  ;;  %v1069_v63 = vrot.slane %v1023_v6, 5  ;;  %v1149_v15 = vrot.slane %v1023_v6, 6 }
 0x116   : > { %10987 = vst [vmem:[#allocation19_spill] sm:$0xff] %v6077_v32  ;;  %v6091_v36 = vmul.f32 %v6069_v52, %v1508_v49  ;;  %v1227_v9 = vrot.slane %v1023_v6, 7  ;;  %v1334_v11 = vrot.slane %v1023_v6, 1  ;;  %v1412_v32 = vrot.slane %v1023_v6, 2 }
 0x117   : > { %v1469_v0 = vadd.f32 %v1453_v31, %v1391_v19  ;;  %v10990_v14 = vrot.slane %v5900_v16, 5  ;;  %v10991_v1 = vrot.slane %v5900_v16, 6  ;;  %v1490_v60 = vrot.slane %v1023_v6, 3 }
 0x118   : > { %10989 = vst [vmem:[#allocation21_spill] sm:$0xff] %v6091_v36  ;;  %v10992_v19 = vrot.slane %v5900_v16, 7  ;;  %v1295_v36 = vmul.f32 %v5859_v48, %v1023_v6  ;;  %v665_v42 = vadd.f32 %v5963_v30, %v5748_v47  ;;  %v6310_v30 = vld [vmem:[#allocation2 + $0x98] sm:$0xff] }
 0x119   : > { %v1080_v35 = vsel %vm1079_vm10, %v10990_v14, %v1069_v63  ;;  %v1158_v27 = vsel %vm1157_vm11, %v10991_v1, %v1149_v15  ;;  %v10993_v14 = vrot.slane %v5763_v55, 1  ;;  %v6113_v15 = vadd.f32 %v1530_v59, %v1468_v29  ;;  %11024 = vst [vmem:[#allocation36_spill] sm:$0xff] %v6310_v30 }
 0x11a   : > { %v1102_v49 = vmul.f32 %v5869_v7, %v1080_v35  ;;  %v1180_v56 = vmul.f32 %v5874_v8, %v1158_v27  ;;  %v1236_v31 = vsel %vm1235_vm12, %v10992_v19, %v1227_v9  ;;  %v10994_v35 = vrot.slane %v5900_v16, 1 }
 0x11b   : > { %v1351_v63 = vsel %vm1350_vm14, %v1334_v11, %v10993_v14  ;;  %v1258_v1 = vmul.f32 %v5898_v20, %v1236_v31  ;;  %v10995_v9 = vrot.slane %v5763_v55, 2  ;;  %v10996_v29 = vrot.slane %v5900_v16, 2  ;;  %v6130_v31 = vld [vmem:[#allocation2 + $0x68] sm:$0xff] }
 0x11c   : > { %v1359_v27 = vsel %vm1350_vm14, %v10994_v35, %v1334_v11  ;;  %v1196_v24 = vadd.f32 %v1180_v56, %v1102_v49  ;;  %v6132_v6 = vadd.f32 %v1531_v3, %v1469_v0  ;;  %v1373_v14 = vmul.f32 %v6005_v58, %v1351_v63 }
 0x11d   : > { %v1372_v52 = vmul.f32 %v6005_v58, %v1359_v27  ;;  %v1429_v19 = vsel %vm1428_vm15, %v1412_v32, %v10995_v9  ;;  %v1437_v59 = vsel %vm1428_vm15, %v10996_v29, %v1412_v32  ;;  %v10997_v11 = vrot.slane %v5763_v55, 3 }
 0x11e   : > { %v10998_v56 = vrot.slane %v5900_v16, 3  ;;  %v1274_v27 = vadd.f32 %v1258_v1, %v1196_v24  ;;  %v1450_v32 = vmul.f32 %v6015_v26, %v1437_v59  ;;  %v1451_v29 = vmul.f32 %v6015_v26, %v1429_v19 }
 0x11f   : > { %v1507_v49 = vsel %vm1506_vm2, %v1490_v60, %v10997_v11  ;;  %v1388_v9 = vadd.f32 %v1372_v52, %v1310_v25  ;;  %v10779_v0 = vrot.slane %v6130_v31, 5  ;;  %v10778_v3 = vrot.slane %v6130_v31, 6 }
 0x120   : > { %v1515_v35 = vsel %vm1506_vm2, %v10998_v56, %v1490_v60  ;;  %v10777_v16 = vrot.slane %v6130_v31, 7  ;;  %v1311_v24 = vadd.f32 %v1295_v36, %v1274_v27  ;;  %v1529_v52 = vmul.f32 %v6039_v38, %v1507_v49 }
 0x121   : > { %v1528_v55 = vmul.f32 %v6039_v38, %v1515_v35  ;;  %v1466_v25 = vadd.f32 %v1450_v32, %v1388_v9  ;;  %v1300_v60 = vmul.f32 %v5859_v48, %v6130_v31  ;;  %v10999_v63 = vrot.slane %v5779_v2, 5  ;;  %v6180_v32 = vld [vmem:[%s10753_s6 + $0xe] ss:$0 sm:$0xff] }
 0x122   : > { %v11000_v19 = vrot.slane %v5779_v2, 6  ;;  %v11001_v59 = vrot.slane %v5779_v2, 7  ;;  %v1389_v56 = vadd.f32 %v1373_v14, %v1311_v24  ;;  %v6185_v2 = vld [vmem:[%s10753_s6 + $0xf] ss:$0 sm:$0xff]  ;;  %v6196_v24 = vld [vmem:[%s10753_s6 + $0x10] ss:$0 sm:$0xff] }
 0x123   : > { %v1091_v1 = vsel %vm1079_vm10, %v10999_v63, %v10779_v0  ;;  %v1544_v35 = vadd.f32 %v1528_v55, %v1466_v25  ;;  %v6201_v25 = vld [vmem:[%s10753_s6 + $0x11] ss:$0 sm:$0xff]  ;;  %v6210_v14 = vld [vmem:[%s10753_s6 + $0x15] ss:$0 sm:$0xff] }
 0x124   : > { %v1169_v36 = vsel %vm1157_vm11, %v11000_v19, %v10778_v3  ;;  %v1247_v11 = vsel %vm1235_vm12, %v11001_v59, %v10777_v16  ;;  %v1107_v27 = vmul.f32 %v5869_v7, %v1091_v1  ;;  %v6191_v55 = vmul.f32 %v5914_v4, %v1091_v1  ;;  %11004 = vst [vmem:[#allocation24_spill] sm:$0xff] %v6210_v14  ;;  %v6215_v3 = vld [vmem:[%s10753_s6 + $0x16] ss:$0 sm:$0xff] }
 0x125   : > { %v1185_v9 = vmul.f32 %v5874_v8, %v1169_v36  ;;  %v1263_v63 = vmul.f32 %v5898_v20, %v1247_v11  ;;  %v1467_v59 = vadd.f32 %v1451_v29, %v1389_v56  ;;  %v1654_v49 = vadd.f32 %v5954_v28, %v1544_v35  ;;  %11005 = vst [vmem:[#allocation25_spill] sm:$0xff] %v6215_v3 }
 0x126   : > { %11002 = vst [vmem:[#allocation22_spill] sm:$0xff] %v6191_v55  ;;  %v6205_v19 = vmul.f32 %v5933_v39, %v1169_v36  ;;  %v6226_v29 = vmul.f32 %v5944_v45, %v1247_v11  ;;  %v6230_v56 = vmul.f32 %v5879_v10, %v6130_v31  ;;  %v6233_v35 = vmul.f32 %v6180_v32, %v1091_v1 }
 0x127   : > { %v1201_v16 = vadd.f32 %v1185_v9, %v1107_v27  ;;  %v6236_v27 = vmul.f32 %v6185_v2, %v1169_v36  ;;  %v1545_v9 = vadd.f32 %v1529_v52, %v1467_v59  ;;  %v1731_v0 = vadd.f32 %v5966_v22, %v1654_v49  ;;  %v6262_v22 = vld [vmem:[%s10753_s6 + $0x18] ss:$0 sm:$0xff] }
 0x128   : > { %11003 = vst [vmem:[#allocation23_spill] sm:$0xff] %v6205_v19  ;;  %11008 = vst [vmem:[#allocation26_spill] sm:$0xff] %v6226_v29  ;;  %v6245_v29 = vmul.f32 %v6196_v24, %v1247_v11  ;;  %v6251_v19 = vpop.f32.mrb[13].mxu0  ;;  %v6257_v55 = vmul.f32 %v6215_v3, %v1169_v36  ;;  %v11016_v52 = vmax.f32 %v5847_v44, 0.0  ;;  %v11018_v36 = vmax.f32 %v5862_v62, 0.0 }
 0x129   : > { %11009 = vst [vmem:[#allocation27_spill] sm:$0xff] %v6230_v56  ;;  %11010 = vst [vmem:[#allocation28_spill] sm:$0xff] %v6233_v35  ;;  %v6249_v56 = vmul.f32 %v6201_v25, %v6130_v31  ;;  %v1279_v35 = vadd.f32 %v1263_v63, %v1201_v16  ;;  %v1655_v59 = vadd.f32 %v6042_v54, %v1545_v9  ;;  %v689_v44 = vmax.f32 %v5905_v61, 0.0 }
 0x12a   : > { %11011 = vst [vmem:[#allocation29_spill] sm:$0xff] %v6236_v27  ;;  %11014 = vst [vmem:[#allocation32_spill] sm:$0xff] %v6251_v19  ;;  %v6254_v27 = vmul.f32 %v6210_v14, %v1091_v1  ;;  %v752_v49 = vsel %vm6221_vm9, %v11016_v52, 0.0  ;;  %v1808_v16 = vadd.f32 %v5974_v12, %v1731_v0  ;;  %v6271_v1 = vmul.f32 %v6241_v18, %v1247_v11 }
 0x12b   : > { %11013 = vst [vmem:[#allocation31_spill] sm:$0xff] %v6249_v56  ;;  %11015 = vst [vmem:[#allocation33_spill] sm:$0xff] %v6262_v22  ;;  %v755_v63 = vsel %vm5842_vm13, %v11018_v36, 0.0  ;;  %v662_v52 = vadd.f32 %v5936_v37, %v5748_v47  ;;  %v654_v62 = vadd.f32 %v5748_v47, %v5950_v33  ;;  %v1732_v54 = vadd.f32 %v6045_v34, %v1655_v59 }
 0x12c   : > { %11017 = vst [vmem:[#allocation34_spill] sm:$0xff] %v6271_v1  ;;  %768 = vst.msk [vmem:[#allocation2 + $0x48] sm:$0xff] %vm451_vm1, %v752_v49  ;;  %v6297_v61 = vmul.f32 %v6262_v22, %v6130_v31  ;;  %v1845_v37 = vadd.f32 %v5948_v53, %v1808_v16  ;;  %v657_v33 = vadd.f32 %v5748_v47, %v5971_v13  ;;  %v753_v34 = vsel %vm6221_vm9, %v689_v44, 0.0  ;;  %v6319_v16 = vld [vmem:[#allocation2 + $0xe0] sm:$0xff]  ;;  %v6336_v44 = vpop.f32.mrb[14].mxu0 }
 0x12d   : > { %771 = vst.msk [vmem:[#allocation2 + $0x70] sm:$0xff] %vm451_vm1, %v755_v63  ;;  %vm6304_vm13 = vmand %vm712_vm7, %vm720_vm8  ;;  %v694_v0 = vmax.f32 %v662_v52, 0.0  ;;  %v692_v11 = vmax.f32 %v654_v62, 0.0  ;;  %v695_v9 = vmax.f32 %v665_v42, 0.0  ;;  %v1809_v53 = vadd.f32 %v6061_v23, %v1732_v54 }
 0x12e   : > { %11021 = vst [vmem:[#allocation35_spill] sm:$0xff] %v6297_v61  ;;  %v6315_v49 = vadd.f32 %v1300_v60, %v1279_v35  ;;  %v1922_v57 = vadd.f32 %v6074_v21, %v1845_v37  ;;  %769 = vst.msk [vmem:[#allocation2 + $0x50] sm:$0xff] %vm451_vm1, %v753_v34  ;;  %v693_v59 = vmax.f32 %v657_v33, 0.0  ;;  %v6349_v62 = vadd.s32 7, %v5738_v43 }
 0x12f   : > { %11025 = vst [vmem:[#allocation37_spill] sm:$0xff] %v6319_v16  ;;  %v758_v13 = vsel %vm6286_vm3, %v694_v0, 0.0  ;;  %v756_v28 = vsel %vm6304_vm13, %v692_v11, 0.0  ;;  %v759_v36 = vsel %vm6286_vm3, %v695_v9, 0.0  ;;  %11026 = vst [vmem:[#allocation38_spill] sm:$0xff] %v6336_v44  ;;  %v6341_v12 = vadd.f32 %v6064_v5, %v1809_v53  ;;  %v11029_v0 = vld [vmem:[#allocation5_spill] sm:$0xff] }
 0x130   : > { %v1999_v60 = vadd.f32 %v6082_v46, %v1922_v57  ;;  %774 = vst.msk [vmem:[#allocation2 + $0xa8] sm:$0xff] %vm451_vm1, %v758_v13  ;;  %772 = vst.msk [vmem:[#allocation2 + $0x88] sm:$0xff] %vm451_vm1, %v756_v28  ;;  %v757_v21 = vsel %vm6304_vm13, %v693_v59, 0.0  ;;  %v6346_v46 = vadd.f32 %v6071_v40, %v5748_v47  ;;  %v11030_v11 = vrot.slane %v11029_v0, 5 }
 0x131   : > { %775 = vst.msk [vmem:[#allocation2 + $0xb0] sm:$0xff] %vm451_vm1, %v759_v36  ;;  %773 = vst.msk [vmem:[#allocation2 + $0x90] sm:$0xff] %vm451_vm1, %v757_v21  ;;  %v11031_v53 = vrot.slane %v11029_v0, 6  ;;  %v11032_v59 = vrot.slane %v11029_v0, 7 }
 0x132   : > { %11027 = vst [vmem:[#allocation39_spill] sm:$0xff] %v6346_v46  ;;  %11028 = vst [vmem:[#allocation40_spill] sm:$0xff] %v6349_v62  ;;  %v2076_v28 = vadd.f32 %v6088_v41, %v1999_v60  ;;  %v11050_v62 = vld [vmem:[#allocation18_spill] sm:$0xff] }
 0x133   : > { %v6338_v52 = vld [vmem:[#allocation2 + $0x48] sm:$0xff] }
 0x134   : > { %v10782_v54 = vrot.slane %v6338_v52, 5  ;;  %v10781_v37 = vrot.slane %v6338_v52, 6  ;;  %v10780_v50 = vrot.slane %v6338_v52, 7  ;;  %v1298_v33 = vmul.f32 %v5859_v48, %v6338_v52  ;;  %v6384_v5 = vld [vmem:[#allocation2 + $0x70] sm:$0xff] }
 0x135   : > { %v1831_v0 = vmul.f32 %v5879_v10, %v6338_v52  ;;  %v1152_v47 = vrot.slane %v6384_v5, 6  ;;  %v1230_v34 = vrot.slane %v6384_v5, 7  ;;  %v1415_v61 = vrot.slane %v6384_v5, 2 }
 0x136   : > { %v1090_v9 = vsel %vm1079_vm10, %v11030_v11, %v10782_v54  ;;  %v1168_v57 = vsel %vm1157_vm11, %v11031_v53, %v10781_v37  ;;  %v1246_v13 = vsel %vm1235_vm12, %v11032_v59, %v10780_v50  ;;  %v1072_v11 = vrot.slane %v6384_v5, 5 }
 0x137   : > { %v1105_v36 = vmul.f32 %v5869_v7, %v1090_v9  ;;  %v1183_v21 = vmul.f32 %v5874_v8, %v1168_v57  ;;  %v1640_v40 = vmul.f32 %v5914_v4, %v1090_v9  ;;  %v1261_v53 = vmul.f32 %v5898_v20, %v1246_v13 }
 0x138   : > { %v1717_v42 = vmul.f32 %v5933_v39, %v1168_v57  ;;  %v2170_v59 = vmul.f32 %v6180_v32, %v1090_v9  ;;  %v1794_v63 = vmul.f32 %v5944_v45, %v1246_v13  ;;  %v2247_v35 = vmul.f32 %v6185_v2, %v1168_v57 }
 0x139   : > { %v1199_v41 = vadd.f32 %v1183_v21, %v1105_v36  ;;  %v1656_v60 = vadd.f32 %v1640_v40, %v6113_v15  ;;  %v2324_v54 = vmul.f32 %v6196_v24, %v1246_v13  ;;  %v1337_v9 = vrot.slane %v6384_v5, 1 }
 0x13a   : > { %v2186_v23 = vadd.f32 %v2170_v59, %v2076_v28  ;;  %v11033_v15 = vrot.slane %v6130_v31, 5  ;;  %v11034_v57 = vrot.slane %v6130_v31, 6  ;;  %v11035_v21 = vrot.slane %v6130_v31, 7  ;;  %v11036_v59 = vld [vmem:[#allocation6_spill] sm:$0xff] }
 0x13b   : > { %v1277_v50 = vadd.f32 %v1261_v53, %v1199_v41  ;;  %v1733_v37 = vadd.f32 %v1717_v42, %v1656_v60  ;;  %v11037_v41 = vrot.slane %v11036_v59, 1  ;;  %v6533_v30 = vmul.f32 %v6201_v25, %v6384_v5 }
 0x13c   : > { %v2263_v36 = vadd.f32 %v2247_v35, %v2186_v23  ;;  %v6403_v40 = vsel %vm1079_vm10, %v11033_v15, %v1072_v11  ;;  %v6409_v28 = vsel %vm1157_vm11, %v11034_v57, %v1152_v47  ;;  %v6415_v42 = vsel %vm1235_vm12, %v11035_v21, %v1230_v34 }
 0x13d   : > { %v1810_v13 = vadd.f32 %v1794_v63, %v1733_v37  ;;  %v2361_v23 = vmul.f32 %v6201_v25, %v6338_v52  ;;  %v1108_v35 = vmul.f32 %v5869_v7, %v6403_v40  ;;  %v1186_v11 = vmul.f32 %v5874_v8, %v6409_v28  ;;  %11054 = vst [vmem:[#allocation47_spill] sm:$0xff] %v6533_v30 }
 0x13e   : > { %v2340_v53 = vadd.f32 %v2324_v54, %v2263_v36  ;;  %v1301_v47 = vmul.f32 %v5859_v48, %v6384_v5  ;;  %v1354_v34 = vsel %vm1350_vm14, %v1337_v9, %v11037_v41  ;;  %v11038_v63 = vrot.slane %v6130_v31, 1 }
 0x13f   : > { %v6433_v60 = vadd.f32 %v1298_v33, %v1277_v50  ;;  %v1202_v15 = vadd.f32 %v1186_v11, %v1108_v35  ;;  %v1264_v57 = vmul.f32 %v5898_v20, %v6415_v42  ;;  %v6438_v36 = vadd.f32 %v1831_v0, %v1810_v13 }
 0x140   : > { %v1362_v37 = vsel %vm1350_vm14, %v11038_v63, %v1337_v9  ;;  %v1379_v21 = vmul.f32 %v6005_v58, %v1354_v34  ;;  %v1493_v41 = vrot.slane %v6384_v5, 3  ;;  %v6443_v16 = vadd.f32 %v2361_v23, %v2340_v53 }
 0x141   : > { %v1378_v54 = vmul.f32 %v6005_v58, %v1362_v37  ;;  %v1280_v44 = vadd.f32 %v1264_v57, %v1202_v15  ;;  %v6448_v33 = vmul.f32 %v5914_v4, %v6403_v40  ;;  %v11039_v9 = vrot.slane %v11036_v59, 2 }
 0x142   : > { %v11040_v13 = vrot.slane %v6130_v31, 2  ;;  %v11041_v23 = vrot.slane %v11036_v59, 3  ;;  %v6469_v57 = vmul.f32 %v5933_v39, %v6409_v28  ;;  %v6475_v59 = vpop.f32.mrb[15].mxu0 }
 0x143   : > { %v1394_v50 = vadd.f32 %v1378_v54, %v6315_v49  ;;  %v1432_v0 = vsel %vm1428_vm15, %v1415_v61, %v11039_v9  ;;  %v11042_v49 = vrot.slane %v6130_v31, 3  ;;  %v1317_v63 = vadd.f32 %v1301_v47, %v1280_v44  ;;  %11043 = vst [vmem:[#allocation5_spill] sm:$0xff] %v6475_v59  ;;  %v6493_v59 = vld [vmem:[%s10753_s6 + $0x12] ss:$0 sm:$0xff] }
 0x144   : > { %v1440_v35 = vsel %vm1428_vm15, %v11040_v13, %v1415_v61  ;;  %v1510_v11 = vsel %vm1506_vm2, %v1493_v41, %v11041_v23  ;;  %v6473_v61 = vmul.f32 %v5944_v45, %v6415_v42  ;;  %v1457_v54 = vmul.f32 %v6015_v26, %v1432_v0  ;;  %v11045_v13 = vld [vmem:[#allocation16_spill] sm:$0xff] }
 0x145   : > { %v1518_v53 = vsel %vm1506_vm2, %v11042_v49, %v1493_v41  ;;  %v1456_v15 = vmul.f32 %v6015_v26, %v1440_v35  ;;  %v1535_v9 = vmul.f32 %v6039_v38, %v1510_v11  ;;  %v6482_v44 = vmul.f32 %v5879_v10, %v6384_v5 }
 0x146   : > { %v1534_v31 = vmul.f32 %v6039_v38, %v1518_v53  ;;  %v1395_v47 = vadd.f32 %v1379_v21, %v1317_v63  ;;  %v6485_v23 = vmul.f32 %v11045_v13, %v1362_v37  ;;  %v6488_v49 = vmul.f32 %v11045_v13, %v1354_v34  ;;  %v6510_v63 = vld [vmem:[%s10753_s6 + $0x13] ss:$0 sm:$0xff] }
 0x147   : > { %11044 = vst [vmem:[#allocation6_spill] sm:$0xff] %v6482_v44  ;;  %v1472_v41 = vadd.f32 %v1456_v15, %v1394_v50  ;;  %v6496_v43 = vmul.f32 %v6050_v17, %v1440_v35  ;;  %v6499_v19 = vmul.f32 %v6050_v17, %v1432_v0  ;;  %v6502_v21 = vmul.f32 %v11050_v62, %v1518_v53  ;;  %v6515_v15 = vld [vmem:[%s10753_s6 + $0x14] ss:$0 sm:$0xff] }
 0x148   : > { %11046 = vst [vmem:[#allocation41_spill] sm:$0xff] %v6485_v23  ;;  %11047 = vst [vmem:[#allocation42_spill] sm:$0xff] %v6488_v49  ;;  %v6505_v50 = vmul.f32 %v11050_v62, %v1510_v11  ;;  %v1473_v46 = vadd.f32 %v1457_v54, %v1395_v47  ;;  %v6529_v44 = vmul.f32 %v6196_v24, %v6415_v42  ;;  %v6544_v47 = vld [vmem:[%s10753_s6 + $0x19] ss:$0 sm:$0xff] }
 0x149   : > { %11048 = vst [vmem:[#allocation43_spill] sm:$0xff] %v6496_v43  ;;  %11049 = vst [vmem:[#allocation44_spill] sm:$0xff] %v6499_v19  ;;  %v6517_v49 = vadd.f32 %v1534_v31, %v1472_v41  ;;  %v6521_v19 = vmul.f32 %v6180_v32, %v6403_v40  ;;  %v6536_v54 = vmul.f32 %v6493_v59, %v1362_v37  ;;  %v6549_v41 = vld [vmem:[%s10753_s6 + $0x1a] ss:$0 sm:$0xff]  ;;  %v6562_v43 = vld [vmem:[#allocation2 + $0x50] sm:$0xff] }
 0x14a   : > { %11051 = vst [vmem:[#allocation18_spill] sm:$0xff] %v6502_v21  ;;  %11052 = vst [vmem:[#allocation45_spill] sm:$0xff] %v6505_v50  ;;  %v6525_v50 = vmul.f32 %v6185_v2, %v6409_v28  ;;  %v6539_v31 = vmul.f32 %v6493_v59, %v1354_v34  ;;  %v6551_v21 = vadd.f32 %v1535_v9, %v1473_v46 }
 0x14b   : > { %11053 = vst [vmem:[#allocation46_spill] sm:$0xff] %v6517_v49  ;;  %11055 = vst [vmem:[#allocation48_spill] sm:$0xff] %v6536_v54  ;;  %v6554_v30 = vmul.f32 %v6510_v63, %v1440_v35  ;;  %v6557_v54 = vmul.f32 %v6510_v63, %v1432_v0  ;;  %v6565_v56 = vmul.f32 %v6515_v15, %v1510_v11  ;;  %v1229_v49 = vrot.slane %v6562_v43, 7 }
 0x14c   : > { %11056 = vst [vmem:[#allocation49_spill] sm:$0xff] %v6539_v31  ;;  %11057 = vst [vmem:[#allocation50_spill] sm:$0xff] %v6544_v47  ;;  %v6560_v31 = vmul.f32 %v6515_v15, %v1518_v53  ;;  %v6569_v23 = vmul.f32 %v6210_v14, %v6403_v40  ;;  %v6573_v46 = vmul.f32 %v6215_v3, %v6409_v28  ;;  %v11084_v3 = vrot.slane %v6338_v52, 3 }
 0x14d   : > { %11058 = vst [vmem:[#allocation51_spill] sm:$0xff] %v6549_v41  ;;  %11059 = vst [vmem:[#allocation52_spill] sm:$0xff] %v6551_v21  ;;  %v6577_v9 = vmul.f32 %v6241_v18, %v6415_v42  ;;  %v6589_v40 = vmul.f32 %v6544_v47, %v1362_v37  ;;  %v6592_v21 = vmul.f32 %v6544_v47, %v1354_v34  ;;  %v1336_v34 = vrot.slane %v6562_v43, 1 }
 0x14e   : > { %11060 = vst [vmem:[#allocation53_spill] sm:$0xff] %v6554_v30  ;;  %11061 = vst [vmem:[#allocation54_spill] sm:$0xff] %v6557_v54  ;;  %v6582_v54 = vld [vmem:[%s10753_s6 + $0x1b] ss:$0 sm:$0xff]  ;;  %v6595_v28 = vmul.f32 %v6549_v41, %v1440_v35  ;;  %v6598_v42 = vmul.f32 %v6549_v41, %v1432_v0  ;;  %v1151_v30 = vrot.slane %v6562_v43, 6  ;;  %v1414_v35 = vrot.slane %v6562_v43, 2 }
 0x14f   : > { %11062 = vst [vmem:[#allocation55_spill] sm:$0xff] %v6560_v31  ;;  %11063 = vst [vmem:[#allocation56_spill] sm:$0xff] %v6565_v56  ;;  %v6586_v56 = vmul.f32 %v6262_v22, %v6384_v5  ;;  %v1071_v31 = vrot.slane %v6562_v43, 5  ;;  %v6604_v5 = vmul.f32 %v6582_v54, %v1518_v53  ;;  %v6607_v37 = vmul.f32 %v6582_v54, %v1510_v11 }
 0x150   : > { %11064 = vst [vmem:[#allocation57_spill] sm:$0xff] %v6569_v23  ;;  %11065 = vst [vmem:[#allocation58_spill] sm:$0xff] %v6573_v46  ;;  %v11077_v53 = vrot.slane %v6338_v52, 7  ;;  %v11082_v41 = vrot.slane %v6338_v52, 2 }
 0x151   : > { %11066 = vst [vmem:[#allocation59_spill] sm:$0xff] %v6577_v9  ;;  %11067 = vst [vmem:[#allocation60_spill] sm:$0xff] %v6582_v54  ;;  %v1832_v9 = vmul.f32 %v5879_v10, %v6562_v43 }
 0x152   : > { %11068 = vst [vmem:[#allocation61_spill] sm:$0xff] %v6586_v56  ;;  %11069 = vst [vmem:[#allocation62_spill] sm:$0xff] %v6589_v40  ;;  %v1238_v11 = vsel %vm1235_vm12, %v11077_v53, %v1229_v49  ;;  %v1299_v56 = vmul.f32 %v5859_v48, %v6562_v43  ;;  %v1439_v47 = vsel %vm1428_vm15, %v11082_v41, %v1414_v35 }
 0x153   : > { %11070 = vst [vmem:[#allocation63_spill] sm:$0xff] %v6592_v21  ;;  %11071 = vst [vmem:[#allocation64_spill] sm:$0xff] %v6595_v28  ;;  %v11075_v28 = vrot.slane %v6338_v52, 5 }
 0x154   : > { %11072 = vst [vmem:[#allocation65_spill] sm:$0xff] %v6598_v42  ;;  %11073 = vst [vmem:[#allocation66_spill] sm:$0xff] %v6604_v5  ;;  %v11076_v42 = vrot.slane %v6338_v52, 6 }
 0x155   : > { %11074 = vst [vmem:[#allocation67_spill] sm:$0xff] %v6607_v37  ;;  %v1082_v0 = vsel %vm1079_vm10, %v11075_v28, %v1071_v31  ;;  %v1492_v37 = vrot.slane %v6562_v43, 3  ;;  %v11078_v31 = vld [vmem:[#allocation7_spill] sm:$0xff] }
 0x156   : > { %v1160_v21 = vsel %vm1157_vm11, %v11076_v42, %v1151_v30  ;;  %v1106_v5 = vmul.f32 %v5869_v7, %v1082_v0  ;;  %v11079_v28 = vrot.slane %v11078_v31, 1  ;;  %v11080_v30 = vrot.slane %v6338_v52, 1 }
 0x157   : > { %v1184_v40 = vmul.f32 %v5874_v8, %v1160_v21  ;;  %v11081_v49 = vrot.slane %v11078_v31, 2  ;;  %v11083_v18 = vrot.slane %v11078_v31, 3  ;;  %v1517_v41 = vsel %vm1506_vm2, %v11084_v3, %v1492_v37 }
 0x158   : > { %v1353_v54 = vsel %vm1350_vm14, %v1336_v34, %v11079_v28  ;;  %v1361_v42 = vsel %vm1350_vm14, %v11080_v30, %v1336_v34  ;;  %v1262_v28 = vmul.f32 %v5898_v20, %v1238_v11  ;;  %v1454_v30 = vmul.f32 %v6015_v26, %v1439_v47 }
 0x159   : > { %v1431_v53 = vsel %vm1428_vm15, %v1414_v35, %v11081_v49  ;;  %v1200_v46 = vadd.f32 %v1184_v40, %v1106_v5  ;;  %v1376_v22 = vmul.f32 %v6005_v58, %v1361_v42  ;;  %v1377_v34 = vmul.f32 %v6005_v58, %v1353_v54 }
 0x15a   : > { %v1509_v49 = vsel %vm1506_vm2, %v1492_v37, %v11083_v18  ;;  %v1641_v40 = vmul.f32 %v5914_v4, %v1082_v0  ;;  %v1455_v14 = vmul.f32 %v6015_v26, %v1431_v53  ;;  %v1718_v58 = vmul.f32 %v5933_v39, %v1160_v21 }
 0x15b   : > { %v1278_v5 = vadd.f32 %v1262_v28, %v1200_v46  ;;  %v1392_v35 = vadd.f32 %v1376_v22, %v6433_v60  ;;  %v1532_v23 = vmul.f32 %v6039_v38, %v1517_v41  ;;  %v1533_v31 = vmul.f32 %v6039_v38, %v1509_v49  ;;  %v11085_v46 = vld [vmem:[#allocation19_spill] sm:$0xff] }
 0x15c   : > { %v1657_v18 = vadd.f32 %v1641_v40, %v6132_v6  ;;  %v1908_v52 = vmul.f32 %v11045_v13, %v1361_v42  ;;  %v1795_v3 = vmul.f32 %v5944_v45, %v1238_v11  ;;  %v1923_v37 = vadd.f32 %v11085_v46, %v6341_v12  ;;  %v11086_v40 = vld [vmem:[#allocation20_spill] sm:$0xff]  ;;  %v11088_v46 = vld [vmem:[#allocation21_spill] sm:$0xff] }
 0x15d   : > { %v1315_v10 = vadd.f32 %v1299_v56, %v1278_v5  ;;  %v1470_v1 = vadd.f32 %v1454_v30, %v1392_v35  ;;  %v1909_v60 = vmul.f32 %v11045_v13, %v1353_v54  ;;  %v1985_v26 = vmul.f32 %v6050_v17, %v1439_v47 }
 0x15e   : > { %v1734_v22 = vadd.f32 %v1718_v58, %v1657_v18  ;;  %v1924_v28 = vadd.f32 %v1908_v52, %v6438_v36  ;;  %v1986_v6 = vmul.f32 %v6050_v17, %v1431_v53  ;;  %v2000_v4 = vadd.f32 %v11086_v40, %v1923_v37  ;;  %v11087_v58 = vld [vmem:[#allocation22_spill] sm:$0xff] }
 0x15f   : > { %v1393_v39 = vadd.f32 %v1377_v34, %v1315_v10  ;;  %v1548_v38 = vadd.f32 %v1532_v23, %v1470_v1  ;;  %v2062_v5 = vmul.f32 %v11050_v62, %v1517_v41  ;;  %v2063_v35 = vmul.f32 %v11050_v62, %v1509_v49 }
 0x160   : > { %v1811_v56 = vadd.f32 %v1795_v3, %v1734_v22  ;;  %v2001_v30 = vadd.f32 %v1985_v26, %v1924_v28  ;;  %v2077_v13 = vadd.f32 %v11088_v46, %v2000_v4  ;;  %v2171_v36 = vmul.f32 %v6180_v32, %v1082_v0  ;;  %v11089_v3 = vld [vmem:[#allocation23_spill] sm:$0xff]  ;;  %v6686_v0 = vld [vmem:[#allocation2 + $0xa8] sm:$0xff] }
 0x161   : > { %v1471_v12 = vadd.f32 %v1455_v14, %v1393_v39  ;;  %v1658_v18 = vadd.f32 %v11087_v58, %v1548_v38  ;;  %v2248_v1 = vmul.f32 %v6185_v2, %v1160_v21  ;;  %v2438_v23 = vmul.f32 %v6493_v59, %v1361_v42  ;;  %v11090_v39 = vld [vmem:[#allocation28_spill] sm:$0xff] }
 0x162   : > { %v1848_v52 = vadd.f32 %v1832_v9, %v1811_v56  ;;  %v2078_v10 = vadd.f32 %v2062_v5, %v2001_v30  ;;  %v2187_v37 = vadd.f32 %v2171_v36, %v2077_v13  ;;  %v2325_v22 = vmul.f32 %v6196_v24, %v1238_v11  ;;  %v11091_v13 = vld [vmem:[#allocation26_spill] sm:$0xff] }
 0x163   : > { %v1549_v34 = vadd.f32 %v1533_v31, %v1471_v12  ;;  %v1735_v26 = vadd.f32 %v11089_v3, %v1658_v18  ;;  %v2454_v38 = vadd.f32 %v2438_v23, %v6443_v16  ;;  %v2515_v4 = vmul.f32 %v6510_v63, %v1439_v47  ;;  %v11092_v16 = vld [vmem:[#allocation29_spill] sm:$0xff] }
 0x164   : > { %v1925_v28 = vadd.f32 %v1909_v60, %v1848_v52  ;;  %v2188_v14 = vadd.f32 %v11090_v39, %v2078_v10  ;;  %v2264_v21 = vadd.f32 %v2248_v1, %v2187_v37  ;;  %v2362_v42 = vmul.f32 %v6201_v25, %v6562_v43 }
 0x165   : > { %v1659_v9 = vadd.f32 %v6448_v33, %v1549_v34  ;;  %v2439_v31 = vmul.f32 %v6493_v59, %v1353_v54  ;;  %v6693_v40 = vadd.f32 %v11091_v13, %v1735_v26  ;;  %v2531_v60 = vadd.f32 %v2515_v4, %v2454_v38  ;;  %v11098_v4 = vld [vmem:[#allocation34_spill] sm:$0xff]  ;;  %v11101_v13 = vld [vmem:[#allocation13_spill] sm:$0xff] }
 0x166   : > { %v2002_v11 = vadd.f32 %v1986_v6, %v1925_v28  ;;  %v2592_v56 = vmul.f32 %v6515_v15, %v1517_v41  ;;  %v2265_v30 = vadd.f32 %v11092_v16, %v2188_v14  ;;  %v2341_v47 = vadd.f32 %v2325_v22, %v2264_v21  ;;  %v11093_v6 = vld [vmem:[#allocation8_spill] sm:$0xff] }
 0x167   : > { %v2516_v5 = vmul.f32 %v6510_v63, %v1431_v53  ;;  %v10818_v33 = vrot.slane %v6686_v0, 5  ;;  %v1736_v12 = vadd.f32 %v6469_v57, %v1659_v9  ;;  %v10817_v54 = vrot.slane %v6686_v0, 6 }
 0x168   : > { %v2079_v58 = vadd.f32 %v2063_v35, %v2002_v11  ;;  %v2608_v43 = vadd.f32 %v2592_v56, %v2531_v60  ;;  %v2378_v18 = vadd.f32 %v2362_v42, %v2341_v47  ;;  %v2593_v46 = vmul.f32 %v6515_v15, %v1509_v49  ;;  %v11100_v42 = vld [vmem:[#allocation12_spill] sm:$0xff]  ;;  %v6767_v47 = vld [vmem:[%s10753_s6 + $0x1c] ss:$0 sm:$0xff] }
 0x169   : > { %v11094_v41 = vrot.slane %v11093_v6, 5  ;;  %v10816_v53 = vrot.slane %v6686_v0, 7  ;;  %v11095_v10 = vrot.slane %v11093_v6, 6  ;;  %v6719_v1 = vadd.f32 %v6245_v29, %v2265_v30 }
 0x16a   : > { %v2189_v52 = vadd.f32 %v6521_v19, %v2079_v58  ;;  %v2718_v57 = vadd.f32 %v6254_v27, %v2608_v43  ;;  %v2455_v23 = vadd.f32 %v2439_v31, %v2378_v18  ;;  %v11096_v19 = vrot.slane %v11093_v6, 7  ;;  %v11107_v58 = vld [vmem:[#allocation57_spill] sm:$0xff] }
 0x16b   : > { %v1093_v36 = vsel %vm1079_vm10, %v11094_v41, %v10818_v33  ;;  %v1171_v49 = vsel %vm1157_vm11, %v11095_v10, %v10817_v54  ;;  %v6729_v3 = vadd.f32 %v6473_v61, %v1736_v12  ;;  %v1304_v29 = vmul.f32 %v5859_v48, %v6686_v0  ;;  %v6774_v12 = vld [vmem:[#allocation2 + $0x88] sm:$0xff]  ;;  %v6789_v41 = vld [vmem:[%s10753_s6 + $0x1e] ss:$0 sm:$0xff]  ;;  %v11112_v10 = vld [vmem:[#allocation25_spill] sm:$0xff] }
 0x16c   : > { %v1111_v35 = vmul.f32 %v5869_v7, %v1093_v36  ;;  %v1189_v34 = vmul.f32 %v5874_v8, %v1171_v49  ;;  %v1249_v27 = vsel %vm1235_vm12, %v11096_v19, %v10816_v53  ;;  %v2266_v26 = vadd.f32 %v6525_v50, %v2189_v52  ;;  %v6794_v52 = vld [vmem:[%s10753_s6 + $0x1f] ss:$0 sm:$0xff] }
 0x16d   : > { %v2795_v37 = vadd.f32 %v6257_v55, %v2718_v57  ;;  %v2532_v22 = vadd.f32 %v2516_v5, %v2455_v23  ;;  %v1267_v39 = vmul.f32 %v5898_v20, %v1249_v27  ;;  %v6746_v31 = vmul.f32 %v11100_v42, %v1093_v36  ;;  %v6772_v5 = vld [vmem:[%s10753_s6 + $0x1d] ss:$0 sm:$0xff]  ;;  %v11110_v57 = vld [vmem:[#allocation24_spill] sm:$0xff] }
 0x16e   : > { %v1205_v28 = vadd.f32 %v1189_v34, %v1111_v35  ;;  %v6738_v38 = vadd.f32 %v6529_v44, %v2266_v26  ;;  %v6749_v11 = vmul.f32 %v11101_v13, %v1171_v49  ;;  %v6752_v60 = vmul.f32 %v5944_v45, %v1249_v27  ;;  %v11103_v44 = vld [vmem:[#allocation11_spill] sm:$0xff]  ;;  %v11114_v34 = vld [vmem:[#allocation30_spill] sm:$0xff]  ;;  %v11116_v26 = vld [vmem:[#allocation33_spill] sm:$0xff] }
 0x16f   : > { %v6741_v9 = vadd.f32 %v11098_v4, %v2795_v37  ;;  %v2609_v55 = vadd.f32 %v2593_v46, %v2532_v22  ;;  %v6756_v56 = vmul.f32 %v11103_v44, %v6686_v0  ;;  %v6759_v16 = vmul.f32 %v6180_v32, %v1093_v36  ;;  %v11119_v22 = vld [vmem:[#allocation58_spill] sm:$0xff] }
 0x170   : > { %11097 = vst [vmem:[#allocation7_spill] sm:$0xff] %v6738_v38  ;;  %v1283_v21 = vadd.f32 %v1267_v39, %v1205_v28  ;;  %11102 = vst [vmem:[#allocation20_spill] sm:$0xff] %v6752_v60  ;;  %v6762_v30 = vmul.f32 %v6185_v2, %v1171_v49  ;;  %v6780_v46 = vmul.f32 %v6196_v24, %v1249_v27  ;;  %v10820_v61 = vrot.slane %v6774_v12, 6 }
 0x171   : > { %11099 = vst [vmem:[#allocation19_spill] sm:$0xff] %v6741_v9  ;;  %11104 = vst [vmem:[#allocation22_spill] sm:$0xff] %v6756_v56  ;;  %v2719_v43 = vadd.f32 %v11107_v58, %v2609_v55  ;;  %v6784_v6 = vmul.f32 %v6201_v25, %v6686_v0  ;;  %v6797_v35 = vmul.f32 %v11110_v57, %v1093_v36  ;;  %v10819_v55 = vrot.slane %v6774_v12, 5 }
 0x172   : > { %11105 = vst [vmem:[#allocation21_spill] sm:$0xff] %v6759_v16  ;;  %11106 = vst [vmem:[#allocation23_spill] sm:$0xff] %v6762_v30  ;;  %v6777_v18 = vadd.f32 %v1304_v29, %v1283_v21  ;;  %v6800_v23 = vmul.f32 %v11112_v10, %v1171_v49  ;;  %v6803_v19 = vmul.f32 %v11114_v34, %v1249_v27  ;;  %v6809_v29 = vpop.f32.mrb[16].mxu0  ;;  %v11162_v16 = vld [vmem:[#allocation15_spill] sm:$0xff] }
 0x173   : > { %11108 = vst [vmem:[#allocation28_spill] sm:$0xff] %v6780_v46  ;;  %11109 = vst [vmem:[#allocation26_spill] sm:$0xff] %v6784_v6  ;;  %v6807_v37 = vmul.f32 %v11116_v26, %v6686_v0  ;;  %v2796_v28 = vadd.f32 %v11119_v22, %v2719_v43  ;;  %v6813_v39 = vmul.f32 %v6767_v47, %v1093_v36  ;;  %v6819_v21 = vpop.f32.mrb[17].mxu0  ;;  %v6830_v43 = vrot.slane %v6774_v12, 7  ;;  %v11126_v36 = vld [vmem:[#allocation59_spill] sm:$0xff]  ;;  %v11141_v6 = vld [vmem:[#allocation53_spill] sm:$0xff] }
 0x174   : > { %11111 = vst [vmem:[#allocation29_spill] sm:$0xff] %v6797_v35  ;;  %11113 = vst [vmem:[#allocation8_spill] sm:$0xff] %v6800_v23  ;;  %v6816_v4 = vmul.f32 %v6772_v5, %v1171_v49  ;;  %v6822_v58 = vmul.f32 %v6789_v41, %v1249_v27  ;;  %v6826_v50 = vmul.f32 %v6794_v52, %v6686_v0  ;;  %v11128_v49 = vld [vmem:[#allocation9_spill] sm:$0xff]  ;;  %v11156_v35 = vld [vmem:[#allocation10_spill] sm:$0xff] }
 0x175   : > { %11115 = vst [vmem:[#allocation34_spill] sm:$0xff] %v6803_v19  ;;  %11117 = vst [vmem:[#allocation12_spill] sm:$0xff] %v6807_v37  ;;  %v6833_v22 = vadd.f32 %v11126_v36, %v2796_v28  ;;  %v11129_v14 = vrot.slane %v11128_v49, 5  ;;  %v1302_v53 = vmul.f32 %v5859_v48, %v6774_v12  ;;  %v11130_v37 = vrot.slane %v11128_v49, 6  ;;  %v11155_v19 = vld [vmem:[#allocation14_spill] sm:$0xff] }
 0x176   : > { %11118 = vst [vmem:[#allocation13_spill] sm:$0xff] %v6809_v29  ;;  %11120 = vst [vmem:[#allocation11_spill] sm:$0xff] %v6813_v39  ;;  %v11132_v36 = vrot.slane %v11128_v49, 7  ;;  %v11135_v39 = vld [vmem:[#allocation41_spill] sm:$0xff]  ;;  %v11140_v29 = vld [vmem:[#allocation18_spill] sm:$0xff]  ;;  %v11157_v46 = vrot.slane %v11156_v35, 1 }
 0x177   : > { %11121 = vst [vmem:[#allocation57_spill] sm:$0xff] %v6816_v4  ;;  %11122 = vst [vmem:[#allocation24_spill] sm:$0xff] %v6819_v21  ;;  %v1092_v27 = vsel %vm1079_vm10, %v11129_v14, %v10819_v55  ;;  %v6851_v28 = vsel %vm1157_vm11, %v11130_v37, %v10820_v61  ;;  %v11158_v60 = vrot.slane %v11156_v35, 2  ;;  %v11163_v38 = vrot.slane %v11156_v35, 3 }
 0x178   : > { %11123 = vst [vmem:[#allocation25_spill] sm:$0xff] %v6822_v58  ;;  %11124 = vst [vmem:[#allocation30_spill] sm:$0xff] %v6826_v50  ;;  %v1109_v33 = vmul.f32 %v5869_v7, %v1092_v27  ;;  %v1248_v14 = vsel %vm1235_vm12, %v11132_v36, %v6830_v43  ;;  %v1644_v48 = vmul.f32 %v11100_v42, %v1092_v27  ;;  %v11133_v58 = vld [vmem:[#allocation46_spill] sm:$0xff]  ;;  %v11134_v36 = vld [vmem:[#allocation27_spill] sm:$0xff] }
 0x179   : > { %11125 = vst [vmem:[#allocation33_spill] sm:$0xff] %v6830_v43  ;;  %11127 = vst [vmem:[#allocation58_spill] sm:$0xff] %v6833_v22  ;;  %v1187_v54 = vmul.f32 %v5874_v8, %v6851_v28  ;;  %v1265_v7 = vmul.f32 %v5898_v20, %v1248_v14  ;;  %v1721_v61 = vmul.f32 %v11101_v13, %v6851_v28  ;;  %v11136_v13 = vld [vmem:[#allocation31_spill] sm:$0xff]  ;;  %v6879_v22 = vld [vmem:[#allocation2 + $0xb0] sm:$0xff] }
 0x17a   : > { %11131 = vst [vmem:[#allocation59_spill] sm:$0xff] %v6851_v28  ;;  %v1660_v37 = vadd.f32 %v1644_v48, %v11133_v58  ;;  %v1798_v49 = vmul.f32 %v5944_v45, %v1248_v14  ;;  %v1849_v4 = vadd.f32 %v11134_v36, %v6693_v40  ;;  %v1835_v8 = vmul.f32 %v11103_v44, %v6774_v12  ;;  %v6881_v40 = vpop.f32.mrb[18].mxu0 }
 0x17b   : > { %v1203_v42 = vadd.f32 %v1187_v54, %v1109_v33  ;;  %v2174_v20 = vmul.f32 %v6180_v32, %v1092_v27  ;;  %v2251_v55 = vmul.f32 %v6185_v2, %v6851_v28  ;;  %v2328_v48 = vmul.f32 %v6196_v24, %v1248_v14  ;;  %11137 = vst [vmem:[#allocation9_spill] sm:$0xff] %v6881_v40 }
 0x17c   : > { %v1737_v50 = vadd.f32 %v1721_v61, %v1660_v37  ;;  %v1926_v58 = vadd.f32 %v11135_v39, %v1849_v4  ;;  %v2379_v45 = vadd.f32 %v11136_v13, %v6719_v1  ;;  %v2365_v54 = vmul.f32 %v6201_v25, %v6774_v12  ;;  %v11138_v37 = vld [vmem:[#allocation43_spill] sm:$0xff]  ;;  %v11139_v4 = vld [vmem:[#allocation48_spill] sm:$0xff] }
 0x17d   : > { %v1281_v33 = vadd.f32 %v1265_v7, %v1203_v42  ;;  %v2704_v44 = vmul.f32 %v11110_v57, %v1092_v27  ;;  %v2781_v61 = vmul.f32 %v11112_v10, %v6851_v28  ;;  %v2858_v9 = vmul.f32 %v11114_v34, %v1248_v14 }
 0x17e   : > { %v2003_v39 = vadd.f32 %v11138_v37, %v1926_v58  ;;  %v2456_v36 = vadd.f32 %v11139_v4, %v2379_v45  ;;  %v2895_v1 = vmul.f32 %v11116_v26, %v6774_v12  ;;  %v1814_v13 = vadd.f32 %v1798_v49, %v1737_v50  ;;  %v6928_v4 = vld [vmem:[%s10753_s6] ss:$0 sm:$0xff] }
 0x17f   : > { %v1074_v7 = vrot.slane %v6879_v22, 5  ;;  %v1154_v42 = vrot.slane %v6879_v22, 6  ;;  %v1232_v40 = vrot.slane %v6879_v22, 7  ;;  %v6896_v21 = vadd.f32 %v1302_v53, %v1281_v33  ;;  %v11147_v33 = vld [vmem:[#allocation55_spill] sm:$0xff]  ;;  %11148 = vst [vmem:[#allocation41_spill] sm:$0xff] %v6928_v4 }
 0x180   : > { %v2080_v28 = vadd.f32 %v11140_v29, %v2003_v39  ;;  %v2533_v58 = vadd.f32 %v11141_v6, %v2456_v36  ;;  %v6901_v45 = vmul.f32 %v6767_v47, %v1092_v27  ;;  %v11143_v14 = vrot.slane %v6686_v0, 5 }
 0x181   : > { %v11144_v49 = vrot.slane %v6686_v0, 6  ;;  %v11145_v53 = vrot.slane %v6686_v0, 7  ;;  %v6922_v29 = vrot.slane %v6879_v22, 1 }
 0x182   : > { %11142 = vst [vmem:[#allocation46_spill] sm:$0xff] %v6901_v45  ;;  %v6907_v50 = vsel %vm1079_vm10, %v11143_v14, %v1074_v7  ;;  %v2190_v27 = vadd.f32 %v2174_v20, %v2080_v28  ;;  %v2610_v39 = vadd.f32 %v11147_v33, %v2533_v58  ;;  %v6935_v7 = vld [vmem:[%s10753_s6 + $0x1] ss:$0 sm:$0xff]  ;;  %v6942_v28 = vld [vmem:[%s10753_s6 + $0x2] ss:$0 sm:$0xff]  ;;  %v11152_v14 = vrot.slane %v6686_v0, 1 }
 0x183   : > { %v6913_v37 = vsel %vm1157_vm11, %v11144_v49, %v1154_v42  ;;  %v6919_v6 = vsel %vm1235_vm12, %v11145_v53, %v1232_v40  ;;  %11146 = vst [vmem:[#allocation27_spill] sm:$0xff] %v6922_v29  ;;  %v1112_v36 = vmul.f32 %v6928_v4, %v6907_v50  ;;  %11149 = vst [vmem:[#allocation31_spill] sm:$0xff] %v6935_v7  ;;  %v6949_v42 = vld [vmem:[%s10753_s6 + $0x3] ss:$0 sm:$0xff]  ;;  %v6961_v53 = vrot.slane %v6879_v22, 2 }
 0x184   : > { %v1190_v40 = vmul.f32 %v6935_v7, %v6913_v37  ;;  %11150 = vst [vmem:[#allocation43_spill] sm:$0xff] %v6942_v28  ;;  %v1268_v20 = vmul.f32 %v6942_v28, %v6919_v6  ;;  %11151 = vst [vmem:[#allocation48_spill] sm:$0xff] %v6949_v42  ;;  %v1305_v58 = vmul.f32 %v6949_v42, %v6879_v22 }
 0x185   : > { %v6958_v49 = vsel %vm1350_vm14, %v11152_v14, %v6922_v29  ;;  %11154 = vst [vmem:[#allocation53_spill] sm:$0xff] %v6961_v53  ;;  %v2267_v33 = vadd.f32 %v2251_v55, %v2190_v27  ;;  %v2720_v45 = vadd.f32 %v2704_v44, %v2610_v39  ;;  %v1356_v30 = vsel %vm1350_vm14, %v6922_v29, %v11157_v46 }
 0x186   : > { %11153 = vst [vmem:[#allocation18_spill] sm:$0xff] %v6958_v49  ;;  %v1206_v56 = vadd.f32 %v1190_v40, %v1112_v36  ;;  %v1382_v23 = vmul.f32 %v11155_v19, %v6958_v49  ;;  %v1434_v14 = vsel %vm1428_vm15, %v6961_v53, %v11158_v60  ;;  %v11159_v55 = vrot.slane %v6686_v0, 2 }
 0x187   : > { %v6983_v27 = vrot.slane %v6879_v22, 3  ;;  %v2344_v39 = vadd.f32 %v2328_v48, %v2267_v33  ;;  %v2797_v36 = vadd.f32 %v2781_v61, %v2720_v45  ;;  %v6986_v29 = vadd.f32 %v1835_v8, %v1814_v13  ;;  %v11166_v13 = vld [vmem:[#allocation17_spill] sm:$0xff]  ;;  %v7043_v33 = vld [vmem:[%s10753_s6 + $0xa] ss:$0 sm:$0xff] }
 0x188   : > { %v6980_v44 = vsel %vm1428_vm15, %v11159_v55, %v6961_v53  ;;  %v1284_v40 = vadd.f32 %v1268_v20, %v1206_v56  ;;  %v1398_v46 = vadd.f32 %v1382_v23, %v6777_v18  ;;  %v11164_v53 = vrot.slane %v6686_v0, 3  ;;  %11171 = vst [vmem:[#allocation70_spill] sm:$0xff] %v7043_v33 }
 0x189   : > { %11160 = vst [vmem:[#allocation55_spill] sm:$0xff] %v6980_v44  ;;  %11161 = vst [vmem:[#allocation14_spill] sm:$0xff] %v6983_v27  ;;  %v1460_v60 = vmul.f32 %v11162_v16, %v6980_v44  ;;  %v1512_v55 = vsel %vm1506_vm2, %v6983_v27, %v11163_v38  ;;  %v2874_v56 = vadd.f32 %v2858_v9, %v2797_v36  ;;  %v7014_v9 = vld [vmem:[%s10753_s6 + $0x7] ss:$0 sm:$0xff]  ;;  %v11173_v36 = vld [vmem:[#allocation16_spill] sm:$0xff] }
 0x18a   : > { %v7000_v48 = vsel %vm1506_vm2, %v11164_v53, %v6983_v27  ;;  %v1321_v18 = vadd.f32 %v1305_v58, %v1284_v40  ;;  %v1383_v23 = vmul.f32 %v11155_v19, %v1356_v30  ;;  %v1461_v8 = vmul.f32 %v11162_v16, %v1434_v14  ;;  %11167 = vst [vmem:[#allocation15_spill] sm:$0xff] %v7014_v9  ;;  %v7023_v16 = vld [vmem:[%s10753_s6 + $0x8] ss:$0 sm:$0xff]  ;;  %v7034_v58 = vld [vmem:[%s10753_s6 + $0x9] ss:$0 sm:$0xff] }
 0x18b   : > { %11165 = vst [vmem:[#allocation10_spill] sm:$0xff] %v7000_v48  ;;  %v7004_v61 = vadd.f32 %v2365_v54, %v2344_v39  ;;  %v1476_v35 = vadd.f32 %v1460_v60, %v1398_v46  ;;  %v1538_v45 = vmul.f32 %v11166_v13, %v7000_v48  ;;  %v1539_v38 = vmul.f32 %v11166_v13, %v1512_v55 }
 0x18c   : > { %v7009_v20 = vadd.f32 %v2895_v1, %v2874_v56  ;;  %v1399_v0 = vadd.f32 %v1383_v23, %v1321_v18  ;;  %v7018_v19 = vmul.f32 %v7014_v9, %v6907_v50  ;;  %11168 = vst [vmem:[#allocation17_spill] sm:$0xff] %v7023_v16  ;;  %v7027_v54 = vmul.f32 %v7023_v16, %v6913_v37 }
 0x18d   : > { %v7029_v1 = vadd.f32 %v1538_v45, %v1476_v35  ;;  %11170 = vst [vmem:[#allocation69_spill] sm:$0xff] %v7034_v58  ;;  %v7038_v53 = vmul.f32 %v7034_v58, %v6919_v6  ;;  %v7047_v39 = vmul.f32 %v7043_v33, %v6879_v22  ;;  %v7051_v40 = vmul.f32 %v11173_v36, %v6958_v49  ;;  %v7078_v45 = vpop.f32.mrb[19].mxu0 }
 0x18e   : > { %v1477_v46 = vadd.f32 %v1461_v8, %v1399_v0  ;;  %v7054_v60 = vmul.f32 %v11173_v36, %v1356_v30  ;;  %v7058_v56 = vmul.f32 %v6050_v17, %v6980_v44  ;;  %v7061_v18 = vmul.f32 %v6050_v17, %v1434_v14  ;;  %11178 = vst [vmem:[#allocation75_spill] sm:$0xff] %v7078_v45 }
 0x18f   : > { %11169 = vst [vmem:[#allocation68_spill] sm:$0xff] %v7029_v1  ;;  %11172 = vst [vmem:[#allocation71_spill] sm:$0xff] %v7047_v39  ;;  %v7065_v23 = vmul.f32 %v11050_v62, %v7000_v48  ;;  %v7068_v35 = vmul.f32 %v11050_v62, %v1512_v55  ;;  %v7072_v8 = vmul.f32 %v6180_v32, %v6907_v50 }
 0x190   : > { %11174 = vst [vmem:[#allocation16_spill] sm:$0xff] %v7054_v60  ;;  %11175 = vst [vmem:[#allocation72_spill] sm:$0xff] %v7061_v18  ;;  %v7076_v13 = vmul.f32 %v6185_v2, %v6913_v37  ;;  %v7080_v0 = vadd.f32 %v1539_v38, %v1477_v46  ;;  %v7084_v17 = vmul.f32 %v6196_v24, %v6919_v6 }
 0x191   : > { %11176 = vst [vmem:[#allocation73_spill] sm:$0xff] %v7065_v23  ;;  %11177 = vst [vmem:[#allocation74_spill] sm:$0xff] %v7068_v35  ;;  %v7088_v62 = vmul.f32 %v6201_v25, %v6879_v22  ;;  %v7092_v36 = vmul.f32 %v6493_v59, %v6958_v49  ;;  %v7095_v27 = vmul.f32 %v6493_v59, %v1356_v30  ;;  %v11193_v23 = vld [vmem:[#allocation60_spill] sm:$0xff] }
 0x192   : > { %11179 = vst [vmem:[#allocation76_spill] sm:$0xff] %v7080_v0  ;;  %v7099_v45 = vmul.f32 %v6510_v63, %v6980_v44  ;;  %v7102_v38 = vmul.f32 %v6510_v63, %v1434_v14  ;;  %v7106_v46 = vmul.f32 %v6515_v15, %v7000_v48  ;;  %v7109_v0 = vmul.f32 %v6515_v15, %v1512_v55 }
 0x193   : > { %11180 = vst [vmem:[#allocation77_spill] sm:$0xff] %v7088_v62  ;;  %11181 = vst [vmem:[#allocation78_spill] sm:$0xff] %v7095_v27  ;;  %v7113_v35 = vmul.f32 %v11110_v57, %v6907_v50  ;;  %v7117_v27 = vmul.f32 %v11112_v10, %v6913_v37  ;;  %v7121_v18 = vmul.f32 %v11114_v34, %v6919_v6  ;;  %v11190_v10 = vld [vmem:[#allocation51_spill] sm:$0xff] }
 0x194   : > { %11182 = vst [vmem:[#allocation79_spill] sm:$0xff] %v7099_v45  ;;  %11183 = vst [vmem:[#allocation80_spill] sm:$0xff] %v7102_v38  ;;  %v7123_v38 = vld [vmem:[#allocation2 + $0x90] sm:$0xff]  ;;  %v7127_v1 = vmul.f32 %v11116_v26, %v6879_v22  ;;  %v7141_v34 = vmul.f32 %v11190_v10, %v1434_v14  ;;  %v7145_v39 = vmul.f32 %v11193_v23, %v7000_v48  ;;  %v11206_v48 = vld [vmem:[#allocation36_spill] sm:$0xff] }
 0x195   : > { %11184 = vst [vmem:[#allocation81_spill] sm:$0xff] %v7106_v46  ;;  %11185 = vst [vmem:[#allocation82_spill] sm:$0xff] %v7109_v0  ;;  %v11187_v0 = vld [vmem:[#allocation50_spill] sm:$0xff]  ;;  %v7138_v46 = vmul.f32 %v11190_v10, %v6980_v44  ;;  %v1153_v14 = vrot.slane %v7123_v38, 6  ;;  %v11210_v44 = vrot.slane %v11206_v48, 2 }
 0x196   : > { %11186 = vst [vmem:[#allocation83_spill] sm:$0xff] %v7127_v1  ;;  %v7131_v62 = vmul.f32 %v11187_v0, %v6958_v49  ;;  %v7134_v60 = vmul.f32 %v11187_v0, %v1356_v30  ;;  %11192 = vst [vmem:[#allocation85_spill] sm:$0xff] %v7141_v34  ;;  %v7148_v1 = vmul.f32 %v11193_v23, %v1512_v55  ;;  %v1231_v34 = vrot.slane %v7123_v38, 7 }
 0x197   : > { %11191 = vst [vmem:[#allocation51_spill] sm:$0xff] %v7138_v46  ;;  %11194 = vst [vmem:[#allocation60_spill] sm:$0xff] %v7145_v39  ;;  %v7156_v30 = vmul.f32 %v6772_v5, %v6913_v37  ;;  %v1073_v46 = vrot.slane %v7123_v38, 5  ;;  %v7163_v39 = vmul.f32 %v6789_v41, %v6919_v6  ;;  %v7167_v55 = vmul.f32 %v6794_v52, %v6879_v22 }
 0x198   : > { %11188 = vst [vmem:[#allocation50_spill] sm:$0xff] %v7131_v62  ;;  %11189 = vst [vmem:[#allocation84_spill] sm:$0xff] %v7134_v60  ;;  %v7152_v62 = vmul.f32 %v6767_v47, %v6907_v50  ;;  %v7170_v50 = vrot.slane %v7123_v38, 1  ;;  %v7173_v5 = vrot.slane %v7123_v38, 2  ;;  %v11202_v37 = vrot.slane %v6774_v12, 5 }
 0x199   : > { %11195 = vst [vmem:[#allocation86_spill] sm:$0xff] %v7148_v1  ;;  %11197 = vst [vmem:[#allocation88_spill] sm:$0xff] %v7156_v30  ;;  %v11203_v60 = vrot.slane %v6774_v12, 6  ;;  %v7190_v52 = vsel %vm1235_vm12, %v6830_v43, %v1231_v34  ;;  %v1494_v22 = vrot.slane %v7123_v38, 3  ;;  %v11208_v34 = vrot.slane %v6774_v12, 1 }
 0x19a   : > { %11196 = vst [vmem:[#allocation87_spill] sm:$0xff] %v7152_v62  ;;  %11198 = vst [vmem:[#allocation89_spill] sm:$0xff] %v7163_v39  ;;  %v7179_v1 = vsel %vm1079_vm10, %v11202_v37, %v1073_v46  ;;  %v1303_v37 = vmul.f32 %v6949_v42, %v7123_v38  ;;  %v7218_v39 = vsel %vm1428_vm15, %v7173_v5, %v11210_v44  ;;  %v11211_v49 = vrot.slane %v6774_v12, 2 }
 0x19b   : > { %11199 = vst [vmem:[#allocation90_spill] sm:$0xff] %v7167_v55  ;;  %11200 = vst [vmem:[#allocation91_spill] sm:$0xff] %v7170_v50  ;;  %v7185_v41 = vsel %vm1157_vm11, %v11203_v60, %v1153_v14  ;;  %v1110_v6 = vmul.f32 %v6928_v4, %v7179_v1  ;;  %v11207_v55 = vrot.slane %v11206_v48, 1  ;;  %v7211_v14 = vsel %vm1350_vm14, %v11208_v34, %v7170_v50 }
 0x19c   : > { %11201 = vst [vmem:[#allocation92_spill] sm:$0xff] %v7173_v5  ;;  %11204 = vst [vmem:[#allocation93_spill] sm:$0xff] %v7185_v41  ;;  %v1188_v46 = vmul.f32 %v6935_v7, %v7185_v41  ;;  %v1836_v30 = vmul.f32 %v7043_v33, %v7123_v38  ;;  %v1266_v34 = vmul.f32 %v6942_v28, %v7190_v52  ;;  %v11216_v28 = vrot.slane %v6774_v12, 3  ;;  %v7269_v12 = vld [vmem:[%s10753_s6 + $0x6] ss:$0 sm:$0xff] }
 0x19d   : > { %11205 = vst [vmem:[#allocation94_spill] sm:$0xff] %v7190_v52  ;;  %v7204_v60 = vsel %vm1350_vm14, %v7170_v50, %v11207_v55  ;;  %11209 = vst [vmem:[#allocation36_spill] sm:$0xff] %v7211_v14  ;;  %v7225_v55 = vsel %vm1428_vm15, %v11211_v49, %v7173_v5  ;;  %v7234_v50 = vld [vmem:[%s10753_s6 + $0x4] ss:$0 sm:$0xff]  ;;  %v7243_v49 = vld [vmem:[%s10753_s6 + $0x5] ss:$0 sm:$0xff]  ;;  %v1799_v51 = vmul.f32 %v7034_v58, %v7190_v52 }
 0x19e   : > { %11212 = vst [vmem:[#allocation95_spill] sm:$0xff] %v7225_v55  ;;  %v1204_v62 = vadd.f32 %v1188_v46, %v1110_v6  ;;  %11213 = vst [vmem:[#allocation96_spill] sm:$0xff] %v7234_v50  ;;  %v1380_v44 = vmul.f32 %v7234_v50, %v7211_v14  ;;  %v1381_v43 = vmul.f32 %v7234_v50, %v7204_v60  ;;  %v11215_v46 = vrot.slane %v11206_v48, 3  ;;  %v11228_v58 = vld [vmem:[#allocation21_spill] sm:$0xff] }
 0x19f   : > { %11214 = vst [vmem:[#allocation97_spill] sm:$0xff] %v7243_v49  ;;  %v1458_v6 = vmul.f32 %v7243_v49, %v7225_v55  ;;  %v7257_v33 = vsel %vm1506_vm2, %v11216_v28, %v1494_v22  ;;  %v1645_v50 = vmul.f32 %v7014_v9, %v7179_v1  ;;  %v1459_v42 = vmul.f32 %v7243_v49, %v7218_v39 }
 0x1a0   : > { %v7251_v5 = vsel %vm1506_vm2, %v1494_v22, %v11215_v46  ;;  %v1282_v7 = vadd.f32 %v1266_v34, %v1204_v62  ;;  %v1396_v4 = vadd.f32 %v1380_v44, %v6896_v21  ;;  %v1722_v48 = vmul.f32 %v7023_v16, %v7185_v41  ;;  %11217 = vst [vmem:[#allocation98_spill] sm:$0xff] %v7269_v12  ;;  %v11218_v22 = vld [vmem:[#allocation52_spill] sm:$0xff]  ;;  %v11219_v62 = vld [vmem:[#allocation6_spill] sm:$0xff] }
 0x1a1   : > { %v1536_v28 = vmul.f32 %v7269_v12, %v7257_v33  ;;  %v1661_v46 = vadd.f32 %v1645_v50, %v11218_v22  ;;  %v1850_v34 = vadd.f32 %v11219_v62, %v6729_v3  ;;  %v7279_v21 = vld [vmem:[%s10753_s6 + $0xb] ss:$0 sm:$0xff]  ;;  %v1537_v9 = vmul.f32 %v7269_v12, %v7251_v5  ;;  %v11221_v22 = vld [vmem:[#allocation42_spill] sm:$0xff]  ;;  %v7292_v62 = vld [vmem:[%s10753_s6 + $0xc] ss:$0 sm:$0xff] }
 0x1a2   : > { %11220 = vst [vmem:[#allocation52_spill] sm:$0xff] %v7279_v21  ;;  %v1912_v44 = vmul.f32 %v7279_v21, %v7211_v14  ;;  %v1319_v49 = vadd.f32 %v1303_v37, %v1282_v7  ;;  %v1474_v16 = vadd.f32 %v1458_v6, %v1396_v4  ;;  %11222 = vst [vmem:[#allocation6_spill] sm:$0xff] %v7292_v62 }
 0x1a3   : > { %v1738_v50 = vadd.f32 %v1722_v48, %v1661_v46  ;;  %v1927_v45 = vadd.f32 %v11221_v22, %v1850_v34  ;;  %v1989_v7 = vmul.f32 %v7292_v62, %v7225_v55  ;;  %v1913_v6 = vmul.f32 %v7279_v21, %v7204_v60  ;;  %v11223_v34 = vld [vmem:[#allocation44_spill] sm:$0xff]  ;;  %v11226_v21 = vld [vmem:[#allocation7_spill] sm:$0xff] }
 0x1a4   : > { %v1928_v3 = vadd.f32 %v1912_v44, %v6986_v29  ;;  %v1397_v4 = vadd.f32 %v1381_v43, %v1319_v49  ;;  %v1552_v37 = vadd.f32 %v1536_v28, %v1474_v16  ;;  %v1990_v48 = vmul.f32 %v7292_v62, %v7218_v39  ;;  %v7304_v44 = vld [vmem:[%s10753_s6 + $0xd] ss:$0 sm:$0xff] }
 0x1a5   : > { %v1815_v46 = vadd.f32 %v1799_v51, %v1738_v50  ;;  %v2004_v22 = vadd.f32 %v11223_v34, %v1927_v45  ;;  %11224 = vst [vmem:[#allocation42_spill] sm:$0xff] %v7304_v44  ;;  %v2066_v12 = vmul.f32 %v7304_v44, %v7257_v33  ;;  %v2067_v49 = vmul.f32 %v7304_v44, %v7251_v5  ;;  %v11225_v45 = vld [vmem:[#allocation45_spill] sm:$0xff] }
 0x1a6   : > { %v2005_v29 = vadd.f32 %v1989_v7, %v1928_v3  ;;  %v1475_v43 = vadd.f32 %v1459_v42, %v1397_v4  ;;  %v1662_v16 = vadd.f32 %v6746_v31, %v1552_v37  ;;  %v2175_v51 = vmul.f32 %v6180_v32, %v7179_v1  ;;  %v11227_v42 = vld [vmem:[#allocation47_spill] sm:$0xff] }
 0x1a7   : > { %v1852_v28 = vadd.f32 %v1836_v30, %v1815_v46  ;;  %v2081_v50 = vadd.f32 %v11225_v45, %v2004_v22  ;;  %v2252_v7 = vmul.f32 %v6185_v2, %v7185_v41  ;;  %v2380_v4 = vadd.f32 %v11227_v42, %v11226_v21  ;;  %v11229_v46 = vld [vmem:[#allocation20_spill] sm:$0xff] }
 0x1a8   : > { %v2082_v3 = vadd.f32 %v2066_v12, %v2005_v29  ;;  %v1553_v34 = vadd.f32 %v1537_v9, %v1475_v43  ;;  %v1739_v62 = vadd.f32 %v6749_v11, %v1662_v16  ;;  %v2442_v31 = vmul.f32 %v6493_v59, %v7211_v14  ;;  %v11230_v9 = vld [vmem:[#allocation49_spill] sm:$0xff]  ;;  %v11231_v43 = vld [vmem:[#allocation23_spill] sm:$0xff] }
 0x1a9   : > { %v1929_v37 = vadd.f32 %v1913_v6, %v1852_v28  ;;  %v2191_v44 = vadd.f32 %v2175_v51, %v2081_v50  ;;  %v2329_v30 = vmul.f32 %v6196_v24, %v7190_v52  ;;  %v2457_v11 = vadd.f32 %v11230_v9, %v2380_v4  ;;  %v11233_v50 = vld [vmem:[#allocation56_spill] sm:$0xff] }
 0x1aa   : > { %v2192_v32 = vadd.f32 %v11228_v58, %v2082_v3  ;;  %v1663_v12 = vadd.f32 %v7018_v19, %v1553_v34  ;;  %v7326_v2 = vadd.f32 %v11229_v46, %v1739_v62  ;;  %v2458_v22 = vadd.f32 %v2442_v31, %v7004_v61  ;;  %v11232_v62 = vld [vmem:[#allocation54_spill] sm:$0xff] }
 0x1ab   : > { %v2006_v21 = vadd.f32 %v1990_v48, %v1929_v37  ;;  %v2268_v29 = vadd.f32 %v2252_v7, %v2191_v44  ;;  %v2519_v6 = vmul.f32 %v6510_v63, %v7225_v55  ;;  %v2366_v24 = vmul.f32 %v6201_v25, %v7123_v38  ;;  %v11234_v7 = vld [vmem:[#allocation28_spill] sm:$0xff] }
 0x1ac   : > { %v2269_v16 = vadd.f32 %v11231_v43, %v2192_v32  ;;  %v1740_v58 = vadd.f32 %v7027_v54, %v1663_v12  ;;  %v2443_v19 = vmul.f32 %v6493_v59, %v7204_v60  ;;  %v2534_v51 = vadd.f32 %v11232_v62, %v2457_v11  ;;  %v11235_v32 = vld [vmem:[#allocation29_spill] sm:$0xff] }
 0x1ad   : > { %v2083_v28 = vadd.f32 %v2067_v49, %v2006_v21  ;;  %v2345_v45 = vadd.f32 %v2329_v30, %v2268_v29  ;;  %v2535_v61 = vadd.f32 %v2519_v6, %v2458_v22  ;;  %v2596_v48 = vmul.f32 %v6515_v15, %v7257_v33  ;;  %v11236_v21 = vld [vmem:[#allocation8_spill] sm:$0xff] }
 0x1ae   : > { %v7342_v44 = vadd.f32 %v7038_v53, %v1740_v58  ;;  %v2520_v54 = vmul.f32 %v6510_v63, %v7218_v39  ;;  %v2611_v3 = vadd.f32 %v11233_v50, %v2534_v51  ;;  %v2705_v25 = vmul.f32 %v11110_v57, %v7179_v1  ;;  %v7356_v53 = vld [vmem:[%s10753_s6 + $0x16] ss:$0 sm:$0xff]  ;;  %v11238_v51 = vld [vmem:[#allocation40_spill] sm:$0xff] }
 0x1af   : > { %v2193_v59 = vadd.f32 %v7072_v8, %v2083_v28  ;;  %v2346_v49 = vadd.f32 %v11234_v7, %v2269_v16  ;;  %v2382_v34 = vadd.f32 %v2366_v24, %v2345_v45  ;;  %v2612_v42 = vadd.f32 %v2596_v48, %v2535_v61  ;;  %v11247_v7 = vld [vmem:[#allocation22_spill] sm:$0xff]  ;;  %v11262_v61 = vld [vmem:[#allocation77_spill] sm:$0xff] }
 0x1b0   : > { %v2597_v4 = vmul.f32 %v6515_v15, %v7251_v5  ;;  %v2721_v31 = vadd.f32 %v2705_v25, %v2611_v3  ;;  %v2782_v63 = vmul.f32 %v7356_v53, %v7185_v41  ;;  %v2972_v57 = vmul.f32 %v11187_v0, %v7211_v14  ;;  %v7367_v15 = vld [vmem:[%s10753_s6 + $0x17] ss:$0 sm:$0xff] }
 0x1b1   : > { %v2270_v8 = vadd.f32 %v7076_v13, %v2193_v59  ;;  %v2459_v37 = vadd.f32 %v2443_v19, %v2382_v34  ;;  %v2722_v30 = vadd.f32 %v11235_v32, %v2612_v42  ;;  %v2859_v12 = vmul.f32 %v7367_v15, %v7190_v52  ;;  %v11237_v19 = vld [vmem:[#allocation39_spill] sm:$0xff]  ;;  %v7415_v59 = vld [vmem:[#allocation2 + $0xf8] sm:$0xff] }
 0x1b2   : > { %v2798_v46 = vadd.f32 %v2782_v63, %v2721_v31  ;;  %v2896_v9 = vmul.f32 %v11116_v26, %v7123_v38  ;;  %v2988_v11 = vadd.f32 %v2972_v57, %v7009_v20  ;;  %v3049_v13 = vmul.f32 %v11190_v10, %v7225_v55  ;;  %v11250_v63 = vld [vmem:[#allocation26_spill] sm:$0xff] }
 0x1b3   : > { %v2536_v22 = vadd.f32 %v2520_v54, %v2459_v37  ;;  %v2799_v29 = vadd.f32 %v11236_v21, %v2722_v30  ;;  %v2973_v43 = vmul.f32 %v11187_v0, %v7204_v60  ;;  %v3050_v16 = vmul.f32 %v11190_v10, %v7218_v39  ;;  %v7390_v0 = vld [vmem:[#allocation2 + $0xc0] sm:$0xff]  ;;  %v11254_v21 = vld [vmem:[#allocation5_spill] sm:$0xff] }
 0x1b4   : > { %v7382_v6 = vadd.f32 %v7084_v17, %v2270_v8  ;;  %v2875_v58 = vadd.f32 %v2859_v12, %v2798_v46  ;;  %v3065_v24 = vadd.f32 %v3049_v13, %v2988_v11  ;;  %v3126_v26 = vmul.f32 %v11193_v23, %v7257_v33  ;;  %v5358_v33 = vld [vmem:[%s10752_s5] ss:$0 sm:$0xff]  ;;  %v11240_v17 = vld [vmem:[#allocation32_spill] sm:$0xff]  ;;  %v11251_v8 = vld [vmem:[#allocation38_spill] sm:$0xff] }
 0x1b5   : > { %v2613_v20 = vadd.f32 %v2597_v4, %v2536_v22  ;;  %v3127_v38 = vmul.f32 %v11193_v23, %v7251_v5  ;;  %v698_v62 = vmax.f32 %v11237_v19, 0.0  ;;  %vm715_vm4 = vcmp.ge.s32.totalorder %v11238_v51, 3  ;;  %v11241_v5 = vld [vmem:[#allocation34_spill] sm:$0xff]  ;;  %v11284_v19 = vld [vmem:[#allocation69_spill] sm:$0xff]  ;;  %v11359_v4 = vld [vmem:[#allocation24_spill] sm:$0xff] }
 0x1b6   : > { %v2912_v60 = vadd.f32 %v2896_v9, %v2875_v58  ;;  %v7394_v39 = vmul.f32 %v6767_v47, %v7179_v1  ;;  %vm723_vm5 = vcmp.lt.s32.totalorder %v11238_v51, 19  ;;  %v670_v10 = vadd.f32 %v5358_v33, %v11240_v17  ;;  %v11246_v1 = vld [vmem:[#allocation3_spill] sm:$0xff]  ;;  %v7433_v12 = vld [vmem:[#allocation2 + $0xd8] sm:$0xff] }
 0x1b7   : > { %v2723_v23 = vadd.f32 %v7113_v35, %v2613_v20  ;;  %v7403_v28 = vadd.f32 %v11241_v5, %v2799_v29  ;;  %v7405_v45 = vadd.f32 %v3126_v26, %v3065_v24  ;;  %vm7407_vm6 = vmand %vm715_vm4, %vm723_vm5  ;;  %v706_v48 = vadd.s32 6, %v11246_v1  ;;  %v11257_v24 = vld [vmem:[#allocation71_spill] sm:$0xff]  ;;  %v7459_v26 = vpop.f32.mrb[20].mxu0  ;;  %v11258_v20 = vld [vmem:[#allocation73_spill] sm:$0xff] }
 0x1b8   : > { %11239 = vst [vmem:[#allocation44_spill] sm:$0xff] %v7394_v39  ;;  %v2989_v54 = vadd.f32 %v2973_v43, %v2912_v60  ;;  %v762_v50 = vsel %vm7407_vm6, %v698_v62, 0.0  ;;  %v696_v3 = vmax.f32 %v670_v10, 0.0  ;;  %v1853_v34 = vadd.f32 %v11247_v7, %v7326_v2  ;;  %v11256_v43 = vld [vmem:[#allocation79_spill] sm:$0xff]  ;;  %v11282_v62 = vld [vmem:[#allocation17_spill] sm:$0xff] }
 0x1b9   : > { %11242 = vst [vmem:[#allocation45_spill] sm:$0xff] %v7403_v28  ;;  %11243 = vst [vmem:[#allocation7_spill] sm:$0xff] %v7405_v45  ;;  %v2800_v35 = vadd.f32 %v7117_v27, %v2723_v23  ;;  %vm714_vm7 = vcmp.ge.s32.totalorder %v706_v48, 3  ;;  %vm722_vm8 = vcmp.lt.s32.totalorder %v706_v48, 19  ;;  %v2383_v57 = vadd.f32 %v11250_v63, %v2346_v49  ;;  %v7468_v60 = vld [vmem:[#allocation2 + $0x120] sm:$0xff]  ;;  %v11261_v23 = vld [vmem:[#allocation16_spill] sm:$0xff] }
 0x1ba   : > { %778 = vst.msk [vmem:[#allocation2 + $0xe8] sm:$0xff] %vm451_vm1, %v762_v50  ;;  %v3066_v42 = vadd.f32 %v3050_v16, %v2989_v54  ;;  %vm7421_vm9 = vmand %vm714_vm7, %vm722_vm8  ;;  %v681_v37 = vadd.f32 %v5358_v33, %v11251_v8  ;;  %v1930_v30 = vadd.f32 %v7051_v40, %v1853_v34  ;;  %v7446_v29 = vadd.f32 %v5358_v33, %v11254_v21  ;;  %v7470_v33 = vpop.f32.mrb[21].mxu0  ;;  %v11263_v48 = vld [vmem:[#allocation13_spill] sm:$0xff]  ;;  %v11281_v8 = vld [vmem:[#allocation15_spill] sm:$0xff] }
 0x1bb   : > { %v760_v27 = vsel %vm7421_vm9, %v696_v3, 0.0  ;;  %v7436_v46 = vadd.f32 %v7121_v18, %v2800_v35  ;;  %v2460_v49 = vadd.f32 %v7092_v36, %v2383_v57  ;;  %v7451_v18 = vld [vmem:[%s10752_s5] ss:$0 sm:$0xff]  ;;  %11259 = vst [vmem:[#allocation49_spill] sm:$0xff] %v7470_v33  ;;  %v7482_v1 = vadd.f32 %v11262_v61, %v7382_v6  ;;  %v7496_v34 = vpop.f32.mrb[22].mxu0 }
 0x1bc   : > { %776 = vst.msk [vmem:[#allocation2 + $0xc8] sm:$0xff] %vm451_vm1, %v760_v27  ;;  %v699_v9 = vmax.f32 %v681_v37, 0.0  ;;  %v7441_v13 = vadd.f32 %v3127_v38, %v3066_v42  ;;  %v2007_v22 = vadd.f32 %v7058_v56, %v1930_v30  ;;  %11255 = vst [vmem:[#allocation20_spill] sm:$0xff] %v7451_v18  ;;  %v1854_v56 = vadd.f32 %v11257_v24, %v7342_v44  ;;  %v11260_v44 = vld [vmem:[#allocation81_spill] sm:$0xff]  ;;  %v11267_v42 = vld [vmem:[#allocation48_spill] sm:$0xff]  ;;  %v7503_v37 = vpop.f32.mrb[23].mxu0 }
 0x1bd   : > { %11252 = vst [vmem:[#allocation47_spill] sm:$0xff] %v7436_v46  ;;  %v2537_v16 = vadd.f32 %v11256_v43, %v2460_v49  ;;  %v7486_v54 = vadd.f32 %v11263_v48, %v7451_v18  ;;  %v7494_v7 = vstv %s5608_s27  ;;  %11266 = vst [vmem:[#allocation56_spill] sm:$0xff] %v7496_v34  ;;  %v11269_v27 = vld [vmem:[#allocation37_spill] sm:$0xff]  ;;  %v7557_v57 = vld [vmem:[%s10753_s6 + $0xe] ss:$0 sm:$0xff]  ;;  %v11297_v14 = vrot.slane %v7390_v0, 6 }
 0x1be   : > { %11253 = vst [vmem:[#allocation21_spill] sm:$0xff] %v7441_v13  ;;  %v763_v36 = vsel %vm7407_vm6, %v699_v9, 0.0  ;;  %v7462_v38 = vadd.f32 %v11258_v20, %v2007_v22  ;;  %v7478_v5 = vadd.f32 %v11261_v23, %v1854_v56  ;;  %11265 = vst [vmem:[#allocation54_spill] sm:$0xff] %v7494_v7  ;;  %v11270_v30 = vrot.slane %v11269_v27, 5  ;;  %v11275_v24 = vld [vmem:[#allocation41_spill] sm:$0xff]  ;;  %v11276_v20 = vld [vmem:[#allocation31_spill] sm:$0xff] }
 0x1bf   : > { %779 = vst.msk [vmem:[#allocation2 + $0xf0] sm:$0xff] %vm451_vm1, %v763_v36  ;;  %v7475_v10 = vadd.f32 %v11260_v44, %v2537_v16  ;;  %11268 = vst [vmem:[#allocation28_spill] sm:$0xff] %v7503_v37  ;;  %v11272_v22 = vrot.slane %v11269_v27, 6  ;;  %v11274_v43 = vrot.slane %v11269_v27, 7  ;;  %v11277_v23 = vld [vmem:[#allocation70_spill] sm:$0xff]  ;;  %vm966_vm3 = vcmp.ge.s32.totalorder %v7494_v7, 3 }
 0x1c0   : > { %v7535_v48 = vld [vmem:[%s10753_s6 + $0x11] ss:$0 sm:$0xff]  ;;  %v7565_v6 = vld [vmem:[%s10753_s6 + $0xf] ss:$0 sm:$0xff]  ;;  %v7600_v28 = vld [vmem:[%s10753_s6 + $0x18] ss:$0 sm:$0xff] }
 0x1c1   : > { %v7472_v17 = vld [vmem:[#allocation2 + $0xe8] sm:$0xff]  ;;  %vm972_vm6 = vcmp.lt.s32.totalorder %v7494_v7, 19 }
 0x1c2   : > { %v10862_v50 = vrot.slane %v7472_v17, 5  ;;  %v10861_v3 = vrot.slane %v7472_v17, 6  ;;  %v7491_v35 = vrot.slane %v7472_v17, 7  ;;  %v1308_v63 = vmul.f32 %v11267_v42, %v7472_v17  ;;  %vm7941_vm7 = vmand %vm966_vm3, %vm972_vm6 }
 0x1c3   : > { %v7530_v61 = vmul.f32 %v11277_v23, %v7472_v17  ;;  %v7539_v27 = vmul.f32 %v7535_v48, %v7472_v17  ;;  %v7604_v13 = vmul.f32 %v7600_v28, %v7472_v17 }
 0x1c4   : > { %11264 = vst [vmem:[#allocation23_spill] sm:$0xff] %v7491_v35  ;;  %v1095_v9 = vsel %vm1079_vm10, %v11270_v30, %v10862_v50  ;;  %v7517_v21 = vsel %vm1157_vm11, %v11272_v22, %v10861_v3  ;;  %v1251_v16 = vsel %vm1235_vm12, %v11274_v43, %v7491_v35  ;;  %v7541_v30 = vld [vmem:[#allocation2 + $0xc8] sm:$0xff]  ;;  %v11280_v22 = vld [vmem:[#allocation43_spill] sm:$0xff]  ;;  %v7582_v3 = vld [vmem:[%s10753_s6 + $0x15] ss:$0 sm:$0xff] }
 0x1c5   : > { %11273 = vst [vmem:[#allocation29_spill] sm:$0xff] %v7517_v21  ;;  %v1115_v56 = vmul.f32 %v11275_v24, %v1095_v9  ;;  %v1193_v44 = vmul.f32 %v11276_v20, %v7517_v21  ;;  %11278 = vst [vmem:[#allocation8_spill] sm:$0xff] %v7530_v61  ;;  %v1271_v43 = vmul.f32 %v11280_v22, %v1251_v16  ;;  %v7595_v25 = vrot.slane %v7541_v30, 5 }
 0x1c6   : > { %11279 = vst [vmem:[#allocation39_spill] sm:$0xff] %v7539_v27  ;;  %v7545_v51 = vmul.f32 %v11281_v8, %v1095_v9  ;;  %v7549_v58 = vmul.f32 %v11282_v62, %v7517_v21  ;;  %v7552_v36 = vmul.f32 %v11284_v19, %v1251_v16  ;;  %v7560_v11 = vmul.f32 %v7557_v57, %v1095_v9  ;;  %v11300_v27 = vld [vmem:[#allocation68_spill] sm:$0xff]  ;;  %v7650_v37 = vld [vmem:[#allocation2 + $0xf0] sm:$0xff] }
 0x1c7   : > { %v1209_v40 = vadd.f32 %v1193_v44, %v1115_v56  ;;  %v7569_v2 = vmul.f32 %v7565_v6, %v7517_v21  ;;  %v7574_v56 = vld [vmem:[%s10753_s6 + $0x10] ss:$0 sm:$0xff]  ;;  %v7585_v50 = vmul.f32 %v7582_v3, %v1095_v9  ;;  %v7589_v32 = vmul.f32 %v7356_v53, %v7517_v21  ;;  %11292 = vst [vmem:[#allocation79_spill] sm:$0xff] %v7595_v25 }
 0x1c8   : > { %11283 = vst [vmem:[#allocation40_spill] sm:$0xff] %v7549_v58  ;;  %11285 = vst [vmem:[#allocation32_spill] sm:$0xff] %v7552_v36  ;;  %v7577_v44 = vmul.f32 %v7574_v56, %v1251_v16  ;;  %v7592_v31 = vmul.f32 %v7367_v15, %v1251_v16  ;;  %v10868_v45 = vrot.slane %v7541_v30, 6  ;;  %v7608_v21 = vrot.slane %v7541_v30, 7 }
 0x1c9   : > { %11286 = vst [vmem:[#allocation34_spill] sm:$0xff] %v7560_v11  ;;  %11287 = vst [vmem:[#allocation3_spill] sm:$0xff] %v7569_v2  ;;  %v1287_v46 = vadd.f32 %v1271_v43, %v1209_v40  ;;  %v7611_v16 = vmul.f32 %v6767_v47, %v1095_v9  ;;  %v11296_v40 = vrot.slane %v7390_v0, 5  ;;  %v1306_v55 = vmul.f32 %v11267_v42, %v7541_v30 }
 0x1ca   : > { %11288 = vst [vmem:[#allocation22_spill] sm:$0xff] %v7577_v44  ;;  %11289 = vst [vmem:[#allocation26_spill] sm:$0xff] %v7585_v50  ;;  %v7628_v9 = vsel %vm1157_vm11, %v11297_v14, %v10868_v45  ;;  %v1076_v2 = vrot.slane %v7650_v37, 5  ;;  %v2899_v11 = vmul.f32 %v7600_v28, %v7541_v30 }
 0x1cb   : > { %11290 = vst [vmem:[#allocation38_spill] sm:$0xff] %v7589_v32  ;;  %11291 = vst [vmem:[#allocation5_spill] sm:$0xff] %v7592_v31  ;;  %v1094_v43 = vsel %vm1079_vm10, %v11296_v40, %v7595_v25  ;;  %v1324_v41 = vadd.f32 %v1308_v63, %v1287_v46  ;;  %v1191_v39 = vmul.f32 %v11276_v20, %v7628_v9 }
 0x1cc   : > { %11293 = vst [vmem:[#allocation71_spill] sm:$0xff] %v7604_v13  ;;  %11294 = vst [vmem:[#allocation73_spill] sm:$0xff] %v7608_v21  ;;  %v1113_v13 = vmul.f32 %v11275_v24, %v1094_v43  ;;  %v1648_v34 = vmul.f32 %v11281_v8, %v1094_v43  ;;  %v1725_v14 = vmul.f32 %v11282_v62, %v7628_v9 }
 0x1cd   : > { %11295 = vst [vmem:[#allocation81_spill] sm:$0xff] %v7611_v16  ;;  %11298 = vst [vmem:[#allocation16_spill] sm:$0xff] %v7628_v9  ;;  %v11299_v16 = vrot.slane %v7390_v0, 7  ;;  %v2178_v45 = vmul.f32 %v7557_v57, %v1094_v43  ;;  %v1839_v46 = vmul.f32 %v11277_v23, %v7541_v30  ;;  %v2255_v63 = vmul.f32 %v7565_v6, %v7628_v9 }
 0x1ce   : > { %v1664_v52 = vadd.f32 %v1648_v34, %v11300_v27  ;;  %v2369_v32 = vmul.f32 %v7535_v48, %v7541_v30  ;;  %v2708_v44 = vmul.f32 %v7582_v3, %v1094_v43  ;;  %v2785_v34 = vmul.f32 %v7356_v53, %v7628_v9  ;;  %v11322_v9 = vld [vmem:[#allocation98_spill] sm:$0xff] }
 0x1cf   : > { %v1250_v40 = vsel %vm1235_vm12, %v11299_v16, %v7608_v21  ;;  %v1207_v16 = vadd.f32 %v1191_v39, %v1113_v13  ;;  %v2194_v61 = vadd.f32 %v2178_v45, %v7462_v38  ;;  %v1156_v45 = vrot.slane %v7650_v37, 6 }
 0x1d0   : > { %v1269_v33 = vmul.f32 %v11280_v22, %v1250_v40  ;;  %v1802_v0 = vmul.f32 %v11284_v19, %v1250_v40  ;;  %v2332_v31 = vmul.f32 %v7574_v56, %v1250_v40  ;;  %v1741_v13 = vadd.f32 %v1725_v14, %v1664_v52 }
 0x1d1   : > { %v2862_v27 = vmul.f32 %v7367_v15, %v1250_v40  ;;  %v2271_v50 = vadd.f32 %v2255_v63, %v2194_v61  ;;  %v2724_v36 = vadd.f32 %v2708_v44, %v7475_v10  ;;  %v7666_v58 = vmul.f32 %v6767_v47, %v1094_v43 }
 0x1d2   : > { %v1285_v39 = vadd.f32 %v1269_v33, %v1207_v16  ;;  %v1818_v38 = vadd.f32 %v1802_v0, %v1741_v13  ;;  %v1234_v52 = vrot.slane %v7650_v37, 7  ;;  %v11302_v40 = vrot.slane %v7472_v17, 5 }
 0x1d3   : > { %11301 = vst [vmem:[#allocation77_spill] sm:$0xff] %v7666_v58  ;;  %v2348_v33 = vadd.f32 %v2332_v31, %v2271_v50  ;;  %v2801_v14 = vadd.f32 %v2785_v34, %v2724_v36  ;;  %v11303_v61 = vrot.slane %v7472_v17, 6  ;;  %v1309_v16 = vmul.f32 %v11267_v42, %v7650_v37 }
 0x1d4   : > { %v7673_v10 = vsel %vm1079_vm10, %v11302_v40, %v1076_v2  ;;  %v7681_v0 = vadd.f32 %v1306_v55, %v1285_v39  ;;  %v7690_v50 = vsel %vm1235_vm12, %v7491_v35, %v1234_v52  ;;  %v7692_v2 = vadd.f32 %v1839_v46, %v1818_v38 }
 0x1d5   : > { %v7679_v44 = vsel %vm1157_vm11, %v11303_v61, %v1156_v45  ;;  %v1116_v43 = vmul.f32 %v11275_v24, %v7673_v10  ;;  %11305 = vst [vmem:[#allocation48_spill] sm:$0xff] %v7690_v50  ;;  %v2878_v36 = vadd.f32 %v2862_v27, %v2801_v14  ;;  %v7697_v55 = vrot.slane %v7650_v37, 1 }
 0x1d6   : > { %11304 = vst [vmem:[#allocation13_spill] sm:$0xff] %v7679_v44  ;;  %v1194_v31 = vmul.f32 %v11276_v20, %v7679_v44  ;;  %v1272_v39 = vmul.f32 %v11280_v22, %v7690_v50  ;;  %v7702_v13 = vrot.slane %v7650_v37, 2  ;;  %v1497_v34 = vrot.slane %v7650_v37, 3 }
 0x1d7   : > { %11306 = vst [vmem:[#allocation37_spill] sm:$0xff] %v7697_v55  ;;  %v7705_v45 = vadd.f32 %v2369_v32, %v2348_v33  ;;  %v11308_v46 = vrot.slane %v7415_v59, 1  ;;  %v11309_v38 = vrot.slane %v7472_v17, 1  ;;  %v7721_v14 = vmul.f32 %v11281_v8, %v7673_v10  ;;  %v11313_v33 = vld [vmem:[#allocation96_spill] sm:$0xff] }
 0x1d8   : > { %v1210_v63 = vadd.f32 %v1194_v31, %v1116_v43  ;;  %11307 = vst [vmem:[#allocation4_spill] sm:$0xff] %v7702_v13  ;;  %v7723_v40 = vadd.f32 %v2899_v11, %v2878_v36  ;;  %v11314_v43 = vrot.slane %v7415_v59, 2  ;;  %v11317_v11 = vrot.slane %v7415_v59, 3  ;;  %v7754_v59 = vpop.f32.mrb[0].mxu1 }
 0x1d9   : > { %v1358_v27 = vsel %vm1350_vm14, %v7697_v55, %v11308_v46  ;;  %v7717_v52 = vsel %vm1350_vm14, %v11309_v38, %v7697_v55  ;;  %11311 = vst [vmem:[#allocation31_spill] sm:$0xff] %v7721_v14  ;;  %v11315_v46 = vrot.slane %v7472_v17, 2  ;;  %11321 = vst [vmem:[#allocation17_spill] sm:$0xff] %v7754_v59  ;;  %v11327_v59 = vld [vmem:[#allocation52_spill] sm:$0xff] }
 0x1da   : > { %11310 = vst [vmem:[#allocation41_spill] sm:$0xff] %v7717_v52  ;;  %11312 = vst [vmem:[#allocation70_spill] sm:$0xff] %v7723_v40  ;;  %v1288_v32 = vadd.f32 %v1272_v39, %v1210_v63  ;;  %v1386_v61 = vmul.f32 %v11313_v33, %v7717_v52  ;;  %v1436_v31 = vsel %vm1428_vm15, %v7702_v13, %v11314_v43  ;;  %v11318_v63 = vrot.slane %v7472_v17, 3 }
 0x1db   : > { %v7737_v38 = vsel %vm1428_vm15, %v11315_v46, %v7702_v13  ;;  %v1514_v36 = vsel %vm1506_vm2, %v1497_v34, %v11317_v11  ;;  %v7749_v43 = vmul.f32 %v11282_v62, %v7679_v44  ;;  %v1387_v35 = vmul.f32 %v11313_v33, %v1358_v27  ;;  %v11320_v46 = vld [vmem:[#allocation97_spill] sm:$0xff] }
 0x1dc   : > { %11316 = vst [vmem:[#allocation43_spill] sm:$0xff] %v7737_v38  ;;  %v1522_v39 = vsel %vm1506_vm2, %v11318_v63, %v1497_v34  ;;  %v1325_v55 = vadd.f32 %v1309_v16, %v1288_v32  ;;  %v1402_v58 = vadd.f32 %v1386_v61, %v1324_v41  ;;  %v1464_v13 = vmul.f32 %v11320_v46, %v7737_v38  ;;  %v7763_v63 = vpop.f32.mrb[1].mxu1  ;;  %v7768_v41 = vld [vmem:[%s10755_s8] sm:$0xf] }
 0x1dd   : > { %11319 = vst [vmem:[#allocation15_spill] sm:$0xff] %v7749_v43  ;;  %v1465_v11 = vmul.f32 %v11320_v46, %v1436_v31  ;;  %v1542_v17 = vmul.f32 %v11322_v9, %v1522_v39  ;;  %v1543_v40 = vmul.f32 %v11322_v9, %v1514_v36  ;;  %v7761_v34 = vmul.f32 %v11284_v19, %v7690_v50  ;;  %v7778_v14 = vpop.f32.mrb[2].mxu1 }
 0x1de   : > { %11324 = vst [vmem:[#allocation68_spill] sm:$0xff] %v7763_v63  ;;  %11325 = vst [vmem:[#allocation96_spill] sm:$0xff] %v7768_v41  ;;  %v1403_v16 = vadd.f32 %v1387_v35, %v1325_v55  ;;  %v1480_v32 = vadd.f32 %v1464_v13, %v1402_v58  ;;  %v7772_v61 = vmul.f32 %v11277_v23, %v7650_v37  ;;  %5299 = vmatprep.subr.msk.bf16.mxu1 %vm583_vm0, %v7768_v41  ;;  %v11334_v55 = vld [vmem:[#allocation42_spill] sm:$0xff] }
 0x1df   : > { %11323 = vst [vmem:[#allocation69_spill] sm:$0xff] %v7761_v34  ;;  %v7776_v43 = vmul.f32 %v11327_v59, %v7717_v52  ;;  %11329 = vst [vmem:[#allocation52_spill] sm:$0xff] %v7778_v14  ;;  %v7783_v63 = vmul.f32 %v11327_v59, %v1358_v27  ;;  %v11331_v34 = vld [vmem:[#allocation6_spill] sm:$0xff]  ;;  %v7793_v13 = vmul.f32 %v11334_v55, %v1522_v39 }
 0x1e0   : > { %11326 = vst [vmem:[#allocation97_spill] sm:$0xff] %v7772_v61  ;;  %v7787_v35 = vmul.f32 %v11331_v34, %v7737_v38  ;;  %v7790_v58 = vmul.f32 %v11331_v34, %v1436_v31  ;;  %v7795_v61 = vpop.f32.mrb[3].mxu1  ;;  %v7797_v14 = vadd.f32 %v1542_v17, %v1480_v32  ;;  %v7800_v41 = vmul.f32 %v11334_v55, %v1514_v36  ;;  %v7821_v17 = vld [vmem:[%s10753_s6 + $0x12] ss:$0 sm:$0xff] }
 0x1e1   : > { %11328 = vst [vmem:[#allocation98_spill] sm:$0xff] %v7776_v43  ;;  %11330 = vst [vmem:[#allocation99_spill] sm:$0xff] %v7783_v63  ;;  %v1481_v43 = vadd.f32 %v1465_v11, %v1403_v16  ;;  %v7804_v63 = vmul.f32 %v7557_v57, %v7673_v10  ;;  %v7816_v11 = vmul.f32 %v7535_v48, %v7650_v37 }
 0x1e2   : > { %11332 = vst [vmem:[#allocation6_spill] sm:$0xff] %v7787_v35  ;;  %11333 = vst [vmem:[#allocation100_spill] sm:$0xff] %v7790_v58  ;;  %v7808_v35 = vmul.f32 %v7565_v6, %v7679_v44  ;;  %v7812_v58 = vmul.f32 %v7574_v56, %v7690_v50  ;;  %v7825_v16 = vmul.f32 %v7821_v17, %v7717_v52 }
 0x1e3   : > { %11335 = vst [vmem:[#allocation42_spill] sm:$0xff] %v7793_v13  ;;  %11336 = vst [vmem:[#allocation101_spill] sm:$0xff] %v7795_v61  ;;  %v7827_v32 = vadd.f32 %v1543_v40, %v1481_v43  ;;  %v7830_v61 = vmul.f32 %v7821_v17, %v1358_v27  ;;  %v7847_v40 = vld [vmem:[%s10753_s6 + $0x14] ss:$0 sm:$0xff] }
 0x1e4   : > { %11337 = vst [vmem:[#allocation102_spill] sm:$0xff] %v7797_v14  ;;  %11338 = vst [vmem:[#allocation103_spill] sm:$0xff] %v7800_v41  ;;  %v7835_v41 = vld [vmem:[%s10753_s6 + $0x13] ss:$0 sm:$0xff]  ;;  %v7850_v43 = vmul.f32 %v7847_v40, %v1522_v39  ;;  %v950_v14 = vmax.f32 %v7486_v54, 0.0 }
 0x1e5   : > { %11339 = vst [vmem:[#allocation104_spill] sm:$0xff] %v7816_v11  ;;  %11340 = vst [vmem:[#allocation105_spill] sm:$0xff] %v7825_v16  ;;  %v7839_v11 = vmul.f32 %v7835_v41, %v7737_v38  ;;  %v7842_v13 = vmul.f32 %v7835_v41, %v1436_v31  ;;  %v7869_v16 = vmul.f32 %v7600_v28, %v7650_v37 }
 0x1e6   : > { %11341 = vst [vmem:[#allocation106_spill] sm:$0xff] %v7827_v32  ;;  %11342 = vst [vmem:[#allocation107_spill] sm:$0xff] %v7830_v61  ;;  %v7853_v32 = vmul.f32 %v7847_v40, %v1514_v36  ;;  %v7857_v61 = vmul.f32 %v7582_v3, %v7673_v10 }
 0x1e7   : > { %11343 = vst [vmem:[#allocation108_spill] sm:$0xff] %v7839_v11  ;;  %11344 = vst [vmem:[#allocation109_spill] sm:$0xff] %v7842_v13  ;;  %v7861_v11 = vmul.f32 %v7356_v53, %v7679_v44  ;;  %v7865_v13 = vmul.f32 %v7367_v15, %v7690_v50  ;;  %v7886_v50 = vld [vmem:[%s10753_s6 + $0x1a] ss:$0 sm:$0xff] }
 0x1e8   : > { %11345 = vst [vmem:[#allocation110_spill] sm:$0xff] %v7850_v43  ;;  %11346 = vst [vmem:[#allocation111_spill] sm:$0xff] %v7853_v32  ;;  %v7874_v32 = vld [vmem:[%s10753_s6 + $0x19] ss:$0 sm:$0xff]  ;;  %v7890_v37 = vmul.f32 %v7886_v50, %v7737_v38 }
 0x1e9   : > { %11347 = vst [vmem:[#allocation112_spill] sm:$0xff] %v7865_v13  ;;  %11348 = vst [vmem:[#allocation113_spill] sm:$0xff] %v7869_v16  ;;  %v7878_v43 = vmul.f32 %v7874_v32, %v7717_v52  ;;  %v7881_v44 = vmul.f32 %v7874_v32, %v1358_v27  ;;  %v7893_v16 = vmul.f32 %v7886_v50, %v1436_v31  ;;  %v7898_v52 = vld [vmem:[%s10753_s6 + $0x1b] ss:$0 sm:$0xff]  ;;  %v961_v13 = vadd.s32 1, %v7494_v7 }
 0x1ea   : > { %11351 = vst [vmem:[#allocation116_spill] sm:$0xff] %v7890_v37  ;;  %v7901_v27 = vmul.f32 %v7898_v52, %v1522_v39  ;;  %v11355_v37 = vld [vmem:[#allocation72_spill] sm:$0xff]  ;;  %v11356_v31 = vld [vmem:[#allocation78_spill] sm:$0xff]  ;;  %v7915_v39 = vmul.f32 %v7898_v52, %v1514_v36 }
 0x1eb   : > { %11349 = vst [vmem:[#allocation114_spill] sm:$0xff] %v7878_v43  ;;  %11350 = vst [vmem:[#allocation115_spill] sm:$0xff] %v7881_v44  ;;  %v11354_v44 = vmax.f32 %v7446_v29, 0.0  ;;  %v2008_v38 = vadd.f32 %v11355_v37, %v7478_v5  ;;  %v7919_v29 = vmul.f32 %v6767_v47, %v7673_v10  ;;  %v7924_v5 = vld [vmem:[#allocation2 + $0x100] sm:$0xff]  ;;  %vm967_vm13 = vcmp.ge.s32.totalorder %v961_v13, 3  ;;  %v7928_v37 = vld [vmem:[#allocation2 + $0x138] sm:$0xff] }
 0x1ec   : > { %11352 = vst [vmem:[#allocation117_spill] sm:$0xff] %v7893_v16  ;;  %11353 = vst [vmem:[#allocation118_spill] sm:$0xff] %v7901_v27  ;;  %v2461_v16 = vadd.f32 %v11356_v31, %v7482_v1  ;;  %vm973_vm4 = vcmp.lt.s32.totalorder %v961_v13, 19  ;;  %v11362_v36 = vld [vmem:[#allocation74_spill] sm:$0xff]  ;;  %v11363_v47 = vmov 0  ;;  %v11366_v13 = vmov 0 }
 0x1ed   : > { %v761_v43 = vsel %vm7421_vm9, %v11354_v44, 0.0  ;;  %11357 = vst [vmem:[#allocation72_spill] sm:$0xff] %v7915_v39  ;;  %11358 = vst [vmem:[#allocation78_spill] sm:$0xff] %v7919_v29  ;;  %v902_v44 = vadd.f32 %v7451_v18, %v11359_v4  ;;  %v7931_v31 = vadd.f32 %v11362_v36, %v2008_v38  ;;  %v11367_v13 = vsel %vm7941_vm7, 4294967295, %v11366_v13  ;;  %v11369_v36 = vld [vmem:[#allocation9_spill] sm:$0xff]  ;;  %v7951_v39 = vld [vmem:[#allocation2 + $0x118] sm:$0xff] }
 0x1ee   : > { %777 = vst.msk [vmem:[#allocation2 + $0xd0] sm:$0xff] %vm451_vm1, %v761_v43  ;;  %v11360_v43 = vld [vmem:[#allocation80_spill] sm:$0xff]  ;;  %11361 = vst [vmem:[#allocation24_spill] sm:$0xff] %v7928_v37  ;;  %v7949_v54 = vadd.f32 %v11369_v36, %v7451_v18  ;;  %v7978_v38 = vadd.f32 %v7459_v26, %v7451_v18  ;;  %v7984_v27 = vadd.s32 3, %v7494_v7  ;;  %v11381_v37 = vrot.slane %v7541_v30, 6 }
 0x1ef   : > { %v2538_v1 = vadd.f32 %v11360_v43, %v2461_v16  ;;  %vm7933_vm5 = vmand %vm967_vm13, %vm973_vm4  ;;  %v948_v4 = vmax.f32 %v902_v44, 0.0  ;;  %11368 = vst [vmem:[#allocation74_spill] sm:$0xff] %v11367_v13  ;;  %v11372_v44 = vld [vmem:[#allocation82_spill] sm:$0xff] }
 0x1f0   : > { %v11364_v47 = vsel %vm7933_vm5, 4294967295, %v11363_v47  ;;  %v998_v16 = vsel %vm7933_vm5, %v950_v14, 0.0  ;;  %11370 = vst [vmem:[#allocation9_spill] sm:$0xff] %v7949_v54  ;;  %11371 = vst [vmem:[#allocation119_spill] sm:$0xff] %v7951_v39 }
 0x1f1   : > { %11365 = vst [vmem:[#allocation80_spill] sm:$0xff] %v11364_v47  ;;  %v7954_v10 = vadd.f32 %v11372_v44, %v2538_v1  ;;  %1011 = vst.msk [vmem:[#allocation2 + $0x128] sm:$0xff] %vm451_vm1, %v998_v16  ;;  %v996_v14 = vsel %vm7941_vm7, %v948_v4, 0.0  ;;  %v11373_v47 = vld [vmem:[#allocation75_spill] sm:$0xff] }
 0x1f2   : > { %1009 = vst.msk [vmem:[#allocation2 + $0x108] sm:$0xff] %vm451_vm1, %v996_v14  ;;  %v7967_v1 = vadd.f32 %v7451_v18, %v11373_v47  ;;  %v7969_v16 = vld [vmem:[#allocation2 + $0x160] sm:$0xff]  ;;  %11376 = vst [vmem:[#allocation120_spill] sm:$0xff] %v7978_v38  ;;  %v11390_v38 = vrot.slane %v7433_v12, 3 }
 0x1f3   : > { %11375 = vst [vmem:[#allocation75_spill] sm:$0xff] %v7969_v16  ;;  %11377 = vst [vmem:[#allocation121_spill] sm:$0xff] %v7984_v27 }
 0x1f4   : > { %11374 = vst [vmem:[#allocation82_spill] sm:$0xff] %v7967_v1 }
 0x1f5   : > { %v7971_v44 = vld [vmem:[#allocation2 + $0xd0] sm:$0xff] }
 0x1f6   : > { %v1075_v29 = vrot.slane %v7971_v44, 5  ;;  %v1155_v36 = vrot.slane %v7971_v44, 6  ;;  %v1233_v47 = vrot.slane %v7971_v44, 7  ;;  %v1307_v4 = vmul.f32 %v11267_v42, %v7971_v44 }
 0x1f7   : > { %v7989_v43 = vrot.slane %v7971_v44, 1  ;;  %v7992_v14 = vrot.slane %v7971_v44, 2  ;;  %v1496_v18 = vrot.slane %v7971_v44, 3  ;;  %v2370_v16 = vmul.f32 %v7535_v48, %v7971_v44 }
 0x1f8   : > { %v7998_v39 = vsel %vm1079_vm10, %v7595_v25, %v1075_v29  ;;  %v8004_v7 = vsel %vm1157_vm11, %v11381_v37, %v1155_v36  ;;  %v8009_v42 = vsel %vm1235_vm12, %v7608_v21, %v1233_v47  ;;  %v11384_v25 = vrot.slane %v7433_v12, 1 }
 0x1f9   : > { %11378 = vst [vmem:[#allocation122_spill] sm:$0xff] %v7989_v43  ;;  %11379 = vst [vmem:[#allocation123_spill] sm:$0xff] %v7992_v14  ;;  %v1114_v26 = vmul.f32 %v11275_v24, %v7998_v39  ;;  %v1192_v29 = vmul.f32 %v11276_v20, %v8004_v7  ;;  %v1840_v36 = vmul.f32 %v11277_v23, %v7971_v44  ;;  %v11385_v47 = vrot.slane %v7541_v30, 1 }
 0x1fa   : > { %11380 = vst [vmem:[#allocation124_spill] sm:$0xff] %v7998_v39  ;;  %11382 = vst [vmem:[#allocation125_spill] sm:$0xff] %v8004_v7  ;;  %v8021_v37 = vsel %vm1350_vm14, %v7989_v43, %v11384_v25  ;;  %v11387_v24 = vrot.slane %v7433_v12, 2  ;;  %v11388_v25 = vrot.slane %v7541_v30, 2  ;;  %v1726_v12 = vmul.f32 %v11282_v62, %v8004_v7 }
 0x1fb   : > { %11383 = vst [vmem:[#allocation126_spill] sm:$0xff] %v8009_v42  ;;  %v8030_v21 = vsel %vm1350_vm14, %v11385_v47, %v7989_v43  ;;  %v1208_v13 = vadd.f32 %v1192_v29, %v1114_v26  ;;  %v1270_v47 = vmul.f32 %v11280_v22, %v8009_v42  ;;  %v11391_v26 = vrot.slane %v7541_v30, 3 }
 0x1fc   : > { %11386 = vst [vmem:[#allocation127_spill] sm:$0xff] %v8030_v21  ;;  %v8037_v20 = vsel %vm1428_vm15, %v7992_v14, %v11387_v24  ;;  %v8044_v23 = vsel %vm1428_vm15, %v11388_v25, %v7992_v14  ;;  %v1384_v43 = vmul.f32 %v11313_v33, %v8030_v21  ;;  %v1385_v24 = vmul.f32 %v11313_v33, %v8021_v37 }
 0x1fd   : > { %11389 = vst [vmem:[#allocation128_spill] sm:$0xff] %v8044_v23  ;;  %v1462_v27 = vmul.f32 %v11320_v46, %v8044_v23  ;;  %v8060_v25 = vsel %vm1506_vm2, %v1496_v18, %v11390_v38  ;;  %v8066_v22 = vsel %vm1506_vm2, %v11391_v26, %v1496_v18  ;;  %v1649_v29 = vmul.f32 %v11281_v8, %v7998_v39  ;;  %v11392_v18 = vld [vmem:[#allocation76_spill] sm:$0xff] }
 0x1fe   : > { %v1286_v14 = vadd.f32 %v1270_v47, %v1208_v13  ;;  %v1400_v33 = vadd.f32 %v1384_v43, %v7681_v0  ;;  %v1463_v1 = vmul.f32 %v11320_v46, %v8037_v20  ;;  %v1540_v38 = vmul.f32 %v11322_v9, %v8066_v22 }
 0x1ff   : > { %v1541_v30 = vmul.f32 %v11322_v9, %v8060_v25  ;;  %v1665_v26 = vadd.f32 %v1649_v29, %v11392_v18  ;;  %v1916_v8 = vmul.f32 %v11327_v59, %v8030_v21  ;;  %v1803_v0 = vmul.f32 %v11284_v19, %v8009_v42 }
 0x200   : > { %v1323_v13 = vadd.f32 %v1307_v4, %v1286_v14  ;;  %v1478_v47 = vadd.f32 %v1462_v27, %v1400_v33  ;;  %v1917_v46 = vmul.f32 %v11327_v59, %v8021_v37  ;;  %v1993_v54 = vmul.f32 %v11331_v34, %v8044_v23 }
 0x201   : > { %v1742_v62 = vadd.f32 %v1726_v12, %v1665_v26  ;;  %v1932_v43 = vadd.f32 %v1916_v8, %v7692_v2  ;;  %v1994_v9 = vmul.f32 %v11331_v34, %v8037_v20  ;;  %v2070_v27 = vmul.f32 %v11334_v55, %v8066_v22 }
 0x202   : > { %v1401_v29 = vadd.f32 %v1385_v24, %v1323_v13  ;;  %v1556_v18 = vadd.f32 %v1540_v38, %v1478_v47  ;;  %v2179_v19 = vmul.f32 %v7557_v57, %v7998_v39  ;;  %v2071_v59 = vmul.f32 %v11334_v55, %v8060_v25  ;;  %v11393_v55 = vld [vmem:[#allocation40_spill] sm:$0xff] }
 0x203   : > { %v1819_v4 = vadd.f32 %v1803_v0, %v1742_v62  ;;  %v2009_v14 = vadd.f32 %v1993_v54, %v1932_v43  ;;  %v2446_v2 = vmul.f32 %v7821_v17, %v8030_v21  ;;  %v2256_v24 = vmul.f32 %v7565_v6, %v8004_v7  ;;  %v11394_v62 = vld [vmem:[#allocation34_spill] sm:$0xff] }
 0x204   : > { %v1479_v33 = vadd.f32 %v1463_v1, %v1401_v29  ;;  %v1666_v12 = vadd.f32 %v7545_v51, %v1556_v18  ;;  %v2195_v34 = vadd.f32 %v2179_v19, %v7931_v31  ;;  %v2523_v54 = vmul.f32 %v7835_v41, %v8044_v23  ;;  %v11395_v29 = vld [vmem:[#allocation31_spill] sm:$0xff] }
 0x205   : > { %v1856_v38 = vadd.f32 %v1840_v36, %v1819_v4  ;;  %v2086_v26 = vadd.f32 %v2070_v27, %v2009_v14  ;;  %v2462_v8 = vadd.f32 %v2446_v2, %v7705_v45  ;;  %v2333_v1 = vmul.f32 %v7574_v56, %v8009_v42  ;;  %v11396_v4 = vld [vmem:[#allocation3_spill] sm:$0xff] }
 0x206   : > { %v1557_v13 = vadd.f32 %v1541_v30, %v1479_v33  ;;  %v1743_v47 = vadd.f32 %v11393_v55, %v1666_v12  ;;  %v2272_v0 = vadd.f32 %v2256_v24, %v2195_v34  ;;  %v2600_v36 = vmul.f32 %v7847_v40, %v8066_v22  ;;  %v11397_v33 = vld [vmem:[#allocation15_spill] sm:$0xff]  ;;  %v11398_v34 = vld [vmem:[#allocation32_spill] sm:$0xff] }
 0x207   : > { %v1933_v51 = vadd.f32 %v1917_v46, %v1856_v38  ;;  %v2196_v31 = vadd.f32 %v11394_v62, %v2086_v26  ;;  %v2539_v43 = vadd.f32 %v2523_v54, %v2462_v8  ;;  %v2447_v27 = vmul.f32 %v7821_v17, %v8021_v37 }
 0x208   : > { %v1667_v18 = vadd.f32 %v11395_v29, %v1557_v13  ;;  %v2349_v45 = vadd.f32 %v2333_v1, %v2272_v0  ;;  %v2524_v30 = vmul.f32 %v7835_v41, %v8037_v20  ;;  %v2709_v46 = vmul.f32 %v7582_v3, %v7998_v39  ;;  %v11399_v13 = vld [vmem:[#allocation26_spill] sm:$0xff] }
 0x209   : > { %v2010_v19 = vadd.f32 %v1994_v9, %v1933_v51  ;;  %v2273_v14 = vadd.f32 %v11396_v4, %v2196_v31  ;;  %v2616_v2 = vadd.f32 %v2600_v36, %v2539_v43  ;;  %v1820_v24 = vadd.f32 %v11398_v34, %v1743_v47  ;;  %v11400_v0 = vld [vmem:[#allocation22_spill] sm:$0xff]  ;;  %v11401_v47 = vld [vmem:[#allocation69_spill] sm:$0xff]  ;;  %v8145_v4 = vld [vmem:[#allocation2 + $0x128] sm:$0xff] }
 0x20a   : > { %v1744_v12 = vadd.f32 %v11397_v33, %v1667_v18  ;;  %v2386_v38 = vadd.f32 %v2370_v16, %v2349_v45  ;;  %v2601_v26 = vmul.f32 %v7847_v40, %v8060_v25  ;;  %v2725_v54 = vadd.f32 %v2709_v46, %v7954_v10  ;;  %v11402_v43 = vld [vmem:[#allocation38_spill] sm:$0xff]  ;;  %v11404_v33 = vld [vmem:[#allocation5_spill] sm:$0xff] }
 0x20b   : > { %v2087_v8 = vadd.f32 %v2071_v59, %v2010_v19  ;;  %v2726_v55 = vadd.f32 %v11399_v13, %v2616_v2  ;;  %v2786_v9 = vmul.f32 %v7356_v53, %v8004_v7  ;;  %v8129_v1 = vadd.f32 %v11400_v0, %v2273_v14  ;;  %v11403_v45 = vld [vmem:[#allocation70_spill] sm:$0xff] }
 0x20c   : > { %v2463_v51 = vadd.f32 %v2447_v27, %v2386_v38  ;;  %v2863_v62 = vmul.f32 %v7367_v15, %v8009_v42  ;;  %v2976_v16 = vmul.f32 %v7874_v32, %v8030_v21  ;;  %v8136_v31 = vadd.f32 %v11401_v47, %v1744_v12  ;;  %v11436_v21 = vld [vmem:[#allocation97_spill] sm:$0xff] }
 0x20d   : > { %v2197_v10 = vadd.f32 %v7804_v63, %v2087_v8  ;;  %v2802_v59 = vadd.f32 %v2786_v9, %v2725_v54  ;;  %v2803_v36 = vadd.f32 %v11402_v43, %v2726_v55  ;;  %v2900_v18 = vmul.f32 %v7600_v28, %v7971_v44  ;;  %v8172_v54 = vld [vmem:[%s10753_s6 + $0x1c] ss:$0 sm:$0xff] }
 0x20e   : > { %v2540_v29 = vadd.f32 %v2524_v30, %v2463_v51  ;;  %v2992_v27 = vadd.f32 %v2976_v16, %v11403_v45  ;;  %v3053_v19 = vmul.f32 %v7886_v50, %v8044_v23  ;;  %v2977_v63 = vmul.f32 %v7874_v32, %v8021_v37 }
 0x20f   : > { %v2274_v14 = vadd.f32 %v7808_v35, %v2197_v10  ;;  %v2879_v2 = vadd.f32 %v2863_v62, %v2802_v59  ;;  %v3054_v46 = vmul.f32 %v7886_v50, %v8037_v20  ;;  %v8153_v12 = vadd.f32 %v11404_v33, %v2803_v36  ;;  %v8207_v59 = vld [vmem:[#allocation2 + $0x108] sm:$0xff] }
 0x210   : > { %v2617_v30 = vadd.f32 %v2601_v26, %v2540_v29  ;;  %v8155_v44 = vadd.f32 %v3053_v19, %v2992_v27  ;;  %v8159_v34 = vmul.f32 %v7898_v52, %v8066_v22  ;;  %v8163_v35 = vmul.f32 %v7898_v52, %v8060_v25  ;;  %v11416_v29 = vld [vmem:[#allocation112_spill] sm:$0xff] }
 0x211   : > { %11405 = vst [vmem:[#allocation76_spill] sm:$0xff] %v8153_v12  ;;  %v2916_v38 = vadd.f32 %v2900_v18, %v2879_v2  ;;  %v10898_v37 = vrot.slane %v8145_v4, 5  ;;  %v10897_v8 = vrot.slane %v8145_v4, 6  ;;  %v2351_v20 = vadd.f32 %v7812_v58, %v2274_v14 }
 0x212   : > { %11406 = vst [vmem:[#allocation40_spill] sm:$0xff] %v8155_v44  ;;  %11407 = vst [vmem:[#allocation34_spill] sm:$0xff] %v8159_v34  ;;  %v2727_v26 = vadd.f32 %v7857_v61, %v2617_v30  ;;  %v8176_v22 = vmul.f32 %v8172_v54, %v7998_v39  ;;  %v8179_v25 = vrot.slane %v8145_v4, 7  ;;  %v11411_v55 = vrot.slane %v7468_v60, 5  ;;  %v11430_v34 = vld [vmem:[#allocation42_spill] sm:$0xff]  ;;  %v11443_v39 = vld [vmem:[#allocation107_spill] sm:$0xff] }
 0x213   : > { %11408 = vst [vmem:[#allocation31_spill] sm:$0xff] %v8163_v35  ;;  %v2993_v13 = vadd.f32 %v2977_v63, %v2916_v38  ;;  %v11412_v58 = vrot.slane %v7468_v60, 6  ;;  %v8197_v0 = vmul.f32 %v7535_v48, %v8145_v4  ;;  %v11414_v62 = vrot.slane %v7468_v60, 7  ;;  %v8250_v38 = vld [vmem:[%s10753_s6 + $0xa] ss:$0 sm:$0xff] }
 0x214   : > { %11409 = vst [vmem:[#allocation3_spill] sm:$0xff] %v8176_v22  ;;  %11410 = vst [vmem:[#allocation15_spill] sm:$0xff] %v8179_v25  ;;  %v2164_v61 = vsel %vm1079_vm10, %v11411_v55, %v10898_v37  ;;  %v2804_v51 = vadd.f32 %v7861_v11, %v2727_v26  ;;  %v10896_v2 = vrot.slane %v8207_v59, 5  ;;  %v10895_v63 = vrot.slane %v8207_v59, 6  ;;  %v11427_v37 = vld [vmem:[#allocation102_spill] sm:$0xff] }
 0x215   : > { %v8193_v9 = vsel %vm1157_vm11, %v11412_v58, %v10897_v8  ;;  %v2318_v16 = vsel %vm1235_vm12, %v11414_v62, %v8179_v25  ;;  %v8209_v43 = vadd.f32 %v3054_v46, %v2993_v13  ;;  %v8212_v36 = vmul.f32 %v7557_v57, %v2164_v61  ;;  %v11421_v13 = vld [vmem:[#allocation8_spill] sm:$0xff] }
 0x216   : > { %11413 = vst [vmem:[#allocation32_spill] sm:$0xff] %v8193_v9  ;;  %v8216_v11 = vmul.f32 %v7565_v6, %v8193_v9  ;;  %v8219_v60 = vmul.f32 %v7574_v56, %v2318_v16  ;;  %v8222_v18 = vadd.f32 %v11416_v29, %v2804_v51  ;;  %v8226_v27 = vmul.f32 %v7582_v3, %v2164_v61  ;;  %v8293_v29 = vld [vmem:[%s10753_s6 + $0x9] ss:$0 sm:$0xff] }
 0x217   : > { %11415 = vst [vmem:[#allocation26_spill] sm:$0xff] %v8209_v43  ;;  %v8230_v19 = vmul.f32 %v7356_v53, %v8193_v9  ;;  %v8233_v14 = vmul.f32 %v7367_v15, %v2318_v16  ;;  %v8238_v46 = vrot.slane %v8207_v59, 7  ;;  %v8242_v30 = vmul.f32 %v7600_v28, %v8145_v4 }
 0x218   : > { %11417 = vst [vmem:[#allocation22_spill] sm:$0xff] %v8222_v18  ;;  %v8245_v33 = vmul.f32 %v8172_v54, %v2164_v61  ;;  %v1843_v26 = vmul.f32 %v8250_v38, %v8207_v59  ;;  %v1857_v55 = vadd.f32 %v11421_v13, %v1820_v24  ;;  %v11422_v58 = vrot.slane %v7924_v5, 5  ;;  %v8278_v13 = vld [vmem:[%s10753_s6 + $0x7] ss:$0 sm:$0xff] }
 0x219   : > { %11418 = vst [vmem:[#allocation69_spill] sm:$0xff] %v8238_v46  ;;  %11419 = vst [vmem:[#allocation38_spill] sm:$0xff] %v8242_v30  ;;  %v11423_v61 = vrot.slane %v7924_v5, 6  ;;  %v11425_v16 = vrot.slane %v7924_v5, 7  ;;  %v2373_v18 = vmul.f32 %v7535_v48, %v8207_v59  ;;  %v1858_v42 = vadd.f32 %v11436_v21, %v8136_v31  ;;  %v11444_v31 = vld [vmem:[#allocation110_spill] sm:$0xff] }
 0x21a   : > { %11420 = vst [vmem:[#allocation70_spill] sm:$0xff] %v8245_v33  ;;  %v1632_v51 = vsel %vm1079_vm10, %v11422_v58, %v10896_v2  ;;  %v11428_v33 = vld [vmem:[#allocation6_spill] sm:$0xff] }
 0x21b   : > { %v8267_v62 = vsel %vm1157_vm11, %v11423_v61, %v10895_v63  ;;  %v1786_v24 = vsel %vm1235_vm12, %v11425_v16, %v8238_v46  ;;  %v1652_v58 = vmul.f32 %v8278_v13, %v1632_v51  ;;  %v8284_v61 = vld [vmem:[%s10753_s6 + $0x8] ss:$0 sm:$0xff]  ;;  %v11426_v63 = vld [vmem:[#allocation98_spill] sm:$0xff]  ;;  %v2182_v47 = vmul.f32 %v7557_v57, %v1632_v51  ;;  %v11429_v16 = vld [vmem:[#allocation39_spill] sm:$0xff] }
 0x21c   : > { %11424 = vst [vmem:[#allocation5_spill] sm:$0xff] %v8267_v62  ;;  %v1729_v5 = vmul.f32 %v8284_v61, %v8267_v62  ;;  %v1934_v2 = vadd.f32 %v11426_v63, %v1857_v55  ;;  %v1806_v45 = vmul.f32 %v8293_v29, %v1786_v24  ;;  %v2259_v8 = vmul.f32 %v7565_v6, %v8267_v62 }
 0x21d   : > { %v1668_v30 = vadd.f32 %v1652_v58, %v11427_v37  ;;  %v2336_v55 = vmul.f32 %v7574_v56, %v1786_v24  ;;  %v2387_v9 = vadd.f32 %v11429_v16, %v8129_v1  ;;  %v2712_v12 = vmul.f32 %v7582_v3, %v1632_v51  ;;  %v11431_v58 = vld [vmem:[#allocation105_spill] sm:$0xff]  ;;  %v11435_v16 = vld [vmem:[#allocation82_spill] sm:$0xff] }
 0x21e   : > { %v2011_v63 = vadd.f32 %v11428_v33, %v1934_v2  ;;  %v2789_v10 = vmul.f32 %v7356_v53, %v8267_v62  ;;  %v2866_v35 = vmul.f32 %v7367_v15, %v1786_v24  ;;  %v11432_v33 = vld [vmem:[#allocation9_spill] sm:$0xff]  ;;  %v949_v22 = vmax.f32 %v11435_v16, 0.0  ;;  %v11437_v62 = vld [vmem:[#allocation104_spill] sm:$0xff] }
 0x21f   : > { %v1745_v43 = vadd.f32 %v1729_v5, %v1668_v30  ;;  %v2464_v2 = vadd.f32 %v11431_v58, %v2387_v9  ;;  %v11433_v44 = vmax.f32 %v11432_v33, 0.0  ;;  %v2388_v7 = vadd.f32 %v11437_v62, %v2351_v20  ;;  %v11438_v24 = vld [vmem:[#allocation120_spill] sm:$0xff]  ;;  %v11440_v58 = vld [vmem:[#allocation121_spill] sm:$0xff]  ;;  %v11454_v33 = vld [vmem:[#allocation103_spill] sm:$0xff] }
 0x220   : > { %v2088_v37 = vadd.f32 %v11430_v34, %v2011_v63  ;;  %v954_v30 = vmax.f32 %v11438_v24, 0.0  ;;  %v11439_v63 = vld [vmem:[#allocation108_spill] sm:$0xff]  ;;  %vm969_vm8 = vcmp.ge.s32.totalorder %v11440_v58, 3  ;;  %v997_v23 = vsel %vm7941_vm7, %v949_v22, 0.0  ;;  %v11450_v22 = vld [vmem:[#allocation109_spill] sm:$0xff] }
 0x221   : > { %v999_v1 = vsel %vm7933_vm5, %v11433_v44, 0.0  ;;  %v1822_v5 = vadd.f32 %v1806_v45, %v1745_v43  ;;  %v2541_v9 = vadd.f32 %v11439_v63, %v2464_v2  ;;  %v11442_v44 = vld [vmem:[#allocation99_spill] sm:$0xff]  ;;  %v2465_v16 = vadd.f32 %v11443_v39, %v2388_v7  ;;  %1010 = vst.msk [vmem:[#allocation2 + $0x110] sm:$0xff] %vm451_vm1, %v997_v23  ;;  %v11449_v7 = vld [vmem:[#allocation100_spill] sm:$0xff] }
 0x222   : > { %1012 = vst.msk [vmem:[#allocation2 + $0x130] sm:$0xff] %vm451_vm1, %v999_v1  ;;  %v2198_v34 = vadd.f32 %v2182_v47, %v2088_v37  ;;  %v1935_v1 = vadd.f32 %v11442_v44, %v1858_v42  ;;  %vm975_vm9 = vcmp.lt.s32.totalorder %v11440_v58, 19  ;;  %v2903_v43 = vmul.f32 %v7600_v28, %v8207_v59  ;;  %v8341_v42 = vld [vmem:[#allocation2 + $0x140] sm:$0xff]  ;;  %v11451_v37 = vld [vmem:[#allocation49_spill] sm:$0xff]  ;;  %v11452_v2 = vld [vmem:[#allocation20_spill] sm:$0xff] }
 0x223   : > { %v2618_v20 = vadd.f32 %v11444_v31, %v2541_v9  ;;  %v8334_v47 = vmul.f32 %v8172_v54, %v1632_v51  ;;  %vm8337_vm3 = vmand %vm969_vm8, %vm975_vm9  ;;  %v11446_v45 = vmov 0  ;;  %v8349_v24 = vadd.f32 %v11452_v2, %v11451_v37  ;;  %v11453_v9 = vld [vmem:[#allocation75_spill] sm:$0xff] }
 0x224   : > { %v2275_v21 = vadd.f32 %v2259_v8, %v2198_v34  ;;  %v11447_v45 = vsel %vm8337_vm3, 4294967295, %v11446_v45  ;;  %v2012_v39 = vadd.f32 %v11449_v7, %v1935_v1  ;;  %v2542_v8 = vadd.f32 %v11450_v22, %v2465_v16  ;;  %v11455_v44 = vld [vmem:[#allocation111_spill] sm:$0xff]  ;;  %v11456_v16 = vld [vmem:[#allocation54_spill] sm:$0xff] }
 0x225   : > { %11445 = vst [vmem:[#allocation112_spill] sm:$0xff] %v8334_v47  ;;  %11448 = vst [vmem:[#allocation8_spill] sm:$0xff] %v11447_v45  ;;  %v1002_v62 = vsel %vm8337_vm3, %v954_v30, 0.0  ;;  %v8351_v51 = vadd.f32 %v1843_v26, %v1822_v5  ;;  %v2728_v63 = vadd.f32 %v2712_v12, %v2618_v20  ;;  %v8362_v30 = vadd.s32 2, %v11456_v16 }
 0x226   : > { %v2352_v34 = vadd.f32 %v2336_v55, %v2275_v21  ;;  %1015 = vst.msk [vmem:[#allocation2 + $0x168] sm:$0xff] %vm451_vm1, %v1002_v62  ;;  %v8356_v23 = vadd.f32 %v11454_v33, %v2012_v39  ;;  %v8359_v1 = vadd.f32 %v11455_v44, %v2542_v8  ;;  %v11470_v31 = vrot.slane %v8145_v4, 2 }
 0x227   : > { %v2805_v26 = vadd.f32 %v2789_v10, %v2728_v63  ;;  %v11500_v16 = vrot.slane %v8207_v59, 2  ;;  %vm968_vm13 = vcmp.ge.s32.totalorder %v8362_v30, 3  ;;  %vm974_vm4 = vcmp.lt.s32.totalorder %v8362_v30, 19 }
 0x228   : > { %v8365_v7 = vadd.f32 %v2373_v18, %v2352_v34  ;;  %v11460_v18 = vrot.slane %v8145_v4, 5  ;;  %v11461_v34 = vrot.slane %v8145_v4, 6  ;;  %v8460_v45 = vld [vmem:[#allocation2 + $0x110] sm:$0xff]  ;;  %vm8651_vm5 = vmand %vm968_vm13, %vm974_vm4 }
 0x229   : > { %v2123_v55 = vld [vmem:[#allocation2 + $0x130] sm:$0xff]  ;;  %v2882_v8 = vadd.f32 %v2866_v35, %v2805_v26 }
 0x22a   : > { %v2148_v21 = vrot.slane %v2123_v55, 5  ;;  %v2225_v20 = vrot.slane %v2123_v55, 6  ;;  %v2302_v39 = vrot.slane %v2123_v55, 7  ;;  %v8370_v22 = vmul.f32 %v7535_v48, %v2123_v55 }
 0x22b   : > { %v8372_v62 = vrot.slane %v2123_v55, 1  ;;  %v8374_v37 = vrot.slane %v2123_v55, 2  ;;  %v2562_v2 = vrot.slane %v2123_v55, 3  ;;  %v8392_v33 = vmul.f32 %v7600_v28, %v2123_v55 }
 0x22c   : > { %11457 = vst [vmem:[#allocation98_spill] sm:$0xff] %v8370_v22  ;;  %v2156_v10 = vsel %vm1079_vm10, %v11460_v18, %v2148_v21  ;;  %v8384_v63 = vsel %vm1157_vm11, %v11461_v34, %v2225_v20  ;;  %v8389_v35 = vsel %vm1235_vm12, %v8179_v25, %v2302_v39  ;;  %v8394_v44 = vadd.f32 %v2903_v43, %v2882_v8  ;;  %v11465_v18 = vld [vmem:[#allocation24_spill] sm:$0xff] }
 0x22d   : > { %11458 = vst [vmem:[#allocation102_spill] sm:$0xff] %v8372_v62  ;;  %11459 = vst [vmem:[#allocation6_spill] sm:$0xff] %v8374_v37  ;;  %v8397_v26 = vmul.f32 %v7557_v57, %v2156_v10  ;;  %v8401_v21 = vmul.f32 %v7565_v6, %v8384_v63  ;;  %v8405_v20 = vmul.f32 %v7574_v56, %v8389_v35  ;;  %v11466_v34 = vrot.slane %v11465_v18, 1 }
 0x22e   : > { %11462 = vst [vmem:[#allocation39_spill] sm:$0xff] %v8384_v63  ;;  %11463 = vst [vmem:[#allocation42_spill] sm:$0xff] %v8389_v35  ;;  %v11467_v43 = vrot.slane %v8145_v4, 1  ;;  %v11469_v8 = vrot.slane %v11465_v18, 2  ;;  %v8429_v12 = vsel %vm1428_vm15, %v11470_v31, %v8374_v37  ;;  %v8454_v25 = vmul.f32 %v7582_v3, %v2156_v10 }
 0x22f   : > { %11464 = vst [vmem:[#allocation105_spill] sm:$0xff] %v8392_v33  ;;  %v2424_v55 = vsel %vm1350_vm14, %v8372_v62, %v11466_v34  ;;  %11471 = vst [vmem:[#allocation80_spill] sm:$0xff] %v8429_v12  ;;  %v8440_v58 = vmul.f32 %v7835_v41, %v8429_v12  ;;  %v11476_v33 = vrot.slane %v11465_v18, 3  ;;  %v8458_v47 = vmul.f32 %v7356_v53, %v8384_v63 }
 0x230   : > { %v8417_v39 = vsel %vm1350_vm14, %v11467_v43, %v8372_v62  ;;  %v2501_v5 = vsel %vm1428_vm15, %v8374_v37, %v11469_v8  ;;  %v8436_v43 = vmul.f32 %v7821_v17, %v2424_v55  ;;  %v11477_v37 = vrot.slane %v8145_v4, 3 }
 0x231   : > { %11468 = vst [vmem:[#allocation9_spill] sm:$0xff] %v8417_v39  ;;  %v8433_v34 = vmul.f32 %v7821_v17, %v8417_v39  ;;  %11474 = vst [vmem:[#allocation104_spill] sm:$0xff] %v8440_v58  ;;  %v8443_v8 = vmul.f32 %v7835_v41, %v2501_v5  ;;  %v2578_v31 = vsel %vm1506_vm2, %v2562_v2, %v11476_v33 }
 0x232   : > { %11473 = vst [vmem:[#allocation97_spill] sm:$0xff] %v8436_v43  ;;  %v2586_v62 = vsel %vm1506_vm2, %v11477_v37, %v2562_v2  ;;  %v8466_v18 = vmul.f32 %v7847_v40, %v2578_v31  ;;  %v8470_v4 = vmul.f32 %v7367_v15, %v8389_v35  ;;  %v8474_v37 = vmul.f32 %v7874_v32, %v8417_v39 }
 0x233   : > { %11472 = vst [vmem:[#allocation82_spill] sm:$0xff] %v8433_v34  ;;  %11475 = vst [vmem:[#allocation120_spill] sm:$0xff] %v8443_v8  ;;  %v8463_v8 = vmul.f32 %v7847_v40, %v2586_v62  ;;  %v8477_v2 = vmul.f32 %v7874_v32, %v2424_v55  ;;  %v8481_v53 = vmul.f32 %v7886_v50, %v8429_v12  ;;  %v1693_v55 = vrot.slane %v8460_v45, 6 }
 0x234   : > { %11479 = vst [vmem:[#allocation121_spill] sm:$0xff] %v8466_v18  ;;  %11480 = vst [vmem:[#allocation74_spill] sm:$0xff] %v8470_v4  ;;  %v8484_v33 = vmul.f32 %v7886_v50, %v2501_v5  ;;  %v8487_v63 = vmul.f32 %v7898_v52, %v2586_v62  ;;  %v8490_v15 = vmul.f32 %v7898_v52, %v2578_v31  ;;  %v8501_v5 = vrot.slane %v8460_v45, 1  ;;  %v11499_v18 = vld [vmem:[#allocation106_spill] sm:$0xff] }
 0x235   : > { %11478 = vst [vmem:[#allocation108_spill] sm:$0xff] %v8463_v8  ;;  %11481 = vst [vmem:[#allocation99_spill] sm:$0xff] %v8474_v37  ;;  %v8493_v35 = vmul.f32 %v8172_v54, %v2156_v10  ;;  %v1616_v37 = vrot.slane %v8460_v45, 5  ;;  %v8504_v62 = vrot.slane %v8460_v45, 2  ;;  %v11490_v31 = vrot.slane %v8207_v59, 5 }
 0x236   : > { %11482 = vst [vmem:[#allocation107_spill] sm:$0xff] %v8477_v2  ;;  %11483 = vst [vmem:[#allocation110_spill] sm:$0xff] %v8481_v53  ;;  %v1770_v2 = vrot.slane %v8460_v45, 7  ;;  %v1844_v53 = vmul.f32 %v8250_v38, %v8460_v45  ;;  %v2030_v38 = vrot.slane %v8460_v45, 3 }
 0x237   : > { %11484 = vst [vmem:[#allocation100_spill] sm:$0xff] %v8484_v33  ;;  %11485 = vst [vmem:[#allocation109_spill] sm:$0xff] %v8487_v63  ;;  %v8510_v10 = vsel %vm1079_vm10, %v11490_v31, %v1616_v37  ;;  %v2374_v33 = vmul.f32 %v7535_v48, %v8460_v45  ;;  %v11494_v31 = vld [vmem:[#allocation119_spill] sm:$0xff] }
 0x238   : > { %11486 = vst [vmem:[#allocation49_spill] sm:$0xff] %v8490_v15  ;;  %11487 = vst [vmem:[#allocation20_spill] sm:$0xff] %v8493_v35  ;;  %v11491_v15 = vrot.slane %v8207_v59, 6  ;;  %v1653_v12 = vmul.f32 %v8278_v13, %v8510_v10  ;;  %v8528_v37 = vsel %vm1235_vm12, %v8238_v46, %v1770_v2  ;;  %v11495_v35 = vrot.slane %v11494_v31, 1  ;;  %v5376_v2 = vld [vmem:[%s10753_s6 + $0xb] ss:$0 sm:$0xff] }
 0x239   : > { %11488 = vst [vmem:[#allocation75_spill] sm:$0xff] %v8501_v5  ;;  %11489 = vst [vmem:[#allocation103_spill] sm:$0xff] %v8504_v62  ;;  %v1807_v48 = vmul.f32 %v8293_v29, %v8528_v37  ;;  %v11496_v13 = vrot.slane %v8207_v59, 1  ;;  %v11498_v46 = vrot.slane %v11494_v31, 2 }
 0x23a   : > { %v8516_v63 = vsel %vm1157_vm11, %v11491_v15, %v1693_v55  ;;  %11493 = vst [vmem:[#allocation24_spill] sm:$0xff] %v8528_v37  ;;  %v1892_v15 = vsel %vm1350_vm14, %v8501_v5, %v11495_v35  ;;  %v1669_v29 = vadd.f32 %v1653_v12, %v11499_v18  ;;  %v11503_v18 = vrot.slane %v8207_v59, 3 }
 0x23b   : > { %11492 = vst [vmem:[#allocation111_spill] sm:$0xff] %v8516_v63  ;;  %v1730_v39 = vmul.f32 %v8284_v61, %v8516_v63  ;;  %v8542_v61 = vsel %vm1350_vm14, %v11496_v13, %v8501_v5  ;;  %v1921_v55 = vmul.f32 %v5376_v2, %v1892_v15  ;;  %v1969_v35 = vsel %vm1428_vm15, %v8504_v62, %v11498_v46  ;;  %v5377_v5 = vld [vmem:[%s10753_s6 + $0xc] ss:$0 sm:$0xff] }
 0x23c   : > { %11497 = vst [vmem:[#allocation119_spill] sm:$0xff] %v8542_v61  ;;  %v1920_v8 = vmul.f32 %v5376_v2, %v8542_v61  ;;  %v8559_v13 = vsel %vm1428_vm15, %v11500_v16, %v8504_v62  ;;  %v1998_v43 = vmul.f32 %v5377_v5, %v1969_v35  ;;  %v11502_v46 = vrot.slane %v11494_v31, 3 }
 0x23d   : > { %11501 = vst [vmem:[#allocation106_spill] sm:$0xff] %v8559_v13  ;;  %v1997_v58 = vmul.f32 %v5377_v5, %v8559_v13  ;;  %v2054_v2 = vsel %vm1506_vm2, %v11503_v18, %v2030_v38  ;;  %v2183_v16 = vmul.f32 %v7557_v57, %v8510_v10  ;;  %v1746_v62 = vadd.f32 %v1730_v39, %v1669_v29  ;;  %v5378_v5 = vld [vmem:[%s10753_s6 + $0xd] ss:$0 sm:$0xff] }
 0x23e   : > { %v2046_v12 = vsel %vm1506_vm2, %v2030_v38, %v11502_v46  ;;  %v1936_v4 = vadd.f32 %v1920_v8, %v8351_v51  ;;  %v2074_v22 = vmul.f32 %v5378_v5, %v2054_v2  ;;  %v2260_v59 = vmul.f32 %v7565_v6, %v8516_v63 }
 0x23f   : > { %v2075_v31 = vmul.f32 %v5378_v5, %v2046_v12  ;;  %v2199_v34 = vadd.f32 %v2183_v16, %v8356_v23  ;;  %v2337_v38 = vmul.f32 %v7574_v56, %v8528_v37  ;;  %v2450_v57 = vmul.f32 %v7821_v17, %v8542_v61 }
 0x240   : > { %v1823_v39 = vadd.f32 %v1807_v48, %v1746_v62  ;;  %v2013_v29 = vadd.f32 %v1997_v58, %v1936_v4  ;;  %v2451_v51 = vmul.f32 %v7821_v17, %v1892_v15  ;;  %v2527_v8 = vmul.f32 %v7835_v41, %v8559_v13  ;;  %v8600_v48 = vld [vmem:[%s10753_s6 + $0x16] ss:$0 sm:$0xff] }
 0x241   : > { %v2276_v23 = vadd.f32 %v2260_v59, %v2199_v34  ;;  %v2466_v6 = vadd.f32 %v2450_v57, %v8365_v7  ;;  %v2528_v46 = vmul.f32 %v7835_v41, %v1969_v35  ;;  %v2604_v56 = vmul.f32 %v7847_v40, %v2054_v2  ;;  %v8607_v41 = vld [vmem:[%s10753_s6 + $0x17] ss:$0 sm:$0xff] }
 0x242   : > { %v1860_v18 = vadd.f32 %v1844_v53, %v1823_v39  ;;  %v2090_v16 = vadd.f32 %v2074_v22, %v2013_v29  ;;  %v2605_v58 = vmul.f32 %v7847_v40, %v2046_v12  ;;  %v2713_v17 = vmul.f32 %v7582_v3, %v8510_v10 }
 0x243   : > { %v2353_v4 = vadd.f32 %v2337_v38, %v2276_v23  ;;  %v2543_v62 = vadd.f32 %v2527_v8, %v2466_v6  ;;  %v2790_v7 = vmul.f32 %v8600_v48, %v8516_v63  ;;  %v2867_v40 = vmul.f32 %v8607_v41, %v8528_v37  ;;  %v11615_v63 = vld [vmem:[#allocation50_spill] sm:$0xff] }
 0x244   : > { %v1937_v22 = vadd.f32 %v1921_v55, %v1860_v18  ;;  %v2200_v3 = vadd.f32 %v8212_v36, %v2090_v16  ;;  %v2729_v34 = vadd.f32 %v2713_v17, %v8359_v1  ;;  %v2904_v53 = vmul.f32 %v7600_v28, %v8460_v45  ;;  %v8624_v45 = vld [vmem:[#allocation2 + $0x168] sm:$0xff] }
 0x245   : > { %v2390_v5 = vadd.f32 %v2374_v33, %v2353_v4  ;;  %v2620_v59 = vadd.f32 %v2604_v56, %v2543_v62  ;;  %v2980_v38 = vmul.f32 %v7874_v32, %v8542_v61  ;;  %v2981_v57 = vmul.f32 %v7874_v32, %v1892_v15  ;;  %11504 = vst [vmem:[#allocation129_spill] sm:$0xff] %v8624_v45  ;;  %v11614_v61 = vld [vmem:[#allocation16_spill] sm:$0xff] }
 0x246   : > { %v2014_v39 = vadd.f32 %v1998_v43, %v1937_v22  ;;  %v2277_v29 = vadd.f32 %v8216_v11, %v2200_v3  ;;  %v2806_v8 = vadd.f32 %v2790_v7, %v2729_v34  ;;  %v3057_v55 = vmul.f32 %v7886_v50, %v8559_v13  ;;  %v8676_v7 = vld [vmem:[#allocation2 + $0x158] sm:$0xff] }
 0x247   : > { %v2467_v36 = vadd.f32 %v2451_v51, %v2390_v5  ;;  %v2730_v1 = vadd.f32 %v8226_v27, %v2620_v59  ;;  %v2996_v23 = vadd.f32 %v2980_v38, %v8394_v44  ;;  %v3058_v28 = vmul.f32 %v7886_v50, %v1969_v35  ;;  %v5381_v5 = vld [vmem:[%s10752_s5] ss:$0 sm:$0xff]  ;;  %v11519_v38 = vld [vmem:[#allocation28_spill] sm:$0xff] }
 0x248   : > { %v2091_v33 = vadd.f32 %v2075_v31, %v2014_v39  ;;  %v2354_v6 = vadd.f32 %v8219_v60, %v2277_v29  ;;  %v2883_v15 = vadd.f32 %v2867_v40, %v2806_v8  ;;  %v8628_v43 = vmul.f32 %v7898_v52, %v2054_v2  ;;  %v11521_v29 = vld [vmem:[#allocation98_spill] sm:$0xff] }
 0x249   : > { %v2544_v11 = vadd.f32 %v2528_v46, %v2467_v36  ;;  %v2807_v56 = vadd.f32 %v8230_v19, %v2730_v1  ;;  %v8631_v18 = vadd.f32 %v3057_v55, %v2996_v23  ;;  %v8634_v27 = vmul.f32 %v7898_v52, %v2046_v12  ;;  %v11522_v55 = vld [vmem:[#allocation74_spill] sm:$0xff] }
 0x24a   : > { %11505 = vst [vmem:[#allocation130_spill] sm:$0xff] %v8628_v43  ;;  %v2201_v44 = vadd.f32 %v8397_v26, %v2091_v33  ;;  %v2920_v35 = vadd.f32 %v2904_v53, %v2883_v15  ;;  %v8639_v31 = vmul.f32 %v8172_v54, %v8510_v10  ;;  %v3204_v60 = vrot.slane %v8624_v45, 5  ;;  %v11524_v33 = vld [vmem:[#allocation104_spill] sm:$0xff]  ;;  %v11525_v15 = vld [vmem:[#allocation97_spill] sm:$0xff] }
 0x24b   : > { %11506 = vst [vmem:[#allocation131_spill] sm:$0xff] %v8631_v18  ;;  %11507 = vst [vmem:[#allocation132_spill] sm:$0xff] %v8634_v27  ;;  %v2621_v51 = vadd.f32 %v2605_v58, %v2544_v11  ;;  %v8643_v2 = vadd.f32 %v8233_v14, %v2807_v56  ;;  %v3281_v19 = vrot.slane %v8624_v45, 6  ;;  %v11512_v14 = vrot.slane %v11453_v9, 5  ;;  %v11526_v56 = vld [vmem:[#allocation17_spill] sm:$0xff]  ;;  %v3689_v58 = vld [vmem:[#allocation2 + $0xa0] sm:$0xff] }
 0x24c   : > { %11508 = vst [vmem:[#allocation133_spill] sm:$0xff] %v8639_v31  ;;  %v2278_v10 = vadd.f32 %v8401_v21, %v2201_v44  ;;  %v2997_v12 = vadd.f32 %v2981_v57, %v2920_v35  ;;  %v11514_v4 = vrot.slane %v11453_v9, 6  ;;  %v2391_v34 = vadd.f32 %v8197_v0, %v2354_v6  ;;  %v11527_v35 = vld [vmem:[#allocation54_spill] sm:$0xff]  ;;  %v11611_v18 = vld [vmem:[#allocation12_spill] sm:$0xff]  ;;  %v11613_v31 = vld [vmem:[#allocation83_spill] sm:$0xff] }
 0x24d   : > { %11509 = vst [vmem:[#allocation134_spill] sm:$0xff] %v8643_v2  ;;  %v3228_v16 = vsel %vm1079_vm10, %v11512_v14, %v3204_v60  ;;  %v2731_v17 = vadd.f32 %v8454_v25, %v2621_v51  ;;  %v11517_v25 = vmax.f32 %v8349_v24, 0.0  ;;  %v2818_v53 = vrot.slane %v8341_v42, 7  ;;  %v11520_v24 = vld [vmem:[#allocation82_spill] sm:$0xff]  ;;  %v11594_v2 = vld [vmem:[#allocation53_spill] sm:$0xff] }
 0x24e   : > { %v8665_v30 = vmul.f32 %v8172_v54, %v3228_v16  ;;  %v8673_v21 = vsel %vm1157_vm11, %v11514_v4, %v3281_v19  ;;  %v2355_v40 = vadd.f32 %v8405_v20, %v2278_v10  ;;  %v8679_v22 = vadd.f32 %v3058_v28, %v2997_v12  ;;  %v11518_v20 = vld [vmem:[#allocation56_spill] sm:$0xff] }
 0x24f   : > { %11515 = vst [vmem:[#allocation136_spill] sm:$0xff] %v8673_v21  ;;  %v1000_v3 = vsel %vm8651_vm5, %v11517_v25, 0.0  ;;  %v2808_v9 = vadd.f32 %v8458_v47, %v2731_v17  ;;  %v929_v59 = vadd.f32 %v5381_v5, %v11518_v20  ;;  %v921_v57 = vadd.f32 %v5381_v5, %v11519_v38  ;;  %v11529_v16 = vld [vmem:[#allocation68_spill] sm:$0xff] }
 0x250   : > { %11513 = vst [vmem:[#allocation135_spill] sm:$0xff] %v8665_v30  ;;  %11516 = vst [vmem:[#allocation137_spill] sm:$0xff] %v8679_v22  ;;  %v2468_v39 = vadd.f32 %v11520_v24, %v2391_v34  ;;  %v2392_v8 = vadd.f32 %v11521_v29, %v2355_v40  ;;  %v2948_v0 = vrot.slane %v8676_v7, 1  ;;  %v3025_v47 = vrot.slane %v8676_v7, 2  ;;  %v11530_v40 = vld [vmem:[#allocation108_spill] sm:$0xff]  ;;  %v11536_v29 = vld [vmem:[#allocation101_spill] sm:$0xff] }
 0x251   : > { %1013 = vst.msk [vmem:[#allocation2 + $0x148] sm:$0xff] %vm451_vm1, %v1000_v3  ;;  %v8699_v36 = vadd.f32 %v11522_v55, %v2808_v9  ;;  %v955_v1 = vmax.f32 %v929_v59, 0.0  ;;  %v953_v23 = vmax.f32 %v921_v57, 0.0  ;;  %v3102_v28 = vrot.slane %v8676_v7, 3  ;;  %v11531_v3 = vld [vmem:[#allocation120_spill] sm:$0xff]  ;;  %v11532_v59 = vld [vmem:[#allocation121_spill] sm:$0xff] }
 0x252   : > { %v2545_v6 = vadd.f32 %v11524_v33, %v2468_v39  ;;  %v2469_v11 = vadd.f32 %v11525_v15, %v2392_v8  ;;  %v942_v44 = vadd.f32 %v5381_v5, %v11526_v56  ;;  %v965_v51 = vadd.s32 5, %v11527_v35  ;;  %v11535_v24 = vld [vmem:[#allocation52_spill] sm:$0xff]  ;;  %v5382_v15 = vld [vmem:[%s10753_s6 + $0x18] ss:$0 sm:$0xff]  ;;  %v8869_v56 = vld [vmem:[%s10753_s6 + $0x1d] ss:$0 sm:$0xff] }
 0x253   : > { %11523 = vst [vmem:[#allocation56_spill] sm:$0xff] %v8699_v36  ;;  %v1003_v12 = vsel %vm8337_vm3, %v955_v1, 0.0  ;;  %v1001_v14 = vsel %vm8651_vm5, %v953_v23, 0.0  ;;  %v934_v17 = vadd.f32 %v5381_v5, %v11529_v16  ;;  %v964_v4 = vadd.s32 4, %v11527_v35  ;;  %v11537_v55 = vld [vmem:[#allocation96_spill] sm:$0xff] }
 0x254   : > { %v2622_v25 = vadd.f32 %v11530_v40, %v2545_v6  ;;  %1016 = vst.msk [vmem:[#allocation2 + $0x170] sm:$0xff] %vm451_vm1, %v1003_v12  ;;  %1014 = vst.msk [vmem:[#allocation2 + $0x150] sm:$0xff] %vm451_vm1, %v1001_v14  ;;  %v2546_v34 = vadd.f32 %v11531_v3, %v2469_v11  ;;  %v958_v9 = vmax.f32 %v942_v44, 0.0  ;;  %vm971_vm6 = vcmp.ge.s32.totalorder %v965_v51, 3  ;;  %v5383_v40 = vld [vmem:[%s10753_s6 + $0x15] ss:$0 sm:$0xff] }
 0x255   : > { %vm977_vm7 = vcmp.lt.s32.totalorder %v965_v51, 19  ;;  %v956_v20 = vmax.f32 %v934_v17, 0.0  ;;  %vm970_vm8 = vcmp.ge.s32.totalorder %v964_v4, 3  ;;  %vm976_vm9 = vcmp.lt.s32.totalorder %v964_v4, 19 }
 0x256   : > { %v2623_v38 = vadd.f32 %v11532_v59, %v2546_v34  ;;  %vm8719_vm3 = vmand %vm971_vm6, %vm977_vm7  ;;  %v945_v39 = vadd.f32 %v5381_v5, %v11535_v24  ;;  %v8725_v8 = vadd.f32 %v5381_v5, %v11536_v29  ;;  %v4832_v1 = vsel %vm583_vm0, %v11537_v55, 0  ;;  %v11546_v24 = vld [vmem:[#allocation19_spill] sm:$0xff] }
 0x257   : > { %vm8738_vm13 = vmand %vm970_vm8, %vm976_vm9  ;;  %5277 = vmatpush3.bf16.msra.mxu1 %v4832_v1  ;;  %v1006_v51 = vsel %vm8719_vm3, %v958_v9, 0.0  ;;  %v11541_v10 = vrot.slane %v8341_v42, 5  ;;  %v11542_v14 = vrot.slane %v8341_v42, 6  ;;  %v11547_v29 = vld [vmem:[#allocation35_spill] sm:$0xff]  ;;  %v11548_v1 = vld [vmem:[#allocation58_spill] sm:$0xff]  ;;  %v3315_v37 = vmul.f32 %v8869_v56, %v11614_v61 }
 0x258   : > { %v8716_v26 = vld [vmem:[#allocation2 + $0x148] sm:$0xff]  ;;  %1019 = vst.msk [vmem:[#allocation2 + $0x1a8] sm:$0xff] %vm451_vm1, %v1006_v51  ;;  %v1004_v4 = vsel %vm8738_vm13, %v956_v20, 0.0  ;;  %v959_v59 = vmax.f32 %v945_v39, 0.0  ;;  %v957_v20 = vmax.f32 %v8725_v8, 0.0  ;;  %v2909_v55 = vadd.f32 %v11547_v29, %v11546_v24  ;;  %v11549_v51 = vld [vmem:[#allocation61_spill] sm:$0xff] }
 0x259   : > { %v2672_v23 = vrot.slane %v8716_v26, 5  ;;  %v2749_v33 = vrot.slane %v8716_v26, 6  ;;  %v8732_v6 = vrot.slane %v8716_v26, 7  ;;  %v2907_v11 = vmul.f32 %v5382_v15, %v8716_v26  ;;  %1017 = vst.msk [vmem:[#allocation2 + $0x188] sm:$0xff] %vm451_vm1, %v1004_v4  ;;  %v11577_v4 = vld [vmem:[#allocation92_spill] sm:$0xff]  ;;  %v11621_v61 = vld [vmem:[#allocation126_spill] sm:$0xff] }
 0x25a   : > { %v2932_v5 = vrot.slane %v8716_v26, 1  ;;  %v3009_v44 = vrot.slane %v8716_v26, 2  ;;  %v3086_v35 = vrot.slane %v8716_v26, 3 }
 0x25b   : > { %11538 = vst [vmem:[#allocation28_spill] sm:$0xff] %v8732_v6  ;;  %v2696_v12 = vsel %vm1079_vm10, %v11541_v10, %v2672_v23  ;;  %v8755_v16 = vsel %vm1157_vm11, %v11542_v14, %v2749_v33  ;;  %v2850_v17 = vsel %vm1235_vm12, %v2818_v53, %v8732_v6  ;;  %v8773_v53 = vld [vmem:[#allocation2 + $0x170] sm:$0xff]  ;;  %v2910_v10 = vadd.f32 %v11549_v51, %v11548_v1 }
 0x25c   : > { %11543 = vst [vmem:[#allocation82_spill] sm:$0xff] %v8755_v16  ;;  %v2716_v3 = vmul.f32 %v5383_v40, %v2696_v12  ;;  %v2793_v42 = vmul.f32 %v8600_v48, %v8755_v16  ;;  %v2870_v34 = vmul.f32 %v8607_v41, %v2850_v17  ;;  %v8770_v9 = vmul.f32 %v8172_v54, %v2696_v12  ;;  %v2655_v26 = vld [vmem:[#allocation2 + $0x150] sm:$0xff]  ;;  %v11591_v16 = vld [vmem:[#allocation88_spill] sm:$0xff] }
 0x25d   : > { %11545 = vst [vmem:[#allocation74_spill] sm:$0xff] %v8773_v53  ;;  %v3212_v17 = vrot.slane %v8773_v53, 5  ;;  %v3289_v12 = vrot.slane %v8773_v53, 6  ;;  %v2680_v39 = vrot.slane %v2655_v26, 5  ;;  %v2757_v46 = vrot.slane %v2655_v26, 6 }
 0x25e   : > { %11544 = vst [vmem:[#allocation98_spill] sm:$0xff] %v8770_v9  ;;  %v2732_v14 = vadd.f32 %v2716_v3, %v2622_v25  ;;  %v2834_v3 = vrot.slane %v2655_v26, 7  ;;  %v2908_v51 = vmul.f32 %v5382_v15, %v2655_v26  ;;  %v3798_v53 = vrot.slane %v3689_v58, 6 }
 0x25f   : > { %v3220_v24 = vsel %vm1079_vm10, %v3204_v60, %v3212_v17  ;;  %v8793_v25 = vsel %vm1157_vm11, %v3281_v19, %v3289_v12  ;;  %v2688_v1 = vsel %vm1079_vm10, %v2672_v23, %v2680_v39  ;;  %v8815_v23 = vrot.slane %v2655_v26, 2 }
 0x260   : > { %v2809_v8 = vadd.f32 %v2793_v42, %v2732_v14  ;;  %11550 = vst [vmem:[#allocation104_spill] sm:$0xff] %v8793_v25  ;;  %v8796_v29 = vmul.f32 %v8172_v54, %v3220_v24  ;;  %v8802_v42 = vsel %vm1157_vm11, %v2749_v33, %v2757_v46  ;;  %v2717_v60 = vmul.f32 %v5383_v40, %v2688_v1 }
 0x261   : > { %11552 = vst [vmem:[#allocation17_spill] sm:$0xff] %v8802_v42  ;;  %v2794_v17 = vmul.f32 %v8600_v48, %v8802_v42  ;;  %v8809_v19 = vsel %vm1235_vm12, %v8732_v6, %v2834_v3  ;;  %v8813_v24 = vrot.slane %v2655_v26, 1  ;;  %11555 = vst [vmem:[#allocation68_spill] sm:$0xff] %v8815_v23  ;;  %v3094_v46 = vrot.slane %v2655_v26, 3 }
 0x262   : > { %11551 = vst [vmem:[#allocation97_spill] sm:$0xff] %v8796_v29  ;;  %v2886_v14 = vadd.f32 %v2870_v34, %v2809_v8  ;;  %11553 = vst [vmem:[#allocation54_spill] sm:$0xff] %v8809_v19  ;;  %v2871_v12 = vmul.f32 %v8607_v41, %v8809_v19  ;;  %v2733_v15 = vadd.f32 %v2717_v60, %v2623_v38  ;;  %v1007_v48 = vsel %vm8719_vm3, %v959_v59, 0.0  ;;  %v11564_v60 = vld [vmem:[#allocation93_spill] sm:$0xff]  ;;  %v8954_v29 = vld [vmem:[%s10753_s6 + $0x26] ss:$0 sm:$0xff] }
 0x263   : > { %11554 = vst [vmem:[#allocation8_spill] sm:$0xff] %v8813_v24  ;;  %v8818_v40 = vmul.f32 %v8172_v54, %v2688_v1  ;;  %v2956_v34 = vsel %vm1350_vm14, %v8813_v24, %v2948_v0  ;;  %v8830_v41 = vsel %vm1350_vm14, %v2932_v5, %v8813_v24  ;;  %v3033_v54 = vsel %vm1428_vm15, %v8815_v23, %v3025_v47  ;;  %v11562_v1 = vld [vmem:[#allocation63_spill] sm:$0xff] }
 0x264   : > { %v2923_v33 = vadd.f32 %v2907_v11, %v2886_v14  ;;  %11557 = vst [vmem:[#allocation120_spill] sm:$0xff] %v8830_v41  ;;  %v8840_v38 = vsel %vm1428_vm15, %v3009_v44, %v8815_v23  ;;  %1020 = vst.msk [vmem:[#allocation2 + $0x1b0] sm:$0xff] %vm451_vm1, %v1007_v48  ;;  %v2810_v57 = vadd.f32 %v2794_v17, %v2733_v15  ;;  %v1005_v59 = vsel %vm8738_vm13, %v957_v20, 0.0  ;;  %v3160_v14 = vld [vmem:[#allocation2 + $0x98] sm:$0xff] }
 0x265   : > { %11556 = vst [vmem:[#allocation108_spill] sm:$0xff] %v8818_v40  ;;  %11558 = vst [vmem:[#allocation121_spill] sm:$0xff] %v8840_v38  ;;  %v2984_v0 = vmul.f32 %v7874_v32, %v8830_v41  ;;  %v2985_v11 = vmul.f32 %v7874_v32, %v2956_v34  ;;  %v3061_v5 = vmul.f32 %v7886_v50, %v8840_v38  ;;  %v8882_v34 = vld [vmem:[%s10753_s6 + $0x1e] ss:$0 sm:$0xff] }
 0x266   : > { %v3062_v26 = vmul.f32 %v7886_v50, %v3033_v54  ;;  %v3110_v47 = vsel %vm1506_vm2, %v3094_v46, %v3102_v28  ;;  %v3118_v44 = vsel %vm1506_vm2, %v3086_v35, %v3094_v46  ;;  %v2887_v39 = vadd.f32 %v2871_v12, %v2810_v57  ;;  %1018 = vst.msk [vmem:[#allocation2 + $0x190] sm:$0xff] %vm451_vm1, %v1005_v59  ;;  %v11561_v50 = vld [vmem:[#allocation62_spill] sm:$0xff]  ;;  %v11563_v35 = vld [vmem:[#allocation59_spill] sm:$0xff]  ;;  %v11569_v59 = vld [vmem:[#allocation33_spill] sm:$0xff] }
 0x267   : > { %v3000_v8 = vadd.f32 %v2984_v0, %v2923_v33  ;;  %v8858_v32 = vmul.f32 %v7898_v52, %v3118_v44  ;;  %v8861_v3 = vmul.f32 %v7898_v52, %v3110_v47  ;;  %v2986_v7 = vadd.f32 %v11561_v50, %v2909_v55  ;;  %v5385_v46 = vld [vmem:[#allocation2 + $0x80] sm:$0xff]  ;;  %v11566_v55 = vld [vmem:[#allocation64_spill] sm:$0xff]  ;;  %v11568_v54 = vld [vmem:[#allocation94_spill] sm:$0xff] }
 0x268   : > { %v2987_v28 = vadd.f32 %v11562_v1, %v2910_v10  ;;  %v3311_v20 = vmul.f32 %v8869_v56, %v11563_v35  ;;  %v3312_v17 = vmul.f32 %v8869_v56, %v11564_v60  ;;  %v2924_v52 = vadd.f32 %v2908_v51, %v2887_v39  ;;  %v11567_v10 = vld [vmem:[#allocation65_spill] sm:$0xff]  ;;  %v5387_v0 = vld [vmem:[#allocation2 + $0x88] sm:$0xff]  ;;  %v8889_v51 = vld [vmem:[%s10753_s6 + $0x1f] ss:$0 sm:$0xff] }
 0x269   : > { %11559 = vst [vmem:[#allocation52_spill] sm:$0xff] %v8858_v32  ;;  %11560 = vst [vmem:[#allocation101_spill] sm:$0xff] %v8861_v3  ;;  %v8875_v12 = vadd.f32 %v3061_v5, %v3000_v8  ;;  %v3343_v33 = vrot.slane %v5385_v46, 7  ;;  %v3063_v15 = vadd.f32 %v11566_v55, %v2986_v7  ;;  %v3389_v57 = vmul.f32 %v8882_v34, %v11568_v54  ;;  %v8895_v47 = vld [vmem:[%s10753_s6 + $0x20] ss:$0 sm:$0xff]  ;;  %v5389_v8 = vld [vmem:[#allocation2 + $0x90] sm:$0xff] }
 0x26a   : > { %v3064_v48 = vadd.f32 %v11567_v10, %v2987_v28  ;;  %v3425_v5 = vmul.f32 %v8889_v51, %v5387_v0  ;;  %v3001_v44 = vadd.f32 %v2985_v11, %v2924_v52  ;;  %v3426_v50 = vmul.f32 %v5389_v8, %v8889_v51  ;;  %v11570_v1 = vld [vmem:[#allocation66_spill] sm:$0xff]  ;;  %v11571_v35 = vld [vmem:[#allocation67_spill] sm:$0xff]  ;;  %v11574_v10 = vld [vmem:[#allocation36_spill] sm:$0xff] }
 0x26b   : > { %11565 = vst [vmem:[#allocation96_spill] sm:$0xff] %v8875_v12  ;;  %v3375_v39 = vsel %vm1235_vm12, %v3343_v33, %v11569_v59  ;;  %v3473_v7 = vrot.slane %v3160_v14, 1  ;;  %v3140_v28 = vadd.f32 %v11570_v1, %v3063_v15  ;;  %v8907_v55 = vld [vmem:[%s10753_s6 + $0x21] ss:$0 sm:$0xff]  ;;  %v3502_v54 = vmul.f32 %v8895_v47, %v11574_v10  ;;  %v11575_v15 = vld [vmem:[#allocation46_spill] sm:$0xff] }
 0x26c   : > { %v3141_v60 = vadd.f32 %v11571_v35, %v3064_v48  ;;  %v3388_v46 = vmul.f32 %v8882_v34, %v3375_v39  ;;  %v8909_v11 = vadd.f32 %v3062_v26, %v3001_v44  ;;  %v11573_v52 = vld [vmem:[#allocation91_spill] sm:$0xff]  ;;  %v3550_v59 = vrot.slane %v3160_v14, 2  ;;  %v11576_v48 = vld [vmem:[#allocation44_spill] sm:$0xff] }
 0x26d   : > { %v3481_v33 = vsel %vm1350_vm14, %v11573_v52, %v3473_v7  ;;  %v3250_v1 = vadd.f32 %v11575_v15, %v3140_v28  ;;  %v11578_v44 = vld [vmem:[#allocation95_spill] sm:$0xff]  ;;  %v3611_v45 = vrot.slane %v5387_v0, 3  ;;  %v3619_v7 = vrot.slane %v5389_v8, 3  ;;  %v8935_v0 = vld [vmem:[#allocation2 + $0xb0] sm:$0xff] }
 0x26e   : > { %11572 = vst [vmem:[#allocation19_spill] sm:$0xff] %v8909_v11  ;;  %v3251_v35 = vadd.f32 %v11576_v48, %v3141_v60  ;;  %v3503_v39 = vmul.f32 %v8895_v47, %v3481_v33  ;;  %v3558_v26 = vsel %vm1428_vm15, %v11577_v4, %v3550_v59  ;;  %v3579_v62 = vmul.f32 %v8907_v55, %v11578_v44  ;;  %v8927_v52 = vld [vmem:[%s10753_s6 + $0x22] ss:$0 sm:$0xff]  ;;  %v8932_v4 = vld [vmem:[#allocation2 + $0xa8] sm:$0xff] }
 0x26f   : > { %v3327_v28 = vadd.f32 %v3311_v20, %v3250_v1  ;;  %v3580_v60 = vmul.f32 %v8907_v55, %v3558_v26  ;;  %v3627_v33 = vrot.slane %v3160_v14, 3  ;;  %v3643_v15 = vsel %vm1506_vm2, %v3611_v45, %v3619_v7  ;;  %v8941_v20 = vld [vmem:[%s10753_s6 + $0x23] ss:$0 sm:$0xff] }
 0x270   : > { %v3328_v10 = vadd.f32 %v3312_v17, %v3251_v35  ;;  %v3721_v48 = vrot.slane %v3689_v58, 5  ;;  %v3729_v59 = vrot.slane %v8932_v4, 5  ;;  %v3737_v8 = vrot.slane %v8935_v0, 5 }
 0x271   : > { %v3404_v17 = vadd.f32 %v3388_v46, %v3327_v28  ;;  %v3635_v14 = vsel %vm1506_vm2, %v3619_v7, %v3627_v33  ;;  %v3656_v45 = vmul.f32 %v8927_v52, %v3643_v15  ;;  %v3814_v33 = vrot.slane %v8935_v0, 6  ;;  %v8963_v15 = vld [vmem:[%s10753_s6 + $0x24] ss:$0 sm:$0xff] }
 0x272   : > { %v3405_v1 = vadd.f32 %v3389_v57, %v3328_v10  ;;  %v3657_v35 = vmul.f32 %v8927_v52, %v3635_v14  ;;  %v3745_v26 = vsel %vm1079_vm10, %v3729_v59, %v3737_v8  ;;  %v3753_v44 = vsel %vm1079_vm10, %v3721_v48, %v3729_v59 }
 0x273   : > { %v3441_v57 = vadd.f32 %v3425_v5, %v3404_v17  ;;  %v3766_v7 = vmul.f32 %v8941_v20, %v3753_v44  ;;  %v3767_v28 = vmul.f32 %v8941_v20, %v3745_v26  ;;  %v3806_v10 = vrot.slane %v8932_v4, 6 }
 0x274   : > { %v3442_v46 = vadd.f32 %v3426_v50, %v3405_v1  ;;  %v3875_v48 = vrot.slane %v3689_v58, 7  ;;  %v3883_v59 = vrot.slane %v8932_v4, 7  ;;  %v3891_v5 = vrot.slane %v8935_v0, 7  ;;  %v8970_v50 = vld [vmem:[%s10753_s6 + $0x25] ss:$0 sm:$0xff]  ;;  %v8974_v1 = vld [vmem:[#allocation2 + $0xb8] sm:$0xff] }
 0x275   : > { %v3518_v8 = vadd.f32 %v3502_v54, %v3441_v57  ;;  %v3957_v17 = vmul.f32 %v8932_v4, %v8954_v29  ;;  %v3822_v26 = vsel %vm1157_vm11, %v3806_v10, %v3814_v33  ;;  %v3830_v58 = vsel %vm1157_vm11, %v3798_v53, %v3806_v10  ;;  %v8994_v10 = vld [vmem:[%s10753_s6 + $0x27] ss:$0 sm:$0xff] }
 0x276   : > { %v3519_v14 = vadd.f32 %v3503_v39, %v3442_v46  ;;  %v3907_v54 = vsel %vm1235_vm12, %v3875_v48, %v3883_v59  ;;  %v3958_v39 = vmul.f32 %v8935_v0, %v8954_v29  ;;  %v3843_v46 = vmul.f32 %v8963_v15, %v3830_v58  ;;  %v9006_v58 = vld [vmem:[%s10753_s6 + $0x28] ss:$0 sm:$0xff] }
 0x277   : > { %v3595_v44 = vadd.f32 %v3579_v62, %v3518_v8  ;;  %v3844_v30 = vmul.f32 %v8963_v15, %v3822_v26  ;;  %v3899_v25 = vsel %vm1235_vm12, %v3883_v59, %v3891_v5  ;;  %v3920_v33 = vmul.f32 %v8970_v50, %v3907_v54  ;;  %v9013_v54 = vld [vmem:[#allocation2 + $0xc0] sm:$0xff] }
 0x278   : > { %v3596_v57 = vadd.f32 %v3580_v60, %v3519_v14  ;;  %v3989_v21 = vrot.slane %v8932_v4, 1  ;;  %v3997_v53 = vrot.slane %v8935_v0, 1  ;;  %v3921_v48 = vmul.f32 %v8970_v50, %v3899_v25 }
 0x279   : > { %v3672_v62 = vadd.f32 %v3656_v45, %v3595_v44  ;;  %v10921_v8 = vrot.slane %v8974_v1, 1  ;;  %v4066_v14 = vrot.slane %v8932_v4, 2  ;;  %v4074_v5 = vrot.slane %v8935_v0, 2  ;;  %v9015_v44 = vld [vmem:[#allocation2 + $0xc8] sm:$0xff] }
 0x27a   : > { %v3673_v60 = vadd.f32 %v3657_v35, %v3596_v57  ;;  %v4021_v59 = vsel %vm1350_vm14, %v3989_v21, %v3997_v53  ;;  %v10922_v26 = vrot.slane %v8974_v1, 2  ;;  %v10923_v11 = vrot.slane %v8974_v1, 3 }
 0x27b   : > { %v3782_v45 = vadd.f32 %v3766_v7, %v3672_v62  ;;  %v4013_v25 = vsel %vm1350_vm14, %v3997_v53, %v10921_v8  ;;  %v4034_v21 = vmul.f32 %v8994_v10, %v4021_v59  ;;  %v4098_v7 = vsel %vm1428_vm15, %v4066_v14, %v4074_v5  ;;  %v9025_v62 = vld [vmem:[#allocation2 + $0xd0] sm:$0xff] }
 0x27c   : > { %v3783_v35 = vadd.f32 %v3767_v28, %v3673_v60  ;;  %v4035_v57 = vmul.f32 %v8994_v10, %v4013_v25  ;;  %v4090_v3 = vsel %vm1428_vm15, %v4074_v5, %v10922_v26  ;;  %v4143_v28 = vrot.slane %v8932_v4, 3  ;;  %v9034_v26 = vld [vmem:[%s10753_s6 + $0x29] ss:$0 sm:$0xff] }
 0x27d   : > { %v3859_v53 = vadd.f32 %v3843_v46, %v3782_v45  ;;  %v4111_v59 = vmul.f32 %v9006_v58, %v4098_v7  ;;  %v4112_v8 = vmul.f32 %v9006_v58, %v4090_v3  ;;  %v4151_v25 = vrot.slane %v8935_v0, 3  ;;  %v9042_v3 = vld [vmem:[%s10753_s6 + $0x2a] ss:$0 sm:$0xff]  ;;  %v9059_v7 = vld [vmem:[%s10753_s6 + $0x2b] ss:$0 sm:$0xff] }
 0x27e   : > { %v3860_v60 = vadd.f32 %v3844_v30, %v3783_v35  ;;  %v10924_v14 = vrot.slane %v9013_v54, 5  ;;  %v4261_v4 = vrot.slane %v9015_v44, 5  ;;  %v4269_v30 = vrot.slane %v9025_v62, 5 }
 0x27f   : > { %v3936_v5 = vadd.f32 %v3920_v33, %v3859_v53  ;;  %v4167_v45 = vsel %vm1506_vm2, %v4151_v25, %v10923_v11  ;;  %v4175_v35 = vsel %vm1506_vm2, %v4143_v28, %v4151_v25  ;;  %v11579_v32 = vrot.slane %v9013_v54, 6 }
 0x280   : > { %v3937_v46 = vadd.f32 %v3921_v48, %v3860_v60  ;;  %v4285_v33 = vsel %vm1079_vm10, %v10924_v14, %v4261_v4  ;;  %v4338_v48 = vrot.slane %v9015_v44, 6  ;;  %v4188_v0 = vmul.f32 %v9034_v26, %v4175_v35 }
 0x281   : > { %v3973_v53 = vadd.f32 %v3957_v17, %v3936_v5  ;;  %v4189_v11 = vmul.f32 %v9034_v26, %v4167_v45  ;;  %v4277_v28 = vsel %vm1079_vm10, %v4261_v4, %v4269_v30  ;;  %v4298_v25 = vmul.f32 %v9042_v3, %v4285_v33  ;;  %v9074_v17 = vld [vmem:[%s10753_s6 + $0x2d] ss:$0 sm:$0xff]  ;;  %v9086_v33 = vld [vmem:[%s10753_s6 + $0x2c] ss:$0 sm:$0xff] }
 0x282   : > { %v3974_v60 = vadd.f32 %v3958_v39, %v3937_v46  ;;  %v4346_v14 = vrot.slane %v9025_v62, 6  ;;  %v4362_v12 = vsel %vm1157_vm11, %v11579_v32, %v4338_v48  ;;  %11580 = vst [vmem:[#allocation35_spill] sm:$0xff] %v9074_v17  ;;  %v4299_v46 = vmul.f32 %v9042_v3, %v4277_v28  ;;  %11581 = vst [vmem:[#allocation58_spill] sm:$0xff] %v9086_v33 }
 0x283   : > { %v4050_v39 = vadd.f32 %v4034_v21, %v3973_v53  ;;  %v4375_v4 = vmul.f32 %v9059_v7, %v4362_v12  ;;  %v10926_v45 = vrot.slane %v9013_v54, 7  ;;  %v4415_v35 = vrot.slane %v9015_v44, 7  ;;  %v9088_v53 = vld [vmem:[#allocation2 + $0xd8] sm:$0xff] }
 0x284   : > { %v4051_v5 = vadd.f32 %v4035_v57, %v3974_v60  ;;  %v4354_v30 = vsel %vm1157_vm11, %v4338_v48, %v4346_v14  ;;  %v4423_v32 = vrot.slane %v9025_v62, 7  ;;  %v4489_v14 = vmul.f32 %v9074_v17, %v9015_v44 }
 0x285   : > { %v4127_v21 = vadd.f32 %v4111_v59, %v4050_v39  ;;  %v4376_v12 = vmul.f32 %v9059_v7, %v4354_v30  ;;  %v4439_v60 = vsel %vm1235_vm12, %v10926_v45, %v4415_v35  ;;  %v4490_v28 = vmul.f32 %v9074_v17, %v9025_v62 }
 0x286   : > { %v4128_v57 = vadd.f32 %v4112_v8, %v4051_v5  ;;  %v4431_v48 = vsel %vm1235_vm12, %v4415_v35, %v4423_v32  ;;  %v4521_v8 = vrot.slane %v9015_v44, 1  ;;  %v4452_v5 = vmul.f32 %v9086_v33, %v4439_v60  ;;  %v9111_v35 = vld [vmem:[%s10753_s6 + $0x2e] ss:$0 sm:$0xff] }
 0x287   : > { %v4204_v59 = vadd.f32 %v4188_v0, %v4127_v21  ;;  %v4453_v30 = vmul.f32 %v9086_v33, %v4431_v48  ;;  %v4529_v38 = vrot.slane %v9025_v62, 1  ;;  %v9106_v32 = vrot.slane %v9088_v53, 1  ;;  %11582 = vst [vmem:[#allocation61_spill] sm:$0xff] %v9111_v35 }
 0x288   : > { %v4205_v39 = vadd.f32 %v4189_v11, %v4128_v57  ;;  %v4598_v45 = vrot.slane %v9015_v44, 2  ;;  %v4606_v23 = vrot.slane %v9025_v62, 2  ;;  %v9116_v21 = vrot.slane %v9088_v53, 2  ;;  %v9121_v57 = vld [vmem:[%s10753_s6 + $0x2f] ss:$0 sm:$0xff] }
 0x289   : > { %v4314_v0 = vadd.f32 %v4298_v25, %v4204_v59  ;;  %11583 = vst [vmem:[#allocation62_spill] sm:$0xff] %v9121_v57  ;;  %v4675_v48 = vrot.slane %v9015_v44, 3  ;;  %v4545_v60 = vsel %vm1350_vm14, %v4529_v38, %v9106_v32  ;;  %v4553_v41 = vsel %vm1350_vm14, %v4521_v8, %v4529_v38  ;;  %v9135_v59 = vld [vmem:[%s10753_s6 + $0x30] ss:$0 sm:$0xff] }
 0x28a   : > { %v4315_v11 = vadd.f32 %v4299_v46, %v4205_v39  ;;  %v4630_v25 = vsel %vm1428_vm15, %v4598_v45, %v4606_v23  ;;  %v4683_v46 = vrot.slane %v9025_v62, 3  ;;  %v4566_v44 = vmul.f32 %v9111_v35, %v4553_v41 }
 0x28b   : > { %v4391_v39 = vadd.f32 %v4375_v4, %v4314_v0  ;;  %v4567_v9 = vmul.f32 %v9111_v35, %v4545_v60  ;;  %v4622_v38 = vsel %vm1428_vm15, %v4606_v23, %v9116_v21  ;;  %v4643_v8 = vmul.f32 %v9121_v57, %v4630_v25  ;;  %v11584_v0 = vld [vmem:[#allocation7_spill] sm:$0xff]  ;;  %v11586_v60 = vld [vmem:[#allocation21_spill] sm:$0xff] }
 0x28c   : > { %v4392_v40 = vadd.f32 %v4376_v12, %v4315_v11  ;;  %v10934_v45 = vrot.slane %v9088_v53, 3  ;;  %v4707_v62 = vsel %vm1506_vm2, %v4675_v48, %v4683_v46  ;;  %v4644_v4 = vmul.f32 %v9121_v57, %v4622_v38  ;;  %v11585_v23 = vld [vmem:[#allocation11_spill] sm:$0xff]  ;;  %v11590_v38 = vld [vmem:[#allocation57_spill] sm:$0xff] }
 0x28d   : > { %v4468_v24 = vadd.f32 %v4452_v5, %v4391_v39  ;;  %v4720_v12 = vmul.f32 %v9135_v59, %v4707_v62  ;;  %v3252_v11 = vadd.f32 %v11585_v23, %v11584_v0  ;;  %v11587_v25 = vld [vmem:[#allocation87_spill] sm:$0xff]  ;;  %v11588_v42 = vrot.slane %v8974_v1, 1 }
 0x28e   : > { %v4469_v6 = vadd.f32 %v4453_v30, %v4392_v40  ;;  %v4699_v41 = vsel %vm1506_vm2, %v4683_v46, %v10934_v45  ;;  %v3253_v19 = vadd.f32 %v11587_v25, %v11586_v60  ;;  %v11589_v48 = vld [vmem:[#allocation27_spill] sm:$0xff]  ;;  %v11592_v45 = vld [vmem:[#allocation18_spill] sm:$0xff]  ;;  %v11593_v36 = vrot.slane %v8974_v1, 2 }
 0x28f   : > { %v3482_v40 = vsel %vm1350_vm14, %v11589_v48, %v11588_v42  ;;  %v4505_v5 = vadd.f32 %v4489_v14, %v4468_v24  ;;  %v4721_v39 = vmul.f32 %v9135_v59, %v4699_v41  ;;  %v3329_v62 = vadd.f32 %v11590_v38, %v3252_v11  ;;  %v11596_v14 = vld [vmem:[#allocation89_spill] sm:$0xff]  ;;  %v11597_v41 = vld [vmem:[#allocation55_spill] sm:$0xff]  ;;  %v11602_v38 = vld [vmem:[#allocation10_spill] sm:$0xff] }
 0x290   : > { %v4506_v30 = vadd.f32 %v4490_v28, %v4469_v6  ;;  %v3330_v46 = vadd.f32 %v11591_v16, %v3253_v19  ;;  %v3504_v0 = vmul.f32 %v8895_v47, %v11592_v45  ;;  %v3505_v23 = vmul.f32 %v8895_v47, %v3482_v40  ;;  %v11595_v6 = vld [vmem:[#allocation25_spill] sm:$0xff] }
 0x291   : > { %v4582_v60 = vadd.f32 %v4566_v44, %v4505_v5  ;;  %v3559_v42 = vsel %vm1428_vm15, %v11594_v2, %v11593_v36  ;;  %v3406_v24 = vadd.f32 %v11595_v6, %v3329_v62  ;;  %v3581_v16 = vmul.f32 %v8907_v55, %v11597_v41  ;;  %v9185_v2 = vld [vmem:[%s10754_s7] ss:$0 sm:$0xff]  ;;  %v11600_v36 = vld [vmem:[#allocation30_spill] sm:$0xff] }
 0x292   : > { %v4583_v25 = vadd.f32 %v4567_v9, %v4506_v30  ;;  %v3407_v28 = vadd.f32 %v11596_v14, %v3330_v46  ;;  %v3582_v19 = vmul.f32 %v8907_v55, %v3559_v42  ;;  %v11598_v44 = vrot.slane %v8974_v1, 3  ;;  %v11599_v9 = vld [vmem:[#allocation14_spill] sm:$0xff]  ;;  %v11603_v46 = vld [vmem:[#allocation79_spill] sm:$0xff] }
 0x293   : > { %v4659_v45 = vadd.f32 %v4643_v8, %v4582_v60  ;;  %v3443_v40 = vadd.f32 %v11600_v36, %v3406_v24  ;;  %v11601_v5 = vld [vmem:[#allocation90_spill] sm:$0xff]  ;;  %v3658_v62 = vmul.f32 %v8927_v52, %v11602_v38  ;;  %v11604_v60 = vrot.slane %v9013_v54, 5  ;;  %v11605_v24 = vld [vmem:[#allocation124_spill] sm:$0xff] }
 0x294   : > { %v4660_v11 = vadd.f32 %v4644_v4, %v4583_v25  ;;  %v3636_v48 = vsel %vm1506_vm2, %v11599_v9, %v11598_v44  ;;  %v3444_v30 = vadd.f32 %v11601_v5, %v3407_v28  ;;  %v3769_v28 = vmul.f32 %v8941_v20, %v11605_v24  ;;  %v9202_v9 = vld [vmem:[#allocation2 + $0xc8] sm:$0xff] }
 0x295   : > { %v3659_v8 = vmul.f32 %v8927_v52, %v3636_v48  ;;  %v4736_v4 = vadd.f32 %v4720_v12, %v4659_v45  ;;  %v3754_v25 = vsel %vm1079_vm10, %v11604_v60, %v11603_v46  ;;  %v3520_v42 = vadd.f32 %v3504_v0, %v3443_v40 }
 0x296   : > { %v4737_v1 = vadd.f32 %v4721_v39, %v4660_v11  ;;  %v3521_v6 = vadd.f32 %v3505_v23, %v3444_v30  ;;  %v3768_v14 = vmul.f32 %v8941_v20, %v3754_v25  ;;  %v3807_v12 = vrot.slane %v9202_v9, 6  ;;  %v9205_v39 = vld [vmem:[#allocation2 + $0xd0] sm:$0xff] }
 0x297   : > { %v4759_v41 = vadd.f32 %v9185_v2, %v4736_v4  ;;  %v3815_v45 = vrot.slane %v9205_v39, 6  ;;  %v3597_v11 = vadd.f32 %v3581_v16, %v3520_v42  ;;  %v3884_v23 = vrot.slane %v9202_v9, 7 }
 0x298   : > { %v4760_v44 = vadd.f32 %v9185_v2, %v4737_v1  ;;  %v3598_v0 = vadd.f32 %v3582_v19, %v3521_v6  ;;  %v3892_v48 = vrot.slane %v9205_v39, 7  ;;  %v11606_v30 = vrot.slane %v9013_v54, 6 }
 0x299   : > { %v4775_v36 = vmax.f32 %v4759_v41, 0.0  ;;  %v3823_v5 = vsel %vm1157_vm11, %v3807_v12, %v3815_v45  ;;  %v3674_v4 = vadd.f32 %v3658_v62, %v3597_v11  ;;  %v11607_v25 = vrot.slane %v9013_v54, 7 }
 0x29a   : > { %v4776_v40 = vmax.f32 %v4760_v44, 0.0  ;;  %v3831_v38 = vsel %vm1157_vm11, %v11606_v30, %v3807_v12  ;;  %v3675_v1 = vadd.f32 %v3659_v8, %v3598_v0  ;;  %v3846_v16 = vmul.f32 %v8963_v15, %v3823_v5  ;;  %v4225_v44 = vld [vmem:[#allocation2 + $0xe0] sm:$0xff] }
 0x29b   : > { %v3845_v46 = vmul.f32 %v8963_v15, %v3831_v38  ;;  %v3900_v60 = vsel %vm1235_vm12, %v3884_v23, %v3892_v48  ;;  %v3908_v42 = vsel %vm1235_vm12, %v11607_v25, %v3884_v23  ;;  %v3959_v6 = vmul.f32 %v9202_v9, %v8954_v29 }
 0x29c   : > { %v4791_v19 = vpack.c.bf16 %v4776_v40, %v4775_v36  ;;  %v3784_v24 = vadd.f32 %v3768_v14, %v3674_v4  ;;  %v3785_v41 = vadd.f32 %v3769_v28, %v3675_v1  ;;  %v3922_v62 = vmul.f32 %v8970_v50, %v3908_v42 }
 0x29d   : > { %v3923_v8 = vmul.f32 %v8970_v50, %v3900_v60  ;;  %v3960_v12 = vmul.f32 %v9205_v39, %v8954_v29  ;;  %v3990_v54 = vrot.slane %v9202_v9, 1  ;;  %v3998_v45 = vrot.slane %v9205_v39, 1 }
 0x29e   : > { %5278 = vmatprep.mubr.msk.bf16.mxu1 %vm451_vm1, %v4791_v19  ;;  %v4067_v11 = vrot.slane %v9202_v9, 2  ;;  %v3861_v0 = vadd.f32 %v3845_v46, %v3784_v24  ;;  %v3862_v23 = vadd.f32 %v3846_v16, %v3785_v41  ;;  %v4075_v14 = vrot.slane %v9205_v39, 2 }
 0x29f   : > { %v4144_v28 = vrot.slane %v9202_v9, 3  ;;  %v4014_v48 = vsel %vm1350_vm14, %v3998_v45, %v9106_v32  ;;  %v4022_v36 = vsel %vm1350_vm14, %v3990_v54, %v3998_v45  ;;  %v4152_v40 = vrot.slane %v9205_v39, 3  ;;  %v9265_v54 = vld [vmem:[#allocation2 + $0xe8] sm:$0xff] }
 0x2a0   : > { %v4254_v5 = vrot.slane %v4225_v44, 5  ;;  %v3938_v30 = vadd.f32 %v3922_v62, %v3861_v0  ;;  %v3939_v38 = vadd.f32 %v3923_v8, %v3862_v23  ;;  %v4036_v4 = vmul.f32 %v8994_v10, %v4022_v36 }
 0x2a1   : > { %v4037_v1 = vmul.f32 %v8994_v10, %v4014_v48  ;;  %v4091_v46 = vsel %vm1428_vm15, %v4075_v14, %v9116_v21  ;;  %v4099_v16 = vsel %vm1428_vm15, %v4067_v11, %v4075_v14  ;;  %v11608_v19 = vrot.slane %v9088_v53, 3  ;;  %v9268_v11 = vld [vmem:[#allocation2 + $0xf0] sm:$0xff] }
 0x2a2   : > { %v9257_v25 = vsel %vm1506_vm2, %v4144_v28, %v4152_v40  ;;  %v3975_v42 = vadd.f32 %v3959_v6, %v3938_v30  ;;  %v3976_v24 = vadd.f32 %v3960_v12, %v3939_v38  ;;  %v4113_v41 = vmul.f32 %v9006_v58, %v4099_v16 }
 0x2a3   : > { %v9253_v60 = vsel %vm1506_vm2, %v4152_v40, %v11608_v19  ;;  %v4114_v62 = vmul.f32 %v9006_v58, %v4091_v46  ;;  %v4190_v8 = vmul.f32 %v9034_v26, %v9257_v25  ;;  %v4262_v45 = vrot.slane %v9265_v54, 5 }
 0x2a4   : > { %v4191_v53 = vmul.f32 %v9034_v26, %v9253_v60  ;;  %v4270_v0 = vrot.slane %v9268_v11, 5  ;;  %v4052_v6 = vadd.f32 %v4036_v4, %v3975_v42  ;;  %v4053_v12 = vadd.f32 %v4037_v1, %v3976_v24  ;;  %v9295_v24 = vld [vmem:[#allocation2 + $0xf8] sm:$0xff] }
 0x2a5   : > { %v4331_v23 = vrot.slane %v4225_v44, 6  ;;  %v4339_v14 = vrot.slane %v9265_v54, 6  ;;  %v9278_v48 = vsel %vm1079_vm10, %v4254_v5, %v4262_v45  ;;  %v4347_v36 = vrot.slane %v9268_v11, 6  ;;  %11609 = vst [vmem:[#allocation63_spill] sm:$0xff] %v9295_v24 }
 0x2a6   : > { %v9274_v28 = vsel %vm1079_vm10, %v4262_v45, %v4270_v0  ;;  %v4408_v40 = vrot.slane %v4225_v44, 7  ;;  %v4129_v30 = vadd.f32 %v4113_v41, %v4052_v6  ;;  %v4130_v38 = vadd.f32 %v4114_v62, %v4053_v12 }
 0x2a7   : > { %v4300_v4 = vmul.f32 %v9042_v3, %v9278_v48  ;;  %v4301_v1 = vmul.f32 %v9042_v3, %v9274_v28  ;;  %v9287_v46 = vsel %vm1157_vm11, %v4339_v14, %v4347_v36  ;;  %v9291_v16 = vsel %vm1157_vm11, %v4331_v23, %v4339_v14 }
 0x2a8   : > { %v4416_v5 = vrot.slane %v9265_v54, 7  ;;  %v4424_v44 = vrot.slane %v9268_v11, 7  ;;  %v4206_v19 = vadd.f32 %v4190_v8, %v4129_v30  ;;  %v4207_v42 = vadd.f32 %v4191_v53, %v4130_v38 }
 0x2a9   : > { %v4377_v41 = vmul.f32 %v9059_v7, %v9291_v16  ;;  %v4378_v62 = vmul.f32 %v9059_v7, %v9287_v46  ;;  %v4491_v8 = vmul.f32 %v9265_v54, %v9074_v17  ;;  %v4492_v53 = vmul.f32 %v9268_v11, %v9074_v17 }
 0x2aa   : > { %v9303_v45 = vsel %vm1235_vm12, %v4416_v5, %v4424_v44  ;;  %v9307_v0 = vsel %vm1235_vm12, %v4408_v40, %v4416_v5  ;;  %v4316_v6 = vadd.f32 %v4300_v4, %v4206_v19  ;;  %v4317_v12 = vadd.f32 %v4301_v1, %v4207_v42 }
 0x2ab   : > { %v4454_v23 = vmul.f32 %v9086_v33, %v9307_v0  ;;  %v4455_v14 = vmul.f32 %v9086_v33, %v9303_v45  ;;  %v4522_v36 = vrot.slane %v9265_v54, 1  ;;  %v4530_v30 = vrot.slane %v9268_v11, 1  ;;  %v5396_v33 = vld [vmem:[#allocation2 + $0xc0] sm:$0xff] }
 0x2ac   : > { %v10935_v40 = vrot.slane %v9295_v24, 1  ;;  %v4599_v38 = vrot.slane %v9265_v54, 2  ;;  %v4393_v5 = vadd.f32 %v4377_v41, %v4316_v6  ;;  %v4394_v44 = vadd.f32 %v4378_v62, %v4317_v12 }
 0x2ad   : > { %v4607_v27 = vrot.slane %v9268_v11, 2  ;;  %v10936_v4 = vrot.slane %v9295_v24, 2  ;;  %v9331_v19 = vsel %vm1350_vm14, %v4522_v36, %v4530_v30  ;;  %v4676_v42 = vrot.slane %v9265_v54, 3 }
 0x2ae   : > { %v9327_v1 = vsel %vm1350_vm14, %v4530_v30, %v10935_v40  ;;  %v4684_v22 = vrot.slane %v9268_v11, 3  ;;  %v4470_v41 = vadd.f32 %v4454_v23, %v4393_v5  ;;  %v4471_v62 = vadd.f32 %v4455_v14, %v4394_v44 }
 0x2af   : > { %v4568_v6 = vmul.f32 %v9111_v35, %v9331_v19  ;;  %v4569_v12 = vmul.f32 %v9111_v35, %v9327_v1  ;;  %v9343_v40 = vsel %vm1428_vm15, %v4607_v27, %v10936_v4  ;;  %v9347_v36 = vsel %vm1428_vm15, %v4599_v38, %v4607_v27  ;;  %v11610_v38 = vld [vmem:[#allocation45_spill] sm:$0xff] }
 0x2b0   : > { %v4692_v30 = vrot.slane %v9295_v24, 3  ;;  %v9352_v23 = vsel %vm1506_vm2, %v4676_v42, %v4684_v22  ;;  %v4507_v14 = vadd.f32 %v4491_v8, %v4470_v41  ;;  %v4508_v5 = vadd.f32 %v4492_v53, %v4471_v62  ;;  %v11612_v42 = vld [vmem:[#allocation47_spill] sm:$0xff] }
 0x2b1   : > { %v4645_v44 = vmul.f32 %v9121_v57, %v9347_v36  ;;  %v4646_v43 = vmul.f32 %v9121_v57, %v9343_v40  ;;  %v4722_v27 = vmul.f32 %v9135_v59, %v9352_v23  ;;  %v2913_v13 = vadd.f32 %v11611_v18, %v11610_v38  ;;  %v11617_v57 = vld [vmem:[#allocation125_spill] sm:$0xff] }
 0x2b2   : > { %v9360_v4 = vsel %vm1506_vm2, %v4684_v22, %v4692_v30  ;;  %v2914_v8 = vadd.f32 %v11613_v31, %v11612_v42  ;;  %v4584_v53 = vadd.f32 %v4568_v6, %v4507_v14  ;;  %v4585_v41 = vadd.f32 %v4569_v12, %v4508_v5  ;;  %v11616_v30 = vld [vmem:[#allocation84_spill] sm:$0xff]  ;;  %v11618_v6 = vld [vmem:[#allocation51_spill] sm:$0xff]  ;;  %v11619_v14 = vld [vmem:[#allocation85_spill] sm:$0xff] }
 0x2b3   : > { %v4723_v62 = vmul.f32 %v9135_v59, %v9360_v4  ;;  %v2990_v22 = vadd.f32 %v11615_v63, %v2913_v13  ;;  %v3316_v35 = vmul.f32 %v8869_v56, %v11617_v57  ;;  %v3345_v18 = vrot.slane %v5396_v33, 7  ;;  %v11620_v42 = vld [vmem:[#allocation73_spill] sm:$0xff] }
 0x2b4   : > { %v2991_v24 = vadd.f32 %v11616_v30, %v2914_v8  ;;  %v4661_v38 = vadd.f32 %v4645_v44, %v4584_v53  ;;  %v4662_v17 = vadd.f32 %v4646_v43, %v4585_v41  ;;  %v3429_v31 = vmul.f32 %v9202_v9, %v8889_v51  ;;  %v11622_v44 = vld [vmem:[#allocation60_spill] sm:$0xff]  ;;  %v11623_v53 = vld [vmem:[#allocation86_spill] sm:$0xff] }
 0x2b5   : > { %v3067_v12 = vadd.f32 %v11618_v6, %v2990_v22  ;;  %v3377_v63 = vsel %vm1235_vm12, %v3345_v18, %v11620_v42  ;;  %v3393_v13 = vmul.f32 %v8882_v34, %v11621_v61  ;;  %v3430_v43 = vmul.f32 %v9205_v39, %v8889_v51  ;;  %v11627_v6 = vld [vmem:[#allocation3_spill] sm:$0xff] }
 0x2b6   : > { %v3068_v5 = vadd.f32 %v11619_v14, %v2991_v24  ;;  %v4738_v8 = vadd.f32 %v4722_v27, %v4661_v38  ;;  %v4739_v57 = vadd.f32 %v4723_v62, %v4662_v17  ;;  %v3392_v33 = vmul.f32 %v8882_v34, %v3377_v63  ;;  %v11624_v24 = vld [vmem:[#allocation122_spill] sm:$0xff]  ;;  %v11625_v27 = vld [vmem:[#allocation127_spill] sm:$0xff]  ;;  %v11626_v38 = vld [vmem:[#allocation77_spill] sm:$0xff] }
 0x2b7   : > { %v3144_v9 = vadd.f32 %v11622_v44, %v3067_v12  ;;  %v3483_v22 = vsel %vm1350_vm14, %v11624_v24, %v9106_v32  ;;  %v3506_v17 = vmul.f32 %v8895_v47, %v11625_v27  ;;  %v11628_v14 = vld [vmem:[#allocation123_spill] sm:$0xff]  ;;  %v11629_v63 = vld [vmem:[#allocation128_spill] sm:$0xff]  ;;  %v3770_v24 = vmul.f32 %v8941_v20, %v9278_v48 }
 0x2b8   : > { %v3145_v41 = vadd.f32 %v11623_v53, %v3068_v5  ;;  %v4761_v30 = vadd.f32 %v9185_v2, %v4738_v8  ;;  %v4762_v18 = vadd.f32 %v9185_v2, %v4739_v57  ;;  %v3507_v62 = vmul.f32 %v8895_v47, %v3483_v22 }
 0x2b9   : > { %v3254_v39 = vadd.f32 %v11626_v38, %v3144_v9  ;;  %v3560_v5 = vsel %vm1428_vm15, %v11628_v14, %v9116_v21  ;;  %v3583_v61 = vmul.f32 %v8907_v55, %v11629_v63  ;;  %v3660_v53 = vmul.f32 %v8927_v52, %v9257_v25  ;;  %v9422_v25 = vld [vmem:[#allocation2 + $0x100] sm:$0xff] }
 0x2ba   : > { %v3255_v12 = vadd.f32 %v11627_v6, %v3145_v41  ;;  %v4777_v42 = vmax.f32 %v4761_v30, 0.0  ;;  %v4778_v32 = vmax.f32 %v4762_v18, 0.0  ;;  %v3584_v8 = vmul.f32 %v8907_v55, %v3560_v5 }
 0x2bb   : > { %v3331_v57 = vadd.f32 %v3315_v37, %v3254_v39  ;;  %v3661_v9 = vmul.f32 %v8927_v52, %v9253_v60  ;;  %v3771_v21 = vmul.f32 %v8941_v20, %v9274_v28  ;;  %v3847_v22 = vmul.f32 %v8963_v15, %v9291_v16 }
 0x2bc   : > { %v3332_v44 = vadd.f32 %v3316_v35, %v3255_v12  ;;  %v4792_v41 = vpack.c.bf16 %v4778_v32, %v4777_v42  ;;  %v3848_v37 = vmul.f32 %v8963_v15, %v9287_v46  ;;  %v3924_v35 = vmul.f32 %v8970_v50, %v9307_v0  ;;  %v9435_v46 = vld [vmem:[#allocation2 + $0x108] sm:$0xff]  ;;  %v9437_v0 = vld [vmem:[#allocation2 + $0x110] sm:$0xff] }
 0x2bd   : > { %v3408_v30 = vadd.f32 %v3392_v33, %v3331_v57  ;;  %v3925_v60 = vmul.f32 %v8970_v50, %v9303_v45  ;;  %v3961_v28 = vmul.f32 %v9265_v54, %v8954_v29  ;;  %v3962_v48 = vmul.f32 %v9268_v11, %v8954_v29 }
 0x2be   : > { %v3409_v18 = vadd.f32 %v3393_v13, %v3332_v44  ;;  %5279 = vmatmul.mubr.msk.bf16.vlgmr.msra.gmra.mrb[4].mxu1 %vm451_vm1, %v4792_v41  ;;  %v9433_v16 = vmul.f32 %v8994_v10, %v9331_v19  ;;  %v9441_v27 = vmul.f32 %v8994_v10, %v9327_v1  ;;  %v9445_v45 = vmul.f32 %v9006_v58, %v9347_v36 }
 0x2bf   : > { %v3445_v13 = vadd.f32 %v3429_v31, %v3408_v30  ;;  %v9449_v38 = vmul.f32 %v9006_v58, %v9343_v40  ;;  %v9453_v19 = vmul.f32 %v9034_v26, %v9352_v23  ;;  %v9457_v31 = vmul.f32 %v9034_v26, %v9360_v4  ;;  %v9484_v30 = vld [vmem:[#allocation2 + $0x118] sm:$0xff] }
 0x2c0   : > { %v3446_v33 = vadd.f32 %v3430_v43, %v3409_v18  ;;  %v10953_v43 = vrot.slane %v9422_v25, 5  ;;  %v4263_v6 = vrot.slane %v9435_v46, 5  ;;  %v4271_v36 = vrot.slane %v9437_v0, 5 }
 0x2c1   : > { %v3522_v1 = vadd.f32 %v3506_v17, %v3445_v13  ;;  %v10952_v12 = vrot.slane %v9422_v25, 6  ;;  %v4340_v40 = vrot.slane %v9435_v46, 6  ;;  %v4348_v14 = vrot.slane %v9437_v0, 6 }
 0x2c2   : > { %v3523_v39 = vadd.f32 %v3507_v62, %v3446_v33  ;;  %v10951_v5 = vrot.slane %v9422_v25, 7  ;;  %v4279_v63 = vsel %vm1079_vm10, %v4263_v6, %v4271_v36  ;;  %v4287_v17 = vsel %vm1079_vm10, %v10953_v43, %v4263_v6 }
 0x2c3   : > { %v3599_v42 = vadd.f32 %v3583_v61, %v3522_v1  ;;  %v9473_v62 = vmul.f32 %v9042_v3, %v4287_v17  ;;  %v9476_v57 = vmul.f32 %v9042_v3, %v4279_v63  ;;  %v4356_v44 = vsel %vm1157_vm11, %v4340_v40, %v4348_v14 }
 0x2c4   : > { %v3600_v32 = vadd.f32 %v3584_v8, %v3523_v39  ;;  %v4364_v61 = vsel %vm1157_vm11, %v10952_v12, %v4340_v40  ;;  %v9490_v13 = vmul.f32 %v9059_v7, %v4356_v44  ;;  %v4417_v33 = vrot.slane %v9435_v46, 7  ;;  %v11630_v39 = vld [vmem:[#allocation35_spill] sm:$0xff] }
 0x2c5   : > { %v3676_v8 = vadd.f32 %v3660_v53, %v3599_v42  ;;  %v9487_v18 = vmul.f32 %v9059_v7, %v4364_v61  ;;  %v4425_v1 = vrot.slane %v9437_v0, 7  ;;  %v9496_v6 = vmul.f32 %v11630_v39, %v9435_v46 }
 0x2c6   : > { %v3677_v41 = vadd.f32 %v3661_v9, %v3600_v32  ;;  %v9500_v53 = vmul.f32 %v11630_v39, %v9437_v0  ;;  %v4523_v40 = vrot.slane %v9435_v46, 1  ;;  %v4531_v14 = vrot.slane %v9437_v0, 1 }
 0x2c7   : > { %v3786_v9 = vadd.f32 %v3770_v24, %v3676_v8  ;;  %v4433_v42 = vsel %vm1235_vm12, %v4417_v33, %v4425_v1  ;;  %v4441_v32 = vsel %vm1235_vm12, %v10951_v5, %v4417_v33  ;;  %v9511_v63 = vrot.slane %v9484_v30, 1 }
 0x2c8   : > { %v3787_v36 = vadd.f32 %v3771_v21, %v3677_v41  ;;  %v4600_v17 = vrot.slane %v9435_v46, 2  ;;  %v11631_v21 = vld [vmem:[#allocation58_spill] sm:$0xff]  ;;  %v4555_v1 = vsel %vm1350_vm14, %v4523_v40, %v4531_v14  ;;  %v4608_v33 = vrot.slane %v9437_v0, 2 }
 0x2c9   : > { %v3863_v44 = vadd.f32 %v3847_v22, %v3786_v9  ;;  %v4456_v61 = vmul.f32 %v11631_v21, %v4441_v32  ;;  %v4457_v8 = vmul.f32 %v11631_v21, %v4433_v42  ;;  %v4547_v41 = vsel %vm1350_vm14, %v4531_v14, %v9511_v63  ;;  %v11632_v22 = vld [vmem:[#allocation61_spill] sm:$0xff]  ;;  %v11635_v21 = vld [vmem:[#allocation34_spill] sm:$0xff] }
 0x2ca   : > { %v3864_v24 = vadd.f32 %v3848_v37, %v3787_v36  ;;  %v9523_v5 = vrot.slane %v9484_v30, 2  ;;  %v9526_v37 = vmul.f32 %v11632_v22, %v4555_v1  ;;  %v9529_v9 = vmul.f32 %v11632_v22, %v4547_v41  ;;  %v11634_v22 = vld [vmem:[#allocation40_spill] sm:$0xff] }
 0x2cb   : > { %v3940_v12 = vadd.f32 %v3924_v35, %v3863_v44  ;;  %v4632_v40 = vsel %vm1428_vm15, %v4600_v17, %v4608_v33  ;;  %v4677_v14 = vrot.slane %v9435_v46, 3  ;;  %v4685_v42 = vrot.slane %v9437_v0, 3  ;;  %v11637_v46 = vld [vmem:[#allocation31_spill] sm:$0xff] }
 0x2cc   : > { %v3941_v43 = vadd.f32 %v3925_v60, %v3864_v24  ;;  %v4624_v36 = vsel %vm1428_vm15, %v4608_v33, %v9523_v5  ;;  %v11633_v60 = vld [vmem:[#allocation62_spill] sm:$0xff]  ;;  %v4693_v41 = vrot.slane %v9484_v30, 3  ;;  %v3146_v17 = vadd.f32 %v11635_v21, %v11634_v22 }
 0x2cd   : > { %v3977_v32 = vadd.f32 %v3961_v28, %v3940_v12  ;;  %v9539_v44 = vmul.f32 %v11633_v60, %v4632_v40  ;;  %v9542_v24 = vmul.f32 %v11633_v60, %v4624_v36  ;;  %v4709_v1 = vsel %vm1506_vm2, %v4677_v14, %v4685_v42  ;;  %v11636_v33 = vld [vmem:[#allocation26_spill] sm:$0xff]  ;;  %v11639_v40 = vld [vmem:[#allocation81_spill] sm:$0xff] }
 0x2ce   : > { %v3978_v35 = vadd.f32 %v3962_v48, %v3941_v43  ;;  %v3147_v39 = vadd.f32 %v11637_v46, %v11636_v33  ;;  %v9554_v0 = vmul.f32 %v9135_v59, %v4709_v1  ;;  %v11638_v43 = vld [vmem:[#allocation29_spill] sm:$0xff]  ;;  %v4701_v36 = vsel %vm1506_vm2, %v4685_v42, %v4693_v41  ;;  %v11640_v22 = vld [vmem:[#allocation78_spill] sm:$0xff]  ;;  %v5397_v1 = vld [vmem:[#allocation2 + $0xe0] sm:$0xff] }
 0x2cf   : > { %v4054_v28 = vadd.f32 %v9433_v16, %v3977_v32  ;;  %v3317_v12 = vmul.f32 %v8869_v56, %v11638_v43  ;;  %v3256_v21 = vadd.f32 %v11639_v40, %v3146_v17  ;;  %v11641_v33 = vld [vmem:[#allocation13_spill] sm:$0xff]  ;;  %v3346_v46 = vrot.slane %v5397_v1, 7  ;;  %v11642_v40 = vld [vmem:[#allocation23_spill] sm:$0xff] }
 0x2d0   : > { %v4055_v48 = vadd.f32 %v9441_v27, %v3978_v35  ;;  %v3257_v14 = vadd.f32 %v11640_v22, %v3147_v39  ;;  %v3318_v16 = vmul.f32 %v8869_v56, %v11641_v33  ;;  %v9569_v35 = vmul.f32 %v9135_v59, %v4701_v36 }
 0x2d1   : > { %v4131_v27 = vadd.f32 %v9445_v45, %v4054_v28  ;;  %v3333_v43 = vadd.f32 %v3317_v12, %v3256_v21  ;;  %v3431_v42 = vmul.f32 %v9265_v54, %v8889_v51  ;;  %v3378_v56 = vsel %vm1235_vm12, %v3346_v46, %v11642_v40  ;;  %v11643_v45 = vld [vmem:[#allocation48_spill] sm:$0xff]  ;;  %v11644_v12 = vld [vmem:[#allocation63_spill] sm:$0xff]  ;;  %v11646_v21 = vld [vmem:[#allocation37_spill] sm:$0xff] }
 0x2d2   : > { %v4132_v32 = vadd.f32 %v9449_v38, %v4055_v48  ;;  %v3334_v60 = vadd.f32 %v3318_v16, %v3257_v14  ;;  %v3395_v38 = vmul.f32 %v8882_v34, %v11643_v45  ;;  %v3394_v28 = vmul.f32 %v8882_v34, %v3378_v56  ;;  %v11647_v14 = vld [vmem:[#allocation41_spill] sm:$0xff]  ;;  %v11650_v46 = vld [vmem:[#allocation43_spill] sm:$0xff]  ;;  %v9607_v45 = vld [vmem:[#allocation2 + $0x108] sm:$0xff] }
 0x2d3   : > { %v4208_v17 = vadd.f32 %v9453_v19, %v4131_v27  ;;  %v3432_v48 = vmul.f32 %v9268_v11, %v8889_v51  ;;  %v11645_v36 = vrot.slane %v11644_v12, 1  ;;  %v3508_v33 = vmul.f32 %v8895_v47, %v11647_v14  ;;  %v11649_v51 = vld [vmem:[#allocation4_spill] sm:$0xff] }
 0x2d4   : > { %v4209_v39 = vadd.f32 %v9457_v31, %v4132_v32  ;;  %v3411_v22 = vadd.f32 %v3395_v38, %v3334_v60  ;;  %v3410_v16 = vadd.f32 %v3394_v28, %v3333_v43  ;;  %v11648_v27 = vrot.slane %v11644_v12, 2  ;;  %v9610_v38 = vld [vmem:[#allocation2 + $0x110] sm:$0xff] }
 0x2d5   : > { %v3484_v54 = vsel %vm1350_vm14, %v11646_v21, %v11645_v36  ;;  %v4318_v19 = vadd.f32 %v9473_v62, %v4208_v17  ;;  %v3663_v43 = vmul.f32 %v8927_v52, %v9360_v4  ;;  %v3817_v28 = vrot.slane %v9610_v38, 6 }
 0x2d6   : > { %v4319_v31 = vadd.f32 %v9476_v57, %v4209_v39  ;;  %v3509_v34 = vmul.f32 %v8895_v47, %v3484_v54  ;;  %v3561_v11 = vsel %vm1428_vm15, %v11649_v51, %v11648_v27  ;;  %v3448_v62 = vadd.f32 %v3432_v48, %v3411_v22 }
 0x2d7   : > { %v4395_v32 = vadd.f32 %v9487_v18, %v4318_v19  ;;  %v3585_v57 = vmul.f32 %v8907_v55, %v11650_v46  ;;  %v3447_v60 = vadd.f32 %v3431_v42, %v3410_v16  ;;  %v3586_v17 = vmul.f32 %v8907_v55, %v3561_v11 }
 0x2d8   : > { %v4396_v1 = vadd.f32 %v9490_v13, %v4319_v31  ;;  %v3662_v47 = vmul.f32 %v8927_v52, %v9352_v23  ;;  %v3525_v56 = vadd.f32 %v3509_v34, %v3448_v62  ;;  %v3732_v18 = vrot.slane %v9607_v45, 5 }
 0x2d9   : > { %v4472_v39 = vadd.f32 %v4456_v61, %v4395_v32  ;;  %v3524_v13 = vadd.f32 %v3508_v33, %v3447_v60  ;;  %v3740_v42 = vrot.slane %v9610_v38, 5  ;;  %v3809_v55 = vrot.slane %v9607_v45, 6 }
 0x2da   : > { %v4473_v40 = vadd.f32 %v4457_v8, %v4396_v1  ;;  %v3602_v4 = vadd.f32 %v3586_v17, %v3525_v56  ;;  %v11651_v61 = vrot.slane %v9422_v25, 5  ;;  %v11652_v22 = vrot.slane %v9422_v25, 6 }
 0x2db   : > { %v4509_v23 = vadd.f32 %v9496_v6, %v4472_v39  ;;  %v3601_v48 = vadd.f32 %v3585_v57, %v3524_v13  ;;  %v3748_v12 = vsel %vm1079_vm10, %v3732_v18, %v3740_v42  ;;  %v3825_v21 = vsel %vm1157_vm11, %v3809_v55, %v3817_v28 }
 0x2dc   : > { %v4510_v52 = vadd.f32 %v9500_v53, %v4473_v40  ;;  %v3756_v8 = vsel %vm1079_vm10, %v11651_v61, %v3732_v18  ;;  %v3679_v53 = vadd.f32 %v3663_v43, %v3602_v4  ;;  %v3773_v19 = vmul.f32 %v8941_v20, %v3748_v12  ;;  %v9671_v4 = vld [vmem:[#allocation2 + $0x128] sm:$0xff]  ;;  %v9673_v61 = vld [vmem:[#allocation2 + $0x130] sm:$0xff] }
 0x2dd   : > { %v3772_v36 = vmul.f32 %v8941_v20, %v3756_v8  ;;  %v4586_v54 = vadd.f32 %v9526_v37, %v4509_v23  ;;  %v3678_v31 = vadd.f32 %v3662_v47, %v3601_v48  ;;  %v3833_v14 = vsel %vm1157_vm11, %v11652_v22, %v3809_v55  ;;  %v9663_v55 = vld [vmem:[#allocation2 + $0x120] sm:$0xff] }
 0x2de   : > { %v4587_v6 = vadd.f32 %v9529_v9, %v4510_v52  ;;  %v3850_v33 = vmul.f32 %v8963_v15, %v3825_v21  ;;  %v3886_v16 = vrot.slane %v9607_v45, 7  ;;  %v3789_v37 = vadd.f32 %v3773_v19, %v3679_v53 }
 0x2df   : > { %v4663_v34 = vadd.f32 %v9539_v44, %v4586_v54  ;;  %v3849_v9 = vmul.f32 %v8963_v15, %v3833_v14  ;;  %v3788_v51 = vadd.f32 %v3772_v36, %v3678_v31  ;;  %v3894_v20 = vrot.slane %v9610_v38, 7 }
 0x2e0   : > { %v4664_v27 = vadd.f32 %v9542_v24, %v4587_v6  ;;  %v11653_v11 = vrot.slane %v9422_v25, 7  ;;  %v3963_v1 = vmul.f32 %v9607_v45, %v8954_v29  ;;  %v3866_v46 = vadd.f32 %v3850_v33, %v3789_v37 }
 0x2e1   : > { %v4740_v62 = vadd.f32 %v9554_v0, %v4663_v34  ;;  %v3865_v57 = vadd.f32 %v3849_v9, %v3788_v51  ;;  %v3902_v15 = vsel %vm1235_vm12, %v3886_v16, %v3894_v20  ;;  %v3964_v25 = vmul.f32 %v9610_v38, %v8954_v29 }
 0x2e2   : > { %v3910_v32 = vsel %vm1235_vm12, %v11653_v11, %v3886_v16  ;;  %v4741_v44 = vadd.f32 %v9569_v35, %v4664_v27  ;;  %v3992_v60 = vrot.slane %v9607_v45, 1  ;;  %v3927_v0 = vmul.f32 %v8970_v50, %v3902_v15 }
 0x2e3   : > { %v3926_v24 = vmul.f32 %v8970_v50, %v3910_v32  ;;  %v4763_v17 = vadd.f32 %v9185_v2, %v4740_v62  ;;  %v4000_v35 = vrot.slane %v9610_v38, 1  ;;  %v4069_v39 = vrot.slane %v9607_v45, 2 }
 0x2e4   : > { %v4764_v47 = vadd.f32 %v9185_v2, %v4741_v44  ;;  %v4077_v40 = vrot.slane %v9610_v38, 2  ;;  %v4146_v56 = vrot.slane %v9607_v45, 3  ;;  %v3943_v29 = vadd.f32 %v3927_v0, %v3866_v46 }
 0x2e5   : > { %v3942_v43 = vadd.f32 %v3926_v24, %v3865_v57  ;;  %v4779_v18 = vmax.f32 %v4763_v17, 0.0  ;;  %v4016_v42 = vsel %vm1350_vm14, %v4000_v35, %v9511_v63  ;;  %v4024_v50 = vsel %vm1350_vm14, %v3992_v60, %v4000_v35  ;;  %v9719_v57 = vld [vmem:[#allocation2 + $0x138] sm:$0xff] }
 0x2e6   : > { %v4780_v13 = vmax.f32 %v4764_v47, 0.0  ;;  %v4041_v23 = vmul.f32 %v8994_v10, %v4016_v42  ;;  %v4093_v52 = vsel %vm1428_vm15, %v4077_v40, %v9523_v5  ;;  %v3980_v48 = vadd.f32 %v3964_v25, %v3943_v29  ;;  %v11654_v47 = vld [vmem:[#allocation35_spill] sm:$0xff] }
 0x2e7   : > { %v3979_v28 = vadd.f32 %v3963_v1, %v3942_v43  ;;  %v4040_v12 = vmul.f32 %v8994_v10, %v4024_v50  ;;  %v4101_v36 = vsel %vm1428_vm15, %v4069_v39, %v4077_v40  ;;  %v4118_v54 = vmul.f32 %v9006_v58, %v4093_v52 }
 0x2e8   : > { %v4793_v8 = vpack.c.bf16 %v4780_v13, %v4779_v18  ;;  %v4117_v21 = vmul.f32 %v9006_v58, %v4101_v36  ;;  %v4154_v6 = vrot.slane %v9610_v38, 3  ;;  %v4256_v53 = vrot.slane %v9663_v55, 5 }
 0x2e9   : > { %v4056_v19 = vadd.f32 %v4040_v12, %v3979_v28  ;;  %v4057_v31 = vadd.f32 %v4041_v23, %v3980_v48  ;;  %v4264_v22 = vrot.slane %v9671_v4, 5  ;;  %v4272_v14 = vrot.slane %v9673_v61, 5 }
 0x2ea   : > { %5282 = vmatprep.mubr.msk.bf16.mxu1 %vm451_vm1, %v4793_v8  ;;  %v9689_v10 = vsel %vm1506_vm2, %v4154_v6, %v4693_v41  ;;  %v9693_v58 = vsel %vm1506_vm2, %v4146_v56, %v4154_v6  ;;  %v4333_v33 = vrot.slane %v9663_v55, 6  ;;  %v4341_v16 = vrot.slane %v9671_v4, 6  ;;  %v11655_v56 = vld [vmem:[#allocation58_spill] sm:$0xff]  ;;  %v11656_v6 = vld [vmem:[#allocation61_spill] sm:$0xff] }
 0x2eb   : > { %v4133_v34 = vadd.f32 %v4117_v21, %v4056_v19  ;;  %v4134_v27 = vadd.f32 %v4118_v54, %v4057_v31  ;;  %v4194_v37 = vmul.f32 %v9034_v26, %v9693_v58  ;;  %v4195_v30 = vmul.f32 %v9034_v26, %v9689_v10 }
 0x2ec   : > { %v4280_v41 = vsel %vm1079_vm10, %v4264_v22, %v4272_v14  ;;  %v4288_v9 = vsel %vm1079_vm10, %v4256_v53, %v4264_v22  ;;  %v4349_v51 = vrot.slane %v9673_v61, 6  ;;  %v4365_v20 = vsel %vm1157_vm11, %v4333_v33, %v4341_v16 }
 0x2ed   : > { %v4210_v11 = vadd.f32 %v4194_v37, %v4133_v34  ;;  %v4211_v32 = vadd.f32 %v4195_v30, %v4134_v27  ;;  %v4304_v1 = vmul.f32 %v9042_v3, %v4288_v9  ;;  %v4305_v26 = vmul.f32 %v9042_v3, %v4280_v41  ;;  %v11658_v41 = vld [vmem:[#allocation76_spill] sm:$0xff]  ;;  %v11659_v9 = vld [vmem:[#allocation71_spill] sm:$0xff] }
 0x2ee   : > { %v4357_v62 = vsel %vm1157_vm11, %v4341_v16, %v4349_v51  ;;  %v4381_v44 = vmul.f32 %v9059_v7, %v4365_v20  ;;  %v4410_v46 = vrot.slane %v9663_v55, 7  ;;  %v4418_v24 = vrot.slane %v9671_v4, 7  ;;  %v11657_v16 = vld [vmem:[#allocation62_spill] sm:$0xff] }
 0x2ef   : > { %v4320_v15 = vadd.f32 %v4304_v1, %v4210_v11  ;;  %v4321_v25 = vadd.f32 %v4305_v26, %v4211_v32  ;;  %v4382_v60 = vmul.f32 %v9059_v7, %v4357_v62  ;;  %v4426_v17 = vrot.slane %v9673_v61, 7  ;;  %v11660_v1 = vld [vmem:[#allocation22_spill] sm:$0xff]  ;;  %v11661_v26 = vld [vmem:[#allocation113_spill] sm:$0xff] }
 0x2f0   : > { %v4442_v3 = vsel %vm1235_vm12, %v4410_v46, %v4418_v24  ;;  %v4495_v0 = vmul.f32 %v11654_v47, %v9671_v4  ;;  %v4496_v35 = vmul.f32 %v11654_v47, %v9673_v61  ;;  %v4524_v43 = vrot.slane %v9671_v4, 1 }
 0x2f1   : > { %v4397_v39 = vadd.f32 %v4381_v44, %v4320_v15  ;;  %v4398_v40 = vadd.f32 %v4382_v60, %v4321_v25  ;;  %v4434_v7 = vsel %vm1235_vm12, %v4418_v24, %v4426_v17  ;;  %v4458_v18 = vmul.f32 %v11655_v56, %v4442_v3  ;;  %v11662_v15 = vld [vmem:[#allocation114_spill] sm:$0xff]  ;;  %v11663_v17 = vld [vmem:[#allocation5_spill] sm:$0xff] }
 0x2f2   : > { %v4459_v13 = vmul.f32 %v11655_v56, %v4434_v7  ;;  %v4532_v29 = vrot.slane %v9673_v61, 1  ;;  %v9738_v42 = vrot.slane %v9719_v57, 1  ;;  %v4601_v28 = vrot.slane %v9671_v4, 2  ;;  %v9778_v60 = vld [vmem:[%s10753_s6 + $0x1d] ss:$0 sm:$0xff] }
 0x2f3   : > { %v4474_v50 = vadd.f32 %v4458_v18, %v4397_v39  ;;  %v4609_v23 = vrot.slane %v9673_v61, 2  ;;  %v9743_v52 = vrot.slane %v9719_v57, 2  ;;  %v4678_v8 = vrot.slane %v9671_v4, 3 }
 0x2f4   : > { %v4475_v48 = vadd.f32 %v4459_v13, %v4398_v40  ;;  %v4548_v12 = vsel %vm1350_vm14, %v4532_v29, %v9738_v42  ;;  %v4556_v36 = vsel %vm1350_vm14, %v4524_v43, %v4532_v29  ;;  %v4686_v21 = vrot.slane %v9673_v61, 3  ;;  %v11665_v43 = vld [vmem:[#allocation111_spill] sm:$0xff]  ;;  %v9789_v13 = vld [vmem:[%s10753_s6 + $0x1f] ss:$0 sm:$0xff] }
 0x2f5   : > { %v4511_v54 = vadd.f32 %v4495_v0, %v4474_v50  ;;  %v4572_v19 = vmul.f32 %v11656_v6, %v4556_v36  ;;  %v4573_v31 = vmul.f32 %v11656_v6, %v4548_v12  ;;  %v4625_v22 = vsel %vm1428_vm15, %v4609_v23, %v9743_v52  ;;  %v11664_v0 = vld [vmem:[#allocation115_spill] sm:$0xff]  ;;  %v11667_v50 = vld [vmem:[#allocation117_spill] sm:$0xff]  ;;  %v9800_v12 = vld [vmem:[%s10753_s6 + $0x1e] ss:$0 sm:$0xff] }
 0x2f6   : > { %v4512_v4 = vadd.f32 %v4496_v35, %v4475_v48  ;;  %v4633_v14 = vsel %vm1428_vm15, %v4601_v28, %v4609_v23  ;;  %v4650_v34 = vmul.f32 %v11657_v16, %v4625_v22  ;;  %v4694_v27 = vrot.slane %v9719_v57, 3  ;;  %v5401_v40 = vld [vmem:[#allocation2 + $0x100] sm:$0xff]  ;;  %v11669_v36 = vld [vmem:[#allocation24_spill] sm:$0xff]  ;;  %v11670_v6 = vld [vmem:[#allocation118_spill] sm:$0xff] }
 0x2f7   : > { %v4588_v37 = vadd.f32 %v4572_v19, %v4511_v54  ;;  %v4649_v61 = vmul.f32 %v11657_v16, %v4633_v14  ;;  %v4710_v30 = vsel %vm1506_vm2, %v4678_v8, %v4686_v21  ;;  %v2917_v51 = vadd.f32 %v11659_v9, %v11658_v41  ;;  %v11668_v8 = vld [vmem:[#allocation69_spill] sm:$0xff]  ;;  %v11672_v16 = vld [vmem:[#allocation75_spill] sm:$0xff] }
 0x2f8   : > { %v4589_v20 = vadd.f32 %v4573_v31, %v4512_v4  ;;  %v4702_v11 = vsel %vm1506_vm2, %v4686_v21, %v4694_v27  ;;  %v4726_v32 = vmul.f32 %v9135_v59, %v4710_v30  ;;  %v2918_v62 = vadd.f32 %v11661_v26, %v11660_v1  ;;  %v11671_v4 = vld [vmem:[#allocation72_spill] sm:$0xff]  ;;  %v9819_v41 = vld [vmem:[%s10753_s6 + $0x20] ss:$0 sm:$0xff]  ;;  %v9832_v26 = vld [vmem:[%s10753_s6 + $0x21] ss:$0 sm:$0xff] }
 0x2f9   : > { %v4665_v44 = vadd.f32 %v4649_v61, %v4588_v37  ;;  %v4727_v24 = vmul.f32 %v9135_v59, %v4702_v11  ;;  %v2994_v25 = vadd.f32 %v11662_v15, %v2917_v51  ;;  %v3319_v3 = vmul.f32 %v9778_v60, %v11663_v17  ;;  %v11666_v59 = vld [vmem:[#allocation116_spill] sm:$0xff]  ;;  %v11674_v9 = vld [vmem:[#allocation119_spill] sm:$0xff] }
 0x2fa   : > { %v4666_v47 = vadd.f32 %v4650_v34, %v4589_v20  ;;  %v2995_v35 = vadd.f32 %v11664_v0, %v2918_v62  ;;  %v3320_v39 = vmul.f32 %v9778_v60, %v11665_v43  ;;  %v3347_v7 = vrot.slane %v5401_v40, 7  ;;  %v11673_v61 = vld [vmem:[#allocation112_spill] sm:$0xff]  ;;  %v11675_v20 = vld [vmem:[#allocation133_spill] sm:$0xff]  ;;  %v11677_v62 = vld [vmem:[#allocation106_spill] sm:$0xff] }
 0x2fb   : > { %v4742_v56 = vadd.f32 %v4726_v32, %v4665_v44  ;;  %v3071_v18 = vadd.f32 %v11666_v59, %v2994_v25  ;;  %v3433_v29 = vmul.f32 %v9789_v13, %v9607_v45  ;;  %v3397_v21 = vmul.f32 %v9800_v12, %v11669_v36  ;;  %v11676_v32 = vld [vmem:[#allocation103_spill] sm:$0xff]  ;;  %v9849_v43 = vld [vmem:[#allocation2 + $0x130] sm:$0xff] }
 0x2fc   : > { %v4743_v28 = vadd.f32 %v4727_v24, %v4666_v47  ;;  %v3072_v23 = vadd.f32 %v11667_v50, %v2995_v35  ;;  %v3379_v48 = vsel %vm1235_vm12, %v3347_v7, %v11668_v8  ;;  %v3434_v31 = vmul.f32 %v9789_v13, %v9610_v38  ;;  %v9840_v15 = vld [vmem:[%s10753_s6 + $0x22] ss:$0 sm:$0xff]  ;;  %v9846_v47 = vld [vmem:[#allocation2 + $0x128] sm:$0xff]  ;;  %v9866_v50 = vld [vmem:[%s10753_s6 + $0x23] ss:$0 sm:$0xff] }
 0x2fd   : > { %v4765_v54 = vadd.f32 %v9185_v2, %v4742_v56  ;;  %v3148_v19 = vadd.f32 %v11670_v6, %v3071_v18  ;;  %v3396_v45 = vmul.f32 %v9800_v12, %v3379_v48  ;;  %v3485_v34 = vsel %vm1350_vm14, %v11672_v16, %v9511_v63  ;;  %v9879_v36 = vld [vmem:[%s10753_s6 + $0x24] ss:$0 sm:$0xff] }
 0x2fe   : > { %v4766_v22 = vadd.f32 %v9185_v2, %v4743_v28  ;;  %v3149_v14 = vadd.f32 %v11671_v4, %v3072_v23  ;;  %v3510_v38 = vmul.f32 %v9819_v41, %v11674_v9  ;;  %v3511_v2 = vmul.f32 %v9819_v41, %v3485_v34 }
 0x2ff   : > { %v4781_v37 = vmax.f32 %v4765_v54, 0.0  ;;  %v3258_v30 = vadd.f32 %v11673_v61, %v3148_v19  ;;  %v3562_v63 = vsel %vm1428_vm15, %v11676_v32, %v9523_v5  ;;  %v3587_v44 = vmul.f32 %v9832_v26, %v11677_v62 }
 0x300   : > { %v4782_v51 = vmax.f32 %v4766_v22, 0.0  ;;  %v3259_v11 = vadd.f32 %v11675_v20, %v3149_v14  ;;  %v3588_v24 = vmul.f32 %v9832_v26, %v3562_v63  ;;  %v3664_v25 = vmul.f32 %v9840_v15, %v9693_v58  ;;  %v9899_v14 = vld [vmem:[%s10753_s6 + $0x26] ss:$0 sm:$0xff]  ;;  %v9919_v63 = vld [vmem:[%s10753_s6 + $0x27] ss:$0 sm:$0xff] }
 0x301   : > { %v3335_v1 = vadd.f32 %v3319_v3, %v3258_v30  ;;  %v3665_v3 = vmul.f32 %v9840_v15, %v9689_v10  ;;  %v3733_v0 = vrot.slane %v9846_v47, 5  ;;  %v3741_v40 = vrot.slane %v9849_v43, 5 }
 0x302   : > { %v4794_v5 = vpack.c.bf16 %v4782_v51, %v4781_v37  ;;  %v3336_v17 = vadd.f32 %v3320_v39, %v3259_v11  ;;  %v3810_v7 = vrot.slane %v9846_v47, 6  ;;  %v3818_v56 = vrot.slane %v9849_v43, 6 }
 0x303   : > { %v3412_v35 = vadd.f32 %v3396_v45, %v3335_v1  ;;  %v3757_v10 = vsel %vm1079_vm10, %v4256_v53, %v3733_v0  ;;  %v3887_v39 = vrot.slane %v9846_v47, 7  ;;  %v3895_v59 = vrot.slane %v9849_v43, 7 }
 0x304   : > { %5283 = vmatmul.mubr.msk.bf16.gmra.mrb[8].mxu1 %vm451_vm1, %v4794_v5  ;;  %v3413_v58 = vadd.f32 %v3397_v21, %v3336_v17  ;;  %v3749_v28 = vsel %vm1079_vm10, %v3733_v0, %v3741_v40  ;;  %v3774_v23 = vmul.f32 %v9866_v50, %v3757_v10  ;;  %v3826_v8 = vsel %vm1157_vm11, %v3810_v7, %v3818_v56  ;;  %v9944_v40 = vld [vmem:[#allocation2 + $0x150] sm:$0xff]  ;;  %v9954_v10 = vld [vmem:[%s10753_s6 + $0x29] ss:$0 sm:$0xff] }
 0x305   : > { %v3449_v18 = vadd.f32 %v3433_v29, %v3412_v35  ;;  %v3775_v53 = vmul.f32 %v9866_v50, %v3749_v28  ;;  %v3834_v29 = vsel %vm1157_vm11, %v4333_v33, %v3810_v7  ;;  %v3852_v21 = vmul.f32 %v9879_v36, %v3826_v8  ;;  %v9892_v33 = vld [vmem:[%s10753_s6 + $0x25] ss:$0 sm:$0xff] }
 0x306   : > { %v3450_v48 = vadd.f32 %v3434_v31, %v3413_v58  ;;  %v3851_v6 = vmul.f32 %v9879_v36, %v3834_v29  ;;  %v3903_v19 = vsel %vm1235_vm12, %v3887_v39, %v3895_v59  ;;  %v3911_v45 = vsel %vm1235_vm12, %v4410_v46, %v3887_v39 }
 0x307   : > { %v3526_v54 = vadd.f32 %v3510_v38, %v3449_v18  ;;  %v3928_v22 = vmul.f32 %v9892_v33, %v3911_v45  ;;  %v3929_v4 = vmul.f32 %v9892_v33, %v3903_v19  ;;  %v3965_v55 = vmul.f32 %v9899_v14, %v9846_v47  ;;  %v9976_v45 = vld [vmem:[%s10753_s6 + $0x2a] ss:$0 sm:$0xff] }
 0x308   : > { %v3527_v31 = vadd.f32 %v3511_v2, %v3450_v48  ;;  %v3966_v46 = vmul.f32 %v9899_v14, %v9849_v43  ;;  %v3993_v34 = vrot.slane %v9846_v47, 1  ;;  %v4001_v37 = vrot.slane %v9849_v43, 1 }
 0x309   : > { %v3603_v16 = vadd.f32 %v3587_v44, %v3526_v54  ;;  %v4070_v30 = vrot.slane %v9846_v47, 2  ;;  %v4078_v9 = vrot.slane %v9849_v43, 2  ;;  %v4147_v38 = vrot.slane %v9846_v47, 3 }
 0x30a   : > { %v3604_v61 = vadd.f32 %v3588_v24, %v3527_v31  ;;  %v4017_v51 = vsel %vm1350_vm14, %v4001_v37, %v9738_v42  ;;  %v4025_v20 = vsel %vm1350_vm14, %v3993_v34, %v4001_v37  ;;  %v4155_v11 = vrot.slane %v9849_v43, 3  ;;  %v9926_v24 = vld [vmem:[#allocation2 + $0x140] sm:$0xff]  ;;  %v9989_v37 = vld [vmem:[%s10753_s6 + $0x2b] ss:$0 sm:$0xff] }
 0x30b   : > { %v3680_v2 = vadd.f32 %v3664_v25, %v3603_v16  ;;  %v4042_v1 = vmul.f32 %v9919_v63, %v4025_v20  ;;  %v4043_v62 = vmul.f32 %v9919_v63, %v4017_v51  ;;  %v4094_v44 = vsel %vm1428_vm15, %v4078_v9, %v9743_v52  ;;  %v9928_v25 = vld [vmem:[#allocation2 + $0x148] sm:$0xff] }
 0x30c   : > { %v3681_v32 = vadd.f32 %v3665_v3, %v3604_v61  ;;  %v4102_v17 = vsel %vm1428_vm15, %v4070_v30, %v4078_v9  ;;  %v9935_v3 = vld [vmem:[%s10753_s6 + $0x28] ss:$0 sm:$0xff]  ;;  %v9942_v35 = vsel %vm1506_vm2, %v4155_v11, %v4694_v27  ;;  %v9949_v58 = vsel %vm1506_vm2, %v4147_v38, %v4155_v11  ;;  %v9992_v9 = vld [vmem:[#allocation2 + $0x158] sm:$0xff]  ;;  %v10000_v20 = vld [vmem:[%s10753_s6 + $0x2d] ss:$0 sm:$0xff] }
 0x30d   : > { %v3790_v5 = vadd.f32 %v3774_v23, %v3680_v2  ;;  %v4120_v0 = vmul.f32 %v9935_v3, %v4094_v44  ;;  %v4119_v56 = vmul.f32 %v9935_v3, %v4102_v17  ;;  %v4197_v57 = vmul.f32 %v9954_v10, %v9942_v35 }
 0x30e   : > { %v3791_v7 = vadd.f32 %v3775_v53, %v3681_v32  ;;  %v4196_v27 = vmul.f32 %v9954_v10, %v9949_v58  ;;  %v4257_v59 = vrot.slane %v9926_v24, 5  ;;  %v4265_v18 = vrot.slane %v9928_v25, 5 }
 0x30f   : > { %v3867_v39 = vadd.f32 %v3851_v6, %v3790_v5  ;;  %v4273_v23 = vrot.slane %v9944_v40, 5  ;;  %v10960_v8 = vrot.slane %v9926_v24, 6  ;;  %v4342_v48 = vrot.slane %v9928_v25, 6 }
 0x310   : > { %v3868_v28 = vadd.f32 %v3852_v21, %v3791_v7  ;;  %v4289_v29 = vsel %vm1079_vm10, %v4257_v59, %v4265_v18  ;;  %v4350_v54 = vrot.slane %v9944_v40, 6  ;;  %v10959_v6 = vrot.slane %v9926_v24, 7 }
 0x311   : > { %v3944_v53 = vadd.f32 %v3928_v22, %v3867_v39  ;;  %v4281_v21 = vsel %vm1079_vm10, %v4265_v18, %v4273_v23  ;;  %v4306_v31 = vmul.f32 %v9976_v45, %v4289_v29  ;;  %v4366_v22 = vsel %vm1157_vm11, %v10960_v8, %v4342_v48  ;;  %v10017_v39 = vld [vmem:[%s10753_s6 + $0x2c] ss:$0 sm:$0xff] }
 0x312   : > { %v3945_v19 = vadd.f32 %v3929_v4, %v3868_v28  ;;  %v4307_v34 = vmul.f32 %v9976_v45, %v4281_v21  ;;  %v4358_v4 = vsel %vm1157_vm11, %v4342_v48, %v4350_v54  ;;  %v4383_v61 = vmul.f32 %v9989_v37, %v4366_v22 }
 0x313   : > { %v3981_v16 = vadd.f32 %v3965_v55, %v3944_v53  ;;  %v4384_v38 = vmul.f32 %v9989_v37, %v4358_v4  ;;  %v4419_v2 = vrot.slane %v9928_v25, 7  ;;  %v4427_v55 = vrot.slane %v9944_v40, 7 }
 0x314   : > { %v3982_v30 = vadd.f32 %v3966_v46, %v3945_v19  ;;  %v4497_v11 = vmul.f32 %v10000_v20, %v9928_v25  ;;  %v4498_v46 = vmul.f32 %v10000_v20, %v9944_v40  ;;  %v4525_v32 = vrot.slane %v9928_v25, 1  ;;  %v10034_v19 = vld [vmem:[%s10753_s6 + $0x2e] ss:$0 sm:$0xff] }
 0x315   : > { %v4058_v51 = vadd.f32 %v4042_v1, %v3981_v16  ;;  %v4435_v5 = vsel %vm1235_vm12, %v4419_v2, %v4427_v55  ;;  %v4443_v1 = vsel %vm1235_vm12, %v10959_v6, %v4419_v2  ;;  %v4533_v17 = vrot.slane %v9944_v40, 1  ;;  %v10050_v55 = vld [vmem:[%s10753_s6 + $0x2f] ss:$0 sm:$0xff]  ;;  %v11686_v6 = vld [vmem:[#allocation42_spill] sm:$0xff] }
 0x316   : > { %v4059_v44 = vadd.f32 %v4043_v62, %v3982_v30  ;;  %v4460_v18 = vmul.f32 %v10017_v39, %v4443_v1  ;;  %v4461_v62 = vmul.f32 %v10017_v39, %v4435_v5  ;;  %v10022_v28 = vrot.slane %v9992_v9, 1 }
 0x317   : > { %v4135_v7 = vadd.f32 %v4119_v56, %v4058_v51  ;;  %v4557_v48 = vsel %vm1350_vm14, %v4525_v32, %v4533_v17  ;;  %v4602_v53 = vrot.slane %v9928_v25, 2  ;;  %v4610_v56 = vrot.slane %v9944_v40, 2 }
 0x318   : > { %v4136_v23 = vadd.f32 %v4120_v0, %v4059_v44  ;;  %v4549_v54 = vsel %vm1350_vm14, %v4533_v17, %v10022_v28  ;;  %v4574_v21 = vmul.f32 %v10034_v19, %v4557_v48  ;;  %v10038_v0 = vrot.slane %v9992_v9, 2  ;;  %v11681_v48 = vld [vmem:[#allocation132_spill] sm:$0xff] }
 0x319   : > { %v4212_v29 = vadd.f32 %v4196_v27, %v4135_v7  ;;  %v4575_v16 = vmul.f32 %v10034_v19, %v4549_v54  ;;  %v4634_v27 = vsel %vm1428_vm15, %v4602_v53, %v4610_v56  ;;  %v4679_v4 = vrot.slane %v9928_v25, 3  ;;  %v11678_v25 = vld [vmem:[#allocation131_spill] sm:$0xff] }
 0x31a   : > { %v4213_v22 = vadd.f32 %v4197_v57, %v4136_v23  ;;  %v4626_v2 = vsel %vm1428_vm15, %v4610_v56, %v10038_v0  ;;  %v4651_v51 = vmul.f32 %v10050_v55, %v4634_v27  ;;  %v4687_v57 = vrot.slane %v9944_v40, 3  ;;  %v11680_v23 = vld [vmem:[#allocation137_spill] sm:$0xff]  ;;  %v11682_v56 = vld [vmem:[#allocation32_spill] sm:$0xff] }
 0x31b   : > { %v4322_v30 = vadd.f32 %v4306_v31, %v4212_v29  ;;  %v4652_v44 = vmul.f32 %v10050_v55, %v4626_v2  ;;  %v10958_v5 = vrot.slane %v9992_v9, 3  ;;  %v11679_v31 = vld [vmem:[#allocation130_spill] sm:$0xff]  ;;  %v3151_v53 = vadd.f32 %v11681_v48, %v11680_v23  ;;  %v11684_v2 = vld [vmem:[#allocation20_spill] sm:$0xff] }
 0x31c   : > { %v4323_v32 = vadd.f32 %v4307_v34, %v4213_v22  ;;  %v3150_v1 = vadd.f32 %v11679_v31, %v11678_v25  ;;  %v4711_v7 = vsel %vm1506_vm2, %v4679_v4, %v4687_v57  ;;  %v3321_v29 = vmul.f32 %v9778_v60, %v11682_v56  ;;  %v10071_v34 = vld [vmem:[%s10753_s6 + $0x30] ss:$0 sm:$0xff]  ;;  %v11683_v22 = vld [vmem:[#allocation70_spill] sm:$0xff] }
 0x31d   : > { %v4399_v17 = vadd.f32 %v4383_v61, %v4322_v30  ;;  %v4703_v40 = vsel %vm1506_vm2, %v4687_v57, %v10958_v5  ;;  %v4728_v61 = vmul.f32 %v10071_v34, %v4711_v7  ;;  %v3261_v25 = vadd.f32 %v11684_v2, %v3151_v53  ;;  %v5423_v57 = vld [vmem:[#allocation2 + $0x120] sm:$0xff] }
 0x31e   : > { %v4400_v54 = vadd.f32 %v4384_v38, %v4323_v32  ;;  %v3260_v27 = vadd.f32 %v11683_v22, %v3150_v1  ;;  %v4729_v30 = vmul.f32 %v10071_v34, %v4703_v40  ;;  %v11685_v38 = vld [vmem:[#allocation39_spill] sm:$0xff]  ;;  %v3348_v48 = vrot.slane %v5423_v57, 7  ;;  %v11689_v22 = vld [vmem:[#allocation9_spill] sm:$0xff] }
 0x31f   : > { %v4476_v4 = vadd.f32 %v4460_v18, %v4399_v17  ;;  %v3322_v32 = vmul.f32 %v9778_v60, %v11685_v38  ;;  %v3399_v8 = vmul.f32 %v9800_v12, %v11686_v6  ;;  %v3435_v1 = vmul.f32 %v9846_v47, %v9789_v13  ;;  %v11687_v17 = vld [vmem:[#allocation15_spill] sm:$0xff] }
 0x320   : > { %v4477_v31 = vadd.f32 %v4461_v62, %v4400_v54  ;;  %v3337_v23 = vadd.f32 %v3321_v29, %v3260_v27  ;;  %v3380_v7 = vsel %vm1235_vm12, %v3348_v48, %v11687_v17  ;;  %v3436_v53 = vmul.f32 %v9849_v43, %v9789_v13  ;;  %v11688_v62 = vld [vmem:[#allocation102_spill] sm:$0xff] }
 0x321   : > { %v4513_v56 = vadd.f32 %v4497_v11, %v4476_v4  ;;  %v3338_v5 = vadd.f32 %v3322_v32, %v3261_v25  ;;  %v3486_v11 = vsel %vm1350_vm14, %v11688_v62, %v9738_v42  ;;  %v3398_v54 = vmul.f32 %v9800_v12, %v3380_v7  ;;  %v11690_v27 = vld [vmem:[#allocation6_spill] sm:$0xff]  ;;  %v11691_v42 = vld [vmem:[#allocation80_spill] sm:$0xff] }
 0x322   : > { %v4514_v18 = vadd.f32 %v4498_v46, %v4477_v31  ;;  %v3512_v47 = vmul.f32 %v9819_v41, %v11689_v22  ;;  %v3513_v46 = vmul.f32 %v9819_v41, %v3486_v11  ;;  %v3563_v43 = vsel %vm1428_vm15, %v11690_v27, %v9743_v52  ;;  %v10107_v52 = vld [vmem:[#allocation2 + $0x148] sm:$0xff] }
 0x323   : > { %v4590_v29 = vadd.f32 %v4574_v21, %v4513_v56  ;;  %v3415_v6 = vadd.f32 %v3399_v8, %v3338_v5  ;;  %v3414_v2 = vadd.f32 %v3398_v54, %v3337_v23  ;;  %v3589_v21 = vmul.f32 %v9832_v26, %v11691_v42 }
 0x324   : > { %v4591_v40 = vadd.f32 %v4575_v16, %v4514_v18  ;;  %v3590_v8 = vmul.f32 %v9832_v26, %v3563_v43  ;;  %v3666_v16 = vmul.f32 %v9840_v15, %v9949_v58  ;;  %v3667_v57 = vmul.f32 %v9840_v15, %v9942_v35  ;;  %v10117_v58 = vld [vmem:[%s10754_s7] ss:$0 sm:$0xff] }
 0x325   : > { %v4667_v4 = vadd.f32 %v4651_v51, %v4590_v29  ;;  %v3452_v25 = vadd.f32 %v3436_v53, %v3415_v6  ;;  %v3451_v32 = vadd.f32 %v3435_v1, %v3414_v2  ;;  %v3734_v51 = vrot.slane %v10107_v52, 5 }
 0x326   : > { %v4668_v38 = vadd.f32 %v4652_v44, %v4591_v40  ;;  %v10110_v44 = vld [vmem:[#allocation2 + $0x150] sm:$0xff]  ;;  %v3811_v56 = vrot.slane %v10107_v52, 6  ;;  %v11692_v53 = vrot.slane %v9926_v24, 6  ;;  %v3888_v43 = vrot.slane %v10107_v52, 7 }
 0x327   : > { %v4744_v5 = vadd.f32 %v4728_v61, %v4667_v4  ;;  %v3529_v31 = vadd.f32 %v3513_v46, %v3452_v25  ;;  %v3742_v23 = vrot.slane %v10110_v44, 5  ;;  %v3528_v1 = vadd.f32 %v3512_v47, %v3451_v32 }
 0x328   : > { %v4745_v48 = vadd.f32 %v4729_v30, %v4668_v38  ;;  %v3819_v30 = vrot.slane %v10110_v44, 6  ;;  %v3758_v7 = vsel %vm1079_vm10, %v4257_v59, %v3734_v51  ;;  %v3835_v62 = vsel %vm1157_vm11, %v11692_v53, %v3811_v56 }
 0x329   : > { %v4767_v61 = vadd.f32 %v10117_v58, %v4744_v5  ;;  %v3606_v35 = vadd.f32 %v3590_v8, %v3529_v31  ;;  %v3750_v17 = vsel %vm1079_vm10, %v3734_v51, %v3742_v23  ;;  %v3605_v29 = vadd.f32 %v3589_v21, %v3528_v1 }
 0x32a   : > { %v4768_v18 = vadd.f32 %v10117_v58, %v4745_v48  ;;  %v3776_v6 = vmul.f32 %v9866_v50, %v3758_v7  ;;  %v3777_v22 = vmul.f32 %v9866_v50, %v3750_v17  ;;  %v3827_v47 = vsel %vm1157_vm11, %v3811_v56, %v3819_v30 }
 0x32b   : > { %v4783_v11 = vmax.f32 %v4767_v61, 0.0  ;;  %v3683_v54 = vadd.f32 %v3667_v57, %v3606_v35  ;;  %v3853_v46 = vmul.f32 %v9879_v36, %v3835_v62  ;;  %v3682_v27 = vadd.f32 %v3666_v16, %v3605_v29  ;;  %v10171_v29 = vld [vmem:[#allocation2 + $0x168] sm:$0xff] }
 0x32c   : > { %v4784_v40 = vmax.f32 %v4768_v18, 0.0  ;;  %v3854_v59 = vmul.f32 %v9879_v36, %v3827_v47  ;;  %v3896_v4 = vrot.slane %v10110_v44, 7  ;;  %v3967_v38 = vmul.f32 %v10107_v52, %v9899_v14 }
 0x32d   : > { %v3793_v25 = vadd.f32 %v3777_v22, %v3683_v54  ;;  %v3968_v42 = vmul.f32 %v10110_v44, %v9899_v14  ;;  %v3792_v21 = vadd.f32 %v3776_v6, %v3682_v27  ;;  %v11693_v16 = vrot.slane %v9926_v24, 7 }
 0x32e   : > { %v4795_v2 = vpack.c.bf16 %v4784_v40, %v4783_v11  ;;  %v3904_v8 = vsel %vm1235_vm12, %v3888_v43, %v3896_v4  ;;  %v3994_v32 = vrot.slane %v10107_v52, 1  ;;  %v4002_v51 = vrot.slane %v10110_v44, 1  ;;  %v10169_v11 = vld [vmem:[#allocation2 + $0x160] sm:$0xff] }
 0x32f   : > { %v3912_v5 = vsel %vm1235_vm12, %v11693_v16, %v3888_v43  ;;  %v3870_v31 = vadd.f32 %v3854_v59, %v3793_v25  ;;  %v3931_v48 = vmul.f32 %v9892_v33, %v3904_v8  ;;  %v3869_v23 = vadd.f32 %v3853_v46, %v3792_v21  ;;  %v10182_v46 = vld [vmem:[#allocation2 + $0x170] sm:$0xff] }
 0x330   : > { %5286 = vmatprep.mubr.msk.bf16.mxu1 %vm451_vm1, %v4795_v2  ;;  %v3930_v57 = vmul.f32 %v9892_v33, %v3912_v5  ;;  %v4071_v56 = vrot.slane %v10107_v52, 2  ;;  %v4079_v61 = vrot.slane %v10110_v44, 2  ;;  %v4148_v24 = vrot.slane %v10107_v52, 3 }
 0x331   : > { %v3947_v1 = vadd.f32 %v3931_v48, %v3870_v31  ;;  %v4018_v35 = vsel %vm1350_vm14, %v4002_v51, %v10022_v28  ;;  %v4026_v30 = vsel %vm1350_vm14, %v3994_v32, %v4002_v51  ;;  %v4156_v18 = vrot.slane %v10110_v44, 3 }
 0x332   : > { %v3946_v17 = vadd.f32 %v3930_v57, %v3869_v23  ;;  %v4044_v7 = vmul.f32 %v9919_v63, %v4026_v30  ;;  %v4045_v53 = vmul.f32 %v9919_v63, %v4018_v35  ;;  %v4095_v62 = vsel %vm1428_vm15, %v4079_v61, %v10038_v0 }
 0x333   : > { %v3984_v54 = vadd.f32 %v3968_v42, %v3947_v1  ;;  %v4103_v6 = vsel %vm1428_vm15, %v4071_v56, %v4079_v61  ;;  %v4122_v40 = vmul.f32 %v9935_v3, %v4095_v62  ;;  %v11694_v22 = vrot.slane %v9992_v9, 3 }
 0x334   : > { %v3983_v27 = vadd.f32 %v3967_v38, %v3946_v17  ;;  %v4121_v59 = vmul.f32 %v9935_v3, %v4103_v6  ;;  %v10187_v43 = vsel %vm1506_vm2, %v4148_v24, %v4156_v18  ;;  %v4258_v25 = vrot.slane %v10169_v11, 5 }
 0x335   : > { %v10180_v47 = vsel %vm1506_vm2, %v4156_v18, %v11694_v22  ;;  %v4061_v2 = vadd.f32 %v4045_v53, %v3984_v54  ;;  %v4198_v9 = vmul.f32 %v9954_v10, %v10187_v43  ;;  %v4266_v42 = vrot.slane %v10171_v29, 5  ;;  %v10215_v18 = vld [vmem:[#allocation2 + $0x178] sm:$0xff] }
 0x336   : > { %v4199_v4 = vmul.f32 %v9954_v10, %v10180_v47  ;;  %v4060_v21 = vadd.f32 %v4044_v7, %v3983_v27  ;;  %v4274_v38 = vrot.slane %v10182_v46, 5  ;;  %v4335_v8 = vrot.slane %v10169_v11, 6 }
 0x337   : > { %v4343_v16 = vrot.slane %v10171_v29, 6  ;;  %v4138_v5 = vadd.f32 %v4122_v40, %v4061_v2  ;;  %v4290_v32 = vsel %vm1079_vm10, %v4258_v25, %v4266_v42  ;;  %v4351_v31 = vrot.slane %v10182_v46, 6 }
 0x338   : > { %v4412_v57 = vrot.slane %v10169_v11, 7  ;;  %v4137_v48 = vadd.f32 %v4121_v59, %v4060_v21  ;;  %v4282_v51 = vsel %vm1079_vm10, %v4266_v42, %v4274_v38  ;;  %v4308_v23 = vmul.f32 %v9976_v45, %v4290_v32 }
 0x339   : > { %v4367_v56 = vsel %vm1157_vm11, %v4335_v8, %v4343_v16  ;;  %v4215_v61 = vadd.f32 %v4199_v4, %v4138_v5  ;;  %v4309_v24 = vmul.f32 %v9976_v45, %v4282_v51  ;;  %v4359_v1 = vsel %vm1157_vm11, %v4343_v16, %v4351_v31 }
 0x33a   : > { %v4385_v35 = vmul.f32 %v9989_v37, %v4367_v56  ;;  %v4214_v30 = vadd.f32 %v4198_v9, %v4137_v48  ;;  %v4386_v17 = vmul.f32 %v9989_v37, %v4359_v1  ;;  %v4420_v7 = vrot.slane %v10171_v29, 7 }
 0x33b   : > { %v4428_v53 = vrot.slane %v10182_v46, 7  ;;  %v4325_v62 = vadd.f32 %v4309_v24, %v4215_v61  ;;  %v4499_v54 = vmul.f32 %v10000_v20, %v10171_v29  ;;  %v4500_v6 = vmul.f32 %v10000_v20, %v10182_v46 }
 0x33c   : > { %v4526_v40 = vrot.slane %v10171_v29, 1  ;;  %v4324_v22 = vadd.f32 %v4308_v23, %v4214_v30  ;;  %v4444_v59 = vsel %vm1235_vm12, %v4412_v57, %v4420_v7  ;;  %v4534_v4 = vrot.slane %v10182_v46, 1 }
 0x33d   : > { %v4436_v27 = vsel %vm1235_vm12, %v4420_v7, %v4428_v53  ;;  %v4402_v2 = vadd.f32 %v4386_v17, %v4325_v62  ;;  %v4462_v9 = vmul.f32 %v10017_v39, %v4444_v59  ;;  %v10235_v21 = vrot.slane %v10215_v18, 1 }
 0x33e   : > { %v4463_v42 = vmul.f32 %v10017_v39, %v4436_v27  ;;  %v4401_v38 = vadd.f32 %v4385_v35, %v4324_v22  ;;  %v4558_v16 = vsel %vm1350_vm14, %v4526_v40, %v4534_v4  ;;  %v4603_v5 = vrot.slane %v10171_v29, 2  ;;  %v11695_v22 = vld [vmem:[#allocation134_spill] sm:$0xff] }
 0x33f   : > { %v4611_v32 = vrot.slane %v10182_v46, 2  ;;  %v4550_v48 = vsel %vm1350_vm14, %v4534_v4, %v10235_v21  ;;  %v4576_v51 = vmul.f32 %v10034_v19, %v4558_v16  ;;  %v10246_v23 = vrot.slane %v10215_v18, 2  ;;  %v11696_v27 = vld [vmem:[#allocation38_spill] sm:$0xff] }
 0x340   : > { %v4479_v31 = vadd.f32 %v4463_v42, %v4402_v2  ;;  %v4478_v56 = vadd.f32 %v4462_v9, %v4401_v38  ;;  %v4577_v61 = vmul.f32 %v10034_v19, %v4550_v48  ;;  %v4680_v1 = vrot.slane %v10171_v29, 3  ;;  %v11698_v2 = vld [vmem:[#allocation105_spill] sm:$0xff]  ;;  %v11699_v42 = vld [vmem:[#allocation82_spill] sm:$0xff] }
 0x341   : > { %v4635_v24 = vsel %vm1428_vm15, %v4603_v5, %v4611_v32  ;;  %v4627_v30 = vsel %vm1428_vm15, %v4611_v32, %v10246_v23  ;;  %v4688_v7 = vrot.slane %v10182_v46, 3  ;;  %v4696_v40 = vrot.slane %v10215_v18, 3  ;;  %v11700_v5 = vld [vmem:[#allocation99_spill] sm:$0xff] }
 0x342   : > { %v4516_v35 = vadd.f32 %v4500_v6, %v4479_v31  ;;  %v4653_v17 = vmul.f32 %v10050_v55, %v4635_v24  ;;  %v4515_v53 = vadd.f32 %v4499_v54, %v4478_v56  ;;  %v4654_v62 = vmul.f32 %v10050_v55, %v4627_v30  ;;  %v11697_v6 = vld [vmem:[#allocation56_spill] sm:$0xff]  ;;  %v11701_v56 = vld [vmem:[#allocation107_spill] sm:$0xff]  ;;  %v11702_v24 = vld [vmem:[#allocation17_spill] sm:$0xff] }
 0x343   : > { %v2921_v59 = vadd.f32 %v11696_v27, %v11695_v22  ;;  %v4712_v29 = vsel %vm1506_vm2, %v4680_v1, %v4688_v7  ;;  %v2922_v9 = vadd.f32 %v11698_v2, %v11697_v6  ;;  %v3323_v38 = vmul.f32 %v9778_v60, %v11699_v42  ;;  %v11703_v30 = vld [vmem:[#allocation110_spill] sm:$0xff]  ;;  %v11704_v6 = vld [vmem:[#allocation100_spill] sm:$0xff] }
 0x344   : > { %v4593_v4 = vadd.f32 %v4577_v61, %v4516_v35  ;;  %v4592_v16 = vadd.f32 %v4576_v51, %v4515_v53  ;;  %v4704_v46 = vsel %vm1506_vm2, %v4688_v7, %v4696_v40  ;;  %v4730_v54 = vmul.f32 %v10071_v34, %v4712_v29  ;;  %v5427_v53 = vld [vmem:[#allocation2 + $0x140] sm:$0xff]  ;;  %v11705_v2 = vld [vmem:[#allocation54_spill] sm:$0xff]  ;;  %v11707_v42 = vld [vmem:[#allocation28_spill] sm:$0xff] }
 0x345   : > { %v2998_v32 = vadd.f32 %v11700_v5, %v2921_v59  ;;  %v4731_v48 = vmul.f32 %v10071_v34, %v4704_v46  ;;  %v2999_v61 = vadd.f32 %v11701_v56, %v2922_v9  ;;  %v3324_v1 = vmul.f32 %v9778_v60, %v11702_v24  ;;  %v11708_v5 = vld [vmem:[#allocation49_spill] sm:$0xff]  ;;  %v11710_v56 = vld [vmem:[#allocation98_spill] sm:$0xff] }
 0x346   : > { %v4670_v31 = vadd.f32 %v4654_v62, %v4593_v4  ;;  %v4669_v35 = vadd.f32 %v4653_v17, %v4592_v16  ;;  %v3349_v22 = vrot.slane %v5427_v53, 7  ;;  %v3401_v29 = vmul.f32 %v9800_v12, %v11705_v2  ;;  %v11706_v4 = vld [vmem:[#allocation109_spill] sm:$0xff] }
 0x347   : > { %v3075_v51 = vadd.f32 %v11703_v30, %v2998_v32  ;;  %v3076_v7 = vadd.f32 %v11704_v6, %v2999_v61  ;;  %v3437_v62 = vmul.f32 %v10107_v52, %v9789_v13  ;;  %v3438_v16 = vmul.f32 %v10110_v44, %v9789_v13  ;;  %v11711_v30 = vld [vmem:[#allocation108_spill] sm:$0xff] }
 0x348   : > { %v4747_v27 = vadd.f32 %v4731_v48, %v4670_v31  ;;  %v4746_v59 = vadd.f32 %v4730_v54, %v4669_v35  ;;  %v3381_v17 = vsel %vm1235_vm12, %v3349_v22, %v11707_v42  ;;  %v11709_v48 = vld [vmem:[#allocation8_spill] sm:$0xff]  ;;  %v3669_v42 = vmul.f32 %v9840_v15, %v10180_v47 }
 0x349   : > { %v3152_v9 = vadd.f32 %v11706_v4, %v3075_v51  ;;  %v3153_v32 = vadd.f32 %v11708_v5, %v3076_v7  ;;  %v3400_v31 = vmul.f32 %v9800_v12, %v3381_v17  ;;  %v3487_v52 = vsel %vm1350_vm14, %v11709_v48, %v10022_v28  ;;  %v11712_v51 = vld [vmem:[#allocation120_spill] sm:$0xff] }
 0x34a   : > { %v4770_v46 = vadd.f32 %v10117_v58, %v4747_v27  ;;  %v4769_v54 = vadd.f32 %v10117_v58, %v4746_v59  ;;  %v3515_v24 = vmul.f32 %v9819_v41, %v3487_v52  ;;  %v3514_v53 = vmul.f32 %v9819_v41, %v11712_v51  ;;  %v11713_v22 = vld [vmem:[#allocation68_spill] sm:$0xff]  ;;  %v11714_v59 = vld [vmem:[#allocation121_spill] sm:$0xff] }
 0x34b   : > { %v3262_v61 = vadd.f32 %v11710_v56, %v3152_v9  ;;  %v3263_v44 = vadd.f32 %v11711_v30, %v3153_v32  ;;  %v3564_v27 = vsel %vm1428_vm15, %v11713_v22, %v10038_v0  ;;  %v3591_v4 = vmul.f32 %v9832_v26, %v11714_v59  ;;  %v10313_v5 = vld [vmem:[#allocation2 + $0x168] sm:$0xff]  ;;  %v10316_v32 = vld [vmem:[#allocation2 + $0x170] sm:$0xff]  ;;  %v10352_v59 = vld [vmem:[#allocation2 + $0x180] sm:$0xff] }
 0x34c   : > { %v4786_v35 = vmax.f32 %v4770_v46, 0.0  ;;  %v4785_v6 = vmax.f32 %v4769_v54, 0.0  ;;  %v3592_v28 = vmul.f32 %v9832_v26, %v3564_v27  ;;  %v3668_v9 = vmul.f32 %v9840_v15, %v10187_v43 }
 0x34d   : > { %v3339_v7 = vadd.f32 %v3323_v38, %v3262_v61  ;;  %v3340_v2 = vadd.f32 %v3324_v1, %v3263_v44  ;;  %v3735_v0 = vrot.slane %v10313_v5, 5  ;;  %v3743_v38 = vrot.slane %v10316_v32, 5 }
 0x34e   : > { %v4796_v17 = vpack.c.bf16 %v4786_v35, %v4785_v6  ;;  %v3812_v48 = vrot.slane %v10313_v5, 6  ;;  %v3820_v52 = vrot.slane %v10316_v32, 6  ;;  %v3889_v43 = vrot.slane %v10313_v5, 7 }
 0x34f   : > { %v3416_v46 = vadd.f32 %v3400_v31, %v3339_v7  ;;  %v3417_v1 = vadd.f32 %v3401_v29, %v3340_v2  ;;  %v3751_v31 = vsel %vm1079_vm10, %v3735_v0, %v3743_v38  ;;  %v3759_v54 = vsel %vm1079_vm10, %v4258_v25, %v3735_v0 }
 0x350   : > { %5287 = vmatmul.mubr.msk.bf16.gmra.mrb[12].mxu1 %vm451_vm1, %v4796_v17  ;;  %v3897_v56 = vrot.slane %v10316_v32, 7  ;;  %v3778_v61 = vmul.f32 %v9866_v50, %v3759_v54  ;;  %v3779_v35 = vmul.f32 %v9866_v50, %v3751_v31  ;;  %v3828_v30 = vsel %vm1157_vm11, %v3812_v48, %v3820_v52  ;;  %v10371_v54 = vld [vmem:[#allocation2 + $0x188] sm:$0xff] }
 0x351   : > { %v3453_v47 = vadd.f32 %v3437_v62, %v3416_v46  ;;  %v3454_v29 = vadd.f32 %v3438_v16, %v3417_v1  ;;  %v3836_v62 = vsel %vm1157_vm11, %v4335_v8, %v3812_v48  ;;  %v3856_v51 = vmul.f32 %v9879_v36, %v3828_v30 }
 0x352   : > { %v3905_v25 = vsel %vm1235_vm12, %v3889_v43, %v3897_v56  ;;  %v3855_v16 = vmul.f32 %v9879_v36, %v3836_v62  ;;  %v3913_v27 = vsel %vm1235_vm12, %v4412_v57, %v3889_v43  ;;  %v3969_v8 = vmul.f32 %v10313_v5, %v9899_v14 }
 0x353   : > { %v3530_v44 = vadd.f32 %v3514_v53, %v3453_v47  ;;  %v3531_v22 = vadd.f32 %v3515_v24, %v3454_v29  ;;  %v3933_v53 = vmul.f32 %v9892_v33, %v3905_v25  ;;  %v3932_v7 = vmul.f32 %v9892_v33, %v3913_v27 }
 0x354   : > { %v3970_v2 = vmul.f32 %v10316_v32, %v9899_v14  ;;  %v3995_v17 = vrot.slane %v10313_v5, 1  ;;  %v4003_v11 = vrot.slane %v10316_v32, 1  ;;  %v4072_v57 = vrot.slane %v10313_v5, 2 }
 0x355   : > { %v3607_v6 = vadd.f32 %v3591_v4, %v3530_v44  ;;  %v3608_v24 = vadd.f32 %v3592_v28, %v3531_v22  ;;  %v4080_v4 = vrot.slane %v10316_v32, 2  ;;  %v4149_v0 = vrot.slane %v10313_v5, 3 }
 0x356   : > { %v4157_v38 = vrot.slane %v10316_v32, 3  ;;  %v4019_v48 = vsel %vm1350_vm14, %v4003_v11, %v10235_v21  ;;  %v4027_v28 = vsel %vm1350_vm14, %v3995_v17, %v4003_v11  ;;  %v4259_v52 = vrot.slane %v10352_v59, 5 }
 0x357   : > { %v3684_v46 = vadd.f32 %v3668_v9, %v3607_v6  ;;  %v3685_v1 = vadd.f32 %v3669_v42, %v3608_v24  ;;  %v4046_v47 = vmul.f32 %v9919_v63, %v4027_v28  ;;  %v4047_v9 = vmul.f32 %v9919_v63, %v4019_v48  ;;  %v10373_v42 = vld [vmem:[#allocation2 + $0x190] sm:$0xff] }
 0x358   : > { %v4096_v31 = vsel %vm1428_vm15, %v4080_v4, %v10246_v23  ;;  %v4104_v29 = vsel %vm1428_vm15, %v4072_v57, %v4080_v4  ;;  %v10387_v25 = vsel %vm1506_vm2, %v4149_v0, %v4157_v38  ;;  %v4267_v18 = vrot.slane %v10371_v54, 5 }
 0x359   : > { %v3794_v43 = vadd.f32 %v3778_v61, %v3684_v46  ;;  %v3795_v56 = vadd.f32 %v3779_v35, %v3685_v1  ;;  %v4124_v30 = vmul.f32 %v9935_v3, %v4096_v31  ;;  %v10382_v61 = vsel %vm1506_vm2, %v4157_v38, %v4696_v40  ;;  %v10415_v31 = vld [vmem:[#allocation2 + $0x198] sm:$0xff] }
 0x35a   : > { %v4123_v62 = vmul.f32 %v9935_v3, %v4104_v29  ;;  %v4201_v35 = vmul.f32 %v9954_v10, %v10382_v61  ;;  %v4200_v27 = vmul.f32 %v9954_v10, %v10387_v25  ;;  %v4275_v6 = vrot.slane %v10373_v42, 5 }
 0x35b   : > { %v3871_v44 = vadd.f32 %v3855_v16, %v3794_v43  ;;  %v3872_v22 = vadd.f32 %v3856_v51, %v3795_v56  ;;  %v4336_v16 = vrot.slane %v10352_v59, 6  ;;  %v4344_v24 = vrot.slane %v10371_v54, 6 }
 0x35c   : > { %v4352_v17 = vrot.slane %v10373_v42, 6  ;;  %v4283_v57 = vsel %vm1079_vm10, %v4267_v18, %v4275_v6  ;;  %v4291_v51 = vsel %vm1079_vm10, %v4259_v52, %v4267_v18  ;;  %v4413_v46 = vrot.slane %v10352_v59, 7 }
 0x35d   : > { %v3948_v40 = vadd.f32 %v3932_v7, %v3871_v44  ;;  %v3949_v11 = vadd.f32 %v3933_v53, %v3872_v22  ;;  %v4310_v7 = vmul.f32 %v9976_v45, %v4291_v51  ;;  %v4311_v0 = vmul.f32 %v9976_v45, %v4283_v57 }
 0x35e   : > { %v4360_v38 = vsel %vm1157_vm11, %v4344_v24, %v4352_v17  ;;  %v4368_v53 = vsel %vm1157_vm11, %v4336_v16, %v4344_v24  ;;  %v4421_v28 = vrot.slane %v10371_v54, 7  ;;  %v4429_v56 = vrot.slane %v10373_v42, 7 }
 0x35f   : > { %v3985_v4 = vadd.f32 %v3969_v8, %v3948_v40  ;;  %v3986_v1 = vadd.f32 %v3970_v2, %v3949_v11  ;;  %v4388_v48 = vmul.f32 %v9989_v37, %v4360_v38  ;;  %v4387_v8 = vmul.f32 %v9989_v37, %v4368_v53 }
 0x360   : > { %v4501_v29 = vmul.f32 %v10000_v20, %v10371_v54  ;;  %v4445_v44 = vsel %vm1235_vm12, %v4413_v46, %v4421_v28  ;;  %v4502_v22 = vmul.f32 %v10000_v20, %v10373_v42  ;;  %v4437_v6 = vsel %vm1235_vm12, %v4421_v28, %v4429_v56 }
 0x361   : > { %v4062_v43 = vadd.f32 %v4046_v47, %v3985_v4  ;;  %v4063_v2 = vadd.f32 %v4047_v9, %v3986_v1  ;;  %v4527_v47 = vrot.slane %v10371_v54, 1  ;;  %v4464_v40 = vmul.f32 %v10017_v39, %v4445_v44 }
 0x362   : > { %v4535_v24 = vrot.slane %v10373_v42, 1  ;;  %v4465_v9 = vmul.f32 %v10017_v39, %v4437_v6  ;;  %v10962_v11 = vrot.slane %v10415_v31, 1  ;;  %v4604_v57 = vrot.slane %v10371_v54, 2 }
 0x363   : > { %v4139_v18 = vadd.f32 %v4123_v62, %v4062_v43  ;;  %v4140_v17 = vadd.f32 %v4124_v30, %v4063_v2  ;;  %v4612_v62 = vrot.slane %v10373_v42, 2  ;;  %v10961_v38 = vrot.slane %v10415_v31, 2 }
 0x364   : > { %v4559_v4 = vsel %vm1350_vm14, %v4527_v47, %v4535_v24  ;;  %v4551_v30 = vsel %vm1350_vm14, %v4535_v24, %v10962_v11  ;;  %v4681_v28 = vrot.slane %v10371_v54, 3  ;;  %v4697_v54 = vrot.slane %v10415_v31, 3  ;;  %v11716_v24 = vld [vmem:[#allocation52_spill] sm:$0xff] }
 0x365   : > { %v4216_v51 = vadd.f32 %v4200_v27, %v4139_v18  ;;  %v4217_v1 = vadd.f32 %v4201_v35, %v4140_v17  ;;  %v4578_v53 = vmul.f32 %v10034_v19, %v4559_v4  ;;  %v4579_v27 = vmul.f32 %v10034_v19, %v4551_v30  ;;  %v11718_v4 = vld [vmem:[#allocation101_spill] sm:$0xff] }
 0x366   : > { %v4628_v56 = vsel %vm1428_vm15, %v4612_v62, %v10961_v38  ;;  %v4636_v35 = vsel %vm1428_vm15, %v4604_v57, %v4612_v62  ;;  %v4689_v18 = vrot.slane %v10373_v42, 3 }
 0x367   : > { %v4326_v43 = vadd.f32 %v4310_v7, %v4216_v51  ;;  %v4327_v2 = vadd.f32 %v4311_v0, %v4217_v1  ;;  %v4655_v44 = vmul.f32 %v10050_v55, %v4636_v35  ;;  %v4656_v47 = vmul.f32 %v10050_v55, %v4628_v56  ;;  %v11715_v7 = vld [vmem:[#allocation96_spill] sm:$0xff]  ;;  %v11717_v51 = vld [vmem:[#allocation19_spill] sm:$0xff] }
 0x368   : > { %v3154_v17 = vadd.f32 %v11716_v24, %v11715_v7  ;;  %v3155_v30 = vadd.f32 %v11718_v4, %v11717_v51  ;;  %v4713_v57 = vsel %vm1506_vm2, %v4681_v28, %v4689_v18  ;;  %v11719_v0 = vld [vmem:[#allocation136_spill] sm:$0xff]  ;;  %v11721_v35 = vld [vmem:[#allocation135_spill] sm:$0xff]  ;;  %v11722_v28 = vld [vmem:[#allocation97_spill] sm:$0xff] }
 0x369   : > { %v4403_v6 = vadd.f32 %v4387_v8, %v4326_v43  ;;  %v4404_v38 = vadd.f32 %v4388_v48, %v4327_v2  ;;  %v3325_v62 = vmul.f32 %v9778_v60, %v11719_v0  ;;  %v11720_v1 = vld [vmem:[#allocation104_spill] sm:$0xff]  ;;  %v4705_v8 = vsel %vm1506_vm2, %v4689_v18, %v4697_v54  ;;  %v5430_v51 = vld [vmem:[#allocation2 + $0x160] sm:$0xff] }
 0x36a   : > { %v3326_v56 = vmul.f32 %v9778_v60, %v11720_v1  ;;  %v4732_v43 = vmul.f32 %v10071_v34, %v4713_v57  ;;  %v3264_v7 = vadd.f32 %v11721_v35, %v3154_v17  ;;  %v4733_v2 = vmul.f32 %v10071_v34, %v4705_v8  ;;  %v11723_v60 = vld [vmem:[#allocation74_spill] sm:$0xff] }
 0x36b   : > { %v4480_v42 = vadd.f32 %v4464_v40, %v4403_v6  ;;  %v4481_v48 = vadd.f32 %v4465_v9, %v4404_v38  ;;  %v3265_v24 = vadd.f32 %v11722_v28, %v3155_v30  ;;  %v3350_v4 = vrot.slane %v5430_v51, 7  ;;  %v11725_v6 = vld [vmem:[#allocation129_spill] sm:$0xff]  ;;  %v10502_v28 = vld [vmem:[#allocation2 + $0x188] sm:$0xff] }
 0x36c   : > { %v3341_v11 = vadd.f32 %v3325_v62, %v3264_v7  ;;  %v11724_v40 = vrot.slane %v11723_v60, 7  ;;  %v11726_v1 = vrot.slane %v11725_v6, 7  ;;  %v3439_v57 = vmul.f32 %v10313_v5, %v9789_v13  ;;  %v10510_v51 = vld [vmem:[#allocation2 + $0x190] sm:$0xff] }
 0x36d   : > { %v4517_v0 = vadd.f32 %v4501_v29, %v4480_v42  ;;  %v4518_v17 = vadd.f32 %v4502_v22, %v4481_v48  ;;  %v3342_v9 = vadd.f32 %v3326_v56, %v3265_v24  ;;  %v3440_v8 = vmul.f32 %v10316_v32, %v9789_v13 }
 0x36e   : > { %v3374_v18 = vsel %vm1235_vm12, %v11726_v1, %v11724_v40  ;;  %v11727_v38 = vmov %v11726_v1  ;;  %v11728_v35 = vrot.slane %v11723_v60, 1  ;;  %v11730_v48 = vrot.slane %v11725_v6, 1 }
 0x36f   : > { %v3382_v30 = vsel %vm1235_vm12, %v3350_v4, %v11727_v38  ;;  %v3403_v29 = vmul.f32 %v9800_v12, %v3374_v18  ;;  %v4594_v62 = vadd.f32 %v4578_v53, %v4517_v0  ;;  %v4595_v22 = vadd.f32 %v4579_v27, %v4518_v17 }
 0x370   : > { %v3402_v42 = vmul.f32 %v9800_v12, %v3382_v30  ;;  %v3488_v5 = vsel %vm1350_vm14, %v11728_v35, %v10235_v21  ;;  %v11729_v7 = vmov %v11728_v35  ;;  %v11731_v21 = vrot.slane %v11723_v60, 2 }
 0x371   : > { %v3419_v56 = vadd.f32 %v3403_v29, %v3342_v9  ;;  %v3496_v53 = vsel %vm1350_vm14, %v11730_v48, %v11729_v7  ;;  %v3517_v12 = vmul.f32 %v9819_v41, %v3488_v5  ;;  %v4671_v13 = vadd.f32 %v4655_v44, %v4594_v62 }
 0x372   : > { %v3418_v32 = vadd.f32 %v3402_v42, %v3341_v11  ;;  %v3516_v24 = vmul.f32 %v9819_v41, %v3496_v53  ;;  %v3565_v27 = vsel %vm1428_vm15, %v11731_v21, %v10246_v23  ;;  %v4672_v4 = vadd.f32 %v4656_v47, %v4595_v22 }
 0x373   : > { %v3456_v0 = vadd.f32 %v3440_v8, %v3419_v56  ;;  %v11732_v40 = vmov %v11731_v21  ;;  %v11733_v1 = vrot.slane %v11725_v6, 2  ;;  %v3594_v11 = vmul.f32 %v9832_v26, %v3565_v27 }
 0x374   : > { %v4748_v41 = vadd.f32 %v4732_v43, %v4671_v13  ;;  %v3455_v18 = vadd.f32 %v3439_v57, %v3418_v32  ;;  %v3670_v23 = vmul.f32 %v9840_v15, %v10387_v25  ;;  %v4749_v9 = vadd.f32 %v4733_v2, %v4672_v4 }
 0x375   : > { %v3573_v44 = vsel %vm1428_vm15, %v11733_v1, %v11732_v40  ;;  %v3533_v38 = vadd.f32 %v3517_v12, %v3456_v0  ;;  %v3671_v47 = vmul.f32 %v9840_v15, %v10382_v61  ;;  %v3736_v60 = vrot.slane %v10502_v28, 5  ;;  %v4249_v1 = vld [vmem:[#allocation2 + $0x1a0] sm:$0xff] }
 0x376   : > { %v3593_v17 = vmul.f32 %v9832_v26, %v3573_v44  ;;  %v4771_v6 = vadd.f32 %v10117_v58, %v4748_v41  ;;  %v3532_v30 = vadd.f32 %v3516_v24, %v3455_v18  ;;  %v3744_v29 = vrot.slane %v10510_v51, 5 }
 0x377   : > { %v3813_v43 = vrot.slane %v10502_v28, 6  ;;  %v4772_v57 = vadd.f32 %v10117_v58, %v4749_v9  ;;  %v3610_v26 = vadd.f32 %v3594_v11, %v3533_v38  ;;  %v3760_v25 = vsel %vm1079_vm10, %v4259_v52, %v3736_v60 }
 0x378   : > { %v3821_v2 = vrot.slane %v10510_v51, 6  ;;  %v4787_v15 = vmax.f32 %v4771_v6, 0.0  ;;  %v3609_v61 = vadd.f32 %v3593_v17, %v3532_v30  ;;  %v3752_v62 = vsel %vm1079_vm10, %v3736_v60, %v3744_v29 }
 0x379   : > { %v3780_v42 = vmul.f32 %v9866_v50, %v3760_v25  ;;  %v4788_v8 = vmax.f32 %v4772_v57, 0.0  ;;  %v3687_v35 = vadd.f32 %v3671_v47, %v3610_v26  ;;  %v3781_v5 = vmul.f32 %v9866_v50, %v3752_v62  ;;  %v10573_v47 = vld [vmem:[#allocation2 + $0x1a8] sm:$0xff] }
 0x37a   : > { %v3829_v22 = vsel %vm1157_vm11, %v3813_v43, %v3821_v2  ;;  %v3686_v56 = vadd.f32 %v3670_v23, %v3609_v61  ;;  %v3837_v52 = vsel %vm1157_vm11, %v4336_v16, %v3813_v43  ;;  %v3890_v48 = vrot.slane %v10502_v28, 7 }
 0x37b   : > { %v3858_v7 = vmul.f32 %v9879_v36, %v3829_v22  ;;  %v4797_v53 = vpack.c.bf16 %v4788_v8, %v4787_v15  ;;  %v3797_v12 = vadd.f32 %v3781_v5, %v3687_v35  ;;  %v3857_v13 = vmul.f32 %v9879_v36, %v3837_v52 }
 0x37c   : > { %v3898_v32 = vrot.slane %v10510_v51, 7  ;;  %v3796_v50 = vadd.f32 %v3780_v42, %v3686_v56  ;;  %v3914_v24 = vsel %vm1235_vm12, %v4413_v46, %v3890_v48  ;;  %v3971_v21 = vmul.f32 %v9899_v14, %v10502_v28 }
 0x37d   : > { %5290 = vmatprep.mubr.msk.bf16.mxu1 %vm451_vm1, %v4797_v53  ;;  %v3874_v16 = vadd.f32 %v3858_v7, %v3797_v12  ;;  %v3934_v4 = vmul.f32 %v9892_v33, %v3914_v24  ;;  %v3996_v36 = vrot.slane %v10502_v28, 1  ;;  %v4004_v59 = vrot.slane %v10510_v51, 1  ;;  %v4252_v24 = vld [vmem:[#allocation2 + $0x1b8] sm:$0xff] }
 0x37e   : > { %v3906_v27 = vsel %vm1235_vm12, %v3890_v48, %v3898_v32  ;;  %v3873_v0 = vadd.f32 %v3857_v13, %v3796_v50  ;;  %v4073_v46 = vrot.slane %v10502_v28, 2  ;;  %v3972_v44 = vmul.f32 %v9899_v14, %v10510_v51  ;;  %v10575_v14 = vld [vmem:[#allocation2 + $0x1b0] sm:$0xff] }
 0x37f   : > { %v3935_v40 = vmul.f32 %v9892_v33, %v3906_v27  ;;  %v4081_v11 = vrot.slane %v10510_v51, 2  ;;  %v4150_v41 = vrot.slane %v10502_v28, 3  ;;  %v4158_v18 = vrot.slane %v10510_v51, 3 }
 0x380   : > { %v3950_v17 = vadd.f32 %v3934_v4, %v3873_v0  ;;  %v11734_v9 = vrot.slane %v10415_v31, 1  ;;  %v4028_v38 = vsel %vm1350_vm14, %v3996_v36, %v4004_v59  ;;  %v11735_v28 = vrot.slane %v10415_v31, 2 }
 0x381   : > { %v3951_v23 = vadd.f32 %v3935_v40, %v3874_v16  ;;  %v4048_v60 = vmul.f32 %v9919_v63, %v4028_v38  ;;  %v4105_v6 = vsel %vm1428_vm15, %v4073_v46, %v4081_v11  ;;  %v4260_v30 = vrot.slane %v4249_v1, 5 }
 0x382   : > { %v4020_v33 = vsel %vm1350_vm14, %v4004_v59, %v11734_v9  ;;  %v4097_v51 = vsel %vm1428_vm15, %v4081_v11, %v11735_v28  ;;  %v3987_v29 = vadd.f32 %v3971_v21, %v3950_v17  ;;  %v4125_v26 = vmul.f32 %v9935_v3, %v4105_v6 }
 0x383   : > { %v3988_v43 = vadd.f32 %v3972_v44, %v3951_v23  ;;  %v4049_v57 = vmul.f32 %v9919_v63, %v4020_v33  ;;  %v4174_v25 = vsel %vm1506_vm2, %v4158_v18, %v4697_v54  ;;  %v4182_v2 = vsel %vm1506_vm2, %v4150_v41, %v4158_v18 }
 0x384   : > { %v4268_v15 = vrot.slane %v10573_v47, 5  ;;  %v4276_v61 = vrot.slane %v10575_v14, 5  ;;  %v4064_v62 = vadd.f32 %v4048_v60, %v3987_v29  ;;  %v4126_v63 = vmul.f32 %v9935_v3, %v4097_v51 }
 0x385   : > { %v4065_v42 = vadd.f32 %v4049_v57, %v3988_v43  ;;  %v4202_v8 = vmul.f32 %v9954_v10, %v4182_v2  ;;  %v4337_v35 = vrot.slane %v4249_v1, 6  ;;  %v4345_v5 = vrot.slane %v10573_v47, 6  ;;  %v10650_v57 = vld [vmem:[%s10756_s9] ss:$0 sm:$0xff] }
 0x386   : > { %v4284_v31 = vsel %vm1079_vm10, %v4268_v15, %v4276_v61  ;;  %v4292_v54 = vsel %vm1079_vm10, %v4260_v30, %v4268_v15  ;;  %v4141_v22 = vadd.f32 %v4125_v26, %v4064_v62  ;;  %v4203_v52 = vmul.f32 %v9954_v10, %v4174_v25 }
 0x387   : > { %v4142_v56 = vadd.f32 %v4126_v63, %v4065_v42  ;;  %v4312_v7 = vmul.f32 %v9976_v45, %v4292_v54  ;;  %v4353_v48 = vrot.slane %v10575_v14, 6  ;;  %v4369_v3 = vsel %vm1157_vm11, %v4337_v35, %v4345_v5  ;;  %v5199_v42 = vld [vmem:[%s5623_s21 + $0x40] sm:$0xff]  ;;  %v5197_v54 = vld [vmem:[%s5623_s21 + $0x30] sm:$0xff] }
 0x388   : > { %v4414_v53 = vrot.slane %v4249_v1, 7  ;;  %v4422_v12 = vrot.slane %v10573_v47, 7  ;;  %v4218_v13 = vadd.f32 %v4202_v8, %v4141_v22  ;;  %v4313_v50 = vmul.f32 %v9976_v45, %v4284_v31 }
 0x389   : > { %v4219_v32 = vadd.f32 %v4203_v52, %v4142_v56  ;;  %v4430_v10 = vrot.slane %v10575_v14, 7  ;;  %v4361_v21 = vsel %vm1157_vm11, %v4345_v5, %v4353_v48  ;;  %v4389_v16 = vmul.f32 %v9989_v37, %v4369_v3  ;;  %v5200_v56 = vld [vmem:[%s5623_s21 + $0x48] sm:$0xff]  ;;  %v5198_v3 = vld [vmem:[%s5623_s21 + $0x38] sm:$0xff] }
 0x38a   : > { %v4446_v27 = vsel %vm1235_vm12, %v4414_v53, %v4422_v12  ;;  %v4503_v4 = vmul.f32 %v10000_v20, %v10573_v47  ;;  %v4328_v36 = vadd.f32 %v4312_v7, %v4218_v13  ;;  %v4390_v40 = vmul.f32 %v9989_v37, %v4361_v21 }
 0x38b   : > { %v4329_v0 = vadd.f32 %v4313_v50, %v4219_v32  ;;  %v4438_v45 = vsel %vm1235_vm12, %v4422_v12, %v4430_v10  ;;  %v4466_v59 = vmul.f32 %v10017_v39, %v4446_v27  ;;  %v4528_v1 = vrot.slane %v10573_v47, 1 }
 0x38c   : > { %v4467_v46 = vmul.f32 %v10017_v39, %v4438_v45  ;;  %v4536_v44 = vrot.slane %v10575_v14, 1  ;;  %v4405_v11 = vadd.f32 %v4389_v16, %v4328_v36  ;;  %v4544_v18 = vrot.slane %v4252_v24, 1  ;;  %v5203_v36 = vld [vmem:[%s5623_s21 + $0x60] sm:$0xff] }
 0x38d   : > { %v4406_v41 = vadd.f32 %v4390_v40, %v4329_v0  ;;  %v4605_v17 = vrot.slane %v10573_v47, 2  ;;  %v4613_v23 = vrot.slane %v10575_v14, 2  ;;  %v4621_v9 = vrot.slane %v4252_v24, 2  ;;  %v5201_v40 = vld [vmem:[%s5623_s21 + $0x50] sm:$0xff] }
 0x38e   : > { %v4560_v37 = vsel %vm1350_vm14, %v4528_v1, %v4536_v44  ;;  %v4682_v33 = vrot.slane %v10573_v47, 3  ;;  %v4482_v39 = vadd.f32 %v4466_v59, %v4405_v11  ;;  %v4504_v60 = vmul.f32 %v10000_v20, %v10575_v14 }
 0x38f   : > { %v4483_v38 = vadd.f32 %v4467_v46, %v4406_v41  ;;  %v4552_v28 = vsel %vm1350_vm14, %v4536_v44, %v4544_v18  ;;  %v4629_v51 = vsel %vm1428_vm15, %v4613_v23, %v4621_v9  ;;  %v4637_v6 = vsel %vm1428_vm15, %v4605_v17, %v4613_v23  ;;  %v5204_v46 = vld [vmem:[%s5623_s21 + $0x68] sm:$0xff]  ;;  %v5202_v41 = vld [vmem:[%s5623_s21 + $0x58] sm:$0xff] }
 0x390   : > { %v4690_v30 = vrot.slane %v10575_v14, 3  ;;  %v4519_v29 = vadd.f32 %v4503_v4, %v4482_v39  ;;  %v4580_v43 = vmul.f32 %v10034_v19, %v4560_v37  ;;  %v4581_v20 = vmul.f32 %v10034_v19, %v4552_v28 }
 0x391   : > { %v4520_v47 = vadd.f32 %v4504_v60, %v4483_v38  ;;  %v4698_v26 = vrot.slane %v4252_v24, 3  ;;  %v4657_v14 = vmul.f32 %v10050_v55, %v4637_v6  ;;  %v4658_v61 = vmul.f32 %v10050_v55, %v4629_v51  ;;  %v5280_v62 = vpop.f32.mrb[4].mxu1  ;;  %v5205_v60 = vld [vmem:[%s5623_s21 + $0x70] sm:$0xff]  ;;  %v4963_v6 = vld [vmem:[%s5674_s12 + $0x8] sm:$0xff] }
 0x392   : > { %v4714_v25 = vsel %vm1506_vm2, %v4682_v33, %v4690_v30  ;;  %v4596_v2 = vadd.f32 %v4580_v43, %v4519_v29  ;;  %v4877_v8 = vadd.f32 %v5280_v62, %v10650_v57  ;;  %v4868_v31 = vpop.f32.mrb[5].mxu1  ;;  %v4962_v33 = vld [vmem:[%s5674_s12] sm:$0xff]  ;;  %v5206_v43 = vld [vmem:[%s5623_s21 + $0x78] sm:$0xff] }
 0x393   : > { %v4597_v15 = vadd.f32 %v4581_v20, %v4520_v47  ;;  %v4706_v19 = vsel %vm1506_vm2, %v4690_v30, %v4698_v26  ;;  %v4734_v63 = vmul.f32 %v10071_v34, %v4714_v25  ;;  %v4869_v49 = vadd.f32 %v10650_v57, %v4868_v31  ;;  %v5281_v55 = vpop.f32.mrb[6].mxu1 }
 0x394   : > { %v4673_v35 = vadd.f32 %v4657_v14, %v4596_v2  ;;  %v4735_v22 = vmul.f32 %v10071_v34, %v4706_v19  ;;  %v4944_v52 = vadd.f32 %v5199_v42, %v4877_v8  ;;  %v4880_v7 = vadd.f32 %v5281_v55, %v10650_v57  ;;  %v4871_v48 = vpop.f32.mrb[7].mxu1  ;;  %v4966_v14 = vld [vmem:[%s5674_s12 + $0x20] sm:$0xff]  ;;  %v4964_v42 = vld [vmem:[%s5674_s12 + $0x10] sm:$0xff]  ;;  %v4967_v8 = vld [vmem:[%s5674_s12 + $0x28] sm:$0xff] }
 0x395   : > { %v4674_v5 = vadd.f32 %v4658_v61, %v4597_v15  ;;  %v4942_v12 = vadd.f32 %v5197_v54, %v4869_v49  ;;  %v4872_v13 = vadd.f32 %v10650_v57, %v4871_v48 }
 0x396   : > { %v4750_v53 = vadd.f32 %v4734_v63, %v4673_v35  ;;  %4954 = vst.msk [vmem:[%s10666_s20 + $0x10] sm:$0xff] %vm451_vm1, %v4944_v52  ;;  %v4945_v32 = vadd.f32 %v5200_v56, %v4880_v7 }
 0x397   : > { %v4751_v34 = vadd.f32 %v4735_v22, %v4674_v5  ;;  %4952 = vst.msk [vmem:[%s10666_s20] sm:$0xff] %vm451_vm1, %v4942_v12  ;;  %v4943_v24 = vadd.f32 %v5198_v3, %v4872_v13  ;;  %v4965_v5 = vld [vmem:[%s5674_s12 + $0x18] sm:$0xff] }
 0x398   : > { %v4773_v50 = vadd.f32 %v10117_v58, %v4750_v53  ;;  %4955 = vst.msk [vmem:[%s10666_s20 + $0x18] sm:$0xff] %vm451_vm1, %v4945_v32 }
 0x399   : > { %v4774_v10 = vadd.f32 %v10117_v58, %v4751_v34  ;;  %4953 = vst.msk [vmem:[%s10666_s20 + $0x8] sm:$0xff] %vm451_vm1, %v4943_v24 }
 0x39a   : > { %v4789_v21 = vmax.f32 %v4773_v50, 0.0 }
 0x39b   : > { %v4790_v16 = vmax.f32 %v4774_v10, 0.0 }
 0x39d   : > { %v4798_v27 = vpack.c.bf16 %v4790_v16, %v4789_v21 }
 0x39f   : > { %5291 = vmatmul.mubr.msk.bf16.gmra.mrb[16].mxu1 %vm451_vm1, %v4798_v27 }
 0x3d7   : > { %v5284_v4 = vpop.f32.mrb[8].mxu1 }
 0x3d8   : > { %v4893_v58 = vadd.f32 %v5284_v4, %v10650_v57  ;;  %v4884_v0 = vpop.f32.mrb[9].mxu1 }
 0x3d9   : > { %v4885_v45 = vadd.f32 %v10650_v57, %v4884_v0  ;;  %v5285_v59 = vpop.f32.mrb[10].mxu1 }
 0x3da   : > { %v4948_v1 = vadd.f32 %v5203_v36, %v4893_v58  ;;  %v4896_v44 = vadd.f32 %v5285_v59, %v10650_v57  ;;  %v4887_v11 = vpop.f32.mrb[11].mxu1 }
 0x3db   : > { %v4946_v18 = vadd.f32 %v5201_v40, %v4885_v45  ;;  %v4888_v17 = vadd.f32 %v10650_v57, %v4887_v11 }
 0x3dc   : > { %4958 = vst.msk [vmem:[%s10666_s20 + $0x30] sm:$0xff] %vm451_vm1, %v4948_v1  ;;  %v4949_v37 = vadd.f32 %v5204_v46, %v4896_v44 }
 0x3dd   : > { %4956 = vst.msk [vmem:[%s10666_s20 + $0x20] sm:$0xff] %vm451_vm1, %v4946_v18  ;;  %v4947_v23 = vadd.f32 %v5202_v41, %v4888_v17 }
 0x3de   : > { %4959 = vst.msk [vmem:[%s10666_s20 + $0x38] sm:$0xff] %vm451_vm1, %v4949_v37 }
 0x3df   : > { %4957 = vst.msk [vmem:[%s10666_s20 + $0x28] sm:$0xff] %vm451_vm1, %v4947_v23 }
 0x423   : > { %v5288_v9 = vpop.f32.mrb[12].mxu1 }
 0x424   : > { %v4909_v39 = vadd.f32 %v5288_v9, %v10650_v57  ;;  %v4900_v38 = vpop.f32.mrb[13].mxu1 }
 0x425   : > { %v4901_v28 = vadd.f32 %v10650_v57, %v4900_v38  ;;  %v5289_v51 = vpop.f32.mrb[14].mxu1 }
 0x426   : > { %v4968_v30 = vadd.f32 %v4962_v33, %v4909_v39  ;;  %v4912_v29 = vadd.f32 %v5289_v51, %v10650_v57  ;;  %v4903_v47 = vpop.f32.mrb[15].mxu1 }
 0x427   : > { %v4950_v20 = vadd.f32 %v5205_v60, %v4901_v28  ;;  %v4904_v26 = vadd.f32 %v10650_v57, %v4903_v47 }
 0x428   : > { %5207 = vst.msk [vmem:[%s10666_s20 + $0x50] sm:$0xff] %vm451_vm1, %v4968_v30  ;;  %v4969_v25 = vadd.f32 %v4963_v6, %v4912_v29 }
 0x429   : > { %4960 = vst.msk [vmem:[%s10666_s20 + $0x40] sm:$0xff] %vm451_vm1, %v4950_v20  ;;  %v4951_v2 = vadd.f32 %v5206_v43, %v4904_v26 }
 0x42a   : > { %5208 = vst.msk [vmem:[%s10666_s20 + $0x58] sm:$0xff] %vm451_vm1, %v4969_v25 }
 0x42b   : > { %4961 = vst.msk [vmem:[%s10666_s20 + $0x48] sm:$0xff] %vm451_vm1, %v4951_v2 }
 0x472   : > { %v5292_v15 = vpop.f32.mrb[16].mxu1 }
 0x473   : > { %v4925_v61 = vadd.f32 %v5292_v15, %v10650_v57  ;;  %v4916_v62 = vpop.f32.mrb[17].mxu1 }
 0x474   : > { %v4917_v19 = vadd.f32 %v10650_v57, %v4916_v62  ;;  %v5293_v63 = vpop.f32.mrb[18].mxu1 }
 0x475   : > { %v4972_v31 = vadd.f32 %v4966_v14, %v4925_v61  ;;  %v4928_v54 = vadd.f32 %v5293_v63, %v10650_v57  ;;  %v4919_v35 = vpop.f32.mrb[19].mxu1 }
 0x476   : > { %v4970_v22 = vadd.f32 %v4964_v42, %v4917_v19  ;;  %v4920_v49 = vadd.f32 %v10650_v57, %v4919_v35 }
 0x477   : > { %5211 = vst.msk [vmem:[%s10666_s20 + $0x70] sm:$0xff] %vm451_vm1, %v4972_v31  ;;  %v4973_v55 = vadd.f32 %v4967_v8, %v4928_v54 }
 0x478   : > { %5209 = vst.msk [vmem:[%s10666_s20 + $0x60] sm:$0xff] %vm451_vm1, %v4970_v22  ;;  %v4971_v56 = vadd.f32 %v4965_v5, %v4920_v49 }
 0x479   : > { %5212 = vst.msk [vmem:[%s10666_s20 + $0x78] sm:$0xff] %vm451_vm1, %v4973_v55 }
 0x47a   : > { %5210 = vst.msk [vmem:[%s10666_s20 + $0x68] sm:$0xff] %vm451_vm1, %v4971_v56 }
 0x47b PF: > { %s20_s17 = sadd.s32 1, %s5469_s17   ;;  %s11736_s13 = smov %s5461_s15 }
 0x47c   : > { %p17_p9 = scmp.ge.s32.totalorder %s20_s17, 6   ;;  %s11737_s14 = smov %s5465_s16 }
 0x47d   : > { %s11738_s15 = smov %s11741_s18  ;;  %s11739_s16 = smov %s11745_s19 }
 0x47e   :  { %19 = sbr.rel (!%p17_p9) target bundleno = 3 (0x3), region = 102 }

</bundles_post_ra>
